<compile_context>
chip_gen: v7x
topology: tpu7x:2x2x1
jax: 0.10.0
libtpu: 0.0.40
codegen_flags: <defaults>
</compile_context>

<pallas_src>
import functools

import jax
import jax.numpy as jnp
from jax import lax
from jax.experimental import pallas as pl
from jax.experimental.pallas import tpu as pltpu

EPS = 1e-3                         # BatchNorm eps used by the module
VMEM_LIMIT = 48 * 1024 * 1024      # leave headroom on v7x (64 MiB physical/TC)
POOLS = (True, True, False, True, False, False)


def _pad_to(c, mult=128):
    return ((c + mult - 1) // mult) * mult


# ----------------------------------------------------------------------------
# In-kernel helpers (traced into the fused kernel body)
# ----------------------------------------------------------------------------
def _bn_relu(acc, s_ref, b_ref):
    """Folded BatchNorm + ReLU on the f32 conv accumulator."""
    return jnp.maximum(acc * s_ref[...] + b_ref[...], 0.0)


def _maxpool2x2(y):
    """2x2 max pool, stride 2, on a (Bt, H, W, C) f32 value.
    NOTE: reshape/max form kept for lowering robustness (proven path)."""
    bt, h, w, c = y.shape
    y = jnp.max(y.reshape(bt, h // 2, 2, w, c), axis=2)
    y = jnp.max(y.reshape(bt, h // 2, w // 2, 2, c), axis=3)
    return y


def _store_padded(xp_ref, y):
    """Write y (Bt,h,w,C) into the interior of xp_ref (Bt,h+2,w+2,C).
    Only the four halo border strips are zeroed (not the whole buffer);
    unguarded, so it stays correct under megacore 'parallel' sharding."""
    bt, hp, wp, c = xp_ref.shape
    h, w = hp - 2, wp - 2
    zrow = jnp.zeros((bt, 1, wp, c), dtype=xp_ref.dtype)
    zcol = jnp.zeros((bt, hp, 1, c), dtype=xp_ref.dtype)
    xp_ref[:, 0:1, :, :] = zrow
    xp_ref[:, hp - 1:hp, :, :] = zrow
    xp_ref[:, :, 0:1, :] = zcol
    xp_ref[:, :, wp - 1:wp, :] = zcol
    xp_ref[:, 1:h + 1, 1:w + 1, :] = y.astype(xp_ref.dtype)


def _conv3x3(xp_ref, w_ref):
    """3x3 stride-1 conv as nine accumulating MXU dots over shifted halo
    slices (no materialized im2col scratch).
    xp_ref: (Bt, h+2, w+2, Cin) bf16, w_ref: (9, Cin, Cout) bf16.
    Returns (Bt*h*w, Cout) f32."""
    bt, hp, wp, cin = xp_ref.shape
    h, w = hp - 2, wp - 2
    cout = w_ref.shape[-1]
    m = bt * h * w
    acc = jnp.zeros((m, cout), jnp.float32)
    for k in range(9):
        dy, dx = divmod(k, 3)
        patch = xp_ref[:, dy:dy + h, dx:dx + w, :].reshape(m, cin)
        acc = acc + jnp.dot(patch, w_ref[k],
                            preferred_element_type=jnp.float32)
    return acc


# ----------------------------------------------------------------------------
# Fused forward kernel: 6x (conv3x3 + BN + ReLU [+ pool]) + channel mean + fc1
# ----------------------------------------------------------------------------
def fused_cnn_kernel(col0_ref,
                     w0_ref, s0_ref, b0_ref,
                     w1_ref, s1_ref, b1_ref,
                     w2_ref, s2_ref, b2_ref,
                     w3_ref, s3_ref, b3_ref,
                     w4_ref, s4_ref, b4_ref,
                     w5_ref, s5_ref, b5_ref,
                     fcw_ref, fcb_ref,
                     att_ref, emb_ref,
                     xp1, xp2, xp3, xp4, xp5, flat_ref,
                     *, bt, h, w):
    # Layer 0 (Cin=1): one MXU dot on the (Bt*H*W, 9) im2col built wrapper-side.
    m0 = bt * h * w
    acc0 = jnp.dot(col0_ref[...].reshape(m0, 9), w0_ref[...],
                   preferred_element_type=jnp.float32)
    y = _bn_relu(acc0, s0_ref, b0_ref).reshape(bt, h, w, w0_ref.shape[-1])
    _store_padded(xp1, _maxpool2x2(y))                    # (bt, h/2, w/2, 128)

    # Layer 1: conv + BN + ReLU + pool.
    y = _bn_relu(_conv3x3(xp1, w1_ref), s1_ref, b1_ref)
    y = y.reshape(bt, h // 2, w // 2, w1_ref.shape[-1])
    _store_padded(xp2, _maxpool2x2(y))                    # (bt, h/4, w/4, 128)

    # Layer 2: conv + BN + ReLU (no pool).
    y = _bn_relu(_conv3x3(xp2, w2_ref), s2_ref, b2_ref)
    _store_padded(xp3, y.reshape(bt, h // 4, w // 4, w2_ref.shape[-1]))

    # Layer 3: conv + BN + ReLU + pool.
    y = _bn_relu(_conv3x3(xp3, w3_ref), s3_ref, b3_ref)
    y = y.reshape(bt, h // 4, w // 4, w3_ref.shape[-1])
    _store_padded(xp4, _maxpool2x2(y))                    # (bt, h/8, w/8, 128)

    # Layer 4: conv + BN + ReLU (no pool).
    y = _bn_relu(_conv3x3(xp4, w4_ref), s4_ref, b4_ref)
    _store_padded(xp5, y.reshape(bt, h // 8, w // 8, w4_ref.shape[-1]))

    # Layer 5 (final): conv + BN + ReLU; keep the f32 activation live.
    y5 = _bn_relu(_conv3x3(xp5, w5_ref), s5_ref, b5_ref)  # (bt*hf*wf, 256) f32
    hf, wf = h // 8, w // 8
    cf = w5_ref.shape[-1]

    # Fused channel mean: x_att = torch.mean(x, dim=1).
    att_ref[...] = jnp.mean(y5, axis=-1, keepdims=True).reshape(bt, hf * wf, 1)

    # fc1 + ReLU: NHWC flatten into a lane-dense bf16 scratch, then one
    # resident-weight MXU dot (no K-tiling; weight fits VMEM at this size).
    y5_3 = y5.reshape(bt, hf * wf, cf)
    for s in range(hf * wf):
        flat_ref[:, s * cf:(s + 1) * cf] = y5_3[:, s, :].astype(flat_ref.dtype)
    emb = jnp.dot(flat_ref[...], fcw_ref[...],
                  preferred_element_type=jnp.float32)
    emb = jnp.maximum(emb + fcb_ref[...], 0.0)            # (bt, E) f32
    emb_ref[...] = emb[:, None, :]


# ----------------------------------------------------------------------------
# One-time parameter preparation
# ----------------------------------------------------------------------------
def fold_conv_params(params):
    """Fold BN into scale/bias, pad channels to multiples of 128 (lane-dense
    MXU / store path) and lay out conv weights as (9, Cin_p, Cout_p) bf16."""
    prepared = []
    for p in params:
        cout, cin = p["w"].shape[0], p["w"].shape[1]
        cout_p = _pad_to(cout)
        scale = p["gamma"] / jnp.sqrt(p["var"] + EPS)
        bias = p["beta"] + scale * (p["b"] - p["mean"])
        scale = jnp.pad(scale, (0, cout_p - cout)).reshape(1, cout_p)
        bias = jnp.pad(bias, (0, cout_p - cout)).reshape(1, cout_p)
        w = jnp.transpose(p["w"], (2, 3, 1, 0))       # OIHW -> (ky, kx, ci, co)
        if cin == 1:
            w = w.reshape(9, cout)                    # layer-0 im2col weight
            w = jnp.pad(w, ((0, 0), (0, cout_p - cout)))
        else:
            cin_p = _pad_to(cin)
            w = w.reshape(9, cin, cout)
            w = jnp.pad(w, ((0, 0), (0, cin_p - cin), (0, cout_p - cout)))
        prepared.append(dict(w=w.astype(jnp.bfloat16),
                             scale=scale.astype(jnp.float32),
                             bias=bias.astype(jnp.float32)))
    return prepared


def prepare_fc_params(fc_w, fc_b, C, Ho, Wo):
    """Permute fc1 columns so it consumes the NHWC flatten directly."""
    E = fc_w.shape[0]
    w = fc_w.reshape(E, C, Ho, Wo).transpose(2, 3, 1, 0).reshape(Ho * Wo * C, E)
    return w.astype(jnp.bfloat16), fc_b.reshape(1, E).astype(jnp.float32)


# ----------------------------------------------------------------------------
# Wrapper
# ----------------------------------------------------------------------------
def _resident(shape):
    """BlockSpec for an operand that stays fully resident across the grid."""
    if len(shape) == 2:
        return pl.BlockSpec(shape, lambda n: (0, 0))
    return pl.BlockSpec(shape, lambda n: (0, 0, 0))


def forward_pallas(x_nchw, conv_prep, fc_w_prep, fc_b_prep):
    N, _, H, W = x_nchw.shape
    # >=2 grid steps so v7x's two TensorCores both get work; the rest of the
    # batch is stacked into each step to grow the MXU M dimension.
    Bt = N // 2 if (N % 2 == 0 and N >= 2) else 1
    steps = N // Bt
    Hf, Wf = H // 8, W // 8
    Cf = 256
    E = fc_w_prep.shape[1]

    # Layer-0 im2col built wrapper-side (Cin=1, tiny data): turns the first
    # conv into a single MXU dot per tile instead of nine single-lane VPU FMAs.
    x = x_nchw[:, 0, :, :].astype(jnp.float32)
    xp = jnp.pad(x, ((0, 0), (1, 1), (1, 1)))
    col0 = jnp.stack([xp[:, dy:dy + H, dx:dx + W]
                      for dy in range(3) for dx in range(3)],
                     axis=-1).reshape(N, H * W, 9).astype(jnp.bfloat16)

    in_specs = [pl.BlockSpec((Bt, H * W, 9), lambda n: (n, 0, 0))]
    operands = [col0]
    for p in conv_prep:
        in_specs += [_resident(p["w"].shape), _resident(p["scale"].shape),
                     _resident(p["bias"].shape)]
        operands += [p["w"], p["scale"], p["bias"]]
    in_specs += [_resident(fc_w_prep.shape), _resident(fc_b_prep.shape)]
    operands += [fc_w_prep, fc_b_prep]

    out_shape = [jax.ShapeDtypeStruct((N, Hf * Wf, 1), jnp.float32),
                 jax.ShapeDtypeStruct((N, 1, E), jnp.float32)]
    out_specs = [pl.BlockSpec((Bt, Hf * Wf, 1), lambda n: (n, 0, 0)),
                 pl.BlockSpec((Bt, 1, E), lambda n: (n, 0, 0))]

    scratch = [
        pltpu.VMEM((Bt, H // 2 + 2, W // 2 + 2, 128), jnp.bfloat16),   # xp1
        pltpu.VMEM((Bt, H // 4 + 2, W // 4 + 2, 128), jnp.bfloat16),   # xp2
        pltpu.VMEM((Bt, H // 4 + 2, W // 4 + 2, 128), jnp.bfloat16),   # xp3
        pltpu.VMEM((Bt, H // 8 + 2, W // 8 + 2, 128), jnp.bfloat16),   # xp4
        pltpu.VMEM((Bt, H // 8 + 2, W // 8 + 2, 256), jnp.bfloat16),   # xp5
        pltpu.VMEM((Bt, Hf * Wf * Cf), jnp.bfloat16),                  # flat
    ]

    kern = functools.partial(fused_cnn_kernel, bt=Bt, h=H, w=W)
    att_col, emb3 = pl.pallas_call(
        kern,
        out_shape=out_shape,
        grid_spec=pltpu.PrefetchScalarGridSpec(
            num_scalar_prefetch=0,
            grid=(steps,),
            in_specs=in_specs,
            out_specs=out_specs,
            scratch_shapes=scratch),
        compiler_params=pltpu.CompilerParams(
            dimension_semantics=("parallel",),
            vmem_limit_bytes=VMEM_LIMIT),
    )(*operands)

    x_att = att_col.reshape(N, Hf, Wf)
    emb = emb3.reshape(N, E)
    return x_att, emb


# ----------------------------------------------------------------------------
# Parameter init (deterministic, synthetic)
# ----------------------------------------------------------------------------
def init_params(key, embedding, feat_dim):
    conv_dims = [(1, 64), (64, 96), (96, 128), (128, 128), (128, 256), (256, 256)]
    params = []
    for cin, cout in conv_dims:
        key, k1, k2, k3, k4, k5, k6 = jax.random.split(key, 7)
        params.append(dict(
            w=jax.random.normal(k1, (cout, cin, 3, 3), jnp.float32)
              * (1.0 / (cin * 9) ** 0.5),
            b=0.05 * jax.random.normal(k2, (cout,), jnp.float32),
            gamma=1.0 + 0.1 * jax.random.normal(k3, (cout,), jnp.float32),
            beta=0.1 * jax.random.normal(k4, (cout,), jnp.float32),
            mean=0.1 * jax.random.normal(k5, (cout,), jnp.float32),
            var=jax.random.uniform(k6, (cout,), jnp.float32, 0.5, 1.5),
        ))
    key, kw, kb = jax.random.split(key, 3)
    fc_w = jax.random.normal(kw, (embedding, feat_dim), jnp.float32) \
        * (1.0 / feat_dim ** 0.5)
    fc_b = 0.05 * jax.random.normal(kb, (embedding,), jnp.float32)
    return params, fc_w, fc_b


# ----------------------------------------------------------------------------
# Plain-JAX reference (NCHW, mirrors the PyTorch forward) for verification
# ----------------------------------------------------------------------------
def forward_ref(x, params, fc_w, fc_b):
    for p, pool in zip(params, POOLS):
        y = lax.conv_general_dilated(
            x, p["w"], (1, 1), "SAME",
            dimension_numbers=("NCHW", "OIHW", "NCHW"))
        y = y + p["b"][None, :, None, None]
        y = (y - p["mean"][None, :, None, None]) \
            / jnp.sqrt(p["var"] + EPS)[None, :, None, None] \
            * p["gamma"][None, :, None, None] + p["beta"][None, :, None, None]
        y = jnp.maximum(y, 0.0)
        if pool:
            N, C, Hh, Ww = y.shape
            y = y.reshape(N, C, Hh // 2, 2, Ww // 2, 2).max(axis=(3, 5))
        x = y
    x_att = jnp.mean(x, axis=1)
    flat = x.reshape(x.shape[0], -1)
    emb = jnp.maximum(flat @ fc_w.T + fc_b, 0.0)
    return x_att, emb


# ----------------------------------------------------------------------------
if __name__ == "__main__":
    N, H, W = 2, 16, 16           # small shapes; original model used 1x96x96
    embedding = 128
    feat_dim = 256 * (H // 8) * (W // 8)

    key = jax.random.PRNGKey(0)
    kx, kp = jax.random.split(key)
    x = jax.random.normal(kx, (N, 1, H, W), jnp.float32)
    params, fc_w, fc_b = init_params(kp, embedding, feat_dim)

    # One-time parameter preparation (outside the forward).
    conv_prep = fold_conv_params(params)
    fc_w_prep, fc_b_prep = prepare_fc_params(fc_w, fc_b, 256, H // 8, W // 8)

    fwd = jax.jit(forward_pallas)
    x_att, emb = fwd(x, conv_prep, fc_w_prep, fc_b_prep)
    jax.block_until_ready((x_att, emb))

    ra, re = forward_ref(x, params, fc_w, fc_b)
    assert x_att.shape == (N, H // 8, W // 8)
    assert emb.shape == (N, embedding)
    # bf16 MXU operands + bf16 inter-layer activations drive the tolerance
    # (accumulation is f32 throughout).
    err_att = float(jnp.max(jnp.abs(x_att - ra)))
    err_emb = float(jnp.max(jnp.abs(emb - re)))
    assert jnp.allclose(x_att, ra, atol=1e-1, rtol=1e-1), f"x_att err {err_att}"
    assert jnp.allclose(emb, re, atol=1.5e-1, rtol=1e-1), f"emb err {err_emb}"

    print("KERNEL_OK")
</pallas_src>

<mosaic_0001>
module attributes {stable_mosaic.version = 11 : i64} {
  func.func @fused_cnn_kernel(%arg0: i32, %arg1: memref<1x256x9xbf16, #tpu.memory_space<vmem>>, %arg2: memref<9x128xbf16, #tpu.memory_space<vmem>>, %arg3: memref<1x128xf32, #tpu.memory_space<vmem>>, %arg4: memref<1x128xf32, #tpu.memory_space<vmem>>, %arg5: memref<9x128x128xbf16, #tpu.memory_space<vmem>>, %arg6: memref<1x128xf32, #tpu.memory_space<vmem>>, %arg7: memref<1x128xf32, #tpu.memory_space<vmem>>, %arg8: memref<9x128x128xbf16, #tpu.memory_space<vmem>>, %arg9: memref<1x128xf32, #tpu.memory_space<vmem>>, %arg10: memref<1x128xf32, #tpu.memory_space<vmem>>, %arg11: memref<9x128x128xbf16, #tpu.memory_space<vmem>>, %arg12: memref<1x128xf32, #tpu.memory_space<vmem>>, %arg13: memref<1x128xf32, #tpu.memory_space<vmem>>, %arg14: memref<9x128x256xbf16, #tpu.memory_space<vmem>>, %arg15: memref<1x256xf32, #tpu.memory_space<vmem>>, %arg16: memref<1x256xf32, #tpu.memory_space<vmem>>, %arg17: memref<9x256x256xbf16, #tpu.memory_space<vmem>>, %arg18: memref<1x256xf32, #tpu.memory_space<vmem>>, %arg19: memref<1x256xf32, #tpu.memory_space<vmem>>, %arg20: memref<1024x128xbf16, #tpu.memory_space<vmem>>, %arg21: memref<1x128xf32, #tpu.memory_space<vmem>>, %arg22: memref<1x4x1xf32, #tpu.memory_space<vmem>>, %arg23: memref<1x1x128xf32, #tpu.memory_space<vmem>>, %arg24: memref<1x10x10x128xbf16, #tpu.memory_space<vmem>>, %arg25: memref<1x6x6x128xbf16, #tpu.memory_space<vmem>>, %arg26: memref<1x6x6x128xbf16, #tpu.memory_space<vmem>>, %arg27: memref<1x4x4x128xbf16, #tpu.memory_space<vmem>>, %arg28: memref<1x4x4x256xbf16, #tpu.memory_space<vmem>>, %arg29: memref<1x1024xbf16, #tpu.memory_space<vmem>>) attributes {dimension_semantics = [#tpu.dimension_semantics<parallel>], iteration_bounds = array<i64: 2>, scalar_prefetch = 0 : i64, scratch_operands = 6 : i64, tpu.core_type = #tpu.core_type<tc>, window_params = [{transform_indices = @transform_0, window_bounds = array<i64: 1, 256, 9>}, {pipeline_mode = #tpu.pipeline_mode<synchronous>, transform_indices = @transform_1, window_bounds = array<i64: 9, 128>}, {pipeline_mode = #tpu.pipeline_mode<synchronous>, transform_indices = @transform_2, window_bounds = array<i64: 1, 128>}, {pipeline_mode = #tpu.pipeline_mode<synchronous>, transform_indices = @transform_3, window_bounds = array<i64: 1, 128>}, {pipeline_mode = #tpu.pipeline_mode<synchronous>, transform_indices = @transform_4, window_bounds = array<i64: 9, 128, 128>}, {pipeline_mode = #tpu.pipeline_mode<synchronous>, transform_indices = @transform_5, window_bounds = array<i64: 1, 128>}, {pipeline_mode = #tpu.pipeline_mode<synchronous>, transform_indices = @transform_6, window_bounds = array<i64: 1, 128>}, {pipeline_mode = #tpu.pipeline_mode<synchronous>, transform_indices = @transform_7, window_bounds = array<i64: 9, 128, 128>}, {pipeline_mode = #tpu.pipeline_mode<synchronous>, transform_indices = @transform_8, window_bounds = array<i64: 1, 128>}, {pipeline_mode = #tpu.pipeline_mode<synchronous>, transform_indices = @transform_9, window_bounds = array<i64: 1, 128>}, {pipeline_mode = #tpu.pipeline_mode<synchronous>, transform_indices = @transform_10, window_bounds = array<i64: 9, 128, 128>}, {pipeline_mode = #tpu.pipeline_mode<synchronous>, transform_indices = @transform_11, window_bounds = array<i64: 1, 128>}, {pipeline_mode = #tpu.pipeline_mode<synchronous>, transform_indices = @transform_12, window_bounds = array<i64: 1, 128>}, {pipeline_mode = #tpu.pipeline_mode<synchronous>, transform_indices = @transform_13, window_bounds = array<i64: 9, 128, 256>}, {pipeline_mode = #tpu.pipeline_mode<synchronous>, transform_indices = @transform_14, window_bounds = array<i64: 1, 256>}, {pipeline_mode = #tpu.pipeline_mode<synchronous>, transform_indices = @transform_15, window_bounds = array<i64: 1, 256>}, {pipeline_mode = #tpu.pipeline_mode<synchronous>, transform_indices = @transform_16, window_bounds = array<i64: 9, 256, 256>}, {pipeline_mode = #tpu.pipeline_mode<synchronous>, transform_indices = @transform_17, window_bounds = array<i64: 1, 256>}, {pipeline_mode = #tpu.pipeline_mode<synchronous>, transform_indices = @transform_18, window_bounds = array<i64: 1, 256>}, {pipeline_mode = #tpu.pipeline_mode<synchronous>, transform_indices = @transform_19, window_bounds = array<i64: 1024, 128>}, {pipeline_mode = #tpu.pipeline_mode<synchronous>, transform_indices = @transform_20, window_bounds = array<i64: 1, 128>}, {transform_indices = @transform_21, window_bounds = array<i64: 1, 4, 1>}, {transform_indices = @transform_22, window_bounds = array<i64: 1, 1, 128>}]} {
    %c0 = arith.constant 0 : index
    %c0_0 = arith.constant 0 : index
    %c0_1 = arith.constant 0 : index
    %0 = vector.load %arg1[%c0, %c0_0, %c0_1] : memref<1x256x9xbf16, #tpu.memory_space<vmem>>, vector<1x256x9xbf16>
    %1 = vector.shape_cast %0 : vector<1x256x9xbf16> to vector<256x9xbf16>
    %c0_2 = arith.constant 0 : index
    %c0_3 = arith.constant 0 : index
    %2 = vector.load %arg2[%c0_2, %c0_3] : memref<9x128xbf16, #tpu.memory_space<vmem>>, vector<9x128xbf16>
    %cst = arith.constant dense<0.000000e+00> : vector<256x128xf32>
    %3 = tpu.matmul %1, %2, %cst {dimension_numbers = #tpu.dot_dimension_numbers<[1], [0], [0], [1], [0, 0, 1, 1], [], []>} : vector<256x9xbf16>, vector<9x128xbf16>, vector<256x128xf32> -> vector<256x128xf32>
    %c0_4 = arith.constant 0 : index
    %c0_5 = arith.constant 0 : index
    %4 = vector.load %arg3[%c0_4, %c0_5] : memref<1x128xf32, #tpu.memory_space<vmem>>, vector<1x128xf32>
    %5 = vector.broadcast %4 : vector<1x128xf32> to vector<256x128xf32>
    %6 = arith.mulf %3, %5 : vector<256x128xf32>
    %c0_6 = arith.constant 0 : index
    %c0_7 = arith.constant 0 : index
    %7 = vector.load %arg4[%c0_6, %c0_7] : memref<1x128xf32, #tpu.memory_space<vmem>>, vector<1x128xf32>
    %8 = vector.broadcast %7 : vector<1x128xf32> to vector<256x128xf32>
    %9 = arith.addf %6, %8 : vector<256x128xf32>
    %cst_8 = arith.constant 0.000000e+00 : f32
    %10 = vector.broadcast %cst_8 : f32 to vector<256x128xf32>
    %11 = arith.maximumf %9, %10 : vector<256x128xf32>
    %12 = vector.shape_cast %11 : vector<256x128xf32> to vector<1x16x16x128xf32>
    %13 = vector.shape_cast %12 : vector<1x16x16x128xf32> to vector<1x8x2x16x128xf32>
    %cst_9 = arith.constant dense<0xFF800000> : vector<1x8x16x128xf32>
    %14 = vector.multi_reduction <maximumf>, %13, %cst_9 [2] : vector<1x8x2x16x128xf32> to vector<1x8x16x128xf32>
    %15 = vector.shape_cast %14 : vector<1x8x16x128xf32> to vector<1x8x8x2x128xf32>
    %cst_10 = arith.constant dense<0xFF800000> : vector<1x8x8x128xf32>
    %16 = vector.multi_reduction <maximumf>, %15, %cst_10 [3] : vector<1x8x8x2x128xf32> to vector<1x8x8x128xf32>
    %cst_11 = arith.constant 0.000000e+00 : bf16
    %17 = vector.broadcast %cst_11 : bf16 to vector<1x1x10x128xbf16>
    %cst_12 = arith.constant 0.000000e+00 : bf16
    %18 = vector.broadcast %cst_12 : bf16 to vector<1x10x1x128xbf16>
    %c0_13 = arith.constant 0 : index
    %c0_14 = arith.constant 0 : index
    %c0_15 = arith.constant 0 : index
    %c0_16 = arith.constant 0 : index
    %19 = vector.load %arg24[%c0_13, %c0_14, %c0_15, %c0_16] : memref<1x10x10x128xbf16, #tpu.memory_space<vmem>>, vector<1x1x10x128xbf16>
    tpu.vector_store %arg24[%c0_13, %c0_14, %c0_15, %c0_16], %17 {strides = array<i32>} : memref<1x10x10x128xbf16, #tpu.memory_space<vmem>>, vector<1x1x10x128xbf16>,
    %c0_17 = arith.constant 0 : index
    %c9 = arith.constant 9 : index
    %c0_18 = arith.constant 0 : index
    %c0_19 = arith.constant 0 : index
    %20 = vector.load %arg24[%c0_17, %c9, %c0_18, %c0_19] : memref<1x10x10x128xbf16, #tpu.memory_space<vmem>>, vector<1x1x10x128xbf16>
    tpu.vector_store %arg24[%c0_17, %c9, %c0_18, %c0_19], %17 {strides = array<i32>} : memref<1x10x10x128xbf16, #tpu.memory_space<vmem>>, vector<1x1x10x128xbf16>,
    %c0_20 = arith.constant 0 : index
    %c0_21 = arith.constant 0 : index
    %c0_22 = arith.constant 0 : index
    %c0_23 = arith.constant 0 : index
    %21 = vector.load %arg24[%c0_20, %c0_21, %c0_22, %c0_23] : memref<1x10x10x128xbf16, #tpu.memory_space<vmem>>, vector<1x10x1x128xbf16>
    tpu.vector_store %arg24[%c0_20, %c0_21, %c0_22, %c0_23], %18 {strides = array<i32>} : memref<1x10x10x128xbf16, #tpu.memory_space<vmem>>, vector<1x10x1x128xbf16>,
    %c0_24 = arith.constant 0 : index
    %c0_25 = arith.constant 0 : index
    %c9_26 = arith.constant 9 : index
    %c0_27 = arith.constant 0 : index
    %22 = vector.load %arg24[%c0_24, %c0_25, %c9_26, %c0_27] : memref<1x10x10x128xbf16, #tpu.memory_space<vmem>>, vector<1x10x1x128xbf16>
    tpu.vector_store %arg24[%c0_24, %c0_25, %c9_26, %c0_27], %18 {strides = array<i32>} : memref<1x10x10x128xbf16, #tpu.memory_space<vmem>>, vector<1x10x1x128xbf16>,
    %23 = arith.truncf %16 : vector<1x8x8x128xf32> to vector<1x8x8x128xbf16>
    %c0_28 = arith.constant 0 : index
    %c1 = arith.constant 1 : index
    %c1_29 = arith.constant 1 : index
    %c0_30 = arith.constant 0 : index
    %24 = vector.load %arg24[%c0_28, %c1, %c1_29, %c0_30] : memref<1x10x10x128xbf16, #tpu.memory_space<vmem>>, vector<1x8x8x128xbf16>
    tpu.vector_store %arg24[%c0_28, %c1, %c1_29, %c0_30], %23 {strides = array<i32>} : memref<1x10x10x128xbf16, #tpu.memory_space<vmem>>, vector<1x8x8x128xbf16>,
    %cst_31 = arith.constant 0.000000e+00 : f32
    %25 = vector.broadcast %cst_31 : f32 to vector<64x128xf32>
    %c0_32 = arith.constant 0 : index
    %c0_33 = arith.constant 0 : index
    %c0_34 = arith.constant 0 : index
    %c0_35 = arith.constant 0 : index
    %26 = vector.load %arg24[%c0_32, %c0_33, %c0_34, %c0_35] : memref<1x10x10x128xbf16, #tpu.memory_space<vmem>>, vector<1x8x8x128xbf16>
    %27 = vector.shape_cast %26 : vector<1x8x8x128xbf16> to vector<64x128xbf16>
    %c0_36 = arith.constant 0 : index
    %c0_37 = arith.constant 0 : index
    %c0_38 = arith.constant 0 : index
    %28 = vector.load %arg5[%c0_36, %c0_37, %c0_38] : memref<9x128x128xbf16, #tpu.memory_space<vmem>>, vector<1x128x128xbf16>
    %29 = vector.shape_cast %28 : vector<1x128x128xbf16> to vector<128x128xbf16>
    %cst_39 = arith.constant dense<0.000000e+00> : vector<64x128xf32>
    %30 = tpu.matmul %27, %29, %cst_39 {dimension_numbers = #tpu.dot_dimension_numbers<[1], [0], [0], [1], [0, 0, 1, 1], [], []>} : vector<64x128xbf16>, vector<128x128xbf16>, vector<64x128xf32> -> vector<64x128xf32>
    %31 = arith.addf %25, %30 : vector<64x128xf32>
    %c0_40 = arith.constant 0 : index
    %c0_41 = arith.constant 0 : index
    %c1_42 = arith.constant 1 : index
    %c0_43 = arith.constant 0 : index
    %32 = vector.load %arg24[%c0_40, %c0_41, %c1_42, %c0_43] : memref<1x10x10x128xbf16, #tpu.memory_space<vmem>>, vector<1x8x8x128xbf16>
    %33 = vector.shape_cast %32 : vector<1x8x8x128xbf16> to vector<64x128xbf16>
    %c1_44 = arith.constant 1 : index
    %c0_45 = arith.constant 0 : index
    %c0_46 = arith.constant 0 : index
    %34 = vector.load %arg5[%c1_44, %c0_45, %c0_46] : memref<9x128x128xbf16, #tpu.memory_space<vmem>>, vector<1x128x128xbf16>
    %35 = vector.shape_cast %34 : vector<1x128x128xbf16> to vector<128x128xbf16>
    %cst_47 = arith.constant dense<0.000000e+00> : vector<64x128xf32>
    %36 = tpu.matmul %33, %35, %cst_47 {dimension_numbers = #tpu.dot_dimension_numbers<[1], [0], [0], [1], [0, 0, 1, 1], [], []>} : vector<64x128xbf16>, vector<128x128xbf16>, vector<64x128xf32> -> vector<64x128xf32>
    %37 = arith.addf %31, %36 : vector<64x128xf32>
    %c0_48 = arith.constant 0 : index
    %c0_49 = arith.constant 0 : index
    %c2 = arith.constant 2 : index
    %c0_50 = arith.constant 0 : index
    %38 = vector.load %arg24[%c0_48, %c0_49, %c2, %c0_50] : memref<1x10x10x128xbf16, #tpu.memory_space<vmem>>, vector<1x8x8x128xbf16>
    %39 = vector.shape_cast %38 : vector<1x8x8x128xbf16> to vector<64x128xbf16>
    %c2_51 = arith.constant 2 : index
    %c0_52 = arith.constant 0 : index
    %c0_53 = arith.constant 0 : index
    %40 = vector.load %arg5[%c2_51, %c0_52, %c0_53] : memref<9x128x128xbf16, #tpu.memory_space<vmem>>, vector<1x128x128xbf16>
    %41 = vector.shape_cast %40 : vector<1x128x128xbf16> to vector<128x128xbf16>
    %cst_54 = arith.constant dense<0.000000e+00> : vector<64x128xf32>
    %42 = tpu.matmul %39, %41, %cst_54 {dimension_numbers = #tpu.dot_dimension_numbers<[1], [0], [0], [1], [0, 0, 1, 1], [], []>} : vector<64x128xbf16>, vector<128x128xbf16>, vector<64x128xf32> -> vector<64x128xf32>
    %43 = arith.addf %37, %42 : vector<64x128xf32>
    %c0_55 = arith.constant 0 : index
    %c1_56 = arith.constant 1 : index
    %c0_57 = arith.constant 0 : index
    %c0_58 = arith.constant 0 : index
    %44 = vector.load %arg24[%c0_55, %c1_56, %c0_57, %c0_58] : memref<1x10x10x128xbf16, #tpu.memory_space<vmem>>, vector<1x8x8x128xbf16>
    %45 = vector.shape_cast %44 : vector<1x8x8x128xbf16> to vector<64x128xbf16>
    %c3 = arith.constant 3 : index
    %c0_59 = arith.constant 0 : index
    %c0_60 = arith.constant 0 : index
    %46 = vector.load %arg5[%c3, %c0_59, %c0_60] : memref<9x128x128xbf16, #tpu.memory_space<vmem>>, vector<1x128x128xbf16>
    %47 = vector.shape_cast %46 : vector<1x128x128xbf16> to vector<128x128xbf16>
    %cst_61 = arith.constant dense<0.000000e+00> : vector<64x128xf32>
    %48 = tpu.matmul %45, %47, %cst_61 {dimension_numbers = #tpu.dot_dimension_numbers<[1], [0], [0], [1], [0, 0, 1, 1], [], []>} : vector<64x128xbf16>, vector<128x128xbf16>, vector<64x128xf32> -> vector<64x128xf32>
    %49 = arith.addf %43, %48 : vector<64x128xf32>
    %c0_62 = arith.constant 0 : index
    %c1_63 = arith.constant 1 : index
    %c1_64 = arith.constant 1 : index
    %c0_65 = arith.constant 0 : index
    %50 = vector.load %arg24[%c0_62, %c1_63, %c1_64, %c0_65] : memref<1x10x10x128xbf16, #tpu.memory_space<vmem>>, vector<1x8x8x128xbf16>
    %51 = vector.shape_cast %50 : vector<1x8x8x128xbf16> to vector<64x128xbf16>
    %c4 = arith.constant 4 : index
    %c0_66 = arith.constant 0 : index
    %c0_67 = arith.constant 0 : index
    %52 = vector.load %arg5[%c4, %c0_66, %c0_67] : memref<9x128x128xbf16, #tpu.memory_space<vmem>>, vector<1x128x128xbf16>
    %53 = vector.shape_cast %52 : vector<1x128x128xbf16> to vector<128x128xbf16>
    %cst_68 = arith.constant dense<0.000000e+00> : vector<64x128xf32>
    %54 = tpu.matmul %51, %53, %cst_68 {dimension_numbers = #tpu.dot_dimension_numbers<[1], [0], [0], [1], [0, 0, 1, 1], [], []>} : vector<64x128xbf16>, vector<128x128xbf16>, vector<64x128xf32> -> vector<64x128xf32>
    %55 = arith.addf %49, %54 : vector<64x128xf32>
    %c0_69 = arith.constant 0 : index
    %c1_70 = arith.constant 1 : index
    %c2_71 = arith.constant 2 : index
    %c0_72 = arith.constant 0 : index
    %56 = vector.load %arg24[%c0_69, %c1_70, %c2_71, %c0_72] : memref<1x10x10x128xbf16, #tpu.memory_space<vmem>>, vector<1x8x8x128xbf16>
    %57 = vector.shape_cast %56 : vector<1x8x8x128xbf16> to vector<64x128xbf16>
    %c5 = arith.constant 5 : index
    %c0_73 = arith.constant 0 : index
    %c0_74 = arith.constant 0 : index
    %58 = vector.load %arg5[%c5, %c0_73, %c0_74] : memref<9x128x128xbf16, #tpu.memory_space<vmem>>, vector<1x128x128xbf16>
    %59 = vector.shape_cast %58 : vector<1x128x128xbf16> to vector<128x128xbf16>
    %cst_75 = arith.constant dense<0.000000e+00> : vector<64x128xf32>
    %60 = tpu.matmul %57, %59, %cst_75 {dimension_numbers = #tpu.dot_dimension_numbers<[1], [0], [0], [1], [0, 0, 1, 1], [], []>} : vector<64x128xbf16>, vector<128x128xbf16>, vector<64x128xf32> -> vector<64x128xf32>
    %61 = arith.addf %55, %60 : vector<64x128xf32>
    %c0_76 = arith.constant 0 : index
    %c2_77 = arith.constant 2 : index
    %c0_78 = arith.constant 0 : index
    %c0_79 = arith.constant 0 : index
    %62 = vector.load %arg24[%c0_76, %c2_77, %c0_78, %c0_79] : memref<1x10x10x128xbf16, #tpu.memory_space<vmem>>, vector<1x8x8x128xbf16>
    %63 = vector.shape_cast %62 : vector<1x8x8x128xbf16> to vector<64x128xbf16>
    %c6 = arith.constant 6 : index
    %c0_80 = arith.constant 0 : index
    %c0_81 = arith.constant 0 : index
    %64 = vector.load %arg5[%c6, %c0_80, %c0_81] : memref<9x128x128xbf16, #tpu.memory_space<vmem>>, vector<1x128x128xbf16>
    %65 = vector.shape_cast %64 : vector<1x128x128xbf16> to vector<128x128xbf16>
    %cst_82 = arith.constant dense<0.000000e+00> : vector<64x128xf32>
    %66 = tpu.matmul %63, %65, %cst_82 {dimension_numbers = #tpu.dot_dimension_numbers<[1], [0], [0], [1], [0, 0, 1, 1], [], []>} : vector<64x128xbf16>, vector<128x128xbf16>, vector<64x128xf32> -> vector<64x128xf32>
    %67 = arith.addf %61, %66 : vector<64x128xf32>
    %c0_83 = arith.constant 0 : index
    %c2_84 = arith.constant 2 : index
    %c1_85 = arith.constant 1 : index
    %c0_86 = arith.constant 0 : index
    %68 = vector.load %arg24[%c0_83, %c2_84, %c1_85, %c0_86] : memref<1x10x10x128xbf16, #tpu.memory_space<vmem>>, vector<1x8x8x128xbf16>
    %69 = vector.shape_cast %68 : vector<1x8x8x128xbf16> to vector<64x128xbf16>
    %c7 = arith.constant 7 : index
    %c0_87 = arith.constant 0 : index
    %c0_88 = arith.constant 0 : index
    %70 = vector.load %arg5[%c7, %c0_87, %c0_88] : memref<9x128x128xbf16, #tpu.memory_space<vmem>>, vector<1x128x128xbf16>
    %71 = vector.shape_cast %70 : vector<1x128x128xbf16> to vector<128x128xbf16>
    %cst_89 = arith.constant dense<0.000000e+00> : vector<64x128xf32>
    %72 = tpu.matmul %69, %71, %cst_89 {dimension_numbers = #tpu.dot_dimension_numbers<[1], [0], [0], [1], [0, 0, 1, 1], [], []>} : vector<64x128xbf16>, vector<128x128xbf16>, vector<64x128xf32> -> vector<64x128xf32>
    %73 = arith.addf %67, %72 : vector<64x128xf32>
    %c0_90 = arith.constant 0 : index
    %c2_91 = arith.constant 2 : index
    %c2_92 = arith.constant 2 : index
    %c0_93 = arith.constant 0 : index
    %74 = vector.load %arg24[%c0_90, %c2_91, %c2_92, %c0_93] : memref<1x10x10x128xbf16, #tpu.memory_space<vmem>>, vector<1x8x8x128xbf16>
    %75 = vector.shape_cast %74 : vector<1x8x8x128xbf16> to vector<64x128xbf16>
    %c8 = arith.constant 8 : index
    %c0_94 = arith.constant 0 : index
    %c0_95 = arith.constant 0 : index
    %76 = vector.load %arg5[%c8, %c0_94, %c0_95] : memref<9x128x128xbf16, #tpu.memory_space<vmem>>, vector<1x128x128xbf16>
    %77 = vector.shape_cast %76 : vector<1x128x128xbf16> to vector<128x128xbf16>
    %cst_96 = arith.constant dense<0.000000e+00> : vector<64x128xf32>
    %78 = tpu.matmul %75, %77, %cst_96 {dimension_numbers = #tpu.dot_dimension_numbers<[1], [0], [0], [1], [0, 0, 1, 1], [], []>} : vector<64x128xbf16>, vector<128x128xbf16>, vector<64x128xf32> -> vector<64x128xf32>
    %79 = arith.addf %73, %78 : vector<64x128xf32>
    %c0_97 = arith.constant 0 : index
    %c0_98 = arith.constant 0 : index
    %80 = vector.load %arg6[%c0_97, %c0_98] : memref<1x128xf32, #tpu.memory_space<vmem>>, vector<1x128xf32>
    %81 = vector.broadcast %80 : vector<1x128xf32> to vector<64x128xf32>
    %82 = arith.mulf %79, %81 : vector<64x128xf32>
    %c0_99 = arith.constant 0 : index
    %c0_100 = arith.constant 0 : index
    %83 = vector.load %arg7[%c0_99, %c0_100] : memref<1x128xf32, #tpu.memory_space<vmem>>, vector<1x128xf32>
    %84 = vector.broadcast %83 : vector<1x128xf32> to vector<64x128xf32>
    %85 = arith.addf %82, %84 : vector<64x128xf32>
    %cst_101 = arith.constant 0.000000e+00 : f32
    %86 = vector.broadcast %cst_101 : f32 to vector<64x128xf32>
    %87 = arith.maximumf %85, %86 : vector<64x128xf32>
    %88 = vector.shape_cast %87 : vector<64x128xf32> to vector<1x8x8x128xf32>
    %89 = vector.shape_cast %88 : vector<1x8x8x128xf32> to vector<1x4x2x8x128xf32>
    %cst_102 = arith.constant dense<0xFF800000> : vector<1x4x8x128xf32>
    %90 = vector.multi_reduction <maximumf>, %89, %cst_102 [2] : vector<1x4x2x8x128xf32> to vector<1x4x8x128xf32>
    %91 = vector.shape_cast %90 : vector<1x4x8x128xf32> to vector<1x4x4x2x128xf32>
    %cst_103 = arith.constant dense<0xFF800000> : vector<1x4x4x128xf32>
    %92 = vector.multi_reduction <maximumf>, %91, %cst_103 [3] : vector<1x4x4x2x128xf32> to vector<1x4x4x128xf32>
    %cst_104 = arith.constant 0.000000e+00 : bf16
    %93 = vector.broadcast %cst_104 : bf16 to vector<1x1x6x128xbf16>
    %cst_105 = arith.constant 0.000000e+00 : bf16
    %94 = vector.broadcast %cst_105 : bf16 to vector<1x6x1x128xbf16>
    %c0_106 = arith.constant 0 : index
    %c0_107 = arith.constant 0 : index
    %c0_108 = arith.constant 0 : index
    %c0_109 = arith.constant 0 : index
    %95 = vector.load %arg25[%c0_106, %c0_107, %c0_108, %c0_109] : memref<1x6x6x128xbf16, #tpu.memory_space<vmem>>, vector<1x1x6x128xbf16>
    tpu.vector_store %arg25[%c0_106, %c0_107, %c0_108, %c0_109], %93 {strides = array<i32>} : memref<1x6x6x128xbf16, #tpu.memory_space<vmem>>, vector<1x1x6x128xbf16>,
    %c0_110 = arith.constant 0 : index
    %c5_111 = arith.constant 5 : index
    %c0_112 = arith.constant 0 : index
    %c0_113 = arith.constant 0 : index
    %96 = vector.load %arg25[%c0_110, %c5_111, %c0_112, %c0_113] : memref<1x6x6x128xbf16, #tpu.memory_space<vmem>>, vector<1x1x6x128xbf16>
    tpu.vector_store %arg25[%c0_110, %c5_111, %c0_112, %c0_113], %93 {strides = array<i32>} : memref<1x6x6x128xbf16, #tpu.memory_space<vmem>>, vector<1x1x6x128xbf16>,
    %c0_114 = arith.constant 0 : index
    %c0_115 = arith.constant 0 : index
    %c0_116 = arith.constant 0 : index
    %c0_117 = arith.constant 0 : index
    %97 = vector.load %arg25[%c0_114, %c0_115, %c0_116, %c0_117] : memref<1x6x6x128xbf16, #tpu.memory_space<vmem>>, vector<1x6x1x128xbf16>
    tpu.vector_store %arg25[%c0_114, %c0_115, %c0_116, %c0_117], %94 {strides = array<i32>} : memref<1x6x6x128xbf16, #tpu.memory_space<vmem>>, vector<1x6x1x128xbf16>,
    %c0_118 = arith.constant 0 : index
    %c0_119 = arith.constant 0 : index
    %c5_120 = arith.constant 5 : index
    %c0_121 = arith.constant 0 : index
    %98 = vector.load %arg25[%c0_118, %c0_119, %c5_120, %c0_121] : memref<1x6x6x128xbf16, #tpu.memory_space<vmem>>, vector<1x6x1x128xbf16>
    tpu.vector_store %arg25[%c0_118, %c0_119, %c5_120, %c0_121], %94 {strides = array<i32>} : memref<1x6x6x128xbf16, #tpu.memory_space<vmem>>, vector<1x6x1x128xbf16>,
    %99 = arith.truncf %92 : vector<1x4x4x128xf32> to vector<1x4x4x128xbf16>
    %c0_122 = arith.constant 0 : index
    %c1_123 = arith.constant 1 : index
    %c1_124 = arith.constant 1 : index
    %c0_125 = arith.constant 0 : index
    %100 = vector.load %arg25[%c0_122, %c1_123, %c1_124, %c0_125] : memref<1x6x6x128xbf16, #tpu.memory_space<vmem>>, vector<1x4x4x128xbf16>
    tpu.vector_store %arg25[%c0_122, %c1_123, %c1_124, %c0_125], %99 {strides = array<i32>} : memref<1x6x6x128xbf16, #tpu.memory_space<vmem>>, vector<1x4x4x128xbf16>,
    %cst_126 = arith.constant 0.000000e+00 : f32
    %101 = vector.broadcast %cst_126 : f32 to vector<16x128xf32>
    %c0_127 = arith.constant 0 : index
    %c0_128 = arith.constant 0 : index
    %c0_129 = arith.constant 0 : index
    %c0_130 = arith.constant 0 : index
    %102 = vector.load %arg25[%c0_127, %c0_128, %c0_129, %c0_130] : memref<1x6x6x128xbf16, #tpu.memory_space<vmem>>, vector<1x4x4x128xbf16>
    %103 = vector.shape_cast %102 : vector<1x4x4x128xbf16> to vector<16x128xbf16>
    %c0_131 = arith.constant 0 : index
    %c0_132 = arith.constant 0 : index
    %c0_133 = arith.constant 0 : index
    %104 = vector.load %arg8[%c0_131, %c0_132, %c0_133] : memref<9x128x128xbf16, #tpu.memory_space<vmem>>, vector<1x128x128xbf16>
    %105 = vector.shape_cast %104 : vector<1x128x128xbf16> to vector<128x128xbf16>
    %cst_134 = arith.constant dense<0.000000e+00> : vector<16x128xf32>
    %106 = tpu.matmul %103, %105, %cst_134 {dimension_numbers = #tpu.dot_dimension_numbers<[1], [0], [0], [1], [0, 0, 1, 1], [], []>} : vector<16x128xbf16>, vector<128x128xbf16>, vector<16x128xf32> -> vector<16x128xf32>
    %107 = arith.addf %101, %106 : vector<16x128xf32>
    %c0_135 = arith.constant 0 : index
    %c0_136 = arith.constant 0 : index
    %c1_137 = arith.constant 1 : index
    %c0_138 = arith.constant 0 : index
    %108 = vector.load %arg25[%c0_135, %c0_136, %c1_137, %c0_138] : memref<1x6x6x128xbf16, #tpu.memory_space<vmem>>, vector<1x4x4x128xbf16>
    %109 = vector.shape_cast %108 : vector<1x4x4x128xbf16> to vector<16x128xbf16>
    %c1_139 = arith.constant 1 : index
    %c0_140 = arith.constant 0 : index
    %c0_141 = arith.constant 0 : index
    %110 = vector.load %arg8[%c1_139, %c0_140, %c0_141] : memref<9x128x128xbf16, #tpu.memory_space<vmem>>, vector<1x128x128xbf16>
    %111 = vector.shape_cast %110 : vector<1x128x128xbf16> to vector<128x128xbf16>
    %cst_142 = arith.constant dense<0.000000e+00> : vector<16x128xf32>
    %112 = tpu.matmul %109, %111, %cst_142 {dimension_numbers = #tpu.dot_dimension_numbers<[1], [0], [0], [1], [0, 0, 1, 1], [], []>} : vector<16x128xbf16>, vector<128x128xbf16>, vector<16x128xf32> -> vector<16x128xf32>
    %113 = arith.addf %107, %112 : vector<16x128xf32>
    %c0_143 = arith.constant 0 : index
    %c0_144 = arith.constant 0 : index
    %c2_145 = arith.constant 2 : index
    %c0_146 = arith.constant 0 : index
    %114 = vector.load %arg25[%c0_143, %c0_144, %c2_145, %c0_146] : memref<1x6x6x128xbf16, #tpu.memory_space<vmem>>, vector<1x4x4x128xbf16>
    %115 = vector.shape_cast %114 : vector<1x4x4x128xbf16> to vector<16x128xbf16>
    %c2_147 = arith.constant 2 : index
    %c0_148 = arith.constant 0 : index
    %c0_149 = arith.constant 0 : index
    %116 = vector.load %arg8[%c2_147, %c0_148, %c0_149] : memref<9x128x128xbf16, #tpu.memory_space<vmem>>, vector<1x128x128xbf16>
    %117 = vector.shape_cast %116 : vector<1x128x128xbf16> to vector<128x128xbf16>
    %cst_150 = arith.constant dense<0.000000e+00> : vector<16x128xf32>
    %118 = tpu.matmul %115, %117, %cst_150 {dimension_numbers = #tpu.dot_dimension_numbers<[1], [0], [0], [1], [0, 0, 1, 1], [], []>} : vector<16x128xbf16>, vector<128x128xbf16>, vector<16x128xf32> -> vector<16x128xf32>
    %119 = arith.addf %113, %118 : vector<16x128xf32>
    %c0_151 = arith.constant 0 : index
    %c1_152 = arith.constant 1 : index
    %c0_153 = arith.constant 0 : index
    %c0_154 = arith.constant 0 : index
    %120 = vector.load %arg25[%c0_151, %c1_152, %c0_153, %c0_154] : memref<1x6x6x128xbf16, #tpu.memory_space<vmem>>, vector<1x4x4x128xbf16>
    %121 = vector.shape_cast %120 : vector<1x4x4x128xbf16> to vector<16x128xbf16>
    %c3_155 = arith.constant 3 : index
    %c0_156 = arith.constant 0 : index
    %c0_157 = arith.constant 0 : index
    %122 = vector.load %arg8[%c3_155, %c0_156, %c0_157] : memref<9x128x128xbf16, #tpu.memory_space<vmem>>, vector<1x128x128xbf16>
    %123 = vector.shape_cast %122 : vector<1x128x128xbf16> to vector<128x128xbf16>
    %cst_158 = arith.constant dense<0.000000e+00> : vector<16x128xf32>
    %124 = tpu.matmul %121, %123, %cst_158 {dimension_numbers = #tpu.dot_dimension_numbers<[1], [0], [0], [1], [0, 0, 1, 1], [], []>} : vector<16x128xbf16>, vector<128x128xbf16>, vector<16x128xf32> -> vector<16x128xf32>
    %125 = arith.addf %119, %124 : vector<16x128xf32>
    %c0_159 = arith.constant 0 : index
    %c1_160 = arith.constant 1 : index
    %c1_161 = arith.constant 1 : index
    %c0_162 = arith.constant 0 : index
    %126 = vector.load %arg25[%c0_159, %c1_160, %c1_161, %c0_162] : memref<1x6x6x128xbf16, #tpu.memory_space<vmem>>, vector<1x4x4x128xbf16>
    %127 = vector.shape_cast %126 : vector<1x4x4x128xbf16> to vector<16x128xbf16>
    %c4_163 = arith.constant 4 : index
    %c0_164 = arith.constant 0 : index
    %c0_165 = arith.constant 0 : index
    %128 = vector.load %arg8[%c4_163, %c0_164, %c0_165] : memref<9x128x128xbf16, #tpu.memory_space<vmem>>, vector<1x128x128xbf16>
    %129 = vector.shape_cast %128 : vector<1x128x128xbf16> to vector<128x128xbf16>
    %cst_166 = arith.constant dense<0.000000e+00> : vector<16x128xf32>
    %130 = tpu.matmul %127, %129, %cst_166 {dimension_numbers = #tpu.dot_dimension_numbers<[1], [0], [0], [1], [0, 0, 1, 1], [], []>} : vector<16x128xbf16>, vector<128x128xbf16>, vector<16x128xf32> -> vector<16x128xf32>
    %131 = arith.addf %125, %130 : vector<16x128xf32>
    %c0_167 = arith.constant 0 : index
    %c1_168 = arith.constant 1 : index
    %c2_169 = arith.constant 2 : index
    %c0_170 = arith.constant 0 : index
    %132 = vector.load %arg25[%c0_167, %c1_168, %c2_169, %c0_170] : memref<1x6x6x128xbf16, #tpu.memory_space<vmem>>, vector<1x4x4x128xbf16>
    %133 = vector.shape_cast %132 : vector<1x4x4x128xbf16> to vector<16x128xbf16>
    %c5_171 = arith.constant 5 : index
    %c0_172 = arith.constant 0 : index
    %c0_173 = arith.constant 0 : index
    %134 = vector.load %arg8[%c5_171, %c0_172, %c0_173] : memref<9x128x128xbf16, #tpu.memory_space<vmem>>, vector<1x128x128xbf16>
    %135 = vector.shape_cast %134 : vector<1x128x128xbf16> to vector<128x128xbf16>
    %cst_174 = arith.constant dense<0.000000e+00> : vector<16x128xf32>
    %136 = tpu.matmul %133, %135, %cst_174 {dimension_numbers = #tpu.dot_dimension_numbers<[1], [0], [0], [1], [0, 0, 1, 1], [], []>} : vector<16x128xbf16>, vector<128x128xbf16>, vector<16x128xf32> -> vector<16x128xf32>
    %137 = arith.addf %131, %136 : vector<16x128xf32>
    %c0_175 = arith.constant 0 : index
    %c2_176 = arith.constant 2 : index
    %c0_177 = arith.constant 0 : index
    %c0_178 = arith.constant 0 : index
    %138 = vector.load %arg25[%c0_175, %c2_176, %c0_177, %c0_178] : memref<1x6x6x128xbf16, #tpu.memory_space<vmem>>, vector<1x4x4x128xbf16>
    %139 = vector.shape_cast %138 : vector<1x4x4x128xbf16> to vector<16x128xbf16>
    %c6_179 = arith.constant 6 : index
    %c0_180 = arith.constant 0 : index
    %c0_181 = arith.constant 0 : index
    %140 = vector.load %arg8[%c6_179, %c0_180, %c0_181] : memref<9x128x128xbf16, #tpu.memory_space<vmem>>, vector<1x128x128xbf16>
    %141 = vector.shape_cast %140 : vector<1x128x128xbf16> to vector<128x128xbf16>
    %cst_182 = arith.constant dense<0.000000e+00> : vector<16x128xf32>
    %142 = tpu.matmul %139, %141, %cst_182 {dimension_numbers = #tpu.dot_dimension_numbers<[1], [0], [0], [1], [0, 0, 1, 1], [], []>} : vector<16x128xbf16>, vector<128x128xbf16>, vector<16x128xf32> -> vector<16x128xf32>
    %143 = arith.addf %137, %142 : vector<16x128xf32>
    %c0_183 = arith.constant 0 : index
    %c2_184 = arith.constant 2 : index
    %c1_185 = arith.constant 1 : index
    %c0_186 = arith.constant 0 : index
    %144 = vector.load %arg25[%c0_183, %c2_184, %c1_185, %c0_186] : memref<1x6x6x128xbf16, #tpu.memory_space<vmem>>, vector<1x4x4x128xbf16>
    %145 = vector.shape_cast %144 : vector<1x4x4x128xbf16> to vector<16x128xbf16>
    %c7_187 = arith.constant 7 : index
    %c0_188 = arith.constant 0 : index
    %c0_189 = arith.constant 0 : index
    %146 = vector.load %arg8[%c7_187, %c0_188, %c0_189] : memref<9x128x128xbf16, #tpu.memory_space<vmem>>, vector<1x128x128xbf16>
    %147 = vector.shape_cast %146 : vector<1x128x128xbf16> to vector<128x128xbf16>
    %cst_190 = arith.constant dense<0.000000e+00> : vector<16x128xf32>
    %148 = tpu.matmul %145, %147, %cst_190 {dimension_numbers = #tpu.dot_dimension_numbers<[1], [0], [0], [1], [0, 0, 1, 1], [], []>} : vector<16x128xbf16>, vector<128x128xbf16>, vector<16x128xf32> -> vector<16x128xf32>
    %149 = arith.addf %143, %148 : vector<16x128xf32>
    %c0_191 = arith.constant 0 : index
    %c2_192 = arith.constant 2 : index
    %c2_193 = arith.constant 2 : index
    %c0_194 = arith.constant 0 : index
    %150 = vector.load %arg25[%c0_191, %c2_192, %c2_193, %c0_194] : memref<1x6x6x128xbf16, #tpu.memory_space<vmem>>, vector<1x4x4x128xbf16>
    %151 = vector.shape_cast %150 : vector<1x4x4x128xbf16> to vector<16x128xbf16>
    %c8_195 = arith.constant 8 : index
    %c0_196 = arith.constant 0 : index
    %c0_197 = arith.constant 0 : index
    %152 = vector.load %arg8[%c8_195, %c0_196, %c0_197] : memref<9x128x128xbf16, #tpu.memory_space<vmem>>, vector<1x128x128xbf16>
    %153 = vector.shape_cast %152 : vector<1x128x128xbf16> to vector<128x128xbf16>
    %cst_198 = arith.constant dense<0.000000e+00> : vector<16x128xf32>
    %154 = tpu.matmul %151, %153, %cst_198 {dimension_numbers = #tpu.dot_dimension_numbers<[1], [0], [0], [1], [0, 0, 1, 1], [], []>} : vector<16x128xbf16>, vector<128x128xbf16>, vector<16x128xf32> -> vector<16x128xf32>
    %155 = arith.addf %149, %154 : vector<16x128xf32>
    %c0_199 = arith.constant 0 : index
    %c0_200 = arith.constant 0 : index
    %156 = vector.load %arg9[%c0_199, %c0_200] : memref<1x128xf32, #tpu.memory_space<vmem>>, vector<1x128xf32>
    %157 = vector.broadcast %156 : vector<1x128xf32> to vector<16x128xf32>
    %158 = arith.mulf %155, %157 : vector<16x128xf32>
    %c0_201 = arith.constant 0 : index
    %c0_202 = arith.constant 0 : index
    %159 = vector.load %arg10[%c0_201, %c0_202] : memref<1x128xf32, #tpu.memory_space<vmem>>, vector<1x128xf32>
    %160 = vector.broadcast %159 : vector<1x128xf32> to vector<16x128xf32>
    %161 = arith.addf %158, %160 : vector<16x128xf32>
    %cst_203 = arith.constant 0.000000e+00 : f32
    %162 = vector.broadcast %cst_203 : f32 to vector<16x128xf32>
    %163 = arith.maximumf %161, %162 : vector<16x128xf32>
    %164 = vector.shape_cast %163 : vector<16x128xf32> to vector<1x4x4x128xf32>
    %cst_204 = arith.constant 0.000000e+00 : bf16
    %165 = vector.broadcast %cst_204 : bf16 to vector<1x1x6x128xbf16>
    %cst_205 = arith.constant 0.000000e+00 : bf16
    %166 = vector.broadcast %cst_205 : bf16 to vector<1x6x1x128xbf16>
    %c0_206 = arith.constant 0 : index
    %c0_207 = arith.constant 0 : index
    %c0_208 = arith.constant 0 : index
    %c0_209 = arith.constant 0 : index
    %167 = vector.load %arg26[%c0_206, %c0_207, %c0_208, %c0_209] : memref<1x6x6x128xbf16, #tpu.memory_space<vmem>>, vector<1x1x6x128xbf16>
    tpu.vector_store %arg26[%c0_206, %c0_207, %c0_208, %c0_209], %165 {strides = array<i32>} : memref<1x6x6x128xbf16, #tpu.memory_space<vmem>>, vector<1x1x6x128xbf16>,
    %c0_210 = arith.constant 0 : index
    %c5_211 = arith.constant 5 : index
    %c0_212 = arith.constant 0 : index
    %c0_213 = arith.constant 0 : index
    %168 = vector.load %arg26[%c0_210, %c5_211, %c0_212, %c0_213] : memref<1x6x6x128xbf16, #tpu.memory_space<vmem>>, vector<1x1x6x128xbf16>
    tpu.vector_store %arg26[%c0_210, %c5_211, %c0_212, %c0_213], %165 {strides = array<i32>} : memref<1x6x6x128xbf16, #tpu.memory_space<vmem>>, vector<1x1x6x128xbf16>,
    %c0_214 = arith.constant 0 : index
    %c0_215 = arith.constant 0 : index
    %c0_216 = arith.constant 0 : index
    %c0_217 = arith.constant 0 : index
    %169 = vector.load %arg26[%c0_214, %c0_215, %c0_216, %c0_217] : memref<1x6x6x128xbf16, #tpu.memory_space<vmem>>, vector<1x6x1x128xbf16>
    tpu.vector_store %arg26[%c0_214, %c0_215, %c0_216, %c0_217], %166 {strides = array<i32>} : memref<1x6x6x128xbf16, #tpu.memory_space<vmem>>, vector<1x6x1x128xbf16>,
    %c0_218 = arith.constant 0 : index
    %c0_219 = arith.constant 0 : index
    %c5_220 = arith.constant 5 : index
    %c0_221 = arith.constant 0 : index
    %170 = vector.load %arg26[%c0_218, %c0_219, %c5_220, %c0_221] : memref<1x6x6x128xbf16, #tpu.memory_space<vmem>>, vector<1x6x1x128xbf16>
    tpu.vector_store %arg26[%c0_218, %c0_219, %c5_220, %c0_221], %166 {strides = array<i32>} : memref<1x6x6x128xbf16, #tpu.memory_space<vmem>>, vector<1x6x1x128xbf16>,
    %171 = arith.truncf %164 : vector<1x4x4x128xf32> to vector<1x4x4x128xbf16>
    %c0_222 = arith.constant 0 : index
    %c1_223 = arith.constant 1 : index
    %c1_224 = arith.constant 1 : index
    %c0_225 = arith.constant 0 : index
    %172 = vector.load %arg26[%c0_222, %c1_223, %c1_224, %c0_225] : memref<1x6x6x128xbf16, #tpu.memory_space<vmem>>, vector<1x4x4x128xbf16>
    tpu.vector_store %arg26[%c0_222, %c1_223, %c1_224, %c0_225], %171 {strides = array<i32>} : memref<1x6x6x128xbf16, #tpu.memory_space<vmem>>, vector<1x4x4x128xbf16>,
    %cst_226 = arith.constant 0.000000e+00 : f32
    %173 = vector.broadcast %cst_226 : f32 to vector<16x128xf32>
    %c0_227 = arith.constant 0 : index
    %c0_228 = arith.constant 0 : index
    %c0_229 = arith.constant 0 : index
    %c0_230 = arith.constant 0 : index
    %174 = vector.load %arg26[%c0_227, %c0_228, %c0_229, %c0_230] : memref<1x6x6x128xbf16, #tpu.memory_space<vmem>>, vector<1x4x4x128xbf16>
    %175 = vector.shape_cast %174 : vector<1x4x4x128xbf16> to vector<16x128xbf16>
    %c0_231 = arith.constant 0 : index
    %c0_232 = arith.constant 0 : index
    %c0_233 = arith.constant 0 : index
    %176 = vector.load %arg11[%c0_231, %c0_232, %c0_233] : memref<9x128x128xbf16, #tpu.memory_space<vmem>>, vector<1x128x128xbf16>
    %177 = vector.shape_cast %176 : vector<1x128x128xbf16> to vector<128x128xbf16>
    %cst_234 = arith.constant dense<0.000000e+00> : vector<16x128xf32>
    %178 = tpu.matmul %175, %177, %cst_234 {dimension_numbers = #tpu.dot_dimension_numbers<[1], [0], [0], [1], [0, 0, 1, 1], [], []>} : vector<16x128xbf16>, vector<128x128xbf16>, vector<16x128xf32> -> vector<16x128xf32>
    %179 = arith.addf %173, %178 : vector<16x128xf32>
    %c0_235 = arith.constant 0 : index
    %c0_236 = arith.constant 0 : index
    %c1_237 = arith.constant 1 : index
    %c0_238 = arith.constant 0 : index
    %180 = vector.load %arg26[%c0_235, %c0_236, %c1_237, %c0_238] : memref<1x6x6x128xbf16, #tpu.memory_space<vmem>>, vector<1x4x4x128xbf16>
    %181 = vector.shape_cast %180 : vector<1x4x4x128xbf16> to vector<16x128xbf16>
    %c1_239 = arith.constant 1 : index
    %c0_240 = arith.constant 0 : index
    %c0_241 = arith.constant 0 : index
    %182 = vector.load %arg11[%c1_239, %c0_240, %c0_241] : memref<9x128x128xbf16, #tpu.memory_space<vmem>>, vector<1x128x128xbf16>
    %183 = vector.shape_cast %182 : vector<1x128x128xbf16> to vector<128x128xbf16>
    %cst_242 = arith.constant dense<0.000000e+00> : vector<16x128xf32>
    %184 = tpu.matmul %181, %183, %cst_242 {dimension_numbers = #tpu.dot_dimension_numbers<[1], [0], [0], [1], [0, 0, 1, 1], [], []>} : vector<16x128xbf16>, vector<128x128xbf16>, vector<16x128xf32> -> vector<16x128xf32>
    %185 = arith.addf %179, %184 : vector<16x128xf32>
    %c0_243 = arith.constant 0 : index
    %c0_244 = arith.constant 0 : index
    %c2_245 = arith.constant 2 : index
    %c0_246 = arith.constant 0 : index
    %186 = vector.load %arg26[%c0_243, %c0_244, %c2_245, %c0_246] : memref<1x6x6x128xbf16, #tpu.memory_space<vmem>>, vector<1x4x4x128xbf16>
    %187 = vector.shape_cast %186 : vector<1x4x4x128xbf16> to vector<16x128xbf16>
    %c2_247 = arith.constant 2 : index
    %c0_248 = arith.constant 0 : index
    %c0_249 = arith.constant 0 : index
    %188 = vector.load %arg11[%c2_247, %c0_248, %c0_249] : memref<9x128x128xbf16, #tpu.memory_space<vmem>>, vector<1x128x128xbf16>
    %189 = vector.shape_cast %188 : vector<1x128x128xbf16> to vector<128x128xbf16>
    %cst_250 = arith.constant dense<0.000000e+00> : vector<16x128xf32>
    %190 = tpu.matmul %187, %189, %cst_250 {dimension_numbers = #tpu.dot_dimension_numbers<[1], [0], [0], [1], [0, 0, 1, 1], [], []>} : vector<16x128xbf16>, vector<128x128xbf16>, vector<16x128xf32> -> vector<16x128xf32>
    %191 = arith.addf %185, %190 : vector<16x128xf32>
    %c0_251 = arith.constant 0 : index
    %c1_252 = arith.constant 1 : index
    %c0_253 = arith.constant 0 : index
    %c0_254 = arith.constant 0 : index
    %192 = vector.load %arg26[%c0_251, %c1_252, %c0_253, %c0_254] : memref<1x6x6x128xbf16, #tpu.memory_space<vmem>>, vector<1x4x4x128xbf16>
    %193 = vector.shape_cast %192 : vector<1x4x4x128xbf16> to vector<16x128xbf16>
    %c3_255 = arith.constant 3 : index
    %c0_256 = arith.constant 0 : index
    %c0_257 = arith.constant 0 : index
    %194 = vector.load %arg11[%c3_255, %c0_256, %c0_257] : memref<9x128x128xbf16, #tpu.memory_space<vmem>>, vector<1x128x128xbf16>
    %195 = vector.shape_cast %194 : vector<1x128x128xbf16> to vector<128x128xbf16>
    %cst_258 = arith.constant dense<0.000000e+00> : vector<16x128xf32>
    %196 = tpu.matmul %193, %195, %cst_258 {dimension_numbers = #tpu.dot_dimension_numbers<[1], [0], [0], [1], [0, 0, 1, 1], [], []>} : vector<16x128xbf16>, vector<128x128xbf16>, vector<16x128xf32> -> vector<16x128xf32>
    %197 = arith.addf %191, %196 : vector<16x128xf32>
    %c0_259 = arith.constant 0 : index
    %c1_260 = arith.constant 1 : index
    %c1_261 = arith.constant 1 : index
    %c0_262 = arith.constant 0 : index
    %198 = vector.load %arg26[%c0_259, %c1_260, %c1_261, %c0_262] : memref<1x6x6x128xbf16, #tpu.memory_space<vmem>>, vector<1x4x4x128xbf16>
    %199 = vector.shape_cast %198 : vector<1x4x4x128xbf16> to vector<16x128xbf16>
    %c4_263 = arith.constant 4 : index
    %c0_264 = arith.constant 0 : index
    %c0_265 = arith.constant 0 : index
    %200 = vector.load %arg11[%c4_263, %c0_264, %c0_265] : memref<9x128x128xbf16, #tpu.memory_space<vmem>>, vector<1x128x128xbf16>
    %201 = vector.shape_cast %200 : vector<1x128x128xbf16> to vector<128x128xbf16>
    %cst_266 = arith.constant dense<0.000000e+00> : vector<16x128xf32>
    %202 = tpu.matmul %199, %201, %cst_266 {dimension_numbers = #tpu.dot_dimension_numbers<[1], [0], [0], [1], [0, 0, 1, 1], [], []>} : vector<16x128xbf16>, vector<128x128xbf16>, vector<16x128xf32> -> vector<16x128xf32>
    %203 = arith.addf %197, %202 : vector<16x128xf32>
    %c0_267 = arith.constant 0 : index
    %c1_268 = arith.constant 1 : index
    %c2_269 = arith.constant 2 : index
    %c0_270 = arith.constant 0 : index
    %204 = vector.load %arg26[%c0_267, %c1_268, %c2_269, %c0_270] : memref<1x6x6x128xbf16, #tpu.memory_space<vmem>>, vector<1x4x4x128xbf16>
    %205 = vector.shape_cast %204 : vector<1x4x4x128xbf16> to vector<16x128xbf16>
    %c5_271 = arith.constant 5 : index
    %c0_272 = arith.constant 0 : index
    %c0_273 = arith.constant 0 : index
    %206 = vector.load %arg11[%c5_271, %c0_272, %c0_273] : memref<9x128x128xbf16, #tpu.memory_space<vmem>>, vector<1x128x128xbf16>
    %207 = vector.shape_cast %206 : vector<1x128x128xbf16> to vector<128x128xbf16>
    %cst_274 = arith.constant dense<0.000000e+00> : vector<16x128xf32>
    %208 = tpu.matmul %205, %207, %cst_274 {dimension_numbers = #tpu.dot_dimension_numbers<[1], [0], [0], [1], [0, 0, 1, 1], [], []>} : vector<16x128xbf16>, vector<128x128xbf16>, vector<16x128xf32> -> vector<16x128xf32>
    %209 = arith.addf %203, %208 : vector<16x128xf32>
    %c0_275 = arith.constant 0 : index
    %c2_276 = arith.constant 2 : index
    %c0_277 = arith.constant 0 : index
    %c0_278 = arith.constant 0 : index
    %210 = vector.load %arg26[%c0_275, %c2_276, %c0_277, %c0_278] : memref<1x6x6x128xbf16, #tpu.memory_space<vmem>>, vector<1x4x4x128xbf16>
    %211 = vector.shape_cast %210 : vector<1x4x4x128xbf16> to vector<16x128xbf16>
    %c6_279 = arith.constant 6 : index
    %c0_280 = arith.constant 0 : index
    %c0_281 = arith.constant 0 : index
    %212 = vector.load %arg11[%c6_279, %c0_280, %c0_281] : memref<9x128x128xbf16, #tpu.memory_space<vmem>>, vector<1x128x128xbf16>
    %213 = vector.shape_cast %212 : vector<1x128x128xbf16> to vector<128x128xbf16>
    %cst_282 = arith.constant dense<0.000000e+00> : vector<16x128xf32>
    %214 = tpu.matmul %211, %213, %cst_282 {dimension_numbers = #tpu.dot_dimension_numbers<[1], [0], [0], [1], [0, 0, 1, 1], [], []>} : vector<16x128xbf16>, vector<128x128xbf16>, vector<16x128xf32> -> vector<16x128xf32>
    %215 = arith.addf %209, %214 : vector<16x128xf32>
    %c0_283 = arith.constant 0 : index
    %c2_284 = arith.constant 2 : index
    %c1_285 = arith.constant 1 : index
    %c0_286 = arith.constant 0 : index
    %216 = vector.load %arg26[%c0_283, %c2_284, %c1_285, %c0_286] : memref<1x6x6x128xbf16, #tpu.memory_space<vmem>>, vector<1x4x4x128xbf16>
    %217 = vector.shape_cast %216 : vector<1x4x4x128xbf16> to vector<16x128xbf16>
    %c7_287 = arith.constant 7 : index
    %c0_288 = arith.constant 0 : index
    %c0_289 = arith.constant 0 : index
    %218 = vector.load %arg11[%c7_287, %c0_288, %c0_289] : memref<9x128x128xbf16, #tpu.memory_space<vmem>>, vector<1x128x128xbf16>
    %219 = vector.shape_cast %218 : vector<1x128x128xbf16> to vector<128x128xbf16>
    %cst_290 = arith.constant dense<0.000000e+00> : vector<16x128xf32>
    %220 = tpu.matmul %217, %219, %cst_290 {dimension_numbers = #tpu.dot_dimension_numbers<[1], [0], [0], [1], [0, 0, 1, 1], [], []>} : vector<16x128xbf16>, vector<128x128xbf16>, vector<16x128xf32> -> vector<16x128xf32>
    %221 = arith.addf %215, %220 : vector<16x128xf32>
    %c0_291 = arith.constant 0 : index
    %c2_292 = arith.constant 2 : index
    %c2_293 = arith.constant 2 : index
    %c0_294 = arith.constant 0 : index
    %222 = vector.load %arg26[%c0_291, %c2_292, %c2_293, %c0_294] : memref<1x6x6x128xbf16, #tpu.memory_space<vmem>>, vector<1x4x4x128xbf16>
    %223 = vector.shape_cast %222 : vector<1x4x4x128xbf16> to vector<16x128xbf16>
    %c8_295 = arith.constant 8 : index
    %c0_296 = arith.constant 0 : index
    %c0_297 = arith.constant 0 : index
    %224 = vector.load %arg11[%c8_295, %c0_296, %c0_297] : memref<9x128x128xbf16, #tpu.memory_space<vmem>>, vector<1x128x128xbf16>
    %225 = vector.shape_cast %224 : vector<1x128x128xbf16> to vector<128x128xbf16>
    %cst_298 = arith.constant dense<0.000000e+00> : vector<16x128xf32>
    %226 = tpu.matmul %223, %225, %cst_298 {dimension_numbers = #tpu.dot_dimension_numbers<[1], [0], [0], [1], [0, 0, 1, 1], [], []>} : vector<16x128xbf16>, vector<128x128xbf16>, vector<16x128xf32> -> vector<16x128xf32>
    %227 = arith.addf %221, %226 : vector<16x128xf32>
    %c0_299 = arith.constant 0 : index
    %c0_300 = arith.constant 0 : index
    %228 = vector.load %arg12[%c0_299, %c0_300] : memref<1x128xf32, #tpu.memory_space<vmem>>, vector<1x128xf32>
    %229 = vector.broadcast %228 : vector<1x128xf32> to vector<16x128xf32>
    %230 = arith.mulf %227, %229 : vector<16x128xf32>
    %c0_301 = arith.constant 0 : index
    %c0_302 = arith.constant 0 : index
    %231 = vector.load %arg13[%c0_301, %c0_302] : memref<1x128xf32, #tpu.memory_space<vmem>>, vector<1x128xf32>
    %232 = vector.broadcast %231 : vector<1x128xf32> to vector<16x128xf32>
    %233 = arith.addf %230, %232 : vector<16x128xf32>
    %cst_303 = arith.constant 0.000000e+00 : f32
    %234 = vector.broadcast %cst_303 : f32 to vector<16x128xf32>
    %235 = arith.maximumf %233, %234 : vector<16x128xf32>
    %236 = vector.shape_cast %235 : vector<16x128xf32> to vector<1x4x4x128xf32>
    %237 = vector.shape_cast %236 : vector<1x4x4x128xf32> to vector<1x2x2x4x128xf32>
    %cst_304 = arith.constant dense<0xFF800000> : vector<1x2x4x128xf32>
    %238 = vector.multi_reduction <maximumf>, %237, %cst_304 [2] : vector<1x2x2x4x128xf32> to vector<1x2x4x128xf32>
    %239 = vector.shape_cast %238 : vector<1x2x4x128xf32> to vector<1x2x2x2x128xf32>
    %cst_305 = arith.constant dense<0xFF800000> : vector<1x2x2x128xf32>
    %240 = vector.multi_reduction <maximumf>, %239, %cst_305 [3] : vector<1x2x2x2x128xf32> to vector<1x2x2x128xf32>
    %cst_306 = arith.constant 0.000000e+00 : bf16
    %241 = vector.broadcast %cst_306 : bf16 to vector<1x1x4x128xbf16>
    %cst_307 = arith.constant 0.000000e+00 : bf16
    %242 = vector.broadcast %cst_307 : bf16 to vector<1x4x1x128xbf16>
    %c0_308 = arith.constant 0 : index
    %c0_309 = arith.constant 0 : index
    %c0_310 = arith.constant 0 : index
    %c0_311 = arith.constant 0 : index
    %243 = vector.load %arg27[%c0_308, %c0_309, %c0_310, %c0_311] : memref<1x4x4x128xbf16, #tpu.memory_space<vmem>>, vector<1x1x4x128xbf16>
    tpu.vector_store %arg27[%c0_308, %c0_309, %c0_310, %c0_311], %241 {strides = array<i32>} : memref<1x4x4x128xbf16, #tpu.memory_space<vmem>>, vector<1x1x4x128xbf16>,
    %c0_312 = arith.constant 0 : index
    %c3_313 = arith.constant 3 : index
    %c0_314 = arith.constant 0 : index
    %c0_315 = arith.constant 0 : index
    %244 = vector.load %arg27[%c0_312, %c3_313, %c0_314, %c0_315] : memref<1x4x4x128xbf16, #tpu.memory_space<vmem>>, vector<1x1x4x128xbf16>
    tpu.vector_store %arg27[%c0_312, %c3_313, %c0_314, %c0_315], %241 {strides = array<i32>} : memref<1x4x4x128xbf16, #tpu.memory_space<vmem>>, vector<1x1x4x128xbf16>,
    %c0_316 = arith.constant 0 : index
    %c0_317 = arith.constant 0 : index
    %c0_318 = arith.constant 0 : index
    %c0_319 = arith.constant 0 : index
    %245 = vector.load %arg27[%c0_316, %c0_317, %c0_318, %c0_319] : memref<1x4x4x128xbf16, #tpu.memory_space<vmem>>, vector<1x4x1x128xbf16>
    tpu.vector_store %arg27[%c0_316, %c0_317, %c0_318, %c0_319], %242 {strides = array<i32>} : memref<1x4x4x128xbf16, #tpu.memory_space<vmem>>, vector<1x4x1x128xbf16>,
    %c0_320 = arith.constant 0 : index
    %c0_321 = arith.constant 0 : index
    %c3_322 = arith.constant 3 : index
    %c0_323 = arith.constant 0 : index
    %246 = vector.load %arg27[%c0_320, %c0_321, %c3_322, %c0_323] : memref<1x4x4x128xbf16, #tpu.memory_space<vmem>>, vector<1x4x1x128xbf16>
    tpu.vector_store %arg27[%c0_320, %c0_321, %c3_322, %c0_323], %242 {strides = array<i32>} : memref<1x4x4x128xbf16, #tpu.memory_space<vmem>>, vector<1x4x1x128xbf16>,
    %247 = arith.truncf %240 : vector<1x2x2x128xf32> to vector<1x2x2x128xbf16>
    %c0_324 = arith.constant 0 : index
    %c1_325 = arith.constant 1 : index
    %c1_326 = arith.constant 1 : index
    %c0_327 = arith.constant 0 : index
    %248 = vector.load %arg27[%c0_324, %c1_325, %c1_326, %c0_327] : memref<1x4x4x128xbf16, #tpu.memory_space<vmem>>, vector<1x2x2x128xbf16>
    tpu.vector_store %arg27[%c0_324, %c1_325, %c1_326, %c0_327], %247 {strides = array<i32>} : memref<1x4x4x128xbf16, #tpu.memory_space<vmem>>, vector<1x2x2x128xbf16>,
    %cst_328 = arith.constant 0.000000e+00 : f32
    %249 = vector.broadcast %cst_328 : f32 to vector<4x256xf32>
    %c0_329 = arith.constant 0 : index
    %c0_330 = arith.constant 0 : index
    %c0_331 = arith.constant 0 : index
    %c0_332 = arith.constant 0 : index
    %250 = vector.load %arg27[%c0_329, %c0_330, %c0_331, %c0_332] : memref<1x4x4x128xbf16, #tpu.memory_space<vmem>>, vector<1x2x2x128xbf16>
    %251 = vector.shape_cast %250 : vector<1x2x2x128xbf16> to vector<4x128xbf16>
    %c0_333 = arith.constant 0 : index
    %c0_334 = arith.constant 0 : index
    %c0_335 = arith.constant 0 : index
    %252 = vector.load %arg14[%c0_333, %c0_334, %c0_335] : memref<9x128x256xbf16, #tpu.memory_space<vmem>>, vector<1x128x256xbf16>
    %253 = vector.shape_cast %252 : vector<1x128x256xbf16> to vector<128x256xbf16>
    %cst_336 = arith.constant dense<0.000000e+00> : vector<4x256xf32>
    %254 = tpu.matmul %251, %253, %cst_336 {dimension_numbers = #tpu.dot_dimension_numbers<[1], [0], [0], [1], [0, 0, 1, 1], [], []>} : vector<4x128xbf16>, vector<128x256xbf16>, vector<4x256xf32> -> vector<4x256xf32>
    %255 = arith.addf %249, %254 : vector<4x256xf32>
    %c0_337 = arith.constant 0 : index
    %c0_338 = arith.constant 0 : index
    %c1_339 = arith.constant 1 : index
    %c0_340 = arith.constant 0 : index
    %256 = vector.load %arg27[%c0_337, %c0_338, %c1_339, %c0_340] : memref<1x4x4x128xbf16, #tpu.memory_space<vmem>>, vector<1x2x2x128xbf16>
    %257 = vector.shape_cast %256 : vector<1x2x2x128xbf16> to vector<4x128xbf16>
    %c1_341 = arith.constant 1 : index
    %c0_342 = arith.constant 0 : index
    %c0_343 = arith.constant 0 : index
    %258 = vector.load %arg14[%c1_341, %c0_342, %c0_343] : memref<9x128x256xbf16, #tpu.memory_space<vmem>>, vector<1x128x256xbf16>
    %259 = vector.shape_cast %258 : vector<1x128x256xbf16> to vector<128x256xbf16>
    %cst_344 = arith.constant dense<0.000000e+00> : vector<4x256xf32>
    %260 = tpu.matmul %257, %259, %cst_344 {dimension_numbers = #tpu.dot_dimension_numbers<[1], [0], [0], [1], [0, 0, 1, 1], [], []>} : vector<4x128xbf16>, vector<128x256xbf16>, vector<4x256xf32> -> vector<4x256xf32>
    %261 = arith.addf %255, %260 : vector<4x256xf32>
    %c0_345 = arith.constant 0 : index
    %c0_346 = arith.constant 0 : index
    %c2_347 = arith.constant 2 : index
    %c0_348 = arith.constant 0 : index
    %262 = vector.load %arg27[%c0_345, %c0_346, %c2_347, %c0_348] : memref<1x4x4x128xbf16, #tpu.memory_space<vmem>>, vector<1x2x2x128xbf16>
    %263 = vector.shape_cast %262 : vector<1x2x2x128xbf16> to vector<4x128xbf16>
    %c2_349 = arith.constant 2 : index
    %c0_350 = arith.constant 0 : index
    %c0_351 = arith.constant 0 : index
    %264 = vector.load %arg14[%c2_349, %c0_350, %c0_351] : memref<9x128x256xbf16, #tpu.memory_space<vmem>>, vector<1x128x256xbf16>
    %265 = vector.shape_cast %264 : vector<1x128x256xbf16> to vector<128x256xbf16>
    %cst_352 = arith.constant dense<0.000000e+00> : vector<4x256xf32>
    %266 = tpu.matmul %263, %265, %cst_352 {dimension_numbers = #tpu.dot_dimension_numbers<[1], [0], [0], [1], [0, 0, 1, 1], [], []>} : vector<4x128xbf16>, vector<128x256xbf16>, vector<4x256xf32> -> vector<4x256xf32>
    %267 = arith.addf %261, %266 : vector<4x256xf32>
    %c0_353 = arith.constant 0 : index
    %c1_354 = arith.constant 1 : index
    %c0_355 = arith.constant 0 : index
    %c0_356 = arith.constant 0 : index
    %268 = vector.load %arg27[%c0_353, %c1_354, %c0_355, %c0_356] : memref<1x4x4x128xbf16, #tpu.memory_space<vmem>>, vector<1x2x2x128xbf16>
    %269 = vector.shape_cast %268 : vector<1x2x2x128xbf16> to vector<4x128xbf16>
    %c3_357 = arith.constant 3 : index
    %c0_358 = arith.constant 0 : index
    %c0_359 = arith.constant 0 : index
    %270 = vector.load %arg14[%c3_357, %c0_358, %c0_359] : memref<9x128x256xbf16, #tpu.memory_space<vmem>>, vector<1x128x256xbf16>
    %271 = vector.shape_cast %270 : vector<1x128x256xbf16> to vector<128x256xbf16>
    %cst_360 = arith.constant dense<0.000000e+00> : vector<4x256xf32>
    %272 = tpu.matmul %269, %271, %cst_360 {dimension_numbers = #tpu.dot_dimension_numbers<[1], [0], [0], [1], [0, 0, 1, 1], [], []>} : vector<4x128xbf16>, vector<128x256xbf16>, vector<4x256xf32> -> vector<4x256xf32>
    %273 = arith.addf %267, %272 : vector<4x256xf32>
    %c0_361 = arith.constant 0 : index
    %c1_362 = arith.constant 1 : index
    %c1_363 = arith.constant 1 : index
    %c0_364 = arith.constant 0 : index
    %274 = vector.load %arg27[%c0_361, %c1_362, %c1_363, %c0_364] : memref<1x4x4x128xbf16, #tpu.memory_space<vmem>>, vector<1x2x2x128xbf16>
    %275 = vector.shape_cast %274 : vector<1x2x2x128xbf16> to vector<4x128xbf16>
    %c4_365 = arith.constant 4 : index
    %c0_366 = arith.constant 0 : index
    %c0_367 = arith.constant 0 : index
    %276 = vector.load %arg14[%c4_365, %c0_366, %c0_367] : memref<9x128x256xbf16, #tpu.memory_space<vmem>>, vector<1x128x256xbf16>
    %277 = vector.shape_cast %276 : vector<1x128x256xbf16> to vector<128x256xbf16>
    %cst_368 = arith.constant dense<0.000000e+00> : vector<4x256xf32>
    %278 = tpu.matmul %275, %277, %cst_368 {dimension_numbers = #tpu.dot_dimension_numbers<[1], [0], [0], [1], [0, 0, 1, 1], [], []>} : vector<4x128xbf16>, vector<128x256xbf16>, vector<4x256xf32> -> vector<4x256xf32>
    %279 = arith.addf %273, %278 : vector<4x256xf32>
    %c0_369 = arith.constant 0 : index
    %c1_370 = arith.constant 1 : index
    %c2_371 = arith.constant 2 : index
    %c0_372 = arith.constant 0 : index
    %280 = vector.load %arg27[%c0_369, %c1_370, %c2_371, %c0_372] : memref<1x4x4x128xbf16, #tpu.memory_space<vmem>>, vector<1x2x2x128xbf16>
    %281 = vector.shape_cast %280 : vector<1x2x2x128xbf16> to vector<4x128xbf16>
    %c5_373 = arith.constant 5 : index
    %c0_374 = arith.constant 0 : index
    %c0_375 = arith.constant 0 : index
    %282 = vector.load %arg14[%c5_373, %c0_374, %c0_375] : memref<9x128x256xbf16, #tpu.memory_space<vmem>>, vector<1x128x256xbf16>
    %283 = vector.shape_cast %282 : vector<1x128x256xbf16> to vector<128x256xbf16>
    %cst_376 = arith.constant dense<0.000000e+00> : vector<4x256xf32>
    %284 = tpu.matmul %281, %283, %cst_376 {dimension_numbers = #tpu.dot_dimension_numbers<[1], [0], [0], [1], [0, 0, 1, 1], [], []>} : vector<4x128xbf16>, vector<128x256xbf16>, vector<4x256xf32> -> vector<4x256xf32>
    %285 = arith.addf %279, %284 : vector<4x256xf32>
    %c0_377 = arith.constant 0 : index
    %c2_378 = arith.constant 2 : index
    %c0_379 = arith.constant 0 : index
    %c0_380 = arith.constant 0 : index
    %286 = vector.load %arg27[%c0_377, %c2_378, %c0_379, %c0_380] : memref<1x4x4x128xbf16, #tpu.memory_space<vmem>>, vector<1x2x2x128xbf16>
    %287 = vector.shape_cast %286 : vector<1x2x2x128xbf16> to vector<4x128xbf16>
    %c6_381 = arith.constant 6 : index
    %c0_382 = arith.constant 0 : index
    %c0_383 = arith.constant 0 : index
    %288 = vector.load %arg14[%c6_381, %c0_382, %c0_383] : memref<9x128x256xbf16, #tpu.memory_space<vmem>>, vector<1x128x256xbf16>
    %289 = vector.shape_cast %288 : vector<1x128x256xbf16> to vector<128x256xbf16>
    %cst_384 = arith.constant dense<0.000000e+00> : vector<4x256xf32>
    %290 = tpu.matmul %287, %289, %cst_384 {dimension_numbers = #tpu.dot_dimension_numbers<[1], [0], [0], [1], [0, 0, 1, 1], [], []>} : vector<4x128xbf16>, vector<128x256xbf16>, vector<4x256xf32> -> vector<4x256xf32>
    %291 = arith.addf %285, %290 : vector<4x256xf32>
    %c0_385 = arith.constant 0 : index
    %c2_386 = arith.constant 2 : index
    %c1_387 = arith.constant 1 : index
    %c0_388 = arith.constant 0 : index
    %292 = vector.load %arg27[%c0_385, %c2_386, %c1_387, %c0_388] : memref<1x4x4x128xbf16, #tpu.memory_space<vmem>>, vector<1x2x2x128xbf16>
    %293 = vector.shape_cast %292 : vector<1x2x2x128xbf16> to vector<4x128xbf16>
    %c7_389 = arith.constant 7 : index
    %c0_390 = arith.constant 0 : index
    %c0_391 = arith.constant 0 : index
    %294 = vector.load %arg14[%c7_389, %c0_390, %c0_391] : memref<9x128x256xbf16, #tpu.memory_space<vmem>>, vector<1x128x256xbf16>
    %295 = vector.shape_cast %294 : vector<1x128x256xbf16> to vector<128x256xbf16>
    %cst_392 = arith.constant dense<0.000000e+00> : vector<4x256xf32>
    %296 = tpu.matmul %293, %295, %cst_392 {dimension_numbers = #tpu.dot_dimension_numbers<[1], [0], [0], [1], [0, 0, 1, 1], [], []>} : vector<4x128xbf16>, vector<128x256xbf16>, vector<4x256xf32> -> vector<4x256xf32>
    %297 = arith.addf %291, %296 : vector<4x256xf32>
    %c0_393 = arith.constant 0 : index
    %c2_394 = arith.constant 2 : index
    %c2_395 = arith.constant 2 : index
    %c0_396 = arith.constant 0 : index
    %298 = vector.load %arg27[%c0_393, %c2_394, %c2_395, %c0_396] : memref<1x4x4x128xbf16, #tpu.memory_space<vmem>>, vector<1x2x2x128xbf16>
    %299 = vector.shape_cast %298 : vector<1x2x2x128xbf16> to vector<4x128xbf16>
    %c8_397 = arith.constant 8 : index
    %c0_398 = arith.constant 0 : index
    %c0_399 = arith.constant 0 : index
    %300 = vector.load %arg14[%c8_397, %c0_398, %c0_399] : memref<9x128x256xbf16, #tpu.memory_space<vmem>>, vector<1x128x256xbf16>
    %301 = vector.shape_cast %300 : vector<1x128x256xbf16> to vector<128x256xbf16>
    %cst_400 = arith.constant dense<0.000000e+00> : vector<4x256xf32>
    %302 = tpu.matmul %299, %301, %cst_400 {dimension_numbers = #tpu.dot_dimension_numbers<[1], [0], [0], [1], [0, 0, 1, 1], [], []>} : vector<4x128xbf16>, vector<128x256xbf16>, vector<4x256xf32> -> vector<4x256xf32>
    %303 = arith.addf %297, %302 : vector<4x256xf32>
    %c0_401 = arith.constant 0 : index
    %c0_402 = arith.constant 0 : index
    %304 = vector.load %arg15[%c0_401, %c0_402] : memref<1x256xf32, #tpu.memory_space<vmem>>, vector<1x256xf32>
    %305 = vector.broadcast %304 : vector<1x256xf32> to vector<4x256xf32>
    %306 = arith.mulf %303, %305 : vector<4x256xf32>
    %c0_403 = arith.constant 0 : index
    %c0_404 = arith.constant 0 : index
    %307 = vector.load %arg16[%c0_403, %c0_404] : memref<1x256xf32, #tpu.memory_space<vmem>>, vector<1x256xf32>
    %308 = vector.broadcast %307 : vector<1x256xf32> to vector<4x256xf32>
    %309 = arith.addf %306, %308 : vector<4x256xf32>
    %cst_405 = arith.constant 0.000000e+00 : f32
    %310 = vector.broadcast %cst_405 : f32 to vector<4x256xf32>
    %311 = arith.maximumf %309, %310 : vector<4x256xf32>
    %312 = vector.shape_cast %311 : vector<4x256xf32> to vector<1x2x2x256xf32>
    %cst_406 = arith.constant 0.000000e+00 : bf16
    %313 = vector.broadcast %cst_406 : bf16 to vector<1x1x4x256xbf16>
    %cst_407 = arith.constant 0.000000e+00 : bf16
    %314 = vector.broadcast %cst_407 : bf16 to vector<1x4x1x256xbf16>
    %c0_408 = arith.constant 0 : index
    %c0_409 = arith.constant 0 : index
    %c0_410 = arith.constant 0 : index
    %c0_411 = arith.constant 0 : index
    %315 = vector.load %arg28[%c0_408, %c0_409, %c0_410, %c0_411] : memref<1x4x4x256xbf16, #tpu.memory_space<vmem>>, vector<1x1x4x256xbf16>
    tpu.vector_store %arg28[%c0_408, %c0_409, %c0_410, %c0_411], %313 {strides = array<i32>} : memref<1x4x4x256xbf16, #tpu.memory_space<vmem>>, vector<1x1x4x256xbf16>,
    %c0_412 = arith.constant 0 : index
    %c3_413 = arith.constant 3 : index
    %c0_414 = arith.constant 0 : index
    %c0_415 = arith.constant 0 : index
    %316 = vector.load %arg28[%c0_412, %c3_413, %c0_414, %c0_415] : memref<1x4x4x256xbf16, #tpu.memory_space<vmem>>, vector<1x1x4x256xbf16>
    tpu.vector_store %arg28[%c0_412, %c3_413, %c0_414, %c0_415], %313 {strides = array<i32>} : memref<1x4x4x256xbf16, #tpu.memory_space<vmem>>, vector<1x1x4x256xbf16>,
    %c0_416 = arith.constant 0 : index
    %c0_417 = arith.constant 0 : index
    %c0_418 = arith.constant 0 : index
    %c0_419 = arith.constant 0 : index
    %317 = vector.load %arg28[%c0_416, %c0_417, %c0_418, %c0_419] : memref<1x4x4x256xbf16, #tpu.memory_space<vmem>>, vector<1x4x1x256xbf16>
    tpu.vector_store %arg28[%c0_416, %c0_417, %c0_418, %c0_419], %314 {strides = array<i32>} : memref<1x4x4x256xbf16, #tpu.memory_space<vmem>>, vector<1x4x1x256xbf16>,
    %c0_420 = arith.constant 0 : index
    %c0_421 = arith.constant 0 : index
    %c3_422 = arith.constant 3 : index
    %c0_423 = arith.constant 0 : index
    %318 = vector.load %arg28[%c0_420, %c0_421, %c3_422, %c0_423] : memref<1x4x4x256xbf16, #tpu.memory_space<vmem>>, vector<1x4x1x256xbf16>
    tpu.vector_store %arg28[%c0_420, %c0_421, %c3_422, %c0_423], %314 {strides = array<i32>} : memref<1x4x4x256xbf16, #tpu.memory_space<vmem>>, vector<1x4x1x256xbf16>,
    %319 = arith.truncf %312 : vector<1x2x2x256xf32> to vector<1x2x2x256xbf16>
    %c0_424 = arith.constant 0 : index
    %c1_425 = arith.constant 1 : index
    %c1_426 = arith.constant 1 : index
    %c0_427 = arith.constant 0 : index
    %320 = vector.load %arg28[%c0_424, %c1_425, %c1_426, %c0_427] : memref<1x4x4x256xbf16, #tpu.memory_space<vmem>>, vector<1x2x2x256xbf16>
    tpu.vector_store %arg28[%c0_424, %c1_425, %c1_426, %c0_427], %319 {strides = array<i32>} : memref<1x4x4x256xbf16, #tpu.memory_space<vmem>>, vector<1x2x2x256xbf16>,
    %cst_428 = arith.constant 0.000000e+00 : f32
    %321 = vector.broadcast %cst_428 : f32 to vector<4x256xf32>
    %c0_429 = arith.constant 0 : index
    %c0_430 = arith.constant 0 : index
    %c0_431 = arith.constant 0 : index
    %c0_432 = arith.constant 0 : index
    %322 = vector.load %arg28[%c0_429, %c0_430, %c0_431, %c0_432] : memref<1x4x4x256xbf16, #tpu.memory_space<vmem>>, vector<1x2x2x256xbf16>
    %323 = vector.shape_cast %322 : vector<1x2x2x256xbf16> to vector<4x256xbf16>
    %c0_433 = arith.constant 0 : index
    %c0_434 = arith.constant 0 : index
    %c0_435 = arith.constant 0 : index
    %324 = vector.load %arg17[%c0_433, %c0_434, %c0_435] : memref<9x256x256xbf16, #tpu.memory_space<vmem>>, vector<1x256x256xbf16>
    %325 = vector.shape_cast %324 : vector<1x256x256xbf16> to vector<256x256xbf16>
    %cst_436 = arith.constant dense<0.000000e+00> : vector<4x256xf32>
    %326 = tpu.matmul %323, %325, %cst_436 {dimension_numbers = #tpu.dot_dimension_numbers<[1], [0], [0], [1], [0, 0, 1, 1], [], []>} : vector<4x256xbf16>, vector<256x256xbf16>, vector<4x256xf32> -> vector<4x256xf32>
    %327 = arith.addf %321, %326 : vector<4x256xf32>
    %c0_437 = arith.constant 0 : index
    %c0_438 = arith.constant 0 : index
    %c1_439 = arith.constant 1 : index
    %c0_440 = arith.constant 0 : index
    %328 = vector.load %arg28[%c0_437, %c0_438, %c1_439, %c0_440] : memref<1x4x4x256xbf16, #tpu.memory_space<vmem>>, vector<1x2x2x256xbf16>
    %329 = vector.shape_cast %328 : vector<1x2x2x256xbf16> to vector<4x256xbf16>
    %c1_441 = arith.constant 1 : index
    %c0_442 = arith.constant 0 : index
    %c0_443 = arith.constant 0 : index
    %330 = vector.load %arg17[%c1_441, %c0_442, %c0_443] : memref<9x256x256xbf16, #tpu.memory_space<vmem>>, vector<1x256x256xbf16>
    %331 = vector.shape_cast %330 : vector<1x256x256xbf16> to vector<256x256xbf16>
    %cst_444 = arith.constant dense<0.000000e+00> : vector<4x256xf32>
    %332 = tpu.matmul %329, %331, %cst_444 {dimension_numbers = #tpu.dot_dimension_numbers<[1], [0], [0], [1], [0, 0, 1, 1], [], []>} : vector<4x256xbf16>, vector<256x256xbf16>, vector<4x256xf32> -> vector<4x256xf32>
    %333 = arith.addf %327, %332 : vector<4x256xf32>
    %c0_445 = arith.constant 0 : index
    %c0_446 = arith.constant 0 : index
    %c2_447 = arith.constant 2 : index
    %c0_448 = arith.constant 0 : index
    %334 = vector.load %arg28[%c0_445, %c0_446, %c2_447, %c0_448] : memref<1x4x4x256xbf16, #tpu.memory_space<vmem>>, vector<1x2x2x256xbf16>
    %335 = vector.shape_cast %334 : vector<1x2x2x256xbf16> to vector<4x256xbf16>
    %c2_449 = arith.constant 2 : index
    %c0_450 = arith.constant 0 : index
    %c0_451 = arith.constant 0 : index
    %336 = vector.load %arg17[%c2_449, %c0_450, %c0_451] : memref<9x256x256xbf16, #tpu.memory_space<vmem>>, vector<1x256x256xbf16>
    %337 = vector.shape_cast %336 : vector<1x256x256xbf16> to vector<256x256xbf16>
    %cst_452 = arith.constant dense<0.000000e+00> : vector<4x256xf32>
    %338 = tpu.matmul %335, %337, %cst_452 {dimension_numbers = #tpu.dot_dimension_numbers<[1], [0], [0], [1], [0, 0, 1, 1], [], []>} : vector<4x256xbf16>, vector<256x256xbf16>, vector<4x256xf32> -> vector<4x256xf32>
    %339 = arith.addf %333, %338 : vector<4x256xf32>
    %c0_453 = arith.constant 0 : index
    %c1_454 = arith.constant 1 : index
    %c0_455 = arith.constant 0 : index
    %c0_456 = arith.constant 0 : index
    %340 = vector.load %arg28[%c0_453, %c1_454, %c0_455, %c0_456] : memref<1x4x4x256xbf16, #tpu.memory_space<vmem>>, vector<1x2x2x256xbf16>
    %341 = vector.shape_cast %340 : vector<1x2x2x256xbf16> to vector<4x256xbf16>
    %c3_457 = arith.constant 3 : index
    %c0_458 = arith.constant 0 : index
    %c0_459 = arith.constant 0 : index
    %342 = vector.load %arg17[%c3_457, %c0_458, %c0_459] : memref<9x256x256xbf16, #tpu.memory_space<vmem>>, vector<1x256x256xbf16>
    %343 = vector.shape_cast %342 : vector<1x256x256xbf16> to vector<256x256xbf16>
    %cst_460 = arith.constant dense<0.000000e+00> : vector<4x256xf32>
    %344 = tpu.matmul %341, %343, %cst_460 {dimension_numbers = #tpu.dot_dimension_numbers<[1], [0], [0], [1], [0, 0, 1, 1], [], []>} : vector<4x256xbf16>, vector<256x256xbf16>, vector<4x256xf32> -> vector<4x256xf32>
    %345 = arith.addf %339, %344 : vector<4x256xf32>
    %c0_461 = arith.constant 0 : index
    %c1_462 = arith.constant 1 : index
    %c1_463 = arith.constant 1 : index
    %c0_464 = arith.constant 0 : index
    %346 = vector.load %arg28[%c0_461, %c1_462, %c1_463, %c0_464] : memref<1x4x4x256xbf16, #tpu.memory_space<vmem>>, vector<1x2x2x256xbf16>
    %347 = vector.shape_cast %346 : vector<1x2x2x256xbf16> to vector<4x256xbf16>
    %c4_465 = arith.constant 4 : index
    %c0_466 = arith.constant 0 : index
    %c0_467 = arith.constant 0 : index
    %348 = vector.load %arg17[%c4_465, %c0_466, %c0_467] : memref<9x256x256xbf16, #tpu.memory_space<vmem>>, vector<1x256x256xbf16>
    %349 = vector.shape_cast %348 : vector<1x256x256xbf16> to vector<256x256xbf16>
    %cst_468 = arith.constant dense<0.000000e+00> : vector<4x256xf32>
    %350 = tpu.matmul %347, %349, %cst_468 {dimension_numbers = #tpu.dot_dimension_numbers<[1], [0], [0], [1], [0, 0, 1, 1], [], []>} : vector<4x256xbf16>, vector<256x256xbf16>, vector<4x256xf32> -> vector<4x256xf32>
    %351 = arith.addf %345, %350 : vector<4x256xf32>
    %c0_469 = arith.constant 0 : index
    %c1_470 = arith.constant 1 : index
    %c2_471 = arith.constant 2 : index
    %c0_472 = arith.constant 0 : index
    %352 = vector.load %arg28[%c0_469, %c1_470, %c2_471, %c0_472] : memref<1x4x4x256xbf16, #tpu.memory_space<vmem>>, vector<1x2x2x256xbf16>
    %353 = vector.shape_cast %352 : vector<1x2x2x256xbf16> to vector<4x256xbf16>
    %c5_473 = arith.constant 5 : index
    %c0_474 = arith.constant 0 : index
    %c0_475 = arith.constant 0 : index
    %354 = vector.load %arg17[%c5_473, %c0_474, %c0_475] : memref<9x256x256xbf16, #tpu.memory_space<vmem>>, vector<1x256x256xbf16>
    %355 = vector.shape_cast %354 : vector<1x256x256xbf16> to vector<256x256xbf16>
    %cst_476 = arith.constant dense<0.000000e+00> : vector<4x256xf32>
    %356 = tpu.matmul %353, %355, %cst_476 {dimension_numbers = #tpu.dot_dimension_numbers<[1], [0], [0], [1], [0, 0, 1, 1], [], []>} : vector<4x256xbf16>, vector<256x256xbf16>, vector<4x256xf32> -> vector<4x256xf32>
    %357 = arith.addf %351, %356 : vector<4x256xf32>
    %c0_477 = arith.constant 0 : index
    %c2_478 = arith.constant 2 : index
    %c0_479 = arith.constant 0 : index
    %c0_480 = arith.constant 0 : index
    %358 = vector.load %arg28[%c0_477, %c2_478, %c0_479, %c0_480] : memref<1x4x4x256xbf16, #tpu.memory_space<vmem>>, vector<1x2x2x256xbf16>
    %359 = vector.shape_cast %358 : vector<1x2x2x256xbf16> to vector<4x256xbf16>
    %c6_481 = arith.constant 6 : index
    %c0_482 = arith.constant 0 : index
    %c0_483 = arith.constant 0 : index
    %360 = vector.load %arg17[%c6_481, %c0_482, %c0_483] : memref<9x256x256xbf16, #tpu.memory_space<vmem>>, vector<1x256x256xbf16>
    %361 = vector.shape_cast %360 : vector<1x256x256xbf16> to vector<256x256xbf16>
    %cst_484 = arith.constant dense<0.000000e+00> : vector<4x256xf32>
    %362 = tpu.matmul %359, %361, %cst_484 {dimension_numbers = #tpu.dot_dimension_numbers<[1], [0], [0], [1], [0, 0, 1, 1], [], []>} : vector<4x256xbf16>, vector<256x256xbf16>, vector<4x256xf32> -> vector<4x256xf32>
    %363 = arith.addf %357, %362 : vector<4x256xf32>
    %c0_485 = arith.constant 0 : index
    %c2_486 = arith.constant 2 : index
    %c1_487 = arith.constant 1 : index
    %c0_488 = arith.constant 0 : index
    %364 = vector.load %arg28[%c0_485, %c2_486, %c1_487, %c0_488] : memref<1x4x4x256xbf16, #tpu.memory_space<vmem>>, vector<1x2x2x256xbf16>
    %365 = vector.shape_cast %364 : vector<1x2x2x256xbf16> to vector<4x256xbf16>
    %c7_489 = arith.constant 7 : index
    %c0_490 = arith.constant 0 : index
    %c0_491 = arith.constant 0 : index
    %366 = vector.load %arg17[%c7_489, %c0_490, %c0_491] : memref<9x256x256xbf16, #tpu.memory_space<vmem>>, vector<1x256x256xbf16>
    %367 = vector.shape_cast %366 : vector<1x256x256xbf16> to vector<256x256xbf16>
    %cst_492 = arith.constant dense<0.000000e+00> : vector<4x256xf32>
    %368 = tpu.matmul %365, %367, %cst_492 {dimension_numbers = #tpu.dot_dimension_numbers<[1], [0], [0], [1], [0, 0, 1, 1], [], []>} : vector<4x256xbf16>, vector<256x256xbf16>, vector<4x256xf32> -> vector<4x256xf32>
    %369 = arith.addf %363, %368 : vector<4x256xf32>
    %c0_493 = arith.constant 0 : index
    %c2_494 = arith.constant 2 : index
    %c2_495 = arith.constant 2 : index
    %c0_496 = arith.constant 0 : index
    %370 = vector.load %arg28[%c0_493, %c2_494, %c2_495, %c0_496] : memref<1x4x4x256xbf16, #tpu.memory_space<vmem>>, vector<1x2x2x256xbf16>
    %371 = vector.shape_cast %370 : vector<1x2x2x256xbf16> to vector<4x256xbf16>
    %c8_497 = arith.constant 8 : index
    %c0_498 = arith.constant 0 : index
    %c0_499 = arith.constant 0 : index
    %372 = vector.load %arg17[%c8_497, %c0_498, %c0_499] : memref<9x256x256xbf16, #tpu.memory_space<vmem>>, vector<1x256x256xbf16>
    %373 = vector.shape_cast %372 : vector<1x256x256xbf16> to vector<256x256xbf16>
    %cst_500 = arith.constant dense<0.000000e+00> : vector<4x256xf32>
    %374 = tpu.matmul %371, %373, %cst_500 {dimension_numbers = #tpu.dot_dimension_numbers<[1], [0], [0], [1], [0, 0, 1, 1], [], []>} : vector<4x256xbf16>, vector<256x256xbf16>, vector<4x256xf32> -> vector<4x256xf32>
    %375 = arith.addf %369, %374 : vector<4x256xf32>
    %c0_501 = arith.constant 0 : index
    %c0_502 = arith.constant 0 : index
    %376 = vector.load %arg18[%c0_501, %c0_502] : memref<1x256xf32, #tpu.memory_space<vmem>>, vector<1x256xf32>
    %377 = vector.broadcast %376 : vector<1x256xf32> to vector<4x256xf32>
    %378 = arith.mulf %375, %377 : vector<4x256xf32>
    %c0_503 = arith.constant 0 : index
    %c0_504 = arith.constant 0 : index
    %379 = vector.load %arg19[%c0_503, %c0_504] : memref<1x256xf32, #tpu.memory_space<vmem>>, vector<1x256xf32>
    %380 = vector.broadcast %379 : vector<1x256xf32> to vector<4x256xf32>
    %381 = arith.addf %378, %380 : vector<4x256xf32>
    %cst_505 = arith.constant 0.000000e+00 : f32
    %382 = vector.broadcast %cst_505 : f32 to vector<4x256xf32>
    %383 = arith.maximumf %381, %382 : vector<4x256xf32>
    %cst_506 = arith.constant dense<0.000000e+00> : vector<4xf32>
    %384 = vector.multi_reduction <add>, %383, %cst_506 [1] : vector<4x256xf32> to vector<4xf32>
    %385 = vector.shape_cast %384 : vector<4xf32> to vector<4x1xf32>
    %cst_507 = arith.constant 2.560000e+02 : f32
    %386 = vector.broadcast %cst_507 : f32 to vector<4x1xf32>
    %387 = arith.divf %385, %386 : vector<4x1xf32>
    %388 = vector.shape_cast %387 : vector<4x1xf32> to vector<1x4x1xf32>
    %c0_508 = arith.constant 0 : index
    %c0_509 = arith.constant 0 : index
    %c0_510 = arith.constant 0 : index
    %389 = vector.load %arg22[%c0_508, %c0_509, %c0_510] : memref<1x4x1xf32, #tpu.memory_space<vmem>>, vector<1x4x1xf32>
    tpu.vector_store %arg22[%c0_508, %c0_509, %c0_510], %388 {strides = array<i32>} : memref<1x4x1xf32, #tpu.memory_space<vmem>>, vector<1x4x1xf32>,
    %390 = vector.shape_cast %383 : vector<4x256xf32> to vector<1x4x256xf32>
    %391 = vector.extract_strided_slice %390 {offsets = [0, 0, 0], sizes = [1, 1, 256], strides = [1, 1, 1]} : vector<1x4x256xf32> to vector<1x1x256xf32>
    %392 = vector.shape_cast %391 : vector<1x1x256xf32> to vector<1x256xf32>
    %393 = arith.truncf %392 : vector<1x256xf32> to vector<1x256xbf16>
    %c0_511 = arith.constant 0 : index
    %c0_512 = arith.constant 0 : index
    %394 = vector.load %arg29[%c0_511, %c0_512] : memref<1x1024xbf16, #tpu.memory_space<vmem>>, vector<1x256xbf16>
    tpu.vector_store %arg29[%c0_511, %c0_512], %393 {strides = array<i32>} : memref<1x1024xbf16, #tpu.memory_space<vmem>>, vector<1x256xbf16>,
    %395 = vector.extract_strided_slice %390 {offsets = [0, 1, 0], sizes = [1, 1, 256], strides = [1, 1, 1]} : vector<1x4x256xf32> to vector<1x1x256xf32>
    %396 = vector.shape_cast %395 : vector<1x1x256xf32> to vector<1x256xf32>
    %397 = arith.truncf %396 : vector<1x256xf32> to vector<1x256xbf16>
    %c0_513 = arith.constant 0 : index
    %c256 = arith.constant 256 : index
    %398 = vector.load %arg29[%c0_513, %c256] : memref<1x1024xbf16, #tpu.memory_space<vmem>>, vector<1x256xbf16>
    tpu.vector_store %arg29[%c0_513, %c256], %397 {strides = array<i32>} : memref<1x1024xbf16, #tpu.memory_space<vmem>>, vector<1x256xbf16>,
    %399 = vector.extract_strided_slice %390 {offsets = [0, 2, 0], sizes = [1, 1, 256], strides = [1, 1, 1]} : vector<1x4x256xf32> to vector<1x1x256xf32>
    %400 = vector.shape_cast %399 : vector<1x1x256xf32> to vector<1x256xf32>
    %401 = arith.truncf %400 : vector<1x256xf32> to vector<1x256xbf16>
    %c0_514 = arith.constant 0 : index
    %c512 = arith.constant 512 : index
    %402 = vector.load %arg29[%c0_514, %c512] : memref<1x1024xbf16, #tpu.memory_space<vmem>>, vector<1x256xbf16>
    tpu.vector_store %arg29[%c0_514, %c512], %401 {strides = array<i32>} : memref<1x1024xbf16, #tpu.memory_space<vmem>>, vector<1x256xbf16>,
    %403 = vector.extract_strided_slice %390 {offsets = [0, 3, 0], sizes = [1, 1, 256], strides = [1, 1, 1]} : vector<1x4x256xf32> to vector<1x1x256xf32>
    %404 = vector.shape_cast %403 : vector<1x1x256xf32> to vector<1x256xf32>
    %405 = arith.truncf %404 : vector<1x256xf32> to vector<1x256xbf16>
    %c0_515 = arith.constant 0 : index
    %c768 = arith.constant 768 : index
    %406 = vector.load %arg29[%c0_515, %c768] : memref<1x1024xbf16, #tpu.memory_space<vmem>>, vector<1x256xbf16>
    tpu.vector_store %arg29[%c0_515, %c768], %405 {strides = array<i32>} : memref<1x1024xbf16, #tpu.memory_space<vmem>>, vector<1x256xbf16>,
    %c0_516 = arith.constant 0 : index
    %c0_517 = arith.constant 0 : index
    %407 = vector.load %arg29[%c0_516, %c0_517] : memref<1x1024xbf16, #tpu.memory_space<vmem>>, vector<1x1024xbf16>
    %c0_518 = arith.constant 0 : index
    %c0_519 = arith.constant 0 : index
    %408 = vector.load %arg20[%c0_518, %c0_519] : memref<1024x128xbf16, #tpu.memory_space<vmem>>, vector<1024x128xbf16>
    %cst_520 = arith.constant dense<0.000000e+00> : vector<1x128xf32>
    %409 = tpu.matmul %407, %408, %cst_520 {dimension_numbers = #tpu.dot_dimension_numbers<[1], [0], [0], [1], [0, 0, 1, 1], [], []>} : vector<1x1024xbf16>, vector<1024x128xbf16>, vector<1x128xf32> -> vector<1x128xf32>
    %c0_521 = arith.constant 0 : index
    %c0_522 = arith.constant 0 : index
    %410 = vector.load %arg21[%c0_521, %c0_522] : memref<1x128xf32, #tpu.memory_space<vmem>>, vector<1x128xf32>
    %411 = arith.addf %409, %410 : vector<1x128xf32>
    %cst_523 = arith.constant 0.000000e+00 : f32
    %412 = vector.broadcast %cst_523 : f32 to vector<1x128xf32>
    %413 = arith.maximumf %411, %412 : vector<1x128xf32>
    %414 = vector.shape_cast %413 : vector<1x128xf32> to vector<1x1x128xf32>
    %c0_524 = arith.constant 0 : index
    %c0_525 = arith.constant 0 : index
    %c0_526 = arith.constant 0 : index
    %415 = vector.load %arg23[%c0_524, %c0_525, %c0_526] : memref<1x1x128xf32, #tpu.memory_space<vmem>>, vector<1x1x128xf32>
    tpu.vector_store %arg23[%c0_524, %c0_525, %c0_526], %414 {strides = array<i32>} : memref<1x1x128xf32, #tpu.memory_space<vmem>>, vector<1x1x128xf32>,
    return
  }
  func.func @transform_0(%arg0: i32) -> (i32, i32, i32) {
    %c0_i32 = arith.constant 0 : i32
    %c0_i32_0 = arith.constant 0 : i32
    %c0_i32_1 = arith.constant 0 : i32
    return %arg0, %c0_i32, %c0_i32_0 : i32, i32, i32
  }
  func.func @transform_1(%arg0: i32) -> (i32, i32) {
    %c0_i32 = arith.constant 0 : i32
    %c0_i32_0 = arith.constant 0 : i32
    %c0_i32_1 = arith.constant 0 : i32
    return %c0_i32, %c0_i32_0 : i32, i32
  }
  func.func @transform_2(%arg0: i32) -> (i32, i32) {
    %c0_i32 = arith.constant 0 : i32
    %c0_i32_0 = arith.constant 0 : i32
    %c0_i32_1 = arith.constant 0 : i32
    return %c0_i32, %c0_i32_0 : i32, i32
  }
  func.func @transform_3(%arg0: i32) -> (i32, i32) {
    %c0_i32 = arith.constant 0 : i32
    %c0_i32_0 = arith.constant 0 : i32
    %c0_i32_1 = arith.constant 0 : i32
    return %c0_i32, %c0_i32_0 : i32, i32
  }
  func.func @transform_4(%arg0: i32) -> (i32, i32, i32) {
    %c0_i32 = arith.constant 0 : i32
    %c0_i32_0 = arith.constant 0 : i32
    %c0_i32_1 = arith.constant 0 : i32
    %c0_i32_2 = arith.constant 0 : i32
    return %c0_i32, %c0_i32_0, %c0_i32_1 : i32, i32, i32
  }
  func.func @transform_5(%arg0: i32) -> (i32, i32) {
    %c0_i32 = arith.constant 0 : i32
    %c0_i32_0 = arith.constant 0 : i32
    %c0_i32_1 = arith.constant 0 : i32
    return %c0_i32, %c0_i32_0 : i32, i32
  }
  func.func @transform_6(%arg0: i32) -> (i32, i32) {
    %c0_i32 = arith.constant 0 : i32
    %c0_i32_0 = arith.constant 0 : i32
    %c0_i32_1 = arith.constant 0 : i32
    return %c0_i32, %c0_i32_0 : i32, i32
  }
  func.func @transform_7(%arg0: i32) -> (i32, i32, i32) {
    %c0_i32 = arith.constant 0 : i32
    %c0_i32_0 = arith.constant 0 : i32
    %c0_i32_1 = arith.constant 0 : i32
    %c0_i32_2 = arith.constant 0 : i32
    return %c0_i32, %c0_i32_0, %c0_i32_1 : i32, i32, i32
  }
  func.func @transform_8(%arg0: i32) -> (i32, i32) {
    %c0_i32 = arith.constant 0 : i32
    %c0_i32_0 = arith.constant 0 : i32
    %c0_i32_1 = arith.constant 0 : i32
    return %c0_i32, %c0_i32_0 : i32, i32
  }
  func.func @transform_9(%arg0: i32) -> (i32, i32) {
    %c0_i32 = arith.constant 0 : i32
    %c0_i32_0 = arith.constant 0 : i32
    %c0_i32_1 = arith.constant 0 : i32
    return %c0_i32, %c0_i32_0 : i32, i32
  }
  func.func @transform_10(%arg0: i32) -> (i32, i32, i32) {
    %c0_i32 = arith.constant 0 : i32
    %c0_i32_0 = arith.constant 0 : i32
    %c0_i32_1 = arith.constant 0 : i32
    %c0_i32_2 = arith.constant 0 : i32
    return %c0_i32, %c0_i32_0, %c0_i32_1 : i32, i32, i32
  }
  func.func @transform_11(%arg0: i32) -> (i32, i32) {
    %c0_i32 = arith.constant 0 : i32
    %c0_i32_0 = arith.constant 0 : i32
    %c0_i32_1 = arith.constant 0 : i32
    return %c0_i32, %c0_i32_0 : i32, i32
  }
  func.func @transform_12(%arg0: i32) -> (i32, i32) {
    %c0_i32 = arith.constant 0 : i32
    %c0_i32_0 = arith.constant 0 : i32
    %c0_i32_1 = arith.constant 0 : i32
    return %c0_i32, %c0_i32_0 : i32, i32
  }
  func.func @transform_13(%arg0: i32) -> (i32, i32, i32) {
    %c0_i32 = arith.constant 0 : i32
    %c0_i32_0 = arith.constant 0 : i32
    %c0_i32_1 = arith.constant 0 : i32
    %c0_i32_2 = arith.constant 0 : i32
    return %c0_i32, %c0_i32_0, %c0_i32_1 : i32, i32, i32
  }
  func.func @transform_14(%arg0: i32) -> (i32, i32) {
    %c0_i32 = arith.constant 0 : i32
    %c0_i32_0 = arith.constant 0 : i32
    %c0_i32_1 = arith.constant 0 : i32
    return %c0_i32, %c0_i32_0 : i32, i32
  }
  func.func @transform_15(%arg0: i32) -> (i32, i32) {
    %c0_i32 = arith.constant 0 : i32
    %c0_i32_0 = arith.constant 0 : i32
    %c0_i32_1 = arith.constant 0 : i32
    return %c0_i32, %c0_i32_0 : i32, i32
  }
  func.func @transform_16(%arg0: i32) -> (i32, i32, i32) {
    %c0_i32 = arith.constant 0 : i32
    %c0_i32_0 = arith.constant 0 : i32
    %c0_i32_1 = arith.constant 0 : i32
    %c0_i32_2 = arith.constant 0 : i32
    return %c0_i32, %c0_i32_0, %c0_i32_1 : i32, i32, i32
  }
  func.func @transform_17(%arg0: i32) -> (i32, i32) {
    %c0_i32 = arith.constant 0 : i32
    %c0_i32_0 = arith.constant 0 : i32
    %c0_i32_1 = arith.constant 0 : i32
    return %c0_i32, %c0_i32_0 : i32, i32
  }
  func.func @transform_18(%arg0: i32) -> (i32, i32) {
    %c0_i32 = arith.constant 0 : i32
    %c0_i32_0 = arith.constant 0 : i32
    %c0_i32_1 = arith.constant 0 : i32
    return %c0_i32, %c0_i32_0 : i32, i32
  }
  func.func @transform_19(%arg0: i32) -> (i32, i32) {
    %c0_i32 = arith.constant 0 : i32
    %c0_i32_0 = arith.constant 0 : i32
    %c0_i32_1 = arith.constant 0 : i32
    return %c0_i32, %c0_i32_0 : i32, i32
  }
  func.func @transform_20(%arg0: i32) -> (i32, i32) {
    %c0_i32 = arith.constant 0 : i32
    %c0_i32_0 = arith.constant 0 : i32
    %c0_i32_1 = arith.constant 0 : i32
    return %c0_i32, %c0_i32_0 : i32, i32
  }
  func.func @transform_21(%arg0: i32) -> (i32, i32, i32) {
    %c0_i32 = arith.constant 0 : i32
    %c0_i32_0 = arith.constant 0 : i32
    %c0_i32_1 = arith.constant 0 : i32
    return %arg0, %c0_i32, %c0_i32_0 : i32, i32, i32
  }
  func.func @transform_22(%arg0: i32) -> (i32, i32, i32) {
    %c0_i32 = arith.constant 0 : i32
    %c0_i32_0 = arith.constant 0 : i32
    %c0_i32_1 = arith.constant 0 : i32
    return %arg0, %c0_i32, %c0_i32_0 : i32, i32, i32
  }
}

</mosaic_0001>

<bundles_post_ra>
// kernel: forward_pallas.1
= control target key start
LH: loop header
LB: loop body
LE: loop exit
PB: predicated region body
PF: predicated region fallthrough
CT: control target
= control target key end

     0   :  { %s20646_s0 = inlined_call_operand.vmem [shape: bf16[2,256,9], index: 0, kind: input, shape index: {}]   ;;  %s20647_s1 = inlined_call_operand.hbm [shape: bf16[9,128], index: 1, kind: input, shape index: {}]   ;;  %s20648_s2 = inlined_call_operand.hbm [shape: f32[1,128], index: 2, kind: input, shape index: {}]   ;;  %s20649_s3 = inlined_call_operand.hbm [shape: f32[1,128], index: 3, kind: input, shape index: {}]   ;;  %s20650_s4 = inlined_call_operand.hbm [shape: bf16[9,128,128], index: 4, kind: input, shape index: {}]   ;;  %s20651_s5 = inlined_call_operand.hbm [shape: f32[1,128], index: 5, kind: input, shape index: {}]   ;;  %s20652_s6 = inlined_call_operand.hbm [shape: f32[1,128], index: 6, kind: input, shape index: {}]   ;;  %s20653_s7 = inlined_call_operand.hbm [shape: bf16[9,128,128], index: 7, kind: input, shape index: {}]   ;;  %s20654_s8 = inlined_call_operand.hbm [shape: f32[1,128], index: 8, kind: input, shape index: {}]   ;;  %s20655_s9 = inlined_call_operand.hbm [shape: f32[1,128], index: 9, kind: input, shape index: {}]   ;;  %s20656_s10 = inlined_call_operand.hbm [shape: bf16[9,128,128], index: 10, kind: input, shape index: {}]   ;;  %s20657_s11 = inlined_call_operand.hbm [shape: f32[1,128], index: 11, kind: input, shape index: {}]   ;;  %s20658_s12 = inlined_call_operand.hbm [shape: f32[1,128], index: 12, kind: input, shape index: {}]   ;;  %s20659_s13 = inlined_call_operand.hbm [shape: bf16[9,128,256], index: 13, kind: input, shape index: {}]   ;;  %s20660_s14 = inlined_call_operand.hbm [shape: f32[1,256], index: 14, kind: input, shape index: {}]   ;;  %s20661_s15 = inlined_call_operand.hbm [shape: f32[1,256], index: 15, kind: input, shape index: {}]   ;;  %s20662_s16 = inlined_call_operand.hbm [shape: bf16[9,256,256], index: 16, kind: input, shape index: {}]   ;;  %s20663_s17 = inlined_call_operand.hbm [shape: f32[1,256], index: 17, kind: input, shape index: {}]   ;;  %s20664_s18 = inlined_call_operand.hbm [shape: f32[1,256], index: 18, kind: input, shape index: {}]   ;;  %s20665_s19 = inlined_call_operand.hbm [shape: bf16[1024,128], index: 19, kind: input, shape index: {}]   ;;  %s20666_s20 = inlined_call_operand.hbm [shape: f32[1,128], index: 20, kind: input, shape index: {}]   ;;  %s20667_s21 = inlined_call_operand.vmem [shape: f32[2,4,1], index: 21, kind: output, shape index: {0}]   ;;  %s20668_s22 = inlined_call_operand.hbm [shape: f32[2,1,128], index: 22, kind: output, shape index: {1}]  }
   0x1   :  { %20702 = sst [smem:[#allocation63_spill]] %s20646_s0 }
   0x2   :  { %20703 = sst [smem:[#allocation64_spill]] %s20647_s1 }
   0x3   :  { %20704 = sst [smem:[#allocation65_spill]] %s20648_s2 }
   0x4   :  { %20705 = sst [smem:[#allocation66_spill]] %s20649_s3 }
   0x5   :  { %20706 = sst [smem:[#allocation67_spill]] %s20650_s4 }
   0x6   :  { %20707 = sst [smem:[#allocation68_spill]] %s20651_s5 }
   0x7   :  { %20708 = sst [smem:[#allocation69_spill]] %s20652_s6 }
   0x8   :  { %20709 = sst [smem:[#allocation70_spill]] %s20654_s8 }
   0x9   :  { %20710 = sst [smem:[#allocation71_spill]] %s20656_s10 }
   0xa   :  { %20711 = sst [smem:[#allocation72_spill]] %s20658_s12 }
   0xb   :  { %20712 = sst [smem:[#allocation73_spill]] %s20660_s14 }
   0xc   :  { %20713 = sst [smem:[#allocation74_spill]] %s20667_s21 }
   0xd   :  { %20714 = sst [smem:[#allocation75_spill]] %s20668_s22 }
   0xe   :  { %28 = vsyncpa [#allocation9], 0 }
   0xf   :  { %29 = vsyncpa [#allocation12], 0 }
  0x10   :  { %30 = vsyncpa [#allocation15], 0 }
  0x11   :  { %31 = vsyncpa [#allocation18], 0 }
  0x12   :  { %32 = vsyncpa [#allocation21], 0 }
  0x13   :  { %33 = vsyncpa [#allocation24], 0 }
  0x14   :  { %34 = vsyncpa [#allocation27], 0 }
  0x15   :  { %35 = vsyncpa [#allocation30], 0 }
  0x16   :  { %36 = vsyncpa [#allocation33], 0 }
  0x17   :  { %37 = vsyncpa [#allocation36], 0 }
  0x18   :  { %38 = vsyncpa [#allocation39], 0 }
  0x19   :  { %39 = vsyncpa [#allocation10], 0 }
  0x1a   :  { %41 = vsyncpa [#allocation10 + $0x1], 0  ;;  %s18525_s3 = smov 0   ;;  %s18527_s28 = smov 0  }
  0x1b   :  { %s18529_s29 = smov 0   ;;  %s18531_s30 = smov 0  }
  0x1c LB: > { %20715 = sst [smem:[#allocation53_spill]] %s18365_s3  ;;  %s18546_s4 = sadd.s32 4294967295, %s18377_s30   ;;  %s18377_s30 = sphi %s18531_s30, %s20822_s30   ;;  %s18373_s29 = sphi %s18529_s29, %s20825_s29   ;;  %s18369_s28 = sphi %s18527_s28, %s20824_s28   ;;  %s18365_s3 = sphi %s18525_s3, %s20823_s3  }
  0x1d   : > { %20716 = sst [smem:[#allocation54_spill]] %s18369_s28  ;;  %s14126_s0 = sadd.s32 4294967294, %s18377_s30  }
  0x1e   : > { %20717 = sst [smem:[#allocation55_spill]] %s18373_s29  ;;  %s18550_s23 = sadd.s32 1, %s18377_s30  }
  0x1f   : > { %20718 = sst [smem:[#allocation56_spill]] %s18377_s30  ;;  %s526_s1 = sadd.s32 1, %s18373_s29 }
  0x20   : > { %20719 = sst [smem:[#allocation57_spill]] %s18546_s4  ;;  %s523_s5 = ssub.s32 %s18377_s30, %s18550_s23 }
  0x21   : > { %20720 = sst [smem:[#allocation58_spill]] %s18550_s23  ;;  %p536_p0 = scmp.ne.s32.totalorder %s18373_s29, %s18369_s28 }
  0x22   : > { %p524_p1 = scmp.eq.s32.totalorder %s523_s5, 0  ;;  %p537_p2 = scmp.eq.s32.totalorder %s18546_s4, 1 }
  0x23   : > { %p542_p3 = scmp.ne.s32.totalorder %s18369_s28, %s18365_s3  ;;  %p543_p4 = scmp.eq.s32.totalorder %s14126_s0, 1 }
  0x24   : > { %s18561_s24 = scalar_select %p524_p1, %s18373_s29, %s526_s1  }
  0x25   : > { %p18563_p5 = por %p537_p2, %p536_p0  ;;  %p18567_p6 = por %p543_p4, %p542_p3 }
  0x26   : > { %20721 = sst [smem:[#allocation59_spill]] %s18561_s24  ;;  %p14127_p7 = scmp.ge.s32.totalorder %s18377_s30, 1 }
  0x27   : > { %s20722_s6 = scalar_select %p18563_p5, 1, 0 }
  0x28   : > { %s20724_s25 = scalar_select %p18567_p6, 1, 0 }
  0x29   : > { %20723 = sst [smem:[#allocation60_spill]] %s20722_s6  ;;  %p550_p8 = scmp.lt.s32.totalorder %s18377_s30, 3 }
  0x2a   : > { %20725 = sst [smem:[#allocation61_spill]] %s20724_s25  ;;  %p20685_p9 = scmp.eq.s32.totalorder %s18546_s4, 0 }
  0x2b   : > { %p18574_p10 = pnand %p14127_p7, %p550_p8  ;;  %s18379_s2 = smov [#allocation11]  }
  0x2c   : > { %s576_s27 = sshll.u32 %s18379_s2, 4  ;;  %s18380_s1 = smov [#allocation14]   ;;  %s577_s27 = int_to_ptr.vmem [resolvable:$true] %s576_s27 }
  0x2d   : > { %s20726_s26 = scalar_select %p18574_p10, 1, 0 }
  0x2e   : > { %p16556_p11 = pneg %p18574_p10  ;;  %s597_s5 = sshll.u32 %s18380_s1, 4  ;;  %s18586_s5 = int_to_ptr.vmem [resolvable:$true] %s597_s5 }
  0x2f   : > { %20727 = sst [smem:[#allocation62_spill]] %s20726_s26  ;;  %s18381_s24 = smov [#allocation17]  }
  0x30   : > { %p18582_p12 = pnand %p20685_p9, %p16556_p11  ;;  %s18588_s29 = sshll.u32 %s18381_s24, 4  ;;  %s623_s29 = int_to_ptr.vmem [resolvable:$true] %s18588_s29 }
  0x31   : > { %s20729_s3 = sld [smem:[#allocation65_spill]] }
  0x32   : > { %p18598_p0 = pneg %p18582_p12 }
  0x37   : > { %s20730_s22 = smov %s20729_s3  ;;  %s17711_s2 = scalar_lea.hbm %s20729_s3, 16 }
  0x38   : > { %p17712_p13 = scmp.ne.s32.totalorder %s20730_s22, %s17711_s2  ;;  %p17718_p3 = scmp.lt.u32.totalorder %s17711_s2, %s20730_s22 }
  0x3a   : > { %p17714_p1 = pnand %p18598_p0, %p17712_p13 }
  0x3c   : > { %p17715_p2 = pneg %p17714_p1 }
  0x3e   : > { %p17720_p4 = pnand %p17718_p3, %p17715_p2 }
  0x40   : > { %17723 = shalt.err (!%p17720_p4)
}
  0x41   : > { %s17724_s3 = scalar_lea.vmem %s577_s27, 16  ;;  %s17731_s30 = scalar_lea.vmem %s577_s27, 32 }
  0x42   : > { %p17725_p7 = scmp.ne.s32.totalorder %s577_s27, %s17724_s3  ;;  %p17732_p9 = scmp.lt.s32.totalorder %s577_s27, %s577_s27 }
  0x43   : > { %p17733_p6 = scmp.lt.s32.totalorder %s17731_s30, %s17724_s3 }
  0x44   : > { %p17727_p8 = pnand %p17725_p7, %p18598_p0 }
  0x45   : > { %p17734_p5 = por %p17733_p6, %p17732_p9 }
  0x46   : > { %p17728_p11 = pneg %p17727_p8 }
  0x48   : > { %p17735_p10 = pnand %p17734_p5, %p17728_p11 }
  0x4a   : > { %17738 = shalt.err (!%p17735_p10)
}
  0x4b   : > { %16562 = dma.hbm_to_vmem [thread:$0]  (!%p18582_p12), %s20730_s22, 16, %s577_s27, [#allocation12]  }
  0x4c   : > { %s20732_s1 = sld [smem:[#allocation67_spill]] }
  0x52   : > { %s17739_s24 = scalar_lea.hbm %s20732_s1, 9216 }
  0x53   : > { %p17740_p13 = scmp.ne.s32.totalorder %s20732_s1, %s17739_s24  ;;  %p17746_p5 = scmp.lt.u32.totalorder %s17739_s24, %s20732_s1 }
  0x55   : > { %p17742_p1 = pnand %p17740_p13, %p18598_p0 }
  0x57   : > { %p17743_p6 = pneg %p17742_p1 }
  0x59   : > { %p17748_p9 = pnand %p17746_p5, %p17743_p6 }
  0x5b   : > { %17751 = shalt.err (!%p17748_p9)
}
  0x5c   : > { %s17752_s27 = scalar_lea.vmem %s18586_s5, 9216  ;;  %p17760_p4 = scmp.lt.s32.totalorder %s18586_s5, %s18586_s5 }
  0x5d   : > { %p17753_p10 = scmp.ne.s32.totalorder %s18586_s5, %s17752_s27  ;;  %p17761_p7 = scmp.lt.s32.totalorder %s17752_s27, %s17752_s27 }
  0x5f   : > { %p17755_p2 = pnand %p17753_p10, %p18598_p0  ;;  %p17762_p8 = por %p17761_p7, %p17760_p4 }
  0x61   : > { %p17756_p3 = pneg %p17755_p2 }
  0x63   : > { %p17763_p11 = pnand %p17762_p8, %p17756_p3 }
  0x65   : > { %17766 = shalt.err (!%p17763_p11)
}
  0x66   : > { %s20692_s21 = smov 64   ;;  %s20694_s4 = smov 4  }
  0x67   : > { %16568 = dma.hbm_to_vmem [thread:$0]  (!%p18582_p12), %s20732_s1, 9216, %s18586_s5, [#allocation15], %s20692_s21, %s20692_s21, %s20694_s4  }
  0x68   : > { %s20733_s24 = sld [smem:[#allocation69_spill]] }
  0x6e   : > { %s17767_s3 = scalar_lea.hbm %s20733_s24, 16 }
  0x6f   : > { %p17768_p13 = scmp.ne.s32.totalorder %s20733_s24, %s17767_s3  ;;  %p17774_p5 = scmp.lt.u32.totalorder %s17767_s3, %s20733_s24 }
  0x71   : > { %p17770_p1 = pnand %p17768_p13, %p18598_p0 }
  0x73   : > { %p17771_p6 = pneg %p17770_p1 }
  0x75   : > { %p17776_p9 = pnand %p17774_p5, %p17771_p6 }
  0x77   : > { %17779 = shalt.err (!%p17776_p9)
}
  0x78   : > { %s17780_s23 = scalar_lea.vmem %s623_s29, 16  ;;  %s17787_s5 = scalar_lea.vmem %s623_s29, 32 }
  0x79   : > { %p17781_p10 = scmp.ne.s32.totalorder %s623_s29, %s17780_s23  ;;  %p17788_p4 = scmp.lt.s32.totalorder %s623_s29, %s623_s29 }
  0x7a   : > { %p17789_p7 = scmp.lt.s32.totalorder %s17787_s5, %s17780_s23 }
  0x7b   : > { %p17783_p2 = pnand %p17781_p10, %p18598_p0 }
  0x7c   : > { %p17790_p8 = por %p17789_p7, %p17788_p4 }
  0x7d   : > { %p17784_p3 = pneg %p17783_p2 }
  0x7f   : > { %p17791_p11 = pnand %p17790_p8, %p17784_p3 }
  0x81   : > { %17794 = shalt.err (!%p17791_p11)
}
  0x82   : > { %16574 = dma.hbm_to_vmem [thread:$0]  (!%p18582_p12), %s20733_s24, 16, %s623_s29, [#allocation18]  }
  0x83   : > { %s18384_s22 = smov [#allocation20]   ;;  %s18385_s2 = smov [#allocation23]  }
  0x84   : > { %s646_s26 = sshll.u32 %s18384_s22, 4  ;;  %s667_s3 = sshll.u32 %s18385_s2, 4  ;;  %s647_s26 = int_to_ptr.vmem [resolvable:$true] %s646_s26  ;;  %s668_s3 = int_to_ptr.vmem [resolvable:$true] %s667_s3 }
  0x85   : > { %s20734_s8 = sld [smem:[#allocation70_spill]] }
  0x8b   : > { %s17795_s21 = scalar_lea.hbm %s20734_s8, 16 }
  0x8c   : > { %p17796_p13 = scmp.ne.s32.totalorder %s20734_s8, %s17795_s21  ;;  %p17802_p5 = scmp.lt.u32.totalorder %s17795_s21, %s20734_s8 }
  0x8e   : > { %p17798_p1 = pnand %p17796_p13, %p18598_p0 }
  0x90   : > { %p17799_p6 = pneg %p17798_p1 }
  0x92   : > { %p17804_p9 = pnand %p17802_p5, %p17799_p6 }
  0x94   : > { %17807 = shalt.err (!%p17804_p9)
}
  0x95   : > { %s17808_s29 = scalar_lea.vmem %s647_s26, 16  ;;  %s17815_s25 = scalar_lea.vmem %s647_s26, 32 }
  0x96   : > { %p17809_p10 = scmp.ne.s32.totalorder %s647_s26, %s17808_s29  ;;  %p17816_p4 = scmp.lt.s32.totalorder %s647_s26, %s647_s26 }
  0x97   : > { %p17817_p7 = scmp.lt.s32.totalorder %s17815_s25, %s17808_s29 }
  0x98   : > { %p17811_p2 = pnand %p17809_p10, %p18598_p0 }
  0x99   : > { %p17818_p8 = por %p17817_p7, %p17816_p4 }
  0x9a   : > { %p17812_p3 = pneg %p17811_p2 }
  0x9c   : > { %p17819_p11 = pnand %p17818_p8, %p17812_p3 }
  0x9e   : > { %17822 = shalt.err (!%p17819_p11)
}
  0x9f   : > { %16580 = dma.hbm_to_vmem [thread:$0]  (!%p18582_p12), %s20734_s8, 16, %s647_s26, [#allocation21]  }
  0xa0   : > { %s20735_s10 = sld [smem:[#allocation71_spill]] }
  0xa6   : > { %s17823_s30 = scalar_lea.hbm %s20735_s10, 9216 }
  0xa7   : > { %p17824_p13 = scmp.ne.s32.totalorder %s20735_s10, %s17823_s30  ;;  %p17830_p5 = scmp.lt.u32.totalorder %s17823_s30, %s20735_s10 }
  0xa9   : > { %p17826_p1 = pnand %p17824_p13, %p18598_p0 }
  0xab   : > { %p17827_p6 = pneg %p17826_p1 }
  0xad   : > { %p17832_p9 = pnand %p17830_p5, %p17827_p6 }
  0xaf   : > { %17835 = shalt.err (!%p17832_p9)
}
  0xb0   : > { %s17836_s29 = scalar_lea.vmem %s668_s3, 9216  ;;  %p17844_p4 = scmp.lt.s32.totalorder %s668_s3, %s668_s3 }
  0xb1   : > { %p17837_p10 = scmp.ne.s32.totalorder %s668_s3, %s17836_s29  ;;  %p17845_p7 = scmp.lt.s32.totalorder %s17836_s29, %s17836_s29 }
  0xb3   : > { %p17839_p2 = pnand %p17837_p10, %p18598_p0  ;;  %p17846_p8 = por %p17845_p7, %p17844_p4 }
  0xb5   : > { %p17840_p3 = pneg %p17839_p2 }
  0xb7   : > { %p17847_p11 = pnand %p17846_p8, %p17840_p3 }
  0xb9   : > { %17850 = shalt.err (!%p17847_p11)
}
  0xba   : > { %s20736_s26 = smov 4   ;;  %s20737_s25 = smov 64  }
  0xbb   : > { %16586 = dma.hbm_to_vmem [thread:$0]  (!%p18582_p12), %s20735_s10, 9216, %s668_s3, [#allocation24], %s20737_s25, %s20737_s25, %s20736_s26  }
  0xbc   : > { %s18386_s21 = smov [#allocation26]   ;;  %s18387_s30 = smov [#allocation29]  }
  0xbd   : > { %s692_s4 = sshll.u32 %s18386_s21, 4  ;;  %s716_s27 = sshll.u32 %s18387_s30, 4  ;;  %s693_s4 = int_to_ptr.vmem [resolvable:$true] %s692_s4  ;;  %s717_s27 = int_to_ptr.vmem [resolvable:$true] %s716_s27 }
  0xbe   : > { %s20738_s12 = sld [smem:[#allocation72_spill]] }
  0xc4   : > { %s17851_s6 = scalar_lea.hbm %s20738_s12, 16 }
  0xc5   : > { %p17852_p13 = scmp.ne.s32.totalorder %s20738_s12, %s17851_s6  ;;  %p17858_p5 = scmp.lt.u32.totalorder %s17851_s6, %s20738_s12 }
  0xc7   : > { %p17854_p1 = pnand %p17852_p13, %p18598_p0 }
  0xc9   : > { %p17855_p6 = pneg %p17854_p1 }
  0xcb   : > { %p17860_p9 = pnand %p17858_p5, %p17855_p6 }
  0xcd   : > { %17863 = shalt.err (!%p17860_p9)
}
  0xce   : > { %s17864_s3 = scalar_lea.vmem %s693_s4, 16  ;;  %s17871_s2 = scalar_lea.vmem %s693_s4, 32 }
  0xcf   : > { %p17865_p10 = scmp.ne.s32.totalorder %s693_s4, %s17864_s3  ;;  %p17872_p4 = scmp.lt.s32.totalorder %s693_s4, %s693_s4 }
  0xd0   : > { %p17873_p7 = scmp.lt.s32.totalorder %s17871_s2, %s17864_s3 }
  0xd1   : > { %p17867_p2 = pnand %p17865_p10, %p18598_p0 }
  0xd2   : > { %p17874_p8 = por %p17873_p7, %p17872_p4 }
  0xd3   : > { %p17868_p3 = pneg %p17867_p2 }
  0xd5   : > { %p17875_p11 = pnand %p17874_p8, %p17868_p3 }
  0xd7   : > { %17878 = shalt.err (!%p17875_p11)
}
  0xd8   : > { %16592 = dma.hbm_to_vmem [thread:$0]  (!%p18582_p12), %s20738_s12, 16, %s693_s4, [#allocation27]  }
  0xd9   : > { %s20739_s14 = sld [smem:[#allocation73_spill]] }
  0xdf   : > { %s17879_s23 = scalar_lea.hbm %s20739_s14, 32 }
  0xe0   : > { %p17880_p13 = scmp.ne.s32.totalorder %s20739_s14, %s17879_s23  ;;  %p17886_p5 = scmp.lt.u32.totalorder %s17879_s23, %s20739_s14 }
  0xe2   : > { %p17882_p1 = pnand %p17880_p13, %p18598_p0 }
  0xe4   : > { %p17883_p6 = pneg %p17882_p1 }
  0xe6   : > { %p17888_p9 = pnand %p17886_p5, %p17883_p6 }
  0xe8   : > { %17891 = shalt.err (!%p17888_p9)
}
  0xe9   : > { %s17892_s3 = scalar_lea.vmem %s717_s27, 32  ;;  %p17900_p4 = scmp.lt.s32.totalorder %s717_s27, %s717_s27 }
  0xea   : > { %p17893_p10 = scmp.ne.s32.totalorder %s717_s27, %s17892_s3  ;;  %p17901_p7 = scmp.lt.s32.totalorder %s17892_s3, %s17892_s3 }
  0xec   : > { %p17895_p2 = pnand %p17893_p10, %p18598_p0  ;;  %p17902_p8 = por %p17901_p7, %p17900_p4 }
  0xee   : > { %p17896_p3 = pneg %p17895_p2 }
  0xf0   : > { %p17903_p11 = pnand %p17902_p8, %p17896_p3 }
  0xf2   : > { %17906 = shalt.err (!%p17903_p11)
}
  0xf3   : > { %16598 = dma.hbm_to_vmem [thread:$0]  (!%p18582_p12), %s20739_s14, 32, %s717_s27, [#allocation30]  }
  0xf4   : > { %s18388_s1 = smov [#allocation32]   ;;  %s18389_s8 = smov [#allocation35]  }
  0xf5   : > { %s737_s21 = sshll.u32 %s18388_s1, 4  ;;  %s762_s30 = sshll.u32 %s18389_s8, 4  ;;  %s738_s21 = int_to_ptr.vmem [resolvable:$true] %s737_s21  ;;  %s763_s30 = int_to_ptr.vmem [resolvable:$true] %s762_s30 }
  0xf6   : > { %s17907_s6 = scalar_lea.hbm %s20662_s16, 36864 }
  0xf7   : > { %p17908_p13 = scmp.ne.s32.totalorder %s20662_s16, %s17907_s6  ;;  %p17914_p5 = scmp.lt.u32.totalorder %s17907_s6, %s20662_s16 }
  0xf9   : > { %p17910_p1 = pnand %p17908_p13, %p18598_p0 }
  0xfb   : > { %p17911_p6 = pneg %p17910_p1 }
  0xfd   : > { %p17916_p9 = pnand %p17914_p5, %p17911_p6 }
  0xff   : > { %17919 = shalt.err (!%p17916_p9)
}
 0x100   : > { %s17920_s27 = scalar_lea.vmem %s738_s21, 36864  ;;  %p17928_p4 = scmp.lt.s32.totalorder %s738_s21, %s738_s21 }
 0x101   : > { %p17921_p10 = scmp.ne.s32.totalorder %s738_s21, %s17920_s27  ;;  %p17929_p7 = scmp.lt.s32.totalorder %s17920_s27, %s17920_s27 }
 0x103   : > { %p17923_p2 = pnand %p17921_p10, %p18598_p0  ;;  %p17930_p8 = por %p17929_p7, %p17928_p4 }
 0x105   : > { %p17924_p3 = pneg %p17923_p2 }
 0x107   : > { %p17931_p11 = pnand %p17930_p8, %p17924_p3 }
 0x109   : > { %17934 = shalt.err (!%p17931_p11)
}
 0x10a   : > { %s20697_s2 = smov 128   ;;  %s20698_s1 = smov 8  }
 0x10b   : > { %16604 = dma.hbm_to_vmem [thread:$0]  (!%p18582_p12), %s20662_s16, 36864, %s738_s21, [#allocation33], %s20697_s2, %s20697_s2, %s20698_s1  }
 0x10c   : > { %s17935_s29 = scalar_lea.hbm %s20664_s18, 32 }
 0x10d   : > { %p17936_p13 = scmp.ne.s32.totalorder %s20664_s18, %s17935_s29  ;;  %p17942_p5 = scmp.lt.u32.totalorder %s17935_s29, %s20664_s18 }
 0x10f   : > { %p17938_p1 = pnand %p17936_p13, %p18598_p0 }
 0x111   : > { %p17939_p6 = pneg %p17938_p1 }
 0x113   : > { %p17944_p9 = pnand %p17942_p5, %p17939_p6 }
 0x115   : > { %17947 = shalt.err (!%p17944_p9)
}
 0x116   : > { %s17948_s8 = scalar_lea.vmem %s763_s30, 32  ;;  %p17956_p4 = scmp.lt.s32.totalorder %s763_s30, %s763_s30 }
 0x117   : > { %p17949_p10 = scmp.ne.s32.totalorder %s763_s30, %s17948_s8  ;;  %p17957_p7 = scmp.lt.s32.totalorder %s17948_s8, %s17948_s8 }
 0x119   : > { %p17951_p2 = pnand %p17949_p10, %p18598_p0  ;;  %p17958_p8 = por %p17957_p7, %p17956_p4 }
 0x11b   : > { %p17952_p3 = pneg %p17951_p2 }
 0x11d   : > { %p17959_p11 = pnand %p17958_p8, %p17952_p3 }
 0x11f   : > { %17962 = shalt.err (!%p17959_p11)
}
 0x120   : > { %16610 = dma.hbm_to_vmem [thread:$0]  (!%p18582_p12), %s20664_s18, 32, %s763_s30, [#allocation36]  }
 0x121   : > { %s18392_s5 = smov [#allocation8]   ;;  %s18393_s29 = smov [#allocation13]  }
 0x122   : > { %s562_s6 = sshll.u32 %s18392_s5, 4  ;;  %s587_s22 = sshll.u32 %s18393_s29, 4  ;;  %s563_s6 = int_to_ptr.vmem [resolvable:$true] %s562_s6  ;;  %s588_s22 = int_to_ptr.vmem [resolvable:$true] %s587_s22 }
 0x123   : > { %s20740_s27 = sld [smem:[#allocation64_spill]] }
 0x129   : > { %s17963_s2 = scalar_lea.hbm %s20740_s27, 128 }
 0x12a   : > { %p17964_p13 = scmp.ne.s32.totalorder %s20740_s27, %s17963_s2  ;;  %p17970_p5 = scmp.lt.u32.totalorder %s17963_s2, %s20740_s27 }
 0x12c   : > { %p17966_p1 = pnand %p17964_p13, %p18598_p0 }
 0x12e   : > { %p17967_p6 = pneg %p17966_p1 }
 0x130   : > { %p17972_p9 = pnand %p17970_p5, %p17967_p6 }
 0x132   : > { %17975 = shalt.err (!%p17972_p9)
}
 0x133   : > { %s17976_s30 = scalar_lea.vmem %s563_s6, 128  ;;  %p17984_p4 = scmp.lt.s32.totalorder %s563_s6, %s563_s6 }
 0x134   : > { %p17977_p10 = scmp.ne.s32.totalorder %s563_s6, %s17976_s30  ;;  %p17985_p7 = scmp.lt.s32.totalorder %s17976_s30, %s17976_s30 }
 0x136   : > { %p17979_p2 = pnand %p17977_p10, %p18598_p0  ;;  %p17986_p8 = por %p17985_p7, %p17984_p4 }
 0x138   : > { %p17980_p3 = pneg %p17979_p2 }
 0x13a   : > { %p17987_p11 = pnand %p17986_p8, %p17980_p3 }
 0x13c   : > { %17990 = shalt.err (!%p17987_p11)
}
 0x13d   : > { %16559 = dma.hbm_to_vmem [thread:$0]  (!%p18582_p12), %s20740_s27, 128, %s563_s6, [#allocation9], %s20737_s25, %s20737_s25, %s20736_s26  }
 0x13e   : > { %s20741_s5 = sld [smem:[#allocation66_spill]] }
 0x144   : > { %s17991_s29 = scalar_lea.hbm %s20741_s5, 16 }
 0x145   : > { %p17992_p13 = scmp.ne.s32.totalorder %s20741_s5, %s17991_s29  ;;  %p17998_p5 = scmp.lt.u32.totalorder %s17991_s29, %s20741_s5 }
 0x147   : > { %p17994_p1 = pnand %p17992_p13, %p18598_p0 }
 0x149   : > { %p17995_p6 = pneg %p17994_p1 }
 0x14b   : > { %p18000_p9 = pnand %p17998_p5, %p17995_p6 }
 0x14d   : > { %18003 = shalt.err (!%p18000_p9)
}
 0x14e   : > { %s18004_s30 = scalar_lea.vmem %s588_s22, 16  ;;  %s18011_s6 = scalar_lea.vmem %s588_s22, 32 }
 0x14f   : > { %p18005_p10 = scmp.ne.s32.totalorder %s588_s22, %s18004_s30  ;;  %p18012_p4 = scmp.lt.s32.totalorder %s588_s22, %s588_s22 }
 0x150   : > { %p18013_p7 = scmp.lt.s32.totalorder %s18011_s6, %s18004_s30 }
 0x151   : > { %p18007_p2 = pnand %p18005_p10, %p18598_p0 }
 0x152   : > { %p18014_p8 = por %p18013_p7, %p18012_p4 }
 0x153   : > { %p18008_p3 = pneg %p18007_p2 }
 0x155   : > { %p18015_p11 = pnand %p18014_p8, %p18008_p3 }
 0x157   : > { %18018 = shalt.err (!%p18015_p11)
}
 0x158   : > { %16565 = dma.hbm_to_vmem [thread:$0]  (!%p18582_p12), %s20741_s5, 16, %s588_s22, [#allocation12]  }
 0x159   : > { %s18394_s1 = smov [#allocation16]   ;;  %s18395_s29 = smov [#allocation19]  }
 0x15a   : > { %s611_s23 = sshll.u32 %s18394_s1, 4  ;;  %s632_s3 = sshll.u32 %s18395_s29, 4  ;;  %s612_s23 = int_to_ptr.vmem [resolvable:$true] %s611_s23  ;;  %s633_s3 = int_to_ptr.vmem [resolvable:$true] %s632_s3 }
 0x15b   : > { %s20742_s21 = sld [smem:[#allocation68_spill]] }
 0x161   : > { %s18019_s12 = scalar_lea.hbm %s20742_s21, 16 }
 0x162   : > { %p18020_p13 = scmp.ne.s32.totalorder %s20742_s21, %s18019_s12  ;;  %p18026_p5 = scmp.lt.u32.totalorder %s18019_s12, %s20742_s21 }
 0x164   : > { %p18022_p1 = pnand %p18020_p13, %p18598_p0 }
 0x166   : > { %p18023_p6 = pneg %p18022_p1 }
 0x168   : > { %p18028_p9 = pnand %p18026_p5, %p18023_p6 }
 0x16a   : > { %18031 = shalt.err (!%p18028_p9)
}
 0x16b   : > { %s18032_s22 = scalar_lea.vmem %s612_s23, 16  ;;  %s18039_s2 = scalar_lea.vmem %s612_s23, 32 }
 0x16c   : > { %p18033_p10 = scmp.ne.s32.totalorder %s612_s23, %s18032_s22  ;;  %p18040_p4 = scmp.lt.s32.totalorder %s612_s23, %s612_s23 }
 0x16d   : > { %p18041_p7 = scmp.lt.s32.totalorder %s18039_s2, %s18032_s22 }
 0x16e   : > { %p18035_p2 = pnand %p18033_p10, %p18598_p0 }
 0x16f   : > { %p18042_p8 = por %p18041_p7, %p18040_p4 }
 0x170   : > { %p18036_p3 = pneg %p18035_p2 }
 0x172   : > { %p18043_p11 = pnand %p18042_p8, %p18036_p3 }
 0x174   : > { %18046 = shalt.err (!%p18043_p11)
}
 0x175   : > { %16571 = dma.hbm_to_vmem [thread:$0]  (!%p18582_p12), %s20742_s21, 16, %s612_s23, [#allocation15]  }
 0x176   : > { %s18047_s4 = scalar_lea.hbm %s20653_s7, 9216 }
 0x177   : > { %p18048_p13 = scmp.ne.s32.totalorder %s20653_s7, %s18047_s4  ;;  %p18054_p5 = scmp.lt.u32.totalorder %s18047_s4, %s20653_s7 }
 0x179   : > { %p18050_p1 = pnand %p18048_p13, %p18598_p0 }
 0x17b   : > { %p18051_p6 = pneg %p18050_p1 }
 0x17d   : > { %p18056_p9 = pnand %p18054_p5, %p18051_p6 }
 0x17f   : > { %18059 = shalt.err (!%p18056_p9)
}
 0x180   : > { %s18060_s22 = scalar_lea.vmem %s633_s3, 9216  ;;  %p18068_p4 = scmp.lt.s32.totalorder %s633_s3, %s633_s3 }
 0x181   : > { %p18061_p10 = scmp.ne.s32.totalorder %s633_s3, %s18060_s22  ;;  %p18069_p7 = scmp.lt.s32.totalorder %s18060_s22, %s18060_s22 }
 0x183   : > { %p18063_p2 = pnand %p18061_p10, %p18598_p0  ;;  %p18070_p8 = por %p18069_p7, %p18068_p4 }
 0x185   : > { %p18064_p3 = pneg %p18063_p2 }
 0x187   : > { %p18071_p11 = pnand %p18070_p8, %p18064_p3 }
 0x189   : > { %18074 = shalt.err (!%p18071_p11)
}
 0x18a   : > { %16577 = dma.hbm_to_vmem [thread:$0]  (!%p18582_p12), %s20653_s7, 9216, %s633_s3, [#allocation18], %s20737_s25, %s20737_s25, %s20736_s26  }
 0x18b   : > { %s18396_s1 = smov [#allocation22]   ;;  %s18397_s12 = smov [#allocation25]  }
 0x18c   : > { %s657_s29 = sshll.u32 %s18396_s1, 4  ;;  %s681_s14 = sshll.u32 %s18397_s12, 4  ;;  %s658_s29 = int_to_ptr.vmem [resolvable:$true] %s657_s29  ;;  %s682_s14 = int_to_ptr.vmem [resolvable:$true] %s681_s14 }
 0x18d   : > { %s18075_s30 = scalar_lea.hbm %s20655_s9, 16 }
 0x18e   : > { %p18076_p13 = scmp.ne.s32.totalorder %s20655_s9, %s18075_s30  ;;  %p18082_p5 = scmp.lt.u32.totalorder %s18075_s30, %s20655_s9 }
 0x190   : > { %p18078_p1 = pnand %p18076_p13, %p18598_p0 }
 0x192   : > { %p18079_p6 = pneg %p18078_p1 }
 0x194   : > { %p18084_p9 = pnand %p18082_p5, %p18079_p6 }
 0x196   : > { %18087 = shalt.err (!%p18084_p9)
}
 0x197   : > { %s18088_s3 = scalar_lea.vmem %s658_s29, 16  ;;  %s18095_s2 = scalar_lea.vmem %s658_s29, 32 }
 0x198   : > { %p18089_p10 = scmp.ne.s32.totalorder %s658_s29, %s18088_s3  ;;  %p18096_p4 = scmp.lt.s32.totalorder %s658_s29, %s658_s29 }
 0x199   : > { %p18097_p7 = scmp.lt.s32.totalorder %s18095_s2, %s18088_s3 }
 0x19a   : > { %p18091_p2 = pnand %p18089_p10, %p18598_p0 }
 0x19b   : > { %p18098_p8 = por %p18097_p7, %p18096_p4 }
 0x19c   : > { %p18092_p3 = pneg %p18091_p2 }
 0x19e   : > { %p18099_p11 = pnand %p18098_p8, %p18092_p3 }
 0x1a0   : > { %18102 = shalt.err (!%p18099_p11)
}
 0x1a1   : > { %16583 = dma.hbm_to_vmem [thread:$0]  (!%p18582_p12), %s20655_s9, 16, %s658_s29, [#allocation21]  }
 0x1a2   : > { %s18103_s30 = scalar_lea.hbm %s20657_s11, 16 }
 0x1a3   : > { %p18104_p13 = scmp.ne.s32.totalorder %s20657_s11, %s18103_s30  ;;  %p18110_p5 = scmp.lt.u32.totalorder %s18103_s30, %s20657_s11 }
 0x1a5   : > { %p18106_p1 = pnand %p18104_p13, %p18598_p0 }
 0x1a7   : > { %p18107_p6 = pneg %p18106_p1 }
 0x1a9   : > { %p18112_p9 = pnand %p18110_p5, %p18107_p6 }
 0x1ab   : > { %18115 = shalt.err (!%p18112_p9)
}
 0x1ac   : > { %s18116_s3 = scalar_lea.vmem %s682_s14, 16  ;;  %s18123_s29 = scalar_lea.vmem %s682_s14, 32 }
 0x1ad   : > { %p18117_p10 = scmp.ne.s32.totalorder %s682_s14, %s18116_s3  ;;  %p18124_p4 = scmp.lt.s32.totalorder %s682_s14, %s682_s14 }
 0x1ae   : > { %p18125_p7 = scmp.lt.s32.totalorder %s18123_s29, %s18116_s3 }
 0x1af   : > { %p18119_p2 = pnand %p18117_p10, %p18598_p0 }
 0x1b0   : > { %p18126_p8 = por %p18125_p7, %p18124_p4 }
 0x1b1   : > { %p18120_p3 = pneg %p18119_p2 }
 0x1b3   : > { %p18127_p11 = pnand %p18126_p8, %p18120_p3 }
 0x1b5   : > { %18130 = shalt.err (!%p18127_p11)
}
 0x1b6   : > { %16589 = dma.hbm_to_vmem [thread:$0]  (!%p18582_p12), %s20657_s11, 16, %s682_s14, [#allocation24]  }
 0x1b7   : > { %s18398_s12 = smov [#allocation28]   ;;  %s18399_s8 = smov [#allocation31]  }
 0x1b8   : > { %s702_s4 = sshll.u32 %s18398_s12, 4  ;;  %s727_s30 = sshll.u32 %s18399_s8, 4  ;;  %s703_s4 = int_to_ptr.vmem [resolvable:$true] %s702_s4  ;;  %s728_s30 = int_to_ptr.vmem [resolvable:$true] %s727_s30 }
 0x1b9   : > { %s18131_s22 = scalar_lea.hbm %s20659_s13, 18432 }
 0x1ba   : > { %p18132_p13 = scmp.ne.s32.totalorder %s20659_s13, %s18131_s22  ;;  %p18138_p5 = scmp.lt.u32.totalorder %s18131_s22, %s20659_s13 }
 0x1bc   : > { %p18134_p1 = pnand %p18132_p13, %p18598_p0 }
 0x1be   : > { %p18135_p6 = pneg %p18134_p1 }
 0x1c0   : > { %p18140_p9 = pnand %p18138_p5, %p18135_p6 }
 0x1c2   : > { %18143 = shalt.err (!%p18140_p9)
}
 0x1c3   : > { %s18144_s14 = scalar_lea.vmem %s703_s4, 18432  ;;  %p18152_p4 = scmp.lt.s32.totalorder %s703_s4, %s703_s4 }
 0x1c4   : > { %p18145_p10 = scmp.ne.s32.totalorder %s703_s4, %s18144_s14  ;;  %p18153_p7 = scmp.lt.s32.totalorder %s18144_s14, %s18144_s14 }
 0x1c6   : > { %p18147_p2 = pnand %p18145_p10, %p18598_p0  ;;  %p18154_p8 = por %p18153_p7, %p18152_p4 }
 0x1c8   : > { %p18148_p3 = pneg %p18147_p2 }
 0x1ca   : > { %p18155_p11 = pnand %p18154_p8, %p18148_p3 }
 0x1cc   : > { %18158 = shalt.err (!%p18155_p11)
}
 0x1cd   : > { %s20743_s1 = smov 8   ;;  %s20744_s12 = smov 128  }
 0x1ce   : > { %16595 = dma.hbm_to_vmem [thread:$0]  (!%p18582_p12), %s20659_s13, 18432, %s703_s4, [#allocation27], %s20744_s12, %s20744_s12, %s20743_s1  }
 0x1cf   : > { %s18159_s23 = scalar_lea.hbm %s20661_s15, 32 }
 0x1d0   : > { %p18160_p13 = scmp.ne.s32.totalorder %s20661_s15, %s18159_s23  ;;  %p18166_p5 = scmp.lt.u32.totalorder %s18159_s23, %s20661_s15 }
 0x1d2   : > { %p18162_p1 = pnand %p18160_p13, %p18598_p0 }
 0x1d4   : > { %p18163_p6 = pneg %p18162_p1 }
 0x1d6   : > { %p18168_p9 = pnand %p18166_p5, %p18163_p6 }
 0x1d8   : > { %18171 = shalt.err (!%p18168_p9)
}
 0x1d9   : > { %s18172_s8 = scalar_lea.vmem %s728_s30, 32  ;;  %p18180_p4 = scmp.lt.s32.totalorder %s728_s30, %s728_s30 }
 0x1da   : > { %p18173_p10 = scmp.ne.s32.totalorder %s728_s30, %s18172_s8  ;;  %p18181_p7 = scmp.lt.s32.totalorder %s18172_s8, %s18172_s8 }
 0x1dc   : > { %p18175_p2 = pnand %p18173_p10, %p18598_p0  ;;  %p18182_p8 = por %p18181_p7, %p18180_p4 }
 0x1de   : > { %p18176_p3 = pneg %p18175_p2 }
 0x1e0   : > { %p18183_p11 = pnand %p18182_p8, %p18176_p3 }
 0x1e2   : > { %18186 = shalt.err (!%p18183_p11)
}
 0x1e3   : > { %16601 = dma.hbm_to_vmem [thread:$0]  (!%p18582_p12), %s20661_s15, 32, %s728_s30, [#allocation30]  }
 0x1e4   : > { %s18400_s12 = smov [#allocation34]   ;;  %s18401_s10 = smov [#allocation37]  }
 0x1e5   : > { %s751_s6 = sshll.u32 %s18400_s12, 4  ;;  %s772_s22 = sshll.u32 %s18401_s10, 4  ;;  %s752_s6 = int_to_ptr.vmem [resolvable:$true] %s751_s6  ;;  %s773_s22 = int_to_ptr.vmem [resolvable:$true] %s772_s22 }
 0x1e6   : > { %s18187_s29 = scalar_lea.hbm %s20663_s17, 32 }
 0x1e7   : > { %p18188_p13 = scmp.ne.s32.totalorder %s20663_s17, %s18187_s29  ;;  %p18194_p5 = scmp.lt.u32.totalorder %s18187_s29, %s20663_s17 }
 0x1e9   : > { %p18190_p1 = pnand %p18188_p13, %p18598_p0 }
 0x1eb   : > { %p18191_p6 = pneg %p18190_p1 }
 0x1ed   : > { %p18196_p9 = pnand %p18194_p5, %p18191_p6 }
 0x1ef   : > { %18199 = shalt.err (!%p18196_p9)
}
 0x1f0   : > { %s18200_s30 = scalar_lea.vmem %s752_s6, 32  ;;  %p18208_p4 = scmp.lt.s32.totalorder %s752_s6, %s752_s6 }
 0x1f1   : > { %p18201_p10 = scmp.ne.s32.totalorder %s752_s6, %s18200_s30  ;;  %p18209_p7 = scmp.lt.s32.totalorder %s18200_s30, %s18200_s30 }
 0x1f3   : > { %p18203_p2 = pnand %p18201_p10, %p18598_p0  ;;  %p18210_p8 = por %p18209_p7, %p18208_p4 }
 0x1f5   : > { %p18204_p3 = pneg %p18203_p2 }
 0x1f7   : > { %p18211_p11 = pnand %p18210_p8, %p18204_p3 }
 0x1f9   : > { %18214 = shalt.err (!%p18211_p11)
}
 0x1fa   : > { %16607 = dma.hbm_to_vmem [thread:$0]  (!%p18582_p12), %s20663_s17, 32, %s752_s6, [#allocation33]  }
 0x1fb   : > { %s18215_s3 = scalar_lea.hbm %s20665_s19, 8192 }
 0x1fc   : > { %p18216_p13 = scmp.ne.s32.totalorder %s20665_s19, %s18215_s3  ;;  %p18222_p5 = scmp.lt.u32.totalorder %s18215_s3, %s20665_s19 }
 0x1fe   : > { %p18218_p1 = pnand %p18216_p13, %p18598_p0 }
 0x200   : > { %p18219_p6 = pneg %p18218_p1 }
 0x202   : > { %p18224_p9 = pnand %p18222_p5, %p18219_p6 }
 0x204   : > { %18227 = shalt.err (!%p18224_p9)
}
 0x205   : > { %s18228_s4 = scalar_lea.vmem %s773_s22, 8192  ;;  %p18236_p4 = scmp.lt.s32.totalorder %s773_s22, %s773_s22 }
 0x206   : > { %p18229_p10 = scmp.ne.s32.totalorder %s773_s22, %s18228_s4  ;;  %p18237_p7 = scmp.lt.s32.totalorder %s18228_s4, %s18228_s4 }
 0x208   : > { %p18231_p2 = pnand %p18229_p10, %p18598_p0  ;;  %p18238_p8 = por %p18237_p7, %p18236_p4 }
 0x20a   : > { %p18232_p3 = pneg %p18231_p2 }
 0x20c   : > { %p18239_p11 = pnand %p18238_p8, %p18232_p3 }
 0x20e   : > { %18242 = shalt.err (!%p18239_p11)
}
 0x20f   : > { %16613 = dma.hbm_to_vmem [thread:$0]  (!%p18582_p12), %s20665_s19, 8192, %s773_s22, [#allocation36], %s20737_s25, %s20737_s25, %s20736_s26  }
 0x210   : > { %s18402_s1 = smov [#allocation38]   ;;  %s18243_s3 = scalar_lea.hbm %s20666_s20, 16 }
 0x211   : > { %s786_s12 = sshll.u32 %s18402_s1, 4  ;;  %p18244_p13 = scmp.ne.s32.totalorder %s20666_s20, %s18243_s3  ;;  %s787_s12 = int_to_ptr.vmem [resolvable:$true] %s786_s12 }
 0x212   : > { %p18250_p5 = scmp.lt.u32.totalorder %s18243_s3, %s20666_s20 }
 0x213   : > { %p18246_p1 = pnand %p18244_p13, %p18598_p0 }
 0x215   : > { %p18247_p6 = pneg %p18246_p1 }
 0x217   : > { %p18252_p9 = pnand %p18250_p5, %p18247_p6 }
 0x219   : > { %18255 = shalt.err (!%p18252_p9)
}
 0x21a   : > { %s18256_s26 = scalar_lea.vmem %s787_s12, 16  ;;  %s18263_s25 = scalar_lea.vmem %s787_s12, 32 }
 0x21b   : > { %p18257_p10 = scmp.ne.s32.totalorder %s787_s12, %s18256_s26  ;;  %p18264_p4 = scmp.lt.s32.totalorder %s787_s12, %s787_s12 }
 0x21c   : > { %p18265_p7 = scmp.lt.s32.totalorder %s18263_s25, %s18256_s26 }
 0x21d   : > { %p18259_p2 = pnand %p18257_p10, %p18598_p0 }
 0x21e   : > { %p18266_p8 = por %p18265_p7, %p18264_p4 }
 0x21f   : > { %p18260_p3 = pneg %p18259_p2 }
 0x221   : > { %p18267_p11 = pnand %p18266_p8, %p18260_p3 }
 0x223   : > { %18270 = shalt.err (!%p18267_p11)
}
 0x224   : > { %16616 = dma.hbm_to_vmem [thread:$0]  (!%p18582_p12), %s20666_s20, 16, %s787_s12, [#allocation39]  }
 0x225   : > { %s20745_s6 = sld [smem:[#allocation62_spill]] }
 0x22b   : > { %p20746_p13 = scmp.ne.s32.totalorder %s20745_s6, 0 }
 0x22c   : > { %s20747_s30 = sld [smem:[#allocation57_spill]] (!%p20746_p13) }
 0x22d   : > { %807 = sbr.rel (%p20746_p13) target bundleno = 4054 (0xfd6), region = 104 }
 0x232   : > { %p20748_p1 = scmp.eq.s32.totalorder (!%p20746_p13), %s20747_s30, 0 }
 0x234   : > { %18316 = dma.done.wait (%p20748_p1), [#allocation9], 128   ;;  %p20749_p0 = pmov %p20748_p1 }
 0x236   : > { %18318 = vsyncadd (%p20749_p0), [#allocation9], 4294967168  ;;  %p20750_p6 = pmov %p20749_p0 }
 0x237   : > { %p20751_p5 = pmov %p20749_p0 }
 0x238   : > { %18320 = dma.done.wait (%p20750_p6), [#allocation12], 32  }
 0x239   : > { %18322 = vsyncadd (%p20751_p5), [#allocation12], 4294967264  ;;  %p20752_p9 = pmov %p20749_p0 }
 0x23a   : > { %p20753_p12 = pmov %p20749_p0 }
 0x23b   : > { %18324 = dma.done.wait (%p20752_p9), [#allocation15], 9232  }
 0x23c   : > { %18326 = vsyncadd (%p20753_p12), [#allocation15], 4294958064  ;;  %p20754_p10 = pmov %p20749_p0 }
 0x23d   : > { %p20755_p2 = pmov %p20749_p0 }
 0x23e   : > { %18328 = dma.done.wait (%p20754_p10), [#allocation18], 9232  }
 0x23f   : > { %18330 = vsyncadd (%p20755_p2), [#allocation18], 4294958064  ;;  %p20756_p3 = pmov %p20749_p0 }
 0x240   : > { %p20757_p4 = pmov %p20749_p0 }
 0x241   : > { %18332 = dma.done.wait (%p20756_p3), [#allocation21], 32  }
 0x242   : > { %18334 = vsyncadd (%p20757_p4), [#allocation21], 4294967264  ;;  %p20758_p7 = pmov %p20749_p0 }
 0x243   : > { %p20759_p8 = pmov %p20749_p0 }
 0x244   : > { %18336 = dma.done.wait (%p20758_p7), [#allocation24], 9232  }
 0x245   : > { %18338 = vsyncadd (%p20759_p8), [#allocation24], 4294958064  ;;  %p20760_p11 = pmov %p20749_p0 }
 0x246   : > { %p20761_p13 = pmov %p20749_p0 }
 0x247   : > { %18340 = dma.done.wait (%p20760_p11), [#allocation27], 18448  }
 0x248   : > { %18342 = vsyncadd (%p20761_p13), [#allocation27], 4294948848  ;;  %p20762_p1 = pmov %p20749_p0 }
 0x24a   : > { %18344 = dma.done.wait (%p20762_p1), [#allocation30], 64  }
 0x24b   : > { %18346 = vsyncadd (%p20749_p0), [#allocation30], 4294967232  ;;  %p20763_p6 = pmov %p20749_p0 }
 0x24c   : > { %p20764_p5 = pmov %p20749_p0 }
 0x24d   : > { %18348 = dma.done.wait (%p20763_p6), [#allocation33], 36896  }
 0x24e   : > { %18350 = vsyncadd (%p20764_p5), [#allocation33], 4294930400  ;;  %p20765_p9 = pmov %p20749_p0 }
 0x24f   : > { %p20766_p12 = pmov %p20749_p0 }
 0x250   : > { %18352 = dma.done.wait (%p20765_p9), [#allocation36], 8224  }
 0x251   : > { %18354 = vsyncadd (%p20766_p12), [#allocation36], 4294959072  ;;  %p20767_p10 = pmov %p20749_p0 }
 0x252   : > { %p20768_p2 = pmov %p20749_p0 }
 0x253   : > { %18356 = dma.done.wait (%p20767_p10), [#allocation39], 16  }
 0x254   : > { %18358 = vsyncadd (%p20768_p2), [#allocation39], 4294967280  ;;  %vm1126_vm0 = vcmask 1043456   ;;  %p948_p3 = scmp.lt.s32.totalorder %s20747_s30, 1  ;;  %vm1127_vm1 = vcmask 1044480   ;;  %v18403_v0 = vmov 65535   ;;  %v1440_v42 = vlaneseq }
 0x255   : > { %v1128_v1 = vsel %vm1126_vm0, 4294967295, %v18403_v0  ;;  %vm1077_vm2 = vcmask 72704   ;;  %v16724_v3 = vld [vmem:[#allocation8] sm:$0x1f]   ;;  %s20769_s10 = sld [smem:[#allocation63_spill]]  ;;  %vm2226_vm4 = vcmask 1040384  }
 0x256   : > { %s19032_s28 = scalar_select %p948_p3, %s20747_s30, 1  ;;  %v1129_v2 = vsel %vm1127_vm1, %v1128_v1, 0  ;;  %vm2259_vm3 = vsmask.f32 7938  ;;  %vm20699_vm5 = vsmask.f32 256 }
 0x257   : > { %v1131_v5 = vand.u32 %v16724_v3, %v1129_v2  ;;  %vm19074_vm6 = vmand %vm2226_vm4, %vm2259_vm3  ;;  %v2264_v23 = vld [vmem:[#allocation2 + $0xc] sm:$0x1]  ;;  %v2232_v25 = vld [vmem:[#allocation2 + $0x8] sm:$0x1]  ;;  %v18404_v40 = vmov 1983009808  }
 0x258   : > { %s15206_s0 = sshll.u32 %s19032_s28, 7  ;;  %vm19080_vm7 = vmand %vm2226_vm4, %vm20699_vm5  ;;  %v2265_v24 = vsel %vm19074_vm6, 0, %v2264_v23  ;;  %v2267_v27 = vld [vmem:[#allocation2 + $0x14] sm:$0x1]  ;;  %v2235_v29 = vld [vmem:[#allocation2 + $0x10] sm:$0x1]  ;;  %v1438_v41 = vunpack.c.l.s4 %v18404_v40 }
 0x259   : > { %15674 = vmatprep.subr.bf16.mxu0 %v1131_v5  ;;  %2266 = vst [vmem:[#allocation2 + $0xc] sm:$0x1] %v2265_v24  ;;  %v2233_v26 = vsel %vm19080_vm7, 0, %v2232_v25  ;;  %v2268_v28 = vsel %vm19074_vm6, 0, %v2267_v27  ;;  %v2236_v30 = vsel %vm19080_vm7, 0, %v2235_v29  ;;  %v19106_v49 = vshrl.u32 %v1440_v42, 7  ;;  %vm19163_vm15 = vmand %vm1126_vm0, %vm2259_vm3 }
 0x25a   : > { %15675 = vmatpush3.bf16.msra.mxu0 %v1131_v5  ;;  %2234 = vst [vmem:[#allocation2 + $0x8] sm:$0x1] %v2233_v26  ;;  %2269 = vst [vmem:[#allocation2 + $0x14] sm:$0x1] %v2268_v28  ;;  %v2270_v31 = vld [vmem:[#allocation2 + $0x1c] sm:$0x1]  ;;  %v1439_v48 = vunpack.c.0.s8 %v1438_v41 }
 0x25b   : > { %s19038_s23 = scalar_lea.vmem %s20769_s10, %s15206_s0  ;;  %2237 = vst [vmem:[#allocation2 + $0x10] sm:$0x1] %v2236_v30  ;;  %v2271_v32 = vsel %vm19074_vm6, 0, %v2270_v31  ;;  %v2238_v33 = vld [vmem:[#allocation2 + $0x18] sm:$0x1]  ;;  %vm20700_vm8 = vcmask 1041408  }
 0x25c   : > { %v16725_v4 = vld [vmem:[%s19038_s23] sm:$0xff]   ;;  %v16726_v6 = vld [vmem:[%s19038_s23 + $0x8] sm:$0xff]   ;;  %v16727_v7 = vld [vmem:[%s19038_s23 + $0x10] sm:$0xff]   ;;  %2272 = vst [vmem:[#allocation2 + $0x1c] sm:$0x1] %v2271_v32  ;;  %v2239_v34 = vsel %vm19080_vm7, 0, %v2238_v33  ;;  %v19114_v59 = vsub.s32 %v1439_v48, %v19106_v49 }
 0x25d   : > { %15676 = vmatprep.mubr.msk.bf16.mxu0 %vm1077_vm2, %v16725_v4  ;;  %v16728_v8 = vld [vmem:[%s19038_s23 + $0x18] sm:$0xff]   ;;  %v16729_v9 = vld [vmem:[%s19038_s23 + $0x20] sm:$0xff]   ;;  %v16730_v10 = vld [vmem:[%s19038_s23 + $0x28] sm:$0xff]   ;;  %2240 = vst [vmem:[#allocation2 + $0x18] sm:$0x1] %v2239_v34  ;;  %vm2611_vm9 = vcmask 1042434  }
 0x25e   : > { %15677 = vmatmul.mubr.msk.bf16.vlgmr.msra.gmra.mrb[0].mxu0 %vm1077_vm2, %v16726_v6  ;;  %v16731_v11 = vld [vmem:[%s19038_s23 + $0x30] sm:$0xff]   ;;  %v16732_v12 = vld [vmem:[%s19038_s23 + $0x38] sm:$0xff]   ;;  %v16733_v13 = vld [vmem:[%s19038_s23 + $0x40] sm:$0xff]   ;;  %vm2613_vm10 = vcmask 1043459   ;;  %vm2615_vm11 = vcmask 1044484   ;;  %vm2617_vm12 = vcmask 1045509  }
 0x25f   : > { %15680 = vmatprep.mubr.msk.bf16.mxu0 %vm1077_vm2, %v16727_v7  ;;  %v16734_v14 = vld [vmem:[%s19038_s23 + $0x48] sm:$0xff]   ;;  %v16735_v15 = vld [vmem:[%s19038_s23 + $0x50] sm:$0xff]   ;;  %v16736_v16 = vld [vmem:[%s19038_s23 + $0x58] sm:$0xff]   ;;  %vm2619_vm13 = vcmask 1046534   ;;  %vm2621_vm14 = vcmask 1047559   ;;  %s14172_s3 = sshll.u32 %s19032_s28, 2 }
 0x260   : > { %v16737_v17 = vld [vmem:[%s19038_s23 + $0x60] sm:$0xff]   ;;  %v16738_v18 = vld [vmem:[%s19038_s23 + $0x68] sm:$0xff]   ;;  %v16739_v19 = vld [vmem:[%s19038_s23 + $0x70] sm:$0xff]   ;;  %vm2780_vm1 = vsmask.f32 3328  ;;  %s20813_s14 = sld [smem:[#allocation74_spill]] }
 0x261   : > { %v16740_v20 = vld [vmem:[%s19038_s23 + $0x78] sm:$0xff]   ;;  %v2273_v35 = vld [vmem:[#allocation2 + $0x24] sm:$0x1]  ;;  %v2241_v37 = vld [vmem:[#allocation2 + $0x20] sm:$0x1]  ;;  %s20814_s26 = sld [smem:[#allocation54_spill]] }
 0x262   : > { %v2274_v36 = vsel %vm19074_vm6, 0, %v2273_v35  ;;  %v2242_v38 = vsel %vm19080_vm7, 0, %v2241_v37  ;;  %v19100_v39 = vld [vmem:[#allocation11] ss:$0 sm:$0xff]  ;;  %v19102_v43 = vld [vmem:[#allocation13] ss:$0 sm:$0xff] }
 0x263   : > { %2275 = vst [vmem:[#allocation2 + $0x24] sm:$0x1] %v2274_v36  ;;  %2243 = vst [vmem:[#allocation2 + $0x20] sm:$0x1] %v2242_v38  ;;  %v2276_v62 = vld [vmem:[#allocation2 + $0x2c] sm:$0x1] }
 0x264   : > { %v2277_v2 = vsel %vm19074_vm6, 0, %v2276_v62  ;;  %v16741_v5 = vld [vmem:[#allocation14 + $0x40] sm:$0xff]   ;;  %v16742_v24 = vld [vmem:[#allocation14 + $0x48] sm:$0xff]   ;;  %s20815_s22 = sld [smem:[#allocation60_spill]]  ;;  %s15203_s4 = sshll.u32 %s20747_s30, 4 }
 0x265   : > { %2278 = vst [vmem:[#allocation2 + $0x2c] sm:$0x1] %v2277_v2  ;;  %15708 = vmatprep.subr.bf16.mxu1 %v16741_v5  ;;  %s20816_s12 = sld [smem:[#allocation75_spill]]  ;;  %s18409_s30 = smov [#allocation40]  }
 0x266   : > { %15681 = vmatmul.mubr.msk.bf16.gmra.mrb[4].mxu0 %vm1077_vm2, %v16728_v8  ;;  %15709 = vmatpush3.bf16.msra.mxu1 %v16741_v5  ;;  %s956_s8 = scalar_lea.vmem %s20813_s14, %s14172_s3  ;;  %s18275_s29 = sshll.u32 %s18409_s30, 4  ;;  %s18276_s29 = int_to_ptr.vmem [resolvable:$false] %s18275_s29 }
 0x267   : > { %15684 = vmatprep.mubr.msk.bf16.mxu0 %vm1077_vm2, %v16729_v9  ;;  %15710 = vmatprep.subr.bf16.mxu1 %v16742_v24  ;;  %s946_s25 = sand.u32 1, %s20814_s26   ;;  %s18277_s2 = scalar_lea.vmem %s18276_s29, 32 }
 0x268   : > { %s947_s6 = scalar_lea.vmem [#allocation40], %s946_s25  ;;  %s13839_s23 = scalar_lea.sflag [#allocation10], %s946_s25 }
 0x269   : > { %s13854_s28 = sshll.u32 %s947_s6, 4  ;;  %s20606_s28 = int_to_ptr.vmem [resolvable:$true] %s13854_s28 }
 0x26a   : > { %15711 = vmatpush3.bf16.msra.mxu1 %v16742_v24  ;;  %s18271_s3 = scalar_lea.vmem %s20606_s28, 16  ;;  %p20817_p7 = scmp.ne.s32.totalorder %s20815_s22, 0 }
 0x26b   : > { %s20604_s10 = scalar_lea.hbm %s20816_s12, %s15203_s4  ;;  %p18272_p4 = scmp.ne.s32.totalorder %s20606_s28, %s18271_s3 }
 0x26c   : > { %p18278_p13 = scmp.lt.s32.totalorder %s20606_s28, %s18276_s29  ;;  %p18279_p1 = scmp.lt.s32.totalorder %s18277_s2, %s18271_s3 }
 0x26d   : > { %p18273_p8 = pnand %p18272_p4, %p20817_p7 }
 0x26e   : > { %15685 = vmatmul.mubr.msk.bf16.gmra.mrb[8].mxu0 %vm1077_vm2, %v16730_v10  ;;  %p18280_p0 = por %p18279_p1, %p18278_p13 }
 0x26f   : > { %15688 = vmatprep.mubr.msk.bf16.mxu0 %vm1077_vm2, %v16731_v11  ;;  %p18274_p11 = pneg %p18273_p8 }
 0x271   : > { %p18281_p6 = pnand %p18280_p0, %p18274_p11 }
 0x276   : > { %15689 = vmatmul.mubr.msk.bf16.gmra.mrb[12].mxu0 %vm1077_vm2, %v16732_v12 }
 0x277   : > { %15692 = vmatprep.mubr.msk.bf16.mxu0 %vm1077_vm2, %v16733_v13 }
 0x27e   : > { %15693 = vmatmul.mubr.msk.bf16.gmra.mrb[16].mxu0 %vm1077_vm2, %v16734_v14 }
 0x27f   : > { %15696 = vmatprep.mubr.msk.bf16.mxu0 %vm1077_vm2, %v16735_v15 }
 0x286   : > { %15697 = vmatmul.mubr.msk.bf16.gmra.mrb[20].mxu0 %vm1077_vm2, %v16736_v16 }
 0x287   : > { %15700 = vmatprep.mubr.msk.bf16.mxu0 %vm1077_vm2, %v16737_v17 }
 0x28e   : > { %15701 = vmatmul.mubr.msk.bf16.gmra.mrb[24].mxu0 %vm1077_vm2, %v16738_v18 }
 0x28f   : > { %15704 = vmatprep.mubr.msk.bf16.mxu0 %vm1077_vm2, %v16739_v19 }
 0x296   : > { %15705 = vmatmul.mubr.msk.bf16.gmra.mrb[28].mxu0 %vm1077_vm2, %v16740_v20  ;;  %vm2781_vm2 = vsmask.f32 7440 }
 0x297   : > { %vm19512_vm3 = vmor %vm2780_vm1, %vm2781_vm2  ;;  %vm18407_vm2 = vmmov 0  }
 0x331   : > { %v15678_v44 = vpop.f32.mrb[0].mxu0 }
 0x332   : > { %v1303_v45 = vmul.f32 %v15678_v44, %v19100_v39  ;;  %v1167_v46 = vpop.f32.mrb[1].mxu0 }
 0x333   : > { %v1301_v47 = vmul.f32 %v19100_v39, %v1167_v46  ;;  %v15679_v50 = vpop.f32.mrb[2].mxu0 }
 0x334   : > { %v1342_v51 = vadd.f32 %v19102_v43, %v1303_v45  ;;  %v1304_v52 = vmul.f32 %v15679_v50, %v19100_v39  ;;  %v1170_v53 = vpop.f32.mrb[3].mxu0 }
 0x335   : > { %v1340_v54 = vadd.f32 %v19102_v43, %v1301_v47  ;;  %v1302_v55 = vmul.f32 %v19100_v39, %v1170_v53 }
 0x336   : > { %v1374_v56 = vmax.f32 %v1342_v51, 0.0  ;;  %v1343_v57 = vadd.f32 %v19102_v43, %v1304_v52 }
 0x337   : > { %v1372_v58 = vmax.f32 %v1340_v54, 0.0  ;;  %v1341_v60 = vadd.f32 %v19102_v43, %v1302_v55 }
 0x338   : > { %v1375_v61 = vmax.f32 %v1343_v57, 0.0 }
 0x339   : > { %v1404_v63 = vmax.f32 %v1372_v58, %v1374_v56  ;;  %v1373_v0 = vmax.f32 %v1341_v60, 0.0  ;;  %v15682_v1 = vpop.f32.mrb[4].mxu0 }
 0x33a   : > { %v1307_v3 = vmul.f32 %v15682_v1, %v19100_v39  ;;  %v1183_v4 = vpop.f32.mrb[5].mxu0 }
 0x33b   : > { %v1436_v6 = vcombine.high %v1404_v63, %v1404_v63  ;;  %v1443_v7 = vrot.slane %v1404_v63, %v19114_v59  ;;  %v1405_v8 = vmax.f32 %v1373_v0, %v1375_v61  ;;  %v1305_v9 = vmul.f32 %v19100_v39, %v1183_v4  ;;  %v15683_v10 = vpop.f32.mrb[6].mxu0 }
 0x33c   : > { %v19123_v11 = vadd.f32 %v19102_v43, %v1307_v3  ;;  %v19126_v12 = vmul.f32 %v15683_v10, %v19100_v39  ;;  %v19128_v13 = vpop.f32.mrb[7].mxu0 }
 0x33d   : > { %v1450_v14 = vrot.slane %v1436_v6, %v19114_v59  ;;  %v1451_v15 = vcombine.high %v1443_v7, %v1443_v7  ;;  %v1773_v16 = vsel %vm20700_vm8, %v1443_v7, -inf  ;;  %v1453_v17 = vcombine.high %v1405_v8, %v1405_v8 }
 0x33e   : > { %v1774_v18 = vrot.slane %v1773_v16, 4  ;;  %v1460_v19 = vrot.slane %v1405_v8, %v19114_v59  ;;  %v1378_v20 = vmax.f32 %v19123_v11, 0.0  ;;  %v19135_v23 = vadd.f32 %v19102_v43, %v1305_v9  ;;  %v16743_v11 = vld [vmem:[#allocation14 + $0x50] sm:$0xff]  }
 0x33f   : > { %v1452_v25 = vcombine.high %v1450_v14, %v1450_v14  ;;  %v1780_v26 = vsel %vm20700_vm8, %v1451_v15, -inf  ;;  %v1787_v27 = vsel %vm20700_vm8, %v1450_v14, -inf  ;;  %v1467_v28 = vrot.slane %v1453_v17, %v19114_v59  ;;  %15712 = vmatprep.subr.bf16.mxu1 %v16743_v11 }
 0x340   : > { %v1775_v29 = vmax.f32 %v1773_v16, %v1774_v18  ;;  %v1781_v30 = vrot.slane %v1780_v26, 4  ;;  %v1788_v31 = vrot.slane %v1787_v27, 4  ;;  %v1468_v32 = vcombine.high %v1460_v19, %v1460_v19  ;;  %15713 = vmatpush3.bf16.msra.mxu1 %v16743_v11 }
 0x341   : > { %v1794_v33 = vsel %vm20700_vm8, %v1452_v25, -inf  ;;  %v1469_v34 = vcombine.high %v1467_v28, %v1467_v28  ;;  %v1801_v35 = vsel %vm20700_vm8, %v1460_v19, -inf  ;;  %v1815_v36 = vsel %vm20700_vm8, %v1467_v28, -inf  ;;  %v19143_v37 = vpop.f32.mrb[8].mxu0 }
 0x342   : > { %v1776_v38 = vrot.slane %v1775_v29, 2  ;;  %v1782_v40 = vmax.f32 %v1780_v26, %v1781_v30  ;;  %v1789_v41 = vmax.f32 %v1787_v27, %v1788_v31  ;;  %v1795_v42 = vrot.slane %v1794_v33, 4  ;;  %v19145_v44 = vpop.f32.mrb[9].mxu0 }
 0x343   : > { %v1802_v45 = vrot.slane %v1801_v35, 4  ;;  %v1808_v46 = vsel %vm20700_vm8, %v1468_v32, -inf  ;;  %v1816_v47 = vrot.slane %v1815_v36, 4  ;;  %v1822_v48 = vsel %vm20700_vm8, %v1469_v34, -inf  ;;  %v19149_v50 = vpop.f32.mrb[10].mxu0 }
 0x344   : > { %v1777_v51 = vmax.f32 %v1775_v29, %v1776_v38  ;;  %v1783_v52 = vrot.slane %v1782_v40, 2  ;;  %v1790_v53 = vrot.slane %v1789_v41, 2  ;;  %v1796_v54 = vmax.f32 %v1794_v33, %v1795_v42  ;;  %v19151_v55 = vpop.f32.mrb[11].mxu0 }
 0x345   : > { %v1803_v56 = vmax.f32 %v1801_v35, %v1802_v45  ;;  %v1809_v57 = vrot.slane %v1808_v46, 4  ;;  %v1817_v58 = vmax.f32 %v1815_v36, %v1816_v47  ;;  %v1823_v60 = vrot.slane %v1822_v48, 4 }
 0x346   : > { %v1778_v61 = vrot.slane %v1777_v51, 1  ;;  %v1784_v62 = vmax.f32 %v1782_v40, %v1783_v52  ;;  %v1791_v63 = vmax.f32 %v1789_v41, %v1790_v53  ;;  %v1797_v0 = vrot.slane %v1796_v54, 2 }
 0x347   : > { %v1804_v1 = vrot.slane %v1803_v56, 2  ;;  %v1810_v2 = vmax.f32 %v1808_v46, %v1809_v57  ;;  %v1818_v3 = vrot.slane %v1817_v58, 2  ;;  %v1824_v4 = vmax.f32 %v1822_v48, %v1823_v60 }
 0x348   : > { %v1779_v5 = vmax.f32 %v1777_v51, %v1778_v61  ;;  %v1785_v6 = vrot.slane %v1784_v62, 1  ;;  %v1792_v7 = vrot.slane %v1791_v63, 1  ;;  %v1798_v8 = vmax.f32 %v1796_v54, %v1797_v0 }
 0x349   : > { %v1805_v9 = vmax.f32 %v1803_v56, %v1804_v1  ;;  %v1811_v10 = vrot.slane %v1810_v2, 2  ;;  %v1819_v14 = vmax.f32 %v1817_v58, %v1818_v3  ;;  %v1825_v15 = vrot.slane %v1824_v4, 2  ;;  %v19153_v16 = vpop.f32.mrb[12].mxu0  ;;  %v2703_v58 = vld [vmem:[#allocation2 + $0xc] sm:$0x1] }
 0x34a   : > { %v1786_v17 = vmax.f32 %v1784_v62, %v1785_v6  ;;  %v1793_v18 = vmax.f32 %v1791_v63, %v1792_v7  ;;  %v1799_v19 = vrot.slane %v1798_v8, 1  ;;  %v15207_v24 = vpack.c.bf16 %v1779_v5, %v1779_v5  ;;  %v19155_v25 = vpop.f32.mrb[13].mxu0 }
 0x34b   : > { %v1806_v26 = vrot.slane %v1805_v9, 1  ;;  %v1812_v27 = vmax.f32 %v1810_v2, %v1811_v10  ;;  %v1820_v28 = vrot.slane %v1819_v14, 1  ;;  %v1826_v29 = vmax.f32 %v1824_v4, %v1825_v15  ;;  %v19157_v30 = vpop.f32.mrb[14].mxu0 }
 0x34c   : > { %v1800_v31 = vmax.f32 %v1798_v8, %v1799_v19  ;;  %v15208_v32 = vpack.c.bf16 %v1786_v17, %v1786_v17  ;;  %v15209_v33 = vpack.c.bf16 %v1793_v18, %v1793_v18  ;;  %v2547_v34 = vunpack.c.l.b16 %v15207_v24  ;;  %v19159_v35 = vpop.f32.mrb[15].mxu0  ;;  %v2700_v24 = vld [vmem:[#allocation2 + $0x8] sm:$0xf] }
 0x34d   : > { %v1807_v36 = vmax.f32 %v1805_v9, %v1806_v26  ;;  %v1813_v38 = vrot.slane %v1812_v27, 1  ;;  %v1821_v40 = vmax.f32 %v1819_v14, %v1820_v28  ;;  %v1827_v41 = vrot.slane %v1826_v29, 1 }
 0x34e   : > { %v15210_v45 = vpack.c.bf16 %v1800_v31, %v1800_v31  ;;  %v2548_v46 = vunpack.c.l.b16 %v15208_v32  ;;  %v2549_v47 = vunpack.c.l.b16 %v15209_v33  ;;  %v1376_v48 = vmax.f32 %v19135_v23, 0.0  ;;  %v16744_v33 = vld [vmem:[#allocation14 + $0x58] sm:$0xff]  }
 0x34f   : > { %v1814_v51 = vmax.f32 %v1812_v27, %v1813_v38  ;;  %v1828_v52 = vmax.f32 %v1826_v29, %v1827_v41  ;;  %v15211_v53 = vpack.c.bf16 %v1807_v36, %v1807_v36  ;;  %v15213_v54 = vpack.c.bf16 %v1821_v40, %v1821_v40  ;;  %15714 = vmatprep.subr.bf16.mxu1 %v16744_v33 }
 0x350   : > { %v2550_v56 = vunpack.c.l.b16 %v15210_v45  ;;  %v2612_v57 = vsel %vm2611_vm9, %v2548_v46, %v2547_v34  ;;  %v1406_v60 = vmax.f32 %v1376_v48, %v1378_v20  ;;  %v1347_v61 = vadd.f32 %v19102_v43, %v19126_v12  ;;  %15715 = vmatpush3.bf16.msra.mxu1 %v16744_v33 }
 0x351   : > { %v2614_v62 = vsel %vm2613_vm10, %v2549_v47, %v2612_v57  ;;  %v15212_v63 = vpack.c.bf16 %v1814_v51, %v1814_v51  ;;  %v2551_v0 = vunpack.c.l.b16 %v15211_v53  ;;  %v2553_v1 = vunpack.c.l.b16 %v15213_v54  ;;  %v19174_v23 = vpop.f32.mrb[16].mxu0 }
 0x352   : > { %v2616_v2 = vsel %vm2615_vm11, %v2550_v56, %v2614_v62  ;;  %v15271_v3 = vpack.c.bf16 %v1828_v52, %v1828_v52  ;;  %v1470_v4 = vcombine.high %v1406_v60, %v1406_v60  ;;  %v1477_v5 = vrot.slane %v1406_v60, %v19114_v59  ;;  %v19178_v6 = vpop.f32.mrb[17].mxu0 }
 0x353   : > { %v2552_v20 = vunpack.c.l.b16 %v15212_v63  ;;  %v2618_v7 = vsel %vm2617_vm12, %v2551_v0, %v2616_v2  ;;  %v1379_v12 = vmax.f32 %v1347_v61, 0.0  ;;  %v1306_v8 = vmul.f32 %v19100_v39, %v19128_v13  ;;  %v19183_v9 = vpop.f32.mrb[18].mxu0 }
 0x354   : > { %v2704_v10 = vsel %vm19080_vm7, %v15271_v3, %v2703_v58  ;;  %v1484_v14 = vrot.slane %v1470_v4, %v19114_v59  ;;  %v1485_v15 = vcombine.high %v1477_v5, %v1477_v5  ;;  %v1829_v17 = vsel %vm20700_vm8, %v1477_v5, -inf  ;;  %v19189_v18 = vpop.f32.mrb[19].mxu0 }
 0x355   : > { %v2620_v19 = vsel %vm2619_vm13, %v2552_v20, %v2618_v7  ;;  %2705 = vst [vmem:[#allocation2 + $0xc] sm:$0x1] %v2704_v10  ;;  %v1830_v26 = vrot.slane %v1829_v17, 4  ;;  %v1345_v13 = vadd.f32 %v19102_v43, %v1306_v8  ;;  %v1311_v27 = vmul.f32 %v19143_v37, %v19100_v39 }
 0x356   : > { %v2622_v28 = vsel %vm2621_vm14, %v2553_v1, %v2620_v19  ;;  %v1486_v29 = vcombine.high %v1484_v14, %v1484_v14  ;;  %v1836_v31 = vsel %vm20700_vm8, %v1485_v15, -inf  ;;  %v1843_v32 = vsel %vm20700_vm8, %v1484_v14, -inf }
 0x357   : > { %v2665_v34 = vpack.c.b16 %v2622_v28, %v2622_v28  ;;  %v1831_v36 = vmax.f32 %v1829_v17, %v1830_v26  ;;  %v1837_v38 = vrot.slane %v1836_v31, 4  ;;  %v1844_v40 = vrot.slane %v1843_v32, 4 }
 0x358   : > { %v1850_v41 = vsel %vm20700_vm8, %v1486_v29, -inf  ;;  %v1377_v45 = vmax.f32 %v1345_v13, 0.0  ;;  %v19200_v46 = vadd.f32 %v19102_v43, %v1311_v27  ;;  %v1309_v37 = vmul.f32 %v19100_v39, %v19145_v44 }
 0x359   : > { %v2701_v47 = vsel %vm19163_vm15, %v2665_v34, %v2700_v24  ;;  %v1832_v48 = vrot.slane %v1831_v36, 2  ;;  %v1838_v51 = vmax.f32 %v1836_v31, %v1837_v38  ;;  %v1845_v52 = vmax.f32 %v1843_v32, %v1844_v40  ;;  %v19206_v53 = vpop.f32.mrb[20].mxu0 }
 0x35a   : > { %2702 = vst [vmem:[#allocation2 + $0x8] sm:$0xf] %v2701_v47  ;;  %v1851_v54 = vrot.slane %v1850_v41, 4  ;;  %v1407_v56 = vmax.f32 %v1377_v45, %v1379_v12  ;;  %v1382_v57 = vmax.f32 %v19200_v46, 0.0  ;;  %v1348_v58 = vadd.f32 %v19102_v43, %v1309_v37  ;;  %v19210_v60 = vpop.f32.mrb[21].mxu0 }
 0x35b   : > { %v1833_v44 = vmax.f32 %v1831_v36, %v1832_v48  ;;  %v1839_v61 = vrot.slane %v1838_v51, 2  ;;  %v1846_v62 = vrot.slane %v1845_v52, 2  ;;  %v1312_v63 = vmul.f32 %v19149_v50, %v19100_v39  ;;  %v19214_v0 = vpop.f32.mrb[22].mxu0 }
 0x35c   : > { %v1852_v1 = vmax.f32 %v1850_v41, %v1851_v54  ;;  %v1487_v2 = vcombine.high %v1407_v56, %v1407_v56  ;;  %v1494_v3 = vrot.slane %v1407_v56, %v19114_v59  ;;  %v1380_v4 = vmax.f32 %v1348_v58, 0.0  ;;  %v19217_v5 = vpop.f32.mrb[23].mxu0 }
 0x35d   : > { %v1834_v11 = vrot.slane %v1833_v44, 1  ;;  %v1840_v20 = vmax.f32 %v1838_v51, %v1839_v61  ;;  %v1847_v7 = vmax.f32 %v1845_v52, %v1846_v62  ;;  %v19220_v12 = vadd.f32 %v19102_v43, %v1312_v63 }
 0x35e   : > { %v1853_v8 = vrot.slane %v1852_v1, 2  ;;  %v1501_v10 = vrot.slane %v1487_v2, %v19114_v59  ;;  %v1502_v14 = vcombine.high %v1494_v3, %v1494_v3  ;;  %v1857_v50 = vsel %vm20700_vm8, %v1494_v3, -inf }
 0x35f   : > { %v1835_v15 = vmax.f32 %v1833_v44, %v1834_v11  ;;  %v1841_v17 = vrot.slane %v1840_v20, 1  ;;  %v1848_v19 = vrot.slane %v1847_v7, 1  ;;  %v1858_v24 = vrot.slane %v1857_v50, 4 }
 0x360   : > { %v1854_v26 = vmax.f32 %v1852_v1, %v1853_v8  ;;  %v1503_v13 = vcombine.high %v1501_v10, %v1501_v10  ;;  %v1864_v27 = vsel %vm20700_vm8, %v1502_v14, -inf  ;;  %v1871_v28 = vsel %vm20700_vm8, %v1501_v10, -inf }
 0x361   : > { %v1842_v29 = vmax.f32 %v1840_v20, %v1841_v17  ;;  %v1849_v31 = vmax.f32 %v1847_v7, %v1848_v19  ;;  %v15215_v32 = vpack.c.bf16 %v1835_v15, %v1835_v15  ;;  %v1859_v33 = vmax.f32 %v1857_v50, %v1858_v24  ;;  %v19226_v34 = vpop.f32.mrb[24].mxu0 }
 0x362   : > { %v1855_v36 = vrot.slane %v1854_v26, 1  ;;  %v1865_v38 = vrot.slane %v1864_v27, 4  ;;  %v1872_v40 = vrot.slane %v1871_v28, 4  ;;  %v1878_v41 = vsel %vm20700_vm8, %v1503_v13, -inf  ;;  %v19229_v45 = vpop.f32.mrb[25].mxu0 }
 0x363   : > { %v15216_v46 = vpack.c.bf16 %v1842_v29, %v1842_v29  ;;  %v15217_v37 = vpack.c.bf16 %v1849_v31, %v1849_v31  ;;  %v2555_v47 = vunpack.c.l.b16 %v15215_v32  ;;  %v1860_v48 = vrot.slane %v1859_v33, 2  ;;  %v19231_v51 = vpop.f32.mrb[26].mxu0 }
 0x364   : > { %v1856_v52 = vmax.f32 %v1854_v26, %v1855_v36  ;;  %v1866_v54 = vmax.f32 %v1864_v27, %v1865_v38  ;;  %v1873_v56 = vmax.f32 %v1871_v28, %v1872_v40  ;;  %v1879_v58 = vrot.slane %v1878_v41, 4  ;;  %v19233_v44 = vpop.f32.mrb[27].mxu0  ;;  %v16745_v27 = vld [vmem:[#allocation14 + $0x60] sm:$0xff]  }
 0x365   : > { %v2556_v61 = vunpack.c.l.b16 %v15216_v46  ;;  %v2557_v62 = vunpack.c.l.b16 %v15217_v37  ;;  %v1861_v63 = vmax.f32 %v1859_v33, %v1860_v48  ;;  %v1408_v1 = vmax.f32 %v1380_v4, %v1382_v57  ;;  %15716 = vmatprep.subr.bf16.mxu1 %v16745_v27 }
 0x366   : > { %v15218_v2 = vpack.c.bf16 %v1856_v52, %v1856_v52  ;;  %v1867_v3 = vrot.slane %v1866_v54, 2  ;;  %v1874_v11 = vrot.slane %v1873_v56, 2  ;;  %v1880_v20 = vmax.f32 %v1878_v41, %v1879_v58  ;;  %15717 = vmatpush3.bf16.msra.mxu1 %v16745_v27 }
 0x367   : > { %v2623_v7 = vsel %vm2611_vm9, %v2556_v61, %v2555_v47  ;;  %v1862_v8 = vrot.slane %v1861_v63, 1  ;;  %v1504_v10 = vcombine.high %v1408_v1, %v1408_v1  ;;  %v1511_v14 = vrot.slane %v1408_v1, %v19114_v59 }
 0x368   : > { %v2558_v50 = vunpack.c.l.b16 %v15218_v2  ;;  %v2624_v15 = vsel %vm2613_vm10, %v2557_v62, %v2623_v7  ;;  %v1868_v17 = vmax.f32 %v1866_v54, %v1867_v3  ;;  %v1875_v19 = vmax.f32 %v1873_v56, %v1874_v11 }
 0x369   : > { %v1863_v24 = vmax.f32 %v1861_v63, %v1862_v8  ;;  %v1881_v26 = vrot.slane %v1880_v20, 2  ;;  %v1518_v13 = vrot.slane %v1504_v10, %v19114_v59  ;;  %v1519_v57 = vcombine.high %v1511_v14, %v1511_v14  ;;  %v19239_v4 = vpop.f32.mrb[28].mxu0  ;;  %v2709_v63 = vld [vmem:[#allocation2 + $0x14] sm:$0x1] }
 0x36a   : > { %v1869_v28 = vrot.slane %v1868_v17, 1  ;;  %v1876_v29 = vrot.slane %v1875_v19, 1  ;;  %v2625_v31 = vsel %vm2615_vm11, %v2558_v50, %v2624_v15  ;;  %v1885_v32 = vsel %vm20700_vm8, %v1511_v14, -inf  ;;  %v19243_v33 = vpop.f32.mrb[29].mxu0 }
 0x36b   : > { %v1882_v36 = vmax.f32 %v1880_v20, %v1881_v26  ;;  %v15219_v38 = vpack.c.bf16 %v1863_v24, %v1863_v24  ;;  %v1520_v40 = vcombine.high %v1518_v13, %v1518_v13  ;;  %v1886_v41 = vrot.slane %v1885_v32, 4 }
 0x36c   : > { %v1870_v46 = vmax.f32 %v1868_v17, %v1869_v28  ;;  %v1877_v37 = vmax.f32 %v1875_v19, %v1876_v29  ;;  %v1892_v47 = vsel %vm20700_vm8, %v1519_v57, -inf  ;;  %v1899_v48 = vsel %vm20700_vm8, %v1518_v13, -inf  ;;  %v2706_v17 = vld [vmem:[#allocation2 + $0x10] sm:$0xf] }
 0x36d   : > { %v1883_v52 = vrot.slane %v1882_v36, 1  ;;  %v2559_v54 = vunpack.c.l.b16 %v15219_v38  ;;  %v1887_v56 = vmax.f32 %v1885_v32, %v1886_v41  ;;  %v1893_v58 = vrot.slane %v1892_v47, 4 }
 0x36e   : > { %v15220_v61 = vpack.c.bf16 %v1870_v46, %v1870_v46  ;;  %v15221_v62 = vpack.c.bf16 %v1877_v37, %v1877_v37  ;;  %v1900_v1 = vrot.slane %v1899_v48, 4  ;;  %v1906_v2 = vsel %vm20700_vm8, %v1520_v40, -inf }
 0x36f   : > { %v1884_v3 = vmax.f32 %v1882_v36, %v1883_v52  ;;  %v2626_v11 = vsel %vm2617_vm12, %v2559_v54, %v2625_v31  ;;  %v1888_v20 = vrot.slane %v1887_v56, 2  ;;  %v1894_v7 = vmax.f32 %v1892_v47, %v1893_v58  ;;  %v19257_v47 = vld [vmem:[#allocation11] ss:$0 sm:$0xff] }
 0x370   : > { %v2560_v8 = vunpack.c.l.b16 %v15220_v61  ;;  %v2561_v10 = vunpack.c.l.b16 %v15221_v62  ;;  %v1901_v14 = vmax.f32 %v1899_v48, %v1900_v1  ;;  %v1907_v50 = vrot.slane %v1906_v2, 4 }
 0x371   : > { %v15272_v15 = vpack.c.bf16 %v1884_v3, %v1884_v3  ;;  %v1889_v19 = vmax.f32 %v1887_v56, %v1888_v20  ;;  %v1895_v24 = vrot.slane %v1894_v7, 2  ;;  %v1383_v26 = vmax.f32 %v19220_v12, 0.0 }
 0x372   : > { %v2627_v13 = vsel %vm2619_vm13, %v2560_v8, %v2626_v11  ;;  %v1902_v57 = vrot.slane %v1901_v14, 2  ;;  %v1908_v27 = vmax.f32 %v1906_v2, %v1907_v50  ;;  %v1310_v28 = vmul.f32 %v19100_v39, %v19151_v55 }
 0x373   : > { %v2628_v29 = vsel %vm2621_vm14, %v2561_v10, %v2627_v13  ;;  %v2710_v31 = vsel %vm19080_vm7, %v15272_v15, %v2709_v63  ;;  %v1890_v32 = vrot.slane %v1889_v19, 1  ;;  %v1896_v36 = vmax.f32 %v1894_v7, %v1895_v24 }
 0x374   : > { %v2667_v38 = vpack.c.b16 %v2628_v29, %v2628_v29  ;;  %2711 = vst [vmem:[#allocation2 + $0x14] sm:$0x1] %v2710_v31  ;;  %v1903_v40 = vmax.f32 %v1901_v14, %v1902_v57  ;;  %v1909_v41 = vrot.slane %v1908_v27, 2  ;;  %v1349_v12 = vadd.f32 %v19102_v43, %v1310_v28  ;;  %v19265_v43 = vld [vmem:[#allocation13] ss:$0 sm:$0xff] }
 0x375   : > { %v1891_v46 = vmax.f32 %v1889_v19, %v1890_v32  ;;  %v1897_v37 = vrot.slane %v1896_v36, 1  ;;  %v1315_v39 = vmul.f32 %v19257_v47, %v19153_v16  ;;  %v1313_v55 = vmul.f32 %v19257_v47, %v19155_v25 }
 0x376   : > { %v2707_v48 = vsel %vm19163_vm15, %v2667_v38, %v2706_v17  ;;  %v1904_v52 = vrot.slane %v1903_v40, 1  ;;  %v1910_v54 = vmax.f32 %v1908_v27, %v1909_v41  ;;  %v1381_v56 = vmax.f32 %v1349_v12, 0.0 }
 0x377   : > { %2708 = vst [vmem:[#allocation2 + $0x10] sm:$0xf] %v2707_v48  ;;  %v1898_v58 = vmax.f32 %v1896_v36, %v1897_v37  ;;  %v15223_v61 = vpack.c.bf16 %v1891_v46, %v1891_v46  ;;  %v1354_v62 = vadd.f32 %v19265_v43, %v1315_v39  ;;  %v1352_v63 = vadd.f32 %v19265_v43, %v1313_v55 }
 0x378   : > { %v1905_v1 = vmax.f32 %v1903_v40, %v1904_v52  ;;  %v1911_v16 = vrot.slane %v1910_v54, 1  ;;  %v1409_v2 = vmax.f32 %v1381_v56, %v1383_v26  ;;  %v1316_v25 = vmul.f32 %v19257_v47, %v19157_v30 }
 0x379   : > { %v15224_v3 = vpack.c.bf16 %v1898_v58, %v1898_v58  ;;  %v2563_v11 = vunpack.c.l.b16 %v15223_v61  ;;  %v1386_v20 = vmax.f32 %v1354_v62, 0.0  ;;  %v1384_v7 = vmax.f32 %v1352_v63, 0.0 }
 0x37a   : > { %v1912_v8 = vmax.f32 %v1910_v54, %v1911_v16  ;;  %v15225_v10 = vpack.c.bf16 %v1905_v1, %v1905_v1  ;;  %v1521_v14 = vcombine.high %v1409_v2, %v1409_v2  ;;  %v1528_v50 = vrot.slane %v1409_v2, %v19114_v59 }
 0x37b   : > { %v2564_v15 = vunpack.c.l.b16 %v15224_v3  ;;  %v1410_v17 = vmax.f32 %v1384_v7, %v1386_v20  ;;  %v19273_v19 = vadd.f32 %v19265_v43, %v1316_v25  ;;  %v19277_v24 = vmul.f32 %v19257_v47, %v19159_v35 }
 0x37c   : > { %v15226_v26 = vpack.c.bf16 %v1912_v8, %v1912_v8  ;;  %v2565_v30 = vunpack.c.l.b16 %v15225_v10  ;;  %v1535_v13 = vrot.slane %v1521_v14, %v19114_v59  ;;  %v1536_v57 = vcombine.high %v1528_v50, %v1528_v50 }
 0x37d   : > { %v2629_v27 = vsel %vm2611_vm9, %v2564_v15, %v2563_v11  ;;  %v1913_v28 = vsel %vm20700_vm8, %v1528_v50, -inf  ;;  %v1538_v29 = vcombine.high %v1410_v17, %v1410_v17  ;;  %v1545_v31 = vrot.slane %v1410_v17, %v19114_v59 }
 0x37e   : > { %v2566_v32 = vunpack.c.l.b16 %v15226_v26  ;;  %v2630_v36 = vsel %vm2613_vm10, %v2565_v30, %v2629_v27  ;;  %v1537_v38 = vcombine.high %v1535_v13, %v1535_v13  ;;  %v1914_v40 = vrot.slane %v1913_v28, 4  ;;  %v3180_v42 = vld [vmem:[#allocation2 + $0x10] sm:$0xe] }
 0x37f   : > { %v1920_v35 = vsel %vm20700_vm8, %v1536_v57, -inf  ;;  %v1927_v41 = vsel %vm20700_vm8, %v1535_v13, -inf  ;;  %v1552_v12 = vrot.slane %v1538_v29, %v19114_v59  ;;  %v1553_v46 = vcombine.high %v1545_v31, %v1545_v31 }
 0x380   : > { %v1915_v37 = vmax.f32 %v1913_v28, %v1914_v40  ;;  %v1921_v39 = vrot.slane %v1920_v35, 4  ;;  %v1928_v55 = vrot.slane %v1927_v41, 4  ;;  %v1934_v48 = vsel %vm20700_vm8, %v1537_v38, -inf }
 0x381   : > { %v1935_v52 = vrot.slane %v1934_v48, 4  ;;  %v2631_v54 = vsel %vm2615_vm11, %v2566_v32, %v2630_v36  ;;  %v1554_v56 = vcombine.high %v1552_v12, %v1552_v12  ;;  %v1941_v58 = vsel %vm20700_vm8, %v1545_v31, -inf }
 0x382   : > { %v1916_v61 = vrot.slane %v1915_v37, 2  ;;  %v1922_v62 = vmax.f32 %v1920_v35, %v1921_v39  ;;  %v1929_v63 = vmax.f32 %v1927_v41, %v1928_v55  ;;  %v1942_v1 = vrot.slane %v1941_v58, 4  ;;  %v2715_v55 = vld [vmem:[#allocation2 + $0x1c] sm:$0x1] }
 0x383   : > { %v1936_v16 = vmax.f32 %v1934_v48, %v1935_v52  ;;  %v1948_v2 = vsel %vm20700_vm8, %v1553_v46, -inf  ;;  %v1955_v25 = vsel %vm20700_vm8, %v1552_v12, -inf  ;;  %v1962_v3 = vsel %vm20700_vm8, %v1554_v56, -inf }
 0x384   : > { %v1917_v11 = vmax.f32 %v1915_v37, %v1916_v61  ;;  %v1923_v20 = vrot.slane %v1922_v62, 2  ;;  %v1930_v7 = vrot.slane %v1929_v63, 2  ;;  %v1943_v8 = vmax.f32 %v1941_v58, %v1942_v1 }
 0x385   : > { %v1937_v10 = vrot.slane %v1936_v16, 2  ;;  %v1949_v14 = vrot.slane %v1948_v2, 4  ;;  %v1956_v50 = vrot.slane %v1955_v25, 4  ;;  %v1963_v15 = vrot.slane %v1962_v3, 4 }
 0x386   : > { %v1918_v17 = vrot.slane %v1917_v11, 1  ;;  %v1924_v26 = vmax.f32 %v1922_v62, %v1923_v20  ;;  %v1931_v30 = vmax.f32 %v1929_v63, %v1930_v7  ;;  %v1944_v13 = vrot.slane %v1943_v8, 2  ;;  %v19293_v62 = vpop.f32.mrb[30].mxu0 }
 0x387   : > { %v1938_v57 = vmax.f32 %v1936_v16, %v1937_v10  ;;  %v1950_v27 = vmax.f32 %v1948_v2, %v1949_v14  ;;  %v1957_v28 = vmax.f32 %v1955_v25, %v1956_v50  ;;  %v1964_v29 = vmax.f32 %v1962_v3, %v1963_v15  ;;  %v19295_v25 = vpop.f32.mrb[31].mxu0 }
 0x388   : > { %v1919_v31 = vmax.f32 %v1917_v11, %v1918_v17  ;;  %v1925_v32 = vrot.slane %v1924_v26, 1  ;;  %v1932_v36 = vrot.slane %v1931_v30, 1  ;;  %v1945_v38 = vmax.f32 %v1943_v8, %v1944_v13  ;;  %v16746_v8 = vld [vmem:[#allocation14 + $0x68] sm:$0xff]  }
 0x389   : > { %v1939_v40 = vrot.slane %v1938_v57, 1  ;;  %v1951_v35 = vrot.slane %v1950_v27, 2  ;;  %v1958_v41 = vrot.slane %v1957_v28, 2  ;;  %v1965_v12 = vrot.slane %v1964_v29, 2  ;;  %v2712_v17 = vld [vmem:[#allocation2 + $0x18] sm:$0xf]  ;;  %15718 = vmatprep.subr.bf16.mxu1 %v16746_v8 }
 0x38a   : > { %v1926_v46 = vmax.f32 %v1924_v26, %v1925_v32  ;;  %v1933_v37 = vmax.f32 %v1931_v30, %v1932_v36  ;;  %v15227_v39 = vpack.c.bf16 %v1919_v31, %v1919_v31  ;;  %v1946_v48 = vrot.slane %v1945_v38, 1  ;;  %15719 = vmatpush3.bf16.msra.mxu1 %v16746_v8 }
 0x38b   : > { %v1940_v52 = vmax.f32 %v1938_v57, %v1939_v40  ;;  %v1952_v56 = vmax.f32 %v1950_v27, %v1951_v35  ;;  %v1959_v58 = vmax.f32 %v1957_v28, %v1958_v41  ;;  %v1966_v61 = vmax.f32 %v1964_v29, %v1965_v12  ;;  %v16747_v40 = vld [vmem:[#allocation14 + $0x70] sm:$0xff]  }
 0x38c   : > { %v15228_v63 = vpack.c.bf16 %v1926_v46, %v1926_v46  ;;  %v15229_v1 = vpack.c.bf16 %v1933_v37, %v1933_v37  ;;  %v2567_v16 = vunpack.c.l.b16 %v15227_v39  ;;  %v1947_v2 = vmax.f32 %v1945_v38, %v1946_v48  ;;  %v2244_v37 = vld [vmem:[#allocation2 + $0x28] sm:$0x1]  ;;  %15720 = vmatprep.subr.bf16.mxu1 %v16747_v40 }
 0x38d   : > { %v15273_v3 = vpack.c.bf16 %v1940_v52, %v1940_v52  ;;  %v1953_v11 = vrot.slane %v1952_v56, 1  ;;  %v1960_v20 = vrot.slane %v1959_v58, 1  ;;  %v1967_v7 = vrot.slane %v1966_v61, 1 }
 0x38e   : > { %v2568_v10 = vunpack.c.l.b16 %v15228_v63  ;;  %v2569_v14 = vunpack.c.l.b16 %v15229_v1  ;;  %v2632_v50 = vsel %vm2617_vm12, %v2567_v16, %v2631_v54  ;;  %v15231_v15 = vpack.c.bf16 %v1947_v2, %v1947_v2  ;;  %15721 = vmatpush3.bf16.msra.mxu1 %v16747_v40  ;;  %v16748_v63 = vld [vmem:[#allocation14 + $0x78] sm:$0xff]   ;;  %v16749_v40 = vld [vmem:[#allocation14] sm:$0xff]  }
 0x38f   : > { %v2716_v26 = vsel %vm19080_vm7, %v15273_v3, %v2715_v55  ;;  %v1954_v30 = vmax.f32 %v1952_v56, %v1953_v11  ;;  %v1961_v13 = vmax.f32 %v1959_v58, %v1960_v20  ;;  %v1968_v57 = vmax.f32 %v1966_v61, %v1967_v7  ;;  %15722 = vmatprep.subr.bf16.mxu1 %v16748_v63 }
 0x390   : > { %v2633_v27 = vsel %vm2619_vm13, %v2568_v10, %v2632_v50  ;;  %2717 = vst [vmem:[#allocation2 + $0x1c] sm:$0x1] %v2716_v26  ;;  %v2571_v28 = vunpack.c.l.b16 %v15231_v15  ;;  %v1387_v29 = vmax.f32 %v19273_v19, 0.0  ;;  %v1353_v31 = vadd.f32 %v19265_v43, %v19277_v24 }
 0x391   : > { %v2634_v54 = vsel %vm2621_vm14, %v2569_v14, %v2633_v27  ;;  %v15232_v32 = vpack.c.bf16 %v1954_v30, %v1954_v30  ;;  %v15233_v36 = vpack.c.bf16 %v1961_v13, %v1961_v13  ;;  %v15234_v38 = vpack.c.bf16 %v1968_v57, %v1968_v57 }
 0x392   : > { %v2669_v35 = vpack.c.b16 %v2634_v54, %v2634_v54  ;;  %v1385_v41 = vmax.f32 %v1353_v31, 0.0  ;;  %v1319_v12 = vmul.f32 %v19257_v47, %v19174_v23  ;;  %v1317_v46 = vmul.f32 %v19257_v47, %v19178_v6  ;;  %15723 = vmatpush3.bf16.msra.mxu1 %v16748_v63 }
 0x393   : > { %v2572_v19 = vunpack.c.l.b16 %v15232_v32  ;;  %v2573_v39 = vunpack.c.l.b16 %v15233_v36  ;;  %v2574_v55 = vunpack.c.l.b16 %v15234_v38  ;;  %v1320_v24 = vmul.f32 %v19257_v47, %v19183_v9  ;;  %15732 = vmatprep.subr.bf16.mxu1 %v16749_v40 }
 0x394   : > { %v2713_v48 = vsel %vm19163_vm15, %v2669_v35, %v2712_v17  ;;  %v1411_v52 = vmax.f32 %v1385_v41, %v1387_v29  ;;  %v1358_v56 = vadd.f32 %v19265_v43, %v1319_v12  ;;  %v1356_v58 = vadd.f32 %v19265_v43, %v1317_v46 }
 0x395   : > { %2714 = vst [vmem:[#allocation2 + $0x18] sm:$0xf] %v2713_v48  ;;  %v2635_v23 = vsel %vm2611_vm9, %v2572_v19, %v2571_v28  ;;  %v1359_v6 = vadd.f32 %v19265_v43, %v1320_v24  ;;  %v1318_v61 = vmul.f32 %v19257_v47, %v19189_v18  ;;  %v2245_v9 = vsel %vm19080_vm7, 0, %v2244_v37 }
 0x396   : > { %v2636_v1 = vsel %vm2613_vm10, %v2573_v39, %v2635_v23  ;;  %v1555_v16 = vcombine.high %v1411_v52, %v1411_v52  ;;  %v1562_v2 = vrot.slane %v1411_v52, %v19114_v59  ;;  %v1390_v3 = vmax.f32 %v1358_v56, 0.0  ;;  %2246 = vst [vmem:[#allocation2 + $0x28] sm:$0x1] %v2245_v9 }
 0x397   : > { %v19324_v11 = vsel %vm2615_vm11, %v2574_v55, %v2636_v1  ;;  %v1388_v20 = vmax.f32 %v1356_v58, 0.0  ;;  %v1391_v7 = vmax.f32 %v1359_v6, 0.0  ;;  %v1357_v8 = vadd.f32 %v19265_v43, %v1318_v61 }
 0x398   : > { %v1569_v18 = vrot.slane %v1555_v16, %v19114_v59  ;;  %v1570_v10 = vcombine.high %v1562_v2, %v1562_v2  ;;  %v1969_v14 = vsel %vm20700_vm8, %v1562_v2, -inf  ;;  %v1323_v50 = vmul.f32 %v19257_v47, %v19206_v53 }
 0x399   : > { %v1970_v15 = vrot.slane %v1969_v14, 4  ;;  %v1412_v17 = vmax.f32 %v1388_v20, %v1390_v3  ;;  %v1389_v26 = vmax.f32 %v1357_v8, 0.0  ;;  %v19333_v30 = vmul.f32 %v19257_v47, %v19210_v60 }
 0x39a   : > { %v1571_v13 = vcombine.high %v1569_v18, %v1569_v18  ;;  %v1976_v57 = vsel %vm20700_vm8, %v1570_v10, -inf  ;;  %v1983_v27 = vsel %vm20700_vm8, %v1569_v18, -inf  ;;  %v19338_v28 = vadd.f32 %v19265_v43, %v1323_v50 }
 0x39b   : > { %v1971_v29 = vmax.f32 %v1969_v14, %v1970_v15  ;;  %v1977_v31 = vrot.slane %v1976_v57, 4  ;;  %v1984_v54 = vrot.slane %v1983_v27, 4  ;;  %v1572_v53 = vcombine.high %v1412_v17, %v1412_v17 }
 0x39c   : > { %v1990_v32 = vsel %vm20700_vm8, %v1571_v13, -inf  ;;  %v1579_v36 = vrot.slane %v1412_v17, %v19114_v59  ;;  %v19342_v38 = vmax.f32 %v1389_v26, %v1391_v7  ;;  %v1394_v60 = vmax.f32 %v19338_v28, 0.0 }
 0x39d   : > { %v1972_v35 = vrot.slane %v1971_v29, 2  ;;  %v1978_v41 = vmax.f32 %v1976_v57, %v1977_v31  ;;  %v1985_v12 = vmax.f32 %v1983_v27, %v1984_v54  ;;  %v1991_v46 = vrot.slane %v1990_v32, 4 }
 0x39e   : > { %v1586_v37 = vrot.slane %v1572_v53, %v19114_v59  ;;  %v1587_v19 = vcombine.high %v1579_v36, %v1579_v36  ;;  %v1997_v39 = vsel %vm20700_vm8, %v1579_v36, -inf  ;;  %v1589_v55 = vcombine.high %v19342_v38, %v19342_v38 }
 0x39f   : > { %v1973_v24 = vmax.f32 %v1971_v29, %v1972_v35  ;;  %v1979_v48 = vrot.slane %v1978_v41, 2  ;;  %v1986_v52 = vrot.slane %v1985_v12, 2  ;;  %v1992_v56 = vmax.f32 %v1990_v32, %v1991_v46 }
 0x3a0   : > { %v1588_v58 = vcombine.high %v1586_v37, %v1586_v37  ;;  %v1998_v23 = vrot.slane %v1997_v39, 4  ;;  %v2004_v6 = vsel %vm20700_vm8, %v1587_v19, -inf  ;;  %v2011_v61 = vsel %vm20700_vm8, %v1586_v37, -inf }
 0x3a1   : > { %v1974_v9 = vrot.slane %v1973_v24, 1  ;;  %v1980_v63 = vmax.f32 %v1978_v41, %v1979_v48  ;;  %v1987_v1 = vmax.f32 %v1985_v12, %v1986_v52  ;;  %v1993_v16 = vrot.slane %v1992_v56, 2  ;;  %v2721_v12 = vld [vmem:[#allocation2 + $0x24] sm:$0x1] }
 0x3a2   : > { %v1999_v2 = vmax.f32 %v1997_v39, %v1998_v23  ;;  %v2005_v3 = vrot.slane %v2004_v6, 4  ;;  %v2012_v20 = vrot.slane %v2011_v61, 4  ;;  %v2018_v7 = vsel %vm20700_vm8, %v1588_v58, -inf }
 0x3a3   : > { %v1975_v8 = vmax.f32 %v1973_v24, %v1974_v9  ;;  %v1981_v18 = vrot.slane %v1980_v63, 1  ;;  %v1988_v10 = vrot.slane %v1987_v1, 1  ;;  %v1994_v14 = vmax.f32 %v1992_v56, %v1993_v16 }
 0x3a4   : > { %v2000_v50 = vrot.slane %v1999_v2, 2  ;;  %v2006_v15 = vmax.f32 %v2004_v6, %v2005_v3  ;;  %v2013_v17 = vmax.f32 %v2011_v61, %v2012_v20  ;;  %v2019_v26 = vrot.slane %v2018_v7, 4 }
 0x3a5   : > { %v1982_v13 = vmax.f32 %v1980_v63, %v1981_v18  ;;  %v1989_v57 = vmax.f32 %v1987_v1, %v1988_v10  ;;  %v1995_v27 = vrot.slane %v1994_v14, 1  ;;  %v15235_v29 = vpack.c.bf16 %v1975_v8, %v1975_v8  ;;  %v2718_v63 = vld [vmem:[#allocation2 + $0x20] sm:$0xf] }
 0x3a6   : > { %v2001_v31 = vmax.f32 %v1999_v2, %v2000_v50  ;;  %v2007_v54 = vrot.slane %v2006_v15, 2  ;;  %v2014_v53 = vrot.slane %v2013_v17, 2  ;;  %v2020_v32 = vmax.f32 %v2018_v7, %v2019_v26 }
 0x3a7   : > { %v1996_v36 = vmax.f32 %v1994_v14, %v1995_v27  ;;  %v15236_v40 = vpack.c.bf16 %v1982_v13, %v1982_v13  ;;  %v15237_v35 = vpack.c.bf16 %v1989_v57, %v1989_v57  ;;  %v2575_v41 = vunpack.c.l.b16 %v15235_v29 }
 0x3a8   : > { %v2002_v46 = vrot.slane %v2001_v31, 1  ;;  %v2008_v37 = vmax.f32 %v2006_v15, %v2007_v54  ;;  %v2015_v19 = vmax.f32 %v2013_v17, %v2014_v53  ;;  %v2021_v39 = vrot.slane %v2020_v32, 2 }
 0x3a9   : > { %v2576_v24 = vunpack.c.l.b16 %v15236_v40  ;;  %v2577_v48 = vunpack.c.l.b16 %v15237_v35  ;;  %v2638_v52 = vsel %vm2617_vm12, %v2575_v41, %v19324_v11  ;;  %v15274_v56 = vpack.c.bf16 %v1996_v36, %v1996_v36 }
 0x3aa   : > { %v2003_v58 = vmax.f32 %v2001_v31, %v2002_v46  ;;  %v2009_v23 = vrot.slane %v2008_v37, 1  ;;  %v2016_v6 = vrot.slane %v2015_v19, 1  ;;  %v2022_v61 = vmax.f32 %v2020_v32, %v2021_v39 }
 0x3ab   : > { %v2639_v9 = vsel %vm2619_vm13, %v2576_v24, %v2638_v52  ;;  %v2722_v1 = vsel %vm19080_vm7, %v15274_v56, %v2721_v12  ;;  %v1596_v16 = vrot.slane %v19342_v38, %v19114_v59  ;;  %v1603_v2 = vrot.slane %v1589_v55, %v19114_v59 }
 0x3ac   : > { %v2640_v3 = vsel %vm2621_vm14, %v2577_v48, %v2639_v9  ;;  %2723 = vst [vmem:[#allocation2 + $0x24] sm:$0x1] %v2722_v1  ;;  %v2010_v11 = vmax.f32 %v2008_v37, %v2009_v23  ;;  %v2017_v20 = vmax.f32 %v2015_v19, %v2016_v6  ;;  %v2023_v7 = vrot.slane %v2022_v61, 1  ;;  %v2247_v48 = vld [vmem:[#allocation2 + $0x30] sm:$0x1] }
 0x3ad   : > { %v2671_v8 = vpack.c.b16 %v2640_v3, %v2640_v3  ;;  %v15239_v18 = vpack.c.bf16 %v2003_v58, %v2003_v58  ;;  %v1604_v10 = vcombine.high %v1596_v16, %v1596_v16  ;;  %v1605_v14 = vcombine.high %v1603_v2, %v1603_v2 }
 0x3ae   : > { %v2024_v50 = vmax.f32 %v2022_v61, %v2023_v7  ;;  %v15240_v15 = vpack.c.bf16 %v2010_v11, %v2010_v11  ;;  %v15241_v17 = vpack.c.bf16 %v2017_v20, %v2017_v20  ;;  %v2025_v26 = vsel %vm20700_vm8, %v1596_v16, -inf }
 0x3af   : > { %v2719_v38 = vsel %vm19163_vm15, %v2671_v8, %v2718_v63  ;;  %v2579_v13 = vunpack.c.l.b16 %v15239_v18  ;;  %v2026_v55 = vrot.slane %v2025_v26, 4  ;;  %v2032_v57 = vsel %vm20700_vm8, %v1604_v10, -inf }
 0x3b0   : > { %2720 = vst [vmem:[#allocation2 + $0x20] sm:$0xf] %v2719_v38  ;;  %v15242_v27 = vpack.c.bf16 %v2024_v50, %v2024_v50  ;;  %v2580_v29 = vunpack.c.l.b16 %v15240_v15  ;;  %v2581_v31 = vunpack.c.l.b16 %v15241_v17  ;;  %v2033_v54 = vrot.slane %v2032_v57, 4 }
 0x3b1   : > { %v2027_v53 = vmax.f32 %v2025_v26, %v2026_v55  ;;  %v2039_v32 = vsel %vm20700_vm8, %v1603_v2, -inf  ;;  %v2046_v36 = vsel %vm20700_vm8, %v1605_v14, -inf  ;;  %v1360_v40 = vadd.f32 %v19265_v43, %v19333_v30 }
 0x3b2   : > { %v2582_v35 = vunpack.c.l.b16 %v15242_v27  ;;  %v2641_v41 = vsel %vm2611_vm9, %v2580_v29, %v2579_v13  ;;  %v2034_v12 = vmax.f32 %v2032_v57, %v2033_v54  ;;  %v2040_v46 = vrot.slane %v2039_v32, 4 }
 0x3b3   : > { %v2642_v37 = vsel %vm2613_vm10, %v2581_v31, %v2641_v41  ;;  %v2028_v19 = vrot.slane %v2027_v53, 2  ;;  %v2047_v39 = vrot.slane %v2046_v36, 4  ;;  %v1392_v24 = vmax.f32 %v1360_v40, 0.0  ;;  %v2727_v41 = vld [vmem:[#allocation2 + $0x2c] sm:$0x1] }
 0x3b4   : > { %v2035_v52 = vrot.slane %v2034_v12, 2  ;;  %v2041_v56 = vmax.f32 %v2039_v32, %v2040_v46  ;;  %v2643_v58 = vsel %vm2615_vm11, %v2582_v35, %v2642_v37  ;;  %v1324_v23 = vmul.f32 %v19257_v47, %v19214_v0  ;;  %v2279_v37 = vld [vmem:[#allocation2 + $0x34] sm:$0x1] }
 0x3b5   : > { %v2029_v6 = vmax.f32 %v2027_v53, %v2028_v19  ;;  %v2048_v30 = vmax.f32 %v2046_v36, %v2047_v39  ;;  %v1414_v61 = vmax.f32 %v1392_v24, %v1394_v60  ;;  %v1322_v9 = vmul.f32 %v19257_v47, %v19217_v5 }
 0x3b6   : > { %v2036_v63 = vmax.f32 %v2034_v12, %v2035_v52  ;;  %v2042_v1 = vrot.slane %v2041_v56, 2  ;;  %v1363_v16 = vadd.f32 %v19265_v43, %v1324_v23  ;;  %v2248_v2 = vsel %vm19080_vm7, 0, %v2247_v48  ;;  %v2724_v23 = vld [vmem:[#allocation2 + $0x28] sm:$0xf] }
 0x3b7   : > { %v2030_v3 = vrot.slane %v2029_v6, 1  ;;  %v2049_v11 = vrot.slane %v2048_v30, 2  ;;  %v1606_v20 = vcombine.high %v1414_v61, %v1414_v61  ;;  %v1613_v0 = vrot.slane %v1414_v61, %v19114_v59  ;;  %2249 = vst [vmem:[#allocation2 + $0x30] sm:$0x1] %v2248_v2 }
 0x3b8   : > { %v2037_v7 = vrot.slane %v2036_v63, 1  ;;  %v2043_v8 = vmax.f32 %v2041_v56, %v2042_v1  ;;  %v1395_v28 = vmax.f32 %v1363_v16, 0.0  ;;  %v1361_v60 = vadd.f32 %v19265_v43, %v1322_v9 }
 0x3b9   : > { %v2031_v18 = vmax.f32 %v2029_v6, %v2030_v3  ;;  %v2050_v5 = vmax.f32 %v2048_v30, %v2049_v11  ;;  %v1620_v10 = vrot.slane %v1606_v20, %v19114_v59  ;;  %v1621_v14 = vcombine.high %v1613_v0, %v1613_v0 }
 0x3ba   : > { %v2038_v50 = vmax.f32 %v2036_v63, %v2037_v7  ;;  %v2044_v15 = vrot.slane %v2043_v8, 1  ;;  %v2053_v17 = vsel %vm20700_vm8, %v1613_v0, -inf  ;;  %v1393_v26 = vmax.f32 %v1361_v60, 0.0 }
 0x3bb   : > { %v2051_v38 = vrot.slane %v2050_v5, 1  ;;  %v15243_v13 = vpack.c.bf16 %v2031_v18, %v2031_v18  ;;  %v1622_v55 = vcombine.high %v1620_v10, %v1620_v10  ;;  %v2054_v57 = vrot.slane %v2053_v17, 4 }
 0x3bc   : > { %v2045_v27 = vmax.f32 %v2043_v8, %v2044_v15  ;;  %v15244_v29 = vpack.c.bf16 %v2038_v50, %v2038_v50  ;;  %v2060_v31 = vsel %vm20700_vm8, %v1621_v14, -inf  ;;  %v2067_v43 = vsel %vm20700_vm8, %v1620_v10, -inf }
 0x3bd   : > { %v2052_v54 = vmax.f32 %v2050_v5, %v2051_v38  ;;  %v2583_v53 = vunpack.c.l.b16 %v15243_v13  ;;  %v2055_v32 = vmax.f32 %v2053_v17, %v2054_v57  ;;  %v2061_v36 = vrot.slane %v2060_v31, 4 }
 0x3be   : > { %v15245_v40 = vpack.c.bf16 %v2045_v27, %v2045_v27  ;;  %v2584_v35 = vunpack.c.l.b16 %v15244_v29  ;;  %v2068_v12 = vrot.slane %v2067_v43, 4  ;;  %v2074_v46 = vsel %vm20700_vm8, %v1622_v55, -inf }
 0x3bf   : > { %v2644_v19 = vsel %vm2617_vm12, %v2583_v53, %v2643_v58  ;;  %v15275_v39 = vpack.c.bf16 %v2052_v54, %v2052_v54  ;;  %v2056_v24 = vrot.slane %v2055_v32, 2  ;;  %v2062_v48 = vmax.f32 %v2060_v31, %v2061_v36 }
 0x3c0   : > { %v2585_v52 = vunpack.c.l.b16 %v15245_v40  ;;  %v2645_v56 = vsel %vm2619_vm13, %v2584_v35, %v2644_v19  ;;  %v2069_v6 = vmax.f32 %v2067_v43, %v2068_v12  ;;  %v2075_v30 = vrot.slane %v2074_v46, 4 }
 0x3c1   : > { %v2728_v61 = vsel %vm19080_vm7, %v15275_v39, %v2727_v41  ;;  %v2057_v9 = vmax.f32 %v2055_v32, %v2056_v24  ;;  %v2063_v63 = vrot.slane %v2062_v48, 2  ;;  %v1415_v1 = vmax.f32 %v1393_v26, %v1395_v28 }
 0x3c2   : > { %v2646_v16 = vsel %vm2621_vm14, %v2585_v52, %v2645_v56  ;;  %2729 = vst [vmem:[#allocation2 + $0x2c] sm:$0x1] %v2728_v61  ;;  %v2070_v2 = vrot.slane %v2069_v6, 2  ;;  %v2076_v58 = vmax.f32 %v2074_v46, %v2075_v30  ;;  %v2280_v3 = vsel %vm19074_vm6, 0, %v2279_v37  ;;  %v19405_v52 = vld [vmem:[#allocation13] ss:$0 sm:$0xff] }
 0x3c3   : > { %v2673_v11 = vpack.c.b16 %v2646_v16, %v2646_v16  ;;  %v2058_v20 = vrot.slane %v2057_v9, 1  ;;  %v2064_v0 = vmax.f32 %v2062_v48, %v2063_v63  ;;  %v1623_v7 = vcombine.high %v1415_v1, %v1415_v1  ;;  %2281 = vst [vmem:[#allocation2 + $0x34] sm:$0x1] %v2280_v3 }
 0x3c4   : > { %v2071_v8 = vmax.f32 %v2069_v6, %v2070_v2  ;;  %v2077_v60 = vrot.slane %v2076_v58, 2  ;;  %v1630_v18 = vrot.slane %v1415_v1, %v19114_v59  ;;  %v1327_v28 = vmul.f32 %v19257_v47, %v19226_v34 }
 0x3c5   : > { %v2725_v5 = vsel %vm19163_vm15, %v2673_v11, %v2724_v23  ;;  %v2059_v10 = vmax.f32 %v2057_v9, %v2058_v20  ;;  %v2065_v14 = vrot.slane %v2064_v0, 1  ;;  %v1637_v50 = vrot.slane %v1623_v7, %v19114_v59  ;;  %v19410_v11 = vld [vmem:[#allocation11] ss:$0 sm:$0xff] }
 0x3c6   : > { %2726 = vst [vmem:[#allocation2 + $0x28] sm:$0xf] %v2725_v5  ;;  %v2072_v15 = vrot.slane %v2071_v8, 1  ;;  %v2078_v17 = vmax.f32 %v2076_v58, %v2077_v60  ;;  %v1638_v26 = vcombine.high %v1630_v18, %v1630_v18  ;;  %v2081_v38 = vsel %vm20700_vm8, %v1630_v18, -inf }
 0x3c7   : > { %v2066_v13 = vmax.f32 %v2064_v0, %v2065_v14  ;;  %v15247_v55 = vpack.c.bf16 %v2059_v10, %v2059_v10  ;;  %v1639_v57 = vcombine.high %v1637_v50, %v1637_v50  ;;  %v2082_v27 = vrot.slane %v2081_v38, 4  ;;  %v2250_v0 = vld [vmem:[#allocation2 + $0x38] sm:$0x1] }
 0x3c8   : > { %v2073_v29 = vmax.f32 %v2071_v8, %v2072_v15  ;;  %v2079_v31 = vrot.slane %v2078_v17, 1  ;;  %v2088_v34 = vsel %vm20700_vm8, %v1638_v26, -inf  ;;  %v2095_v47 = vsel %vm20700_vm8, %v1637_v50, -inf }
 0x3c9   : > { %v15248_v43 = vpack.c.bf16 %v2066_v13, %v2066_v13  ;;  %v2587_v54 = vunpack.c.l.b16 %v15247_v55  ;;  %v2083_v53 = vmax.f32 %v2081_v38, %v2082_v27  ;;  %v2089_v32 = vrot.slane %v2088_v34, 4 }
 0x3ca   : > { %v2080_v36 = vmax.f32 %v2078_v17, %v2079_v31  ;;  %v15249_v40 = vpack.c.bf16 %v2073_v29, %v2073_v29  ;;  %v2096_v35 = vrot.slane %v2095_v47, 4  ;;  %v2102_v41 = vsel %vm20700_vm8, %v1639_v57, -inf }
 0x3cb   : > { %v2588_v12 = vunpack.c.l.b16 %v15248_v43  ;;  %v2084_v46 = vrot.slane %v2083_v53, 2  ;;  %v2090_v37 = vmax.f32 %v2088_v34, %v2089_v32  ;;  %v2103_v19 = vrot.slane %v2102_v41, 4 }
 0x3cc   : > { %v15250_v39 = vpack.c.bf16 %v2080_v36, %v2080_v36  ;;  %v2589_v24 = vunpack.c.l.b16 %v15249_v40  ;;  %v2097_v48 = vmax.f32 %v2095_v47, %v2096_v35  ;;  %v1366_v56 = vadd.f32 %v19405_v52, %v1327_v28  ;;  %v2282_v28 = vld [vmem:[#allocation2 + $0x3c] sm:$0x1] }
 0x3cd   : > { %v2647_v23 = vsel %vm2611_vm9, %v2588_v12, %v2587_v54  ;;  %v2085_v6 = vmax.f32 %v2083_v53, %v2084_v46  ;;  %v2091_v30 = vrot.slane %v2090_v37, 2  ;;  %v2104_v61 = vmax.f32 %v2102_v41, %v2103_v19  ;;  %v2733_v53 = vld [vmem:[#allocation2 + $0x34] sm:$0x1] }
 0x3ce   : > { %v2590_v9 = vunpack.c.l.b16 %v15250_v39  ;;  %v2648_v63 = vsel %vm2613_vm10, %v2589_v24, %v2647_v23  ;;  %v2098_v1 = vrot.slane %v2097_v48, 2  ;;  %v1398_v16 = vmax.f32 %v1366_v56, 0.0 }
 0x3cf   : > { %v2086_v2 = vrot.slane %v2085_v6, 1  ;;  %v2092_v58 = vmax.f32 %v2090_v37, %v2091_v30  ;;  %v2105_v3 = vrot.slane %v2104_v61, 2  ;;  %v1325_v20 = vmul.f32 %v19410_v11, %v19229_v45 }
 0x3d0   : > { %v2099_v7 = vmax.f32 %v2097_v48, %v2098_v1  ;;  %v2649_v8 = vsel %vm2615_vm11, %v2590_v9, %v2648_v63  ;;  %v1328_v60 = vmul.f32 %v19410_v11, %v19231_v51  ;;  %v1326_v18 = vmul.f32 %v19410_v11, %v19233_v44 }
 0x3d1   : > { %v2087_v5 = vmax.f32 %v2085_v6, %v2086_v2  ;;  %v2093_v10 = vrot.slane %v2092_v58, 1  ;;  %v2106_v14 = vmax.f32 %v2104_v61, %v2105_v3  ;;  %v1364_v50 = vadd.f32 %v19405_v52, %v1325_v20  ;;  %v2730_v6 = vld [vmem:[#allocation2 + $0x30] sm:$0xf] }
 0x3d2   : > { %v2100_v15 = vrot.slane %v2099_v7, 1  ;;  %v1367_v17 = vadd.f32 %v19405_v52, %v1328_v60  ;;  %v1365_v45 = vadd.f32 %v19405_v52, %v1326_v18  ;;  %v2251_v26 = vsel %vm19080_vm7, 0, %v2250_v0 }
 0x3d3   : > { %v2094_v38 = vmax.f32 %v2092_v58, %v2093_v10  ;;  %v2107_v13 = vrot.slane %v2106_v14, 1  ;;  %v15251_v51 = vpack.c.bf16 %v2087_v5, %v2087_v5  ;;  %v1396_v55 = vmax.f32 %v1364_v50, 0.0  ;;  %2252 = vst [vmem:[#allocation2 + $0x38] sm:$0x1] %v2251_v26 }
 0x3d4   : > { %v2101_v44 = vmax.f32 %v2099_v7, %v2100_v15  ;;  %v1399_v57 = vmax.f32 %v1367_v17, 0.0  ;;  %v1397_v27 = vmax.f32 %v1365_v45, 0.0  ;;  %v2283_v29 = vsel %vm19074_vm6, 0, %v2282_v28 }
 0x3d5   : > { %v2108_v31 = vmax.f32 %v2106_v14, %v2107_v13  ;;  %v15252_v34 = vpack.c.bf16 %v2094_v38, %v2094_v38  ;;  %v2591_v47 = vunpack.c.l.b16 %v15251_v51  ;;  %v1416_v43 = vmax.f32 %v1396_v55, %v1398_v16  ;;  %2284 = vst [vmem:[#allocation2 + $0x3c] sm:$0x1] %v2283_v29 }
 0x3d6   : > { %v15253_v54 = vpack.c.bf16 %v2101_v44, %v2101_v44  ;;  %v1417_v32 = vmax.f32 %v1397_v27, %v1399_v57  ;;  %v1331_v36 = vmul.f32 %v19410_v11, %v19239_v4  ;;  %v19430_v40 = vmul.f32 %v19410_v11, %v19243_v33 }
 0x3d7   : > { %v2592_v35 = vunpack.c.l.b16 %v15252_v34  ;;  %v2650_v41 = vsel %vm2617_vm12, %v2591_v47, %v2649_v8  ;;  %v15276_v12 = vpack.c.bf16 %v2108_v31, %v2108_v31  ;;  %v1640_v46 = vcombine.high %v1416_v43, %v1416_v43 }
 0x3d8   : > { %v2593_v37 = vunpack.c.l.b16 %v15253_v54  ;;  %v1647_v19 = vrot.slane %v1416_v43, %v19114_v59  ;;  %v1657_v39 = vcombine.high %v1417_v32, %v1417_v32  ;;  %v1664_v24 = vrot.slane %v1417_v32, %v19114_v59 }
 0x3d9   : > { %v2651_v48 = vsel %vm2619_vm13, %v2592_v35, %v2650_v41  ;;  %v2734_v4 = vsel %vm19080_vm7, %v15276_v12, %v2733_v53  ;;  %v1654_v56 = vrot.slane %v1640_v46, %v19114_v59  ;;  %v19440_v33 = vadd.f32 %v19405_v52, %v1331_v36 }
 0x3da   : > { %v2652_v23 = vsel %vm2621_vm14, %v2593_v37, %v2651_v48  ;;  %2735 = vst [vmem:[#allocation2 + $0x34] sm:$0x1] %v2734_v4  ;;  %v1655_v30 = vcombine.high %v1647_v19, %v1647_v19  ;;  %v2109_v61 = vsel %vm20700_vm8, %v1647_v19, -inf  ;;  %v1671_v9 = vrot.slane %v1657_v39, %v19114_v59 }
 0x3db   : > { %v2675_v63 = vpack.c.b16 %v2652_v23, %v2652_v23  ;;  %v1656_v1 = vcombine.high %v1654_v56, %v1654_v56  ;;  %v2110_v16 = vrot.slane %v2109_v61, 4  ;;  %v2123_v2 = vsel %vm20700_vm8, %v1654_v56, -inf }
 0x3dc   : > { %v2116_v58 = vsel %vm20700_vm8, %v1655_v30, -inf  ;;  %v2124_v3 = vrot.slane %v2123_v2, 4  ;;  %v1672_v20 = vcombine.high %v1664_v24, %v1664_v24  ;;  %v1673_v0 = vcombine.high %v1671_v9, %v1671_v9 }
 0x3dd   : > { %v2731_v7 = vsel %vm19163_vm15, %v2675_v63, %v2730_v6  ;;  %v2111_v8 = vmax.f32 %v2109_v61, %v2110_v16  ;;  %v2117_v60 = vrot.slane %v2116_v58, 4  ;;  %v2130_v18 = vsel %vm20700_vm8, %v1656_v1, -inf }
 0x3de   : > { %2732 = vst [vmem:[#allocation2 + $0x30] sm:$0xf] %v2731_v7  ;;  %v2125_v28 = vmax.f32 %v2123_v2, %v2124_v3  ;;  %v2131_v5 = vrot.slane %v2130_v18, 4  ;;  %v2137_v10 = vsel %vm20700_vm8, %v1664_v24, -inf  ;;  %v2144_v14 = vsel %vm20700_vm8, %v1672_v20, -inf }
 0x3df   : > { %v2112_v50 = vrot.slane %v2111_v8, 2  ;;  %v2118_v15 = vmax.f32 %v2116_v58, %v2117_v60  ;;  %v2138_v17 = vrot.slane %v2137_v10, 4  ;;  %v2145_v45 = vrot.slane %v2144_v14, 4 }
 0x3e0   : > { %v2126_v26 = vrot.slane %v2125_v28, 2  ;;  %v2132_v38 = vmax.f32 %v2130_v18, %v2131_v5  ;;  %v2151_v13 = vsel %vm20700_vm8, %v1671_v9, -inf  ;;  %v2158_v51 = vsel %vm20700_vm8, %v1673_v0, -inf  ;;  %v19454_v18 = vld [vmem:[#allocation2 + $0x8] sm:$0xf] }
 0x3e1   : > { %v2113_v55 = vmax.f32 %v2111_v8, %v2112_v50  ;;  %v2119_v44 = vrot.slane %v2118_v15, 2  ;;  %v2139_v57 = vmax.f32 %v2137_v10, %v2138_v17  ;;  %v2146_v27 = vmax.f32 %v2144_v14, %v2145_v45 }
 0x3e2   : > { %v2127_v29 = vmax.f32 %v2125_v28, %v2126_v26  ;;  %v2133_v31 = vrot.slane %v2132_v38, 2  ;;  %v2152_v34 = vrot.slane %v2151_v13, 4  ;;  %v2159_v47 = vrot.slane %v2158_v51, 4 }
 0x3e3   : > { %v2114_v43 = vrot.slane %v2113_v55, 1  ;;  %v2120_v54 = vmax.f32 %v2118_v15, %v2119_v44  ;;  %v2140_v53 = vrot.slane %v2139_v57, 2  ;;  %v2147_v32 = vrot.slane %v2146_v27, 2 }
 0x3e4   : > { %v2128_v36 = vrot.slane %v2127_v29, 1  ;;  %v2134_v35 = vmax.f32 %v2132_v38, %v2133_v31  ;;  %v2153_v41 = vmax.f32 %v2151_v13, %v2152_v34  ;;  %v2160_v12 = vmax.f32 %v2158_v51, %v2159_v47  ;;  %v2739_v13 = vld [vmem:[#allocation2 + $0x3c] sm:$0x1]  ;;  %v2736_v47 = vld [vmem:[#allocation2 + $0x38] sm:$0xf] }
 0x3e5   : > { %v2115_v46 = vmax.f32 %v2113_v55, %v2114_v43  ;;  %v2121_v37 = vrot.slane %v2120_v54, 1  ;;  %v2141_v19 = vmax.f32 %v2139_v57, %v2140_v53  ;;  %v2148_v39 = vmax.f32 %v2146_v27, %v2147_v32 }
 0x3e6   : > { %v2129_v24 = vmax.f32 %v2127_v29, %v2128_v36  ;;  %v2135_v48 = vrot.slane %v2134_v35, 1  ;;  %v2154_v4 = vrot.slane %v2153_v41, 2  ;;  %v2161_v56 = vrot.slane %v2160_v12, 2 }
 0x3e7   : > { %v2122_v23 = vmax.f32 %v2120_v54, %v2121_v37  ;;  %v15255_v6 = vpack.c.bf16 %v2115_v46, %v2115_v46  ;;  %v2142_v30 = vrot.slane %v2141_v19, 1  ;;  %v2149_v61 = vrot.slane %v2148_v39, 1  ;;  %v19482_v37 = vld [vmem:[#allocation2 + $0xc] sm:$0x1] }
 0x3e8   : > { %v2136_v9 = vmax.f32 %v2134_v35, %v2135_v48  ;;  %v15257_v63 = vpack.c.bf16 %v2129_v24, %v2129_v24  ;;  %v2155_v1 = vmax.f32 %v2153_v41, %v2154_v4  ;;  %v2162_v16 = vmax.f32 %v2160_v12, %v2161_v56 }
 0x3e9   : > { %v15256_v2 = vpack.c.bf16 %v2122_v23, %v2122_v23  ;;  %v2595_v58 = vunpack.c.l.b16 %v15255_v6  ;;  %v2143_v3 = vmax.f32 %v2141_v19, %v2142_v30  ;;  %v2150_v20 = vmax.f32 %v2148_v39, %v2149_v61 }
 0x3ea   : > { %v15258_v0 = vpack.c.bf16 %v2136_v9, %v2136_v9  ;;  %v2597_v7 = vunpack.c.l.b16 %v15257_v63  ;;  %v2156_v8 = vrot.slane %v2155_v1, 1  ;;  %v2163_v60 = vrot.slane %v2162_v16, 1 }
 0x3eb   : > { %v2596_v28 = vunpack.c.l.b16 %v15256_v2  ;;  %v15259_v5 = vpack.c.bf16 %v2143_v3, %v2143_v3  ;;  %v15260_v10 = vpack.c.bf16 %v2150_v20, %v2150_v20  ;;  %v1402_v14 = vmax.f32 %v19440_v33, 0.0 }
 0x3ec   : > { %v2598_v50 = vunpack.c.l.b16 %v15258_v0  ;;  %v2157_v15 = vmax.f32 %v2155_v1, %v2156_v8  ;;  %v2164_v17 = vmax.f32 %v2162_v16, %v2163_v60  ;;  %v1368_v45 = vadd.f32 %v19405_v52, %v19430_v40  ;;  %v2285_v0 = vld [vmem:[#allocation2 + $0x44] sm:$0x1] }
 0x3ed   : > { %v2653_v26 = vsel %vm2611_vm9, %v2596_v28, %v2595_v58  ;;  %v2599_v38 = vunpack.c.l.b16 %v15259_v5  ;;  %v18405_v27 = vmov 0   ;;  %v2600_v40 = vunpack.c.l.b16 %v15260_v10  ;;  %v2253_v58 = vld [vmem:[#allocation2 + $0x40] sm:$0x1] }
 0x3ee   : > { %v2654_v51 = vsel %vm2613_vm10, %v2597_v7, %v2653_v26  ;;  %v15261_v55 = vpack.c.bf16 %v2157_v15, %v2157_v15  ;;  %v15277_v44 = vpack.c.bf16 %v2164_v17, %v2164_v17  ;;  %v1400_v57 = vmax.f32 %v1368_v45, 0.0  ;;  %2221 = vst [vmem:[#allocation2] sm:$0xf] %v18405_v27  ;;  %2222 = vst [vmem:[#allocation2 + $0x4] sm:$0x1] %v18405_v27 }
 0x3ef   : > { %2224 = vst [vmem:[#allocation2 + $0x48] sm:$0xf] %v18405_v27  ;;  %2225 = vst [vmem:[#allocation2 + $0x4c] sm:$0x1] %v18405_v27  ;;  %v2655_v33 = vsel %vm2615_vm11, %v2598_v50, %v2654_v51  ;;  %v2798_v29 = vshrl.u32 %v19454_v18, 16  ;;  %v2801_v36 = vshll.u32 %v19454_v18, 16  ;;  %v1332_v39 = vmul.f32 %v19410_v11, %v19293_v62 }
 0x3f0   : > { %4958 = vst [vmem:[#allocation3] sm:$0x7] %v18405_v27  ;;  %4960 = vst [vmem:[#allocation3 + $0x14] sm:$0x7] %v18405_v27  ;;  %v2601_v31 = vunpack.c.l.b16 %v15261_v55  ;;  %v2656_v34 = vsel %vm2617_vm12, %v2599_v38, %v2655_v33  ;;  %v2740_v43 = vsel %vm19080_vm7, %v15277_v44, %v2739_v13  ;;  %v1418_v54 = vmax.f32 %v1400_v57, %v1402_v14  ;;  %v19502_v15 = vld [vmem:[#allocation2 + $0x10] sm:$0xf] }
 0x3f1   : > { %6763 = vst [vmem:[#allocation4] sm:$0x7] %v18405_v27  ;;  %6765 = vst [vmem:[#allocation4 + $0x14] sm:$0x7] %v18405_v27  ;;  %v2657_v53 = vsel %vm2619_vm13, %v2600_v40, %v2656_v34  ;;  %v2800_v32 = vrot.slane %v2798_v29, 4  ;;  %v2803_v19 = vrot.slane %v2801_v36, 5  ;;  %v1330_v56 = vmul.f32 %v19410_v11, %v19295_v25 }
 0x3f2   : > { %8555 = vst [vmem:[#allocation5] sm:$0x3] %v18405_v27  ;;  %8557 = vst [vmem:[#allocation5 + $0x6] sm:$0x3] %v18405_v27  ;;  %v2658_v35 = vsel %vm2621_vm14, %v2601_v31, %v2657_v53  ;;  %v1674_v41 = vcombine.high %v1418_v54, %v1418_v54  ;;  %v1681_v12 = vrot.slane %v1418_v54, %v19114_v59  ;;  %v2807_v8 = vshll.u32 %v19482_v37, 16 }
 0x3f3   : > { %10328 = vst [vmem:[#allocation6] sm:$0xf] %v18405_v27  ;;  %10330 = vst [vmem:[#allocation6 + $0xc] sm:$0xf] %v18405_v27  ;;  %v2677_v46 = vpack.c.b16 %v2658_v35, %v2658_v35  ;;  %v2804_v9 = vor.u32 %v2803_v19, %v2800_v32  ;;  %v1371_v63 = vadd.f32 %v19405_v52, %v1332_v39  ;;  %v2254_v26 = vsel %vm19080_vm7, 0, %v2253_v58 }
 0x3f4   : > { %2741 = vst [vmem:[#allocation2 + $0x3c] sm:$0x1] %v2740_v43  ;;  %v1688_v24 = vrot.slane %v1674_v41, %v19114_v59  ;;  %v1689_v48 = vcombine.high %v1681_v12, %v1681_v12  ;;  %v2165_v4 = vsel %vm20700_vm8, %v1681_v12, -inf  ;;  %v1369_v28 = vadd.f32 %v19405_v52, %v1330_v56  ;;  %2255 = vst [vmem:[#allocation2 + $0x40] sm:$0x1] %v2254_v26  ;;  %v16822_v52 = vld [vmem:[#allocation14 + $0x228] sm:$0xff]  }
 0x3f5   : > { %v2737_v23 = vsel %vm19163_vm15, %v2677_v46, %v2736_v47  ;;  %v2166_v6 = vrot.slane %v2165_v4, 4  ;;  %v2229_v30 = vld [vmem:[#allocation2] sm:$0x1]  ;;  %v2261_v61 = vld [vmem:[#allocation2 + $0x4] sm:$0x1]  ;;  %v1403_v60 = vmax.f32 %v1371_v63, 0.0 }
 0x3f6   : > { %2738 = vst [vmem:[#allocation2 + $0x38] sm:$0xf] %v2737_v23  ;;  %v1690_v1 = vcombine.high %v1688_v24, %v1688_v24  ;;  %v2172_v62 = vsel %vm20700_vm8, %v1689_v48, -inf  ;;  %v2179_v16 = vsel %vm20700_vm8, %v1688_v24, -inf  ;;  %v2230_v2 = vsel %vm19080_vm7, 0, %v2229_v30 }
 0x3f7   : > { %v2167_v25 = vmax.f32 %v2165_v4, %v2166_v6  ;;  %v2173_v11 = vrot.slane %v2172_v62, 4  ;;  %v2180_v3 = vrot.slane %v2179_v16, 4  ;;  %2231 = vst [vmem:[#allocation2] sm:$0x1] %v2230_v2  ;;  %v2262_v20 = vsel %vm19074_vm6, 0, %v2261_v61 }
 0x3f8   : > { %v2186_v7 = vsel %vm20700_vm8, %v1690_v1, -inf  ;;  %2263 = vst [vmem:[#allocation2 + $0x4] sm:$0x1] %v2262_v20  ;;  %v19504_v17 = vrot.slane %v2804_v9, 4  ;;  %v1401_v45 = vmax.f32 %v1369_v28, 0.0  ;;  %v2286_v38 = vsel %vm19074_vm6, 0, %v2285_v0 }
 0x3f9   : > { %v2168_v5 = vrot.slane %v2167_v25, 2  ;;  %v2174_v10 = vmax.f32 %v2172_v62, %v2173_v11  ;;  %v2181_v14 = vmax.f32 %v2179_v16, %v2180_v3  ;;  %v2187_v50 = vrot.slane %v2186_v7, 4  ;;  %2287 = vst [vmem:[#allocation2 + $0x44] sm:$0x1] %v2286_v38 }
 0x3fa   : > { %v2809_v57 = vrot.slane %v2807_v8, 5  ;;  %v1419_v40 = vmax.f32 %v1401_v45, %v1403_v60  ;;  %v2812_v33 = vshrl.u32 %v19502_v15, 16  ;;  %v2815_v29 = vshll.u32 %v19502_v15, 16  ;;  %v19538_v45 = vld [vmem:[#allocation2 + $0x18] sm:$0xf] }
 0x3fb   : > { %v2169_v13 = vmax.f32 %v2167_v25, %v2168_v5  ;;  %v2175_v51 = vrot.slane %v2174_v10, 2  ;;  %v2182_v55 = vrot.slane %v2181_v14, 2  ;;  %v2188_v44 = vmax.f32 %v2186_v7, %v2187_v50  ;;  %v19533_v7 = vld [vmem:[#allocation2 + $0x14] sm:$0x1] }
 0x3fc   : > { %v2810_v53 = vsel %vm19512_vm3, %v19504_v17, %v2809_v57  ;;  %v1691_v32 = vcombine.high %v1419_v40, %v1419_v40  ;;  %v1698_v36 = vrot.slane %v1419_v40, %v19114_v59  ;;  %v19524_v35 = vrot.slane %v2812_v33, 4 }
 0x3fd   : > { %v2170_v31 = vrot.slane %v2169_v13, 1  ;;  %v2176_v34 = vmax.f32 %v2174_v10, %v2175_v51  ;;  %v2183_v47 = vmax.f32 %v2181_v14, %v2182_v55  ;;  %v2189_v43 = vrot.slane %v2188_v44, 2  ;;  %v19541_v51 = vld [vmem:[#allocation2 + $0x1c] sm:$0x1] }
 0x3fe   : > { %v19518_v54 = vld [vmem:[#allocation2] sm:$0xf]  ;;  %v2817_v56 = vrot.slane %v2815_v29, 5  ;;  %v1705_v62 = vrot.slane %v1691_v32, %v19114_v59  ;;  %v1706_v3 = vcombine.high %v1698_v36, %v1698_v36  ;;  %v2193_v0 = vsel %vm20700_vm8, %v1698_v36, -inf }
 0x3ff   : > { %v2171_v41 = vmax.f32 %v2169_v13, %v2170_v31  ;;  %v2177_v12 = vrot.slane %v2176_v34, 1  ;;  %v2184_v46 = vrot.slane %v2183_v47, 1  ;;  %v2190_v19 = vmax.f32 %v2188_v44, %v2189_v43  ;;  %v19526_v39 = vld [vmem:[#allocation2 + $0x4] sm:$0x1] }
 0x400   : > { %v2784_v24 = vshrl.u32 %v19518_v54, 16  ;;  %v2787_v48 = vshll.u32 %v19518_v54, 16  ;;  %v2793_v4 = vshll.u32 %v19526_v39, 16  ;;  %v1707_v20 = vcombine.high %v1705_v62, %v1705_v62 }
 0x401   : > { %v2178_v23 = vmax.f32 %v2176_v34, %v2177_v12  ;;  %v2185_v6 = vmax.f32 %v2183_v47, %v2184_v46  ;;  %v2191_v30 = vrot.slane %v2190_v19, 1  ;;  %v15263_v61 = vpack.c.bf16 %v2171_v41, %v2171_v41 }
 0x402   : > { %v2786_v9 = vrot.slane %v2784_v24, 4  ;;  %v2789_v63 = vrot.slane %v2787_v48, 5  ;;  %v2795_v1 = vrot.slane %v2793_v4, 5  ;;  %v2194_v5 = vrot.slane %v2193_v0, 4  ;;  %v19550_v24 = vld [vmem:[#allocation2 + $0x20] sm:$0xf] }
 0x403   : > { %v2192_v16 = vmax.f32 %v2190_v19, %v2191_v30  ;;  %v15264_v2 = vpack.c.bf16 %v2178_v23, %v2178_v23  ;;  %v15265_v58 = vpack.c.bf16 %v2185_v6, %v2185_v6  ;;  %v2603_v25 = vunpack.c.l.b16 %v15263_v61 }
 0x404   : > { %v2790_v11 = vor.u32 %v2789_v63, %v2786_v9  ;;  %v2200_v14 = vsel %vm20700_vm8, %v1706_v3, -inf  ;;  %v2207_v50 = vsel %vm20700_vm8, %v1705_v62, -inf  ;;  %v2214_v17 = vsel %vm20700_vm8, %v1707_v20, -inf }
 0x405   : > { %v15266_v8 = vpack.c.bf16 %v2192_v16, %v2192_v16  ;;  %v2604_v60 = vunpack.c.l.b16 %v15264_v2  ;;  %v2605_v28 = vunpack.c.l.b16 %v15265_v58  ;;  %v2195_v38 = vmax.f32 %v2193_v0, %v2194_v5 }
 0x406   : > { %v2791_v10 = vrot.slane %v2790_v11, 4  ;;  %v2201_v13 = vrot.slane %v2200_v14, 4  ;;  %v2821_v55 = vshll.u32 %v19533_v7, 16  ;;  %v2208_v57 = vrot.slane %v2207_v50, 4 }
 0x407   : > { %v2659_v26 = vsel %vm2611_vm9, %v2604_v60, %v2603_v25  ;;  %v2215_v40 = vrot.slane %v2214_v17, 4  ;;  %v2606_v33 = vunpack.c.l.b16 %v15266_v8  ;;  %v2196_v31 = vrot.slane %v2195_v38, 2  ;;  %v19555_v60 = vld [vmem:[#allocation2 + $0x24] sm:$0x1] }
 0x408   : > { %v2796_v44 = vsel %vm19512_vm3, %v2791_v10, %v2795_v1  ;;  %v2202_v34 = vmax.f32 %v2200_v14, %v2201_v13  ;;  %v2660_v47 = vsel %vm2613_vm10, %v2605_v28, %v2659_v26  ;;  %v2209_v43 = vmax.f32 %v2207_v50, %v2208_v57  ;;  %v19560_v50 = vld [vmem:[#allocation2 + $0x28] sm:$0xf]  ;;  %v2745_v13 = vld [vmem:[#allocation2 + $0x44] sm:$0x1] }
 0x409   : > { %v14280_v29 = vcombine.low %v2796_v44, %v2810_v53  ;;  %v2216_v32 = vmax.f32 %v2214_v17, %v2215_v40  ;;  %v2818_v36 = vor.u32 %v2817_v56, %v19524_v35  ;;  %v2197_v41 = vmax.f32 %v2195_v38, %v2196_v31  ;;  %v19564_v31 = vld [vmem:[#allocation2 + $0x2c] sm:$0x1] }
 0x40a   : > { %v2203_v12 = vrot.slane %v2202_v34, 2  ;;  %v2826_v46 = vshrl.u32 %v19538_v45, 16  ;;  %v2829_v19 = vshll.u32 %v19538_v45, 16  ;;  %v2210_v48 = vrot.slane %v2209_v43, 2 }
 0x40b   : > { %15724 = vmatprep.mubr.bf16.mxu1 %v14280_v29  ;;  %v2217_v4 = vrot.slane %v2216_v32, 2  ;;  %v2835_v53 = vshll.u32 %v19541_v51, 16  ;;  %v2198_v23 = vrot.slane %v2197_v41, 1  ;;  %v2661_v35 = vsel %vm2615_vm11, %v2606_v33, %v2660_v47  ;;  %v16750_v29 = vld [vmem:[#allocation14 + $0x8] sm:$0xff]   ;;  %v19567_v47 = vld [vmem:[#allocation2 + $0x30] sm:$0xf] }
 0x40c   : > { %v2204_v6 = vmax.f32 %v2202_v34, %v2203_v12  ;;  %v2828_v30 = vrot.slane %v2826_v46, 4  ;;  %v2831_v61 = vrot.slane %v2829_v19, 5  ;;  %v2211_v9 = vmax.f32 %v2209_v43, %v2210_v48  ;;  %v19574_v48 = vld [vmem:[#allocation2 + $0x34] sm:$0x1] }
 0x40d   : > { %v2218_v63 = vmax.f32 %v2216_v32, %v2217_v4  ;;  %v2819_v56 = vrot.slane %v2818_v36, 4  ;;  %v2199_v1 = vmax.f32 %v2197_v41, %v2198_v23  ;;  %v2823_v16 = vrot.slane %v2821_v55, 5  ;;  %v16751_v23 = vld [vmem:[#allocation14 + $0x10] sm:$0xff]  }
 0x40e   : > { %v2205_v62 = vrot.slane %v2204_v6, 1  ;;  %v2832_v2 = vor.u32 %v2831_v61, %v2828_v30  ;;  %v2212_v58 = vrot.slane %v2211_v9, 1  ;;  %v2837_v11 = vrot.slane %v2835_v53, 5  ;;  %v17698_v53 = vld [vmem:[#allocation14] sm:$0xff]   ;;  %v19578_v61 = vld [vmem:[#allocation2 + $0x38] sm:$0xf] }
 0x40f   : > { %v2219_v25 = vrot.slane %v2218_v63, 1  ;;  %v2840_v3 = vshrl.u32 %v19550_v24, 16  ;;  %v15267_v0 = vpack.c.bf16 %v2199_v1, %v2199_v1  ;;  %v2843_v28 = vshll.u32 %v19550_v24, 16  ;;  %v19582_v1 = vld [vmem:[#allocation2 + $0x3c] sm:$0x1] }
 0x410   : > { %v2206_v20 = vmax.f32 %v2204_v6, %v2205_v62  ;;  %v2833_v8 = vrot.slane %v2832_v2, 4  ;;  %v2213_v5 = vmax.f32 %v2211_v9, %v2212_v58  ;;  %v2824_v14 = vsel %vm19512_vm3, %v2819_v56, %v2823_v16 }
 0x411   : > { %v2220_v10 = vmax.f32 %v2218_v63, %v2219_v25  ;;  %v2842_v17 = vrot.slane %v2840_v3, 4  ;;  %v2607_v38 = vunpack.c.l.b16 %v15267_v0  ;;  %v2845_v44 = vrot.slane %v2843_v28, 5 }
 0x412   : > { %v15268_v26 = vpack.c.bf16 %v2206_v20, %v2206_v20  ;;  %v2838_v55 = vsel %vm19512_vm3, %v2833_v8, %v2837_v11  ;;  %v15269_v57 = vpack.c.bf16 %v2213_v5, %v2213_v5  ;;  %v2849_v34 = vshll.u32 %v19555_v60, 16 }
 0x413   : > { %v15278_v40 = vpack.c.bf16 %v2220_v10, %v2220_v10  ;;  %v14281_v33 = vcombine.low %v2824_v14, %v2838_v55  ;;  %v2662_v32 = vsel %vm2617_vm12, %v2607_v38, %v2661_v35  ;;  %v2846_v36 = vor.u32 %v2845_v44, %v2842_v17  ;;  %v2742_v35 = vld [vmem:[#allocation2 + $0x40] sm:$0xf]  ;;  %v16752_v17 = vld [vmem:[#allocation14 + $0x18] sm:$0xff]  }
 0x414   : > { %v2608_v43 = vunpack.c.l.b16 %v15268_v26  ;;  %v2854_v41 = vshrl.u32 %v19560_v50, 16  ;;  %v2609_v12 = vunpack.c.l.b16 %v15269_v57  ;;  %v2857_v19 = vshll.u32 %v19560_v50, 16  ;;  %v3181_v57 = vld [vmem:[#allocation2 + $0x18] sm:$0xe] }
 0x415   : > { %v2746_v46 = vsel %vm19080_vm7, %v15278_v40, %v2745_v13  ;;  %15725 = vmatmul.mubr.bf16.vlgmr.msra.gmra.mrb[0].mxu1 %v14281_v33  ;;  %v2863_v30 = vshll.u32 %v19564_v31, 16  ;;  %v2868_v9 = vshrl.u32 %v19567_v47, 16  ;;  %v2871_v62 = vshll.u32 %v19567_v47, 16 }
 0x416   : > { %v2663_v4 = vsel %vm2619_vm13, %v2608_v43, %v2662_v32  ;;  %2747 = vst [vmem:[#allocation2 + $0x44] sm:$0x1] %v2746_v46  ;;  %15733 = vmatpush3.bf16.msra.mxu1 %v17698_v53  ;;  %v2856_v6 = vrot.slane %v2854_v41, 4  ;;  %v2859_v56 = vrot.slane %v2857_v19, 5  ;;  %v2847_v2 = vrot.slane %v2846_v36, 4  ;;  %v16753_v36 = vld [vmem:[#allocation14 + $0x20] sm:$0xff]  }
 0x417   : > { %v2664_v63 = vsel %vm2621_vm14, %v2609_v12, %v2663_v4  ;;  %15734 = vmatprep.subr.bf16.mxu1 %v16750_v29  ;;  %v2851_v58 = vrot.slane %v2849_v34, 5  ;;  %v2870_v25 = vrot.slane %v2868_v9, 4  ;;  %v2873_v3 = vrot.slane %v2871_v62, 5  ;;  %v16754_v9 = vld [vmem:[#allocation14 + $0x28] sm:$0xff]   ;;  %v16758_v62 = vld [vmem:[#allocation14 + $0x80] sm:$0xff]  }
 0x418   : > { %v2679_v16 = vpack.c.b16 %v2664_v63, %v2664_v63  ;;  %v2860_v11 = vor.u32 %v2859_v56, %v2856_v6  ;;  %v2882_v20 = vshrl.u32 %v19578_v61, 16  ;;  %v2885_v0 = vshll.u32 %v19578_v61, 16  ;;  %v16757_v56 = vld [vmem:[#allocation14 + $0x38] sm:$0xff]   ;;  %v4964_v19 = vld [vmem:[#allocation3 + $0x4] sm:$0x1] }
 0x419   : > { %v2865_v28 = vrot.slane %v2863_v30, 5  ;;  %v2877_v5 = vshll.u32 %v19574_v48, 16  ;;  %v2891_v10 = vshll.u32 %v19582_v1, 16  ;;  %v2874_v26 = vor.u32 %v2873_v3, %v2870_v25  ;;  %v16761_v25 = vld [vmem:[#allocation14 + $0x88] sm:$0xff]  }
 0x41a   : > { %v2743_v8 = vsel %vm19163_vm15, %v2679_v16, %v2742_v35  ;;  %15735 = vmatpush3.bf16.msra.mxu1 %v16750_v29  ;;  %v2861_v14 = vrot.slane %v2860_v11, 4  ;;  %v2884_v38 = vrot.slane %v2882_v20, 4  ;;  %v2887_v13 = vrot.slane %v2885_v0, 5  ;;  %v16755_v35 = vld [vmem:[#allocation14 + $0x30] sm:$0xff]  }
 0x41b   : > { %2744 = vst [vmem:[#allocation2 + $0x40] sm:$0xf] %v2743_v8  ;;  %15736 = vmatprep.subr.bf16.mxu1 %v16751_v23  ;;  %v3215_v55 = vrot.slane %v19533_v7, 5  ;;  %v2852_v44 = vsel %vm19512_vm3, %v2847_v2, %v2851_v58  ;;  %v2875_v33 = vrot.slane %v2874_v26, 4  ;;  %vm3202_vm12 = vcmask 1042432   ;;  %v16762_v0 = vld [vmem:[#allocation14 + $0x90] sm:$0xff]  }
 0x41c   : > { %v2866_v40 = vsel %vm19512_vm3, %v2861_v14, %v2865_v28  ;;  %v2888_v29 = vor.u32 %v2887_v13, %v2884_v38  ;;  %v3219_v34 = vrot.slane %v19541_v51, 5  ;;  %v2879_v32 = vrot.slane %v2877_v5, 5  ;;  %v3178_v16 = vld [vmem:[#allocation2] sm:$0xe]  ;;  %v3179_v2 = vld [vmem:[#allocation2 + $0x8] sm:$0xe] }
 0x41d   : > { %v14282_v43 = vcombine.low %v2852_v44, %v2866_v40  ;;  %vm3203_vm14 = vcmask 1046532   ;;  %v2893_v41 = vrot.slane %v2891_v10, 5  ;;  %v14306_v12 = vrot.slane %v3180_v42, 9  ;;  %v16766_v5 = vld [vmem:[#allocation14 + $0xa8] sm:$0xff]   ;;  %v16767_v10 = vld [vmem:[#allocation14 + $0xb0] sm:$0xff]   ;;  %v16769_v13 = vld [vmem:[#allocation14 + $0xc0] sm:$0xff]  }
 0x41e   : > { %15737 = vmatpush3.bf16.msra.mxu1 %v16751_v23  ;;  %v2889_v7 = vrot.slane %v2888_v29, 4  ;;  %v14307_v46 = vrot.slane %v3181_v57, 9  ;;  %vm19598_vm15 = vmor %vm3202_vm12, %vm3203_vm14  ;;  %v2880_v4 = vsel %vm19512_vm3, %v2875_v33, %v2879_v32  ;;  %v14292_v63 = vcombine.low %v19518_v54, %v19454_v18  ;;  %v2288_v14 = vld [vmem:[#allocation2 + $0x4c] sm:$0x1]  ;;  %v3182_v26 = vld [vmem:[#allocation2 + $0x20] sm:$0xe] }
 0x41f   : > { %15738 = vmatprep.subr.bf16.mxu1 %v16752_v17  ;;  %15728 = vmatprep.mubr.bf16.mxu1 %v14282_v43  ;;  %v19608_v53 = vsel %vm19598_vm15, %v14306_v12, %v3215_v55  ;;  %v14293_v58 = vcombine.low %v19502_v15, %v19538_v45  ;;  %v14294_v18 = vcombine.low %v19550_v24, %v19560_v50  ;;  %v3207_v54 = vrot.slane %v19526_v39, 5  ;;  %v16764_v45 = vld [vmem:[#allocation14 + $0x98] sm:$0xff]   ;;  %v3185_v40 = vld [vmem:[#allocation2 + $0x38] sm:$0xe]  ;;  %v3184_v29 = vld [vmem:[#allocation2 + $0x30] sm:$0xe] }
 0x420   : > { %v2894_v51 = vsel %vm19512_vm3, %v2889_v7, %v2893_v41  ;;  %v19612_v23 = vsel %vm19598_vm15, %v14307_v46, %v3219_v34  ;;  %v14304_v11 = vrot.slane %v3178_v16, 9  ;;  %v14305_v3 = vrot.slane %v3179_v2, 9  ;;  %v2256_v50 = vld [vmem:[#allocation2 + $0x48] sm:$0x1]  ;;  %v16770_v33 = vld [vmem:[#allocation14 + $0xc8] sm:$0xff]   ;;  %v16771_v32 = vld [vmem:[#allocation14 + $0xd0] sm:$0xff]  }
 0x421   : > { %v14283_v6 = vcombine.low %v2880_v4, %v2894_v51  ;;  %v14313_v30 = vcombine.low %v19608_v53, %v19612_v23  ;;  %v3211_v20 = vrot.slane %v19482_v37, 5  ;;  %v14295_v39 = vcombine.low %v19567_v47, %v19578_v61  ;;  %v16765_v37 = vld [vmem:[#allocation14 + $0xa0] sm:$0xff]   ;;  %v3183_v47 = vld [vmem:[#allocation2 + $0x28] sm:$0xe]  ;;  %v16775_v51 = vld [vmem:[#allocation14 + $0xe8] sm:$0xff]  }
 0x422   : > { %15739 = vmatpush3.bf16.msra.mxu1 %v16752_v17  ;;  %v3208_v8 = vsel %vm19598_vm15, %v14304_v11, %v3207_v54  ;;  %v2257_v28 = vsel %vm19080_vm7, 0, %v2256_v50  ;;  %v16768_v61 = vld [vmem:[#allocation14 + $0xb8] sm:$0xff]   ;;  %v2289_v17 = vsel %vm19074_vm6, 0, %v2288_v14  ;;  %v14309_v38 = vrot.slane %v3183_v47, 9  ;;  %v16776_v53 = vld [vmem:[#allocation14 + $0xf0] sm:$0xff]   ;;  %v16779_v16 = vld [vmem:[#allocation14 + $0x100] sm:$0xff]  }
 0x423   : > { %15740 = vmatprep.subr.bf16.mxu1 %v16753_v36  ;;  %15729 = vmatmul.mubr.bf16.gmra.mrb[4].mxu1 %v14283_v6  ;;  %v3212_v15 = vsel %vm19598_vm15, %v14305_v3, %v3211_v20  ;;  %2258 = vst [vmem:[#allocation2 + $0x48] sm:$0x1] %v2257_v28  ;;  %2290 = vst [vmem:[#allocation2 + $0x4c] sm:$0x1] %v2289_v17  ;;  %v14308_v55 = vrot.slane %v3182_v26, 9  ;;  %v3227_v44 = vrot.slane %v19564_v31, 5 }
 0x424   : > { %15748 = vmatprep.mubr.bf16.mxu1 %v14292_v63  ;;  %v14312_v24 = vcombine.low %v3208_v8, %v3212_v15  ;;  %v3223_v42 = vrot.slane %v19555_v60, 5  ;;  %v14311_v43 = vrot.slane %v3185_v40, 9  ;;  %v14310_v60 = vrot.slane %v3184_v29, 9  ;;  %v16773_v46 = vld [vmem:[#allocation14 + $0xd8] sm:$0xff]   ;;  %v19651_v54 = vld [vmem:[#allocation2 + $0xc] sm:$0x1] }
 0x425   : > { %v3228_v57 = vsel %vm19598_vm15, %v14309_v38, %v3227_v44  ;;  %v3235_v31 = vrot.slane %v19582_v1, 5  ;;  %v16772_v4 = vld [vmem:[#allocation2 + $0x8] ss:$8 sps:$4 sm:$0xff]   ;;  %v16778_v11 = vld [vmem:[#allocation2 + $0x18] ss:$8 sps:$4 sm:$0xff]   ;;  %v3587_v15 = vshll.u32 %v19651_v54, 16 }
 0x426   : > { %15741 = vmatpush3.bf16.msra.mxu1 %v16753_v36  ;;  %v3224_v21 = vsel %vm19598_vm15, %v14308_v55, %v3223_v42  ;;  %v3231_v36 = vrot.slane %v19574_v48, 5  ;;  %v16774_v1 = vld [vmem:[#allocation14 + $0xe0] sm:$0xff]   ;;  %v3561_v23 = vld [vmem:[#allocation2 + $0x8] sm:$0xf]  ;;  %v16781_v3 = vld [vmem:[#allocation14 + $0x108] sm:$0xff]  }
 0x427   : > { %15742 = vmatprep.subr.bf16.mxu1 %v16754_v9  ;;  %v14314_v34 = vcombine.low %v3224_v21, %v3228_v57  ;;  %v3236_v7 = vsel %vm19598_vm15, %v14311_v43, %v3235_v31  ;;  %v3563_v48 = vld [vmem:[#allocation2 + $0x10] sm:$0xf]  ;;  %v3578_v63 = vshrl.u32 %v3561_v23, 16  ;;  %v16784_v14 = vld [vmem:[#allocation14 + $0x118] sm:$0xff]   ;;  %v3565_v38 = vld [vmem:[#allocation2 + $0x18] sm:$0xf] }
 0x428   : > { %v3232_v41 = vsel %vm19598_vm15, %v14310_v60, %v3231_v36  ;;  %v3592_v6 = vshrl.u32 %v3563_v48, 16  ;;  %v16780_v8 = vld [vmem:[#allocation2 + $0x28] ss:$8 sps:$4 sm:$0xff]   ;;  %v3606_v40 = vshrl.u32 %v3565_v38, 16  ;;  %v3609_v21 = vshll.u32 %v3565_v38, 16 }
 0x429   : > { %v14315_v12 = vcombine.low %v3232_v41, %v3236_v7  ;;  %v3580_v2 = vrot.slane %v3578_v63, 4  ;;  %v3571_v17 = vld [vmem:[#allocation2 + $0x30] sm:$0xf]  ;;  %v3569_v44 = vld [vmem:[#allocation2 + $0x28] sm:$0xf] }
 0x42a   : > { %15743 = vmatpush3.bf16.msra.mxu1 %v16754_v9  ;;  %v16777_v9 = vld [vmem:[#allocation14 + $0xf8] sm:$0xff]   ;;  %v16785_v26 = vld [vmem:[#allocation14 + $0x120] sm:$0xff]   ;;  %v3648_v42 = vshrl.u32 %v3571_v17, 16  ;;  %v3651_v57 = vshll.u32 %v3571_v17, 16  ;;  %v3634_v29 = vshrl.u32 %v3569_v44, 16  ;;  %v3608_v41 = vrot.slane %v3606_v40, 4 }
 0x42b   : > { %15744 = vmatprep.subr.bf16.mxu1 %v16755_v35  ;;  %v3575_v36 = vld [vmem:[#allocation2 + $0x40] sm:$0xf]  ;;  %v19659_v7 = vld [vmem:[#allocation2 + $0x24] sm:$0x1]  ;;  %vm4980_vm6 = vsmask.f32 7946 }
 0x42c   : > { %v3650_v31 = vrot.slane %v3648_v42, 4  ;;  %v3844_v42 = vld [vmem:[#allocation2 + $0x10] sm:$0xe]  ;;  %vm19780_vm1 = vmand %vm2611_vm9, %vm4980_vm6  ;;  %vm5178_vm6 = vsmask.f32 5392 }
 0x42e   : > { %15745 = vmatpush3.bf16.msra.mxu1 %v16755_v35  ;;  %v3581_v35 = vshll.u32 %v3561_v23, 16  ;;  %v3676_v23 = vshrl.u32 %v3575_v36, 16 }
 0x42f   : > { %15746 = vmatprep.subr.bf16.mxu1 %v16757_v56 }
 0x432   : > { %15747 = vmatpush3.bf16.msra.mxu1 %v16757_v56  ;;  %v3594_v56 = vrot.slane %v3592_v6, 4  ;;  %v3679_v6 = vshll.u32 %v3575_v36, 16  ;;  %v16791_v36 = vld [vmem:[#allocation14 + $0x150] sm:$0xff]  }
 0x433   : > { %15756 = vmatprep.subr.bf16.mxu1 %v16758_v62 }
 0x435   : > { %15749 = vmatmul.mubr.bf16.vlgmr.msra.gmra.mrb[0].mxu1 %v14293_v58  ;;  %v3583_v58 = vrot.slane %v3581_v35, 5  ;;  %v3629_v35 = vshll.u32 %v19659_v7, 16 }
 0x436   : > { %15757 = vmatpush3.bf16.msra.mxu1 %v16758_v62  ;;  %15752 = vmatprep.mubr.bf16.mxu1 %v14294_v18 }
 0x437   : > { %15758 = vmatprep.subr.bf16.mxu1 %v16761_v25  ;;  %v3584_v20 = vor.u32 %v3583_v58, %v3580_v2  ;;  %v16788_v2 = vld [vmem:[#allocation14 + $0x138] sm:$0xff]  }
 0x43a   : > { %15759 = vmatpush3.bf16.msra.mxu1 %v16761_v25  ;;  %v19649_v25 = vld [vmem:[#allocation2 + $0x14] sm:$0x1] }
 0x43b   : > { %15760 = vmatprep.subr.bf16.mxu1 %v16762_v0 }
 0x43d   : > { %15753 = vmatmul.mubr.bf16.gmra.mrb[4].mxu1 %v14295_v39 }
 0x43e   : > { %15761 = vmatpush3.bf16.msra.mxu1 %v16762_v0  ;;  %15772 = vmatprep.mubr.bf16.mxu1 %v14312_v24  ;;  %v3601_v0 = vshll.u32 %v19649_v25, 16  ;;  %v3585_v24 = vrot.slane %v3584_v20, 4  ;;  %v3678_v20 = vrot.slane %v3676_v23, 4 }
 0x43f   : > { %15762 = vmatprep.subr.bf16.mxu1 %v16764_v45 }
 0x440   : > { %v3603_v50 = vrot.slane %v3601_v0, 5  ;;  %v3681_v0 = vrot.slane %v3679_v6, 5 }
 0x442   : > { %15763 = vmatpush3.bf16.msra.mxu1 %v16764_v45  ;;  %v16783_v45 = vld [vmem:[#allocation14 + $0x110] sm:$0xff]  }
 0x443   : > { %15764 = vmatprep.subr.bf16.mxu1 %v16765_v37 }
 0x446   : > { %15765 = vmatpush3.bf16.msra.mxu1 %v16765_v37  ;;  %v3589_v37 = vrot.slane %v3587_v15, 5 }
 0x447   : > { %15766 = vmatprep.subr.bf16.mxu1 %v16766_v5 }
 0x44a   : > { %15767 = vmatpush3.bf16.msra.mxu1 %v16766_v5  ;;  %v16782_v5 = vld [vmem:[#allocation2 + $0x38] ss:$8 sps:$4 sm:$0xff]  }
 0x44b   : > { %15768 = vmatprep.subr.bf16.mxu1 %v16767_v10 }
 0x44e   : > { %15769 = vmatpush3.bf16.msra.mxu1 %v16767_v10  ;;  %v3590_v10 = vsel %vm19512_vm3, %v3585_v24, %v3589_v37  ;;  %v16789_v37 = vld [vmem:[#allocation14 + $0x140] sm:$0xff]  }
 0x44f   : > { %15770 = vmatprep.subr.bf16.mxu1 %v16768_v61 }
 0x452   : > { %15771 = vmatpush3.bf16.msra.mxu1 %v16768_v61  ;;  %v3567_v61 = vld [vmem:[#allocation2 + $0x20] sm:$0xf] }
 0x453   : > { %15780 = vmatprep.subr.bf16.mxu1 %v16769_v13  ;;  %v3623_v55 = vshll.u32 %v3567_v61, 16 }
 0x455   : > { %15773 = vmatmul.mubr.bf16.vlgmr.msra.gmra.mrb[0].mxu1 %v14313_v30  ;;  %v3595_v30 = vshll.u32 %v3563_v48, 16  ;;  %v3625_v60 = vrot.slane %v3623_v55, 5 }
 0x456   : > { %15776 = vmatprep.mubr.bf16.mxu1 %v14314_v34  ;;  %15781 = vmatpush3.bf16.msra.mxu1 %v16769_v13  ;;  %v3620_v13 = vshrl.u32 %v3567_v61, 16  ;;  %v3637_v34 = vshll.u32 %v3569_v44, 16  ;;  %v3682_v61 = vor.u32 %v3681_v0, %v3678_v20  ;;  %v3881_v0 = vrot.slane %v19659_v7, 5 }
 0x457   : > { %15782 = vmatprep.subr.bf16.mxu1 %v16770_v33  ;;  %v3597_v62 = vrot.slane %v3595_v30, 5  ;;  %v19663_v30 = vld [vmem:[#allocation2 + $0x1c] sm:$0x1] }
 0x458   : > { %v3622_v43 = vrot.slane %v3620_v13, 4  ;;  %v19678_v13 = vld [vmem:[#allocation2 + $0x3c] sm:$0x1] }
 0x459   : > { %v3598_v18 = vor.u32 %v3597_v62, %v3594_v56  ;;  %v19666_v56 = vld [vmem:[#allocation2 + $0x2c] sm:$0x1] }
 0x45a   : > { %15783 = vmatpush3.bf16.msra.mxu1 %v16770_v33  ;;  %v16786_v33 = vld [vmem:[#allocation14 + $0x128] sm:$0xff]   ;;  %v3626_v48 = vor.u32 %v3625_v60, %v3622_v43  ;;  %v3843_v60 = vld [vmem:[#allocation2 + $0x8] sm:$0xe] }
 0x45b   : > { %15784 = vmatprep.subr.bf16.mxu1 %v16771_v32  ;;  %v3599_v39 = vrot.slane %v3598_v18, 4 }
 0x45d   : > { %15777 = vmatmul.mubr.bf16.gmra.mrb[4].mxu1 %v14315_v12  ;;  %v3604_v28 = vsel %vm19512_vm3, %v3599_v39, %v3603_v50  ;;  %v3611_v12 = vrot.slane %v3609_v21, 5  ;;  %v16790_v21 = vld [vmem:[#allocation14 + $0x148] sm:$0xff]  }
 0x45e   : > { %15785 = vmatpush3.bf16.msra.mxu1 %v16771_v32  ;;  %15796 = vmatprep.mubr.bf16.mxu1 %v16772_v4  ;;  %v14336_v47 = vcombine.low %v3590_v10, %v3604_v28  ;;  %v3653_v32 = vrot.slane %v3651_v57, 5  ;;  %v3636_v4 = vrot.slane %v3634_v29, 4  ;;  %v19671_v10 = vld [vmem:[#allocation2 + $0x44] sm:$0x1]  ;;  %v3671_v29 = vshll.u32 %v19678_v13, 16 }
 0x45f   : > { %15786 = vmatprep.subr.bf16.mxu1 %v16773_v46  ;;  %v3612_v63 = vor.u32 %v3611_v12, %v3608_v41  ;;  %v3685_v17 = vshll.u32 %v19671_v10, 16  ;;  %v14348_v41 = vrot.slane %v3843_v60, 9  ;;  %v3873_v12 = vrot.slane %v19649_v25, 5  ;;  %v16805_v60 = vld [vmem:[#allocation14 + $0x1b8] sm:$0xff]  }
 0x461   : > { %v3613_v39 = vrot.slane %v3612_v63, 4  ;;  %v3687_v43 = vrot.slane %v3685_v17, 5  ;;  %v16793_v63 = vld [vmem:[#allocation14 + $0x160] sm:$0xff]   ;;  %v3897_v17 = vrot.slane %v19671_v10, 5 }
 0x462   : > { %15787 = vmatpush3.bf16.msra.mxu1 %v16773_v46  ;;  %v16787_v46 = vld [vmem:[#allocation14 + $0x130] sm:$0xff]   ;;  %v16802_v10 = vld [vmem:[#allocation14 + $0x1a0] sm:$0xff]  }
 0x463   : > { %15788 = vmatprep.subr.bf16.mxu1 %v16774_v1 }
 0x466   : > { %15789 = vmatpush3.bf16.msra.mxu1 %v16774_v1  ;;  %v3639_v1 = vrot.slane %v3637_v34, 5  ;;  %v3683_v34 = vrot.slane %v3682_v61, 4 }
 0x467   : > { %15790 = vmatprep.subr.bf16.mxu1 %v16775_v51 }
 0x468   : > { %v3640_v58 = vor.u32 %v3639_v1, %v3636_v4  ;;  %v3688_v4 = vsel %vm19512_vm3, %v3683_v34, %v3687_v43  ;;  %v3869_v1 = vrot.slane %v19651_v54, 5  ;;  %v16794_v54 = vld [vmem:[#allocation14 + $0x168] sm:$0xff]  }
 0x46a   : > { %15791 = vmatpush3.bf16.msra.mxu1 %v16775_v51  ;;  %v3573_v51 = vld [vmem:[#allocation2 + $0x38] sm:$0xf]  ;;  %v3641_v28 = vrot.slane %v3640_v58, 4  ;;  %v3870_v6 = vsel %vm19598_vm15, %v14348_v41, %v3869_v1  ;;  %v19713_v1 = vld [vmem:[#allocation2 + $0x1c] sm:$0x1] }
 0x46b   : > { %15792 = vmatprep.subr.bf16.mxu1 %v16776_v53  ;;  %v3662_v62 = vshrl.u32 %v3573_v51, 16  ;;  %v3845_v58 = vld [vmem:[#allocation2 + $0x18] sm:$0xe] }
 0x46c   : > { %v14350_v20 = vrot.slane %v3845_v58, 9 }
 0x46d   : > { %v3664_v24 = vrot.slane %v3662_v62, 4  ;;  %v3846_v62 = vld [vmem:[#allocation2 + $0x20] sm:$0xe] }
 0x46e   : > { %15793 = vmatpush3.bf16.msra.mxu1 %v16776_v53  ;;  %v19661_v53 = vld [vmem:[#allocation2 + $0x34] sm:$0x1] }
 0x46f   : > { %15794 = vmatprep.subr.bf16.mxu1 %v16777_v9  ;;  %v3657_v18 = vshll.u32 %v19661_v53, 16 }
 0x472   : > { %15795 = vmatpush3.bf16.msra.mxu1 %v16777_v9  ;;  %v3654_v9 = vor.u32 %v3653_v32, %v3650_v31  ;;  %v14349_v31 = vrot.slane %v3844_v42, 9 }
 0x473   : > { %15804 = vmatprep.subr.bf16.mxu1 %v16779_v16 }
 0x474   : > { %v3655_v15 = vrot.slane %v3654_v9, 4  ;;  %v16792_v9 = vld [vmem:[#allocation14 + $0x158] sm:$0xff]  }
 0x475   : > { %15797 = vmatmul.mubr.bf16.vlgmr.msra.gmra.mrb[0].mxu1 %v16778_v11  ;;  %v3615_v11 = vshll.u32 %v19663_v30, 16 }
 0x476   : > { %15800 = vmatprep.mubr.bf16.mxu1 %v16780_v8  ;;  %15805 = vmatpush3.bf16.msra.mxu1 %v16779_v16  ;;  %v3665_v16 = vshll.u32 %v3573_v51, 16  ;;  %v3643_v8 = vshll.u32 %v19666_v56, 16  ;;  %v3874_v51 = vsel %vm19598_vm15, %v14349_v31, %v3873_v12  ;;  %v16807_v12 = vld [vmem:[#allocation14 + $0x1c0] sm:$0xff]  }
 0x477   : > { %15806 = vmatprep.subr.bf16.mxu1 %v16781_v3  ;;  %v14356_v25 = vcombine.low %v3870_v6, %v3874_v51  ;;  %v16809_v6 = vld [vmem:[#allocation14 + $0x1c8] sm:$0xff]  }
 0x478   : > { %v3667_v50 = vrot.slane %v3665_v16, 5  ;;  %v3848_v16 = vld [vmem:[#allocation2 + $0x30] sm:$0xe] }
 0x47a   : > { %15807 = vmatpush3.bf16.msra.mxu1 %v16781_v3  ;;  %v3627_v3 = vrot.slane %v3626_v48, 4  ;;  %v3668_v44 = vor.u32 %v3667_v50, %v3664_v24  ;;  %v3885_v50 = vrot.slane %v19666_v56, 5 }
 0x47b   : > { %15808 = vmatprep.subr.bf16.mxu1 %v16783_v45 }
 0x47c   : > { %v3669_v32 = vrot.slane %v3668_v44, 4 }
 0x47d   : > { %15801 = vmatmul.mubr.bf16.gmra.mrb[4].mxu1 %v16782_v5  ;;  %v3659_v5 = vrot.slane %v3657_v18, 5  ;;  %v14351_v18 = vrot.slane %v3846_v62, 9  ;;  %v16811_v62 = vld [vmem:[#allocation14 + $0x1d0] sm:$0xff]  }
 0x47e   : > { %15809 = vmatpush3.bf16.msra.mxu1 %v16783_v45  ;;  %15820 = vmatprep.mubr.bf16.mxu1 %v14336_v47  ;;  %v3631_v45 = vrot.slane %v3629_v35, 5  ;;  %v16795_v35 = vld [vmem:[#allocation14 + $0x170] sm:$0xff]  }
 0x47f   : > { %15810 = vmatprep.subr.bf16.mxu1 %v16784_v14  ;;  %v3660_v38 = vsel %vm19512_vm3, %v3655_v15, %v3659_v5  ;;  %v3882_v24 = vsel %vm19598_vm15, %v14351_v18, %v3881_v0 }
 0x480   : > { %v3632_v47 = vsel %vm19512_vm3, %v3627_v3, %v3631_v45  ;;  %v14353_v3 = vrot.slane %v3848_v16, 9  ;;  %v3877_v45 = vrot.slane %v19663_v30, 5  ;;  %v3849_v30 = vld [vmem:[#allocation2 + $0x38] sm:$0xe] }
 0x481   : > { %v14354_v56 = vrot.slane %v3849_v30, 9 }
 0x482   : > { %15811 = vmatpush3.bf16.msra.mxu1 %v16784_v14  ;;  %v3617_v14 = vrot.slane %v3615_v11, 5  ;;  %v3847_v11 = vld [vmem:[#allocation2 + $0x28] sm:$0xe]  ;;  %v3878_v7 = vsel %vm19598_vm15, %v14350_v20, %v3877_v45  ;;  %v4228_v45 = vld [vmem:[#allocation2 + $0x20] sm:$0xf] }
 0x483   : > { %15812 = vmatprep.subr.bf16.mxu1 %v16785_v26  ;;  %v14352_v15 = vrot.slane %v3847_v11, 9  ;;  %v14357_v5 = vcombine.low %v3878_v7, %v3882_v24  ;;  %v16810_v11 = vld [vmem:[#allocation2 + $0x40] ss:$8 sps:$4 sm:$0xff]  }
 0x484   : > { %v3618_v55 = vsel %vm19512_vm3, %v3613_v39, %v3617_v14  ;;  %v3889_v39 = vrot.slane %v19661_v53, 5  ;;  %v16798_v14 = vld [vmem:[#allocation14 + $0x188] sm:$0xff]   ;;  %v16812_v20 = vld [vmem:[#allocation14 + $0x1d8] sm:$0xff]  }
 0x485   : > { %v14337_v57 = vcombine.low %v3618_v55, %v3632_v47  ;;  %v3886_v53 = vsel %vm19598_vm15, %v14352_v15, %v3885_v50  ;;  %v4234_v15 = vld [vmem:[#allocation2 + $0x38] sm:$0xf] }
 0x486   : > { %15813 = vmatpush3.bf16.msra.mxu1 %v16785_v26  ;;  %v3645_v26 = vrot.slane %v3643_v8, 5  ;;  %v16797_v8 = vld [vmem:[#allocation14 + $0x180] sm:$0xff]   ;;  %v4314_v7 = vshll.u32 %v4234_v15, 16 }
 0x487   : > { %15814 = vmatprep.subr.bf16.mxu1 %v16786_v33 }
 0x488   : > { %v3646_v40 = vsel %vm19512_vm3, %v3641_v28, %v3645_v26  ;;  %v3850_v28 = vld [vmem:[#allocation2 + $0x40] sm:$0xe] }
 0x489   : > { %v14355_v61 = vrot.slane %v3850_v28, 9  ;;  %v16799_v26 = vld [vmem:[#allocation14 + $0x190] sm:$0xff]   ;;  %v4311_v28 = vshrl.u32 %v4234_v15, 16 }
 0x48a   : > { %15815 = vmatpush3.bf16.msra.mxu1 %v16786_v33  ;;  %v14338_v33 = vcombine.low %v3646_v40, %v3660_v38  ;;  %v3893_v38 = vrot.slane %v19678_v13, 5  ;;  %v16800_v40 = vld [vmem:[#allocation2 + $0x10] ss:$8 sps:$4 sm:$0xff]  }
 0x48b   : > { %15816 = vmatprep.subr.bf16.mxu1 %v16787_v46  ;;  %v3898_v55 = vsel %vm19598_vm15, %v14355_v61, %v3897_v17  ;;  %v4226_v13 = vld [vmem:[#allocation2 + $0x18] sm:$0xf] }
 0x48c   : > { %v3894_v44 = vsel %vm19598_vm15, %v14354_v56, %v3893_v38  ;;  %v4255_v34 = vshrl.u32 %v4226_v13, 16  ;;  %v4258_v43 = vshll.u32 %v4226_v13, 16  ;;  %v4313_v56 = vrot.slane %v4311_v28, 4  ;;  %v4236_v38 = vld [vmem:[#allocation2 + $0x40] sm:$0xf] }
 0x48d   : > { %v14359_v42 = vcombine.low %v3894_v44, %v3898_v55  ;;  %v4238_v55 = vld [vmem:[#allocation2 + $0x48] sm:$0xf]  ;;  %v19723_v44 = vld [vmem:[#allocation2 + $0x24] sm:$0x1] }
 0x48e   : > { %15817 = vmatpush3.bf16.msra.mxu1 %v16787_v46  ;;  %v3673_v46 = vrot.slane %v3671_v29, 5  ;;  %v4224_v29 = vld [vmem:[#allocation2 + $0x10] sm:$0xf]  ;;  %v4260_v41 = vrot.slane %v4258_v43, 5  ;;  %v4328_v43 = vshll.u32 %v4236_v38, 16 }
 0x48f   : > { %15818 = vmatprep.subr.bf16.mxu1 %v16788_v2  ;;  %v4241_v31 = vshrl.u32 %v4224_v29, 16 }
 0x490   : > { %v3674_v48 = vsel %vm19512_vm3, %v3669_v32, %v3673_v46  ;;  %v4244_v32 = vshll.u32 %v4224_v29, 16  ;;  %v19727_v29 = vld [vmem:[#allocation2 + $0x3c] sm:$0x1] }
 0x491   : > { %v14339_v23 = vcombine.low %v3674_v48, %v3688_v4  ;;  %v4243_v46 = vrot.slane %v4241_v31, 4  ;;  %v19715_v48 = vld [vmem:[#allocation2 + $0x14] sm:$0x1]  ;;  %v4342_v31 = vshll.u32 %v4238_v55, 16 }
 0x492   : > { %15819 = vmatpush3.bf16.msra.mxu1 %v16788_v2  ;;  %v16796_v2 = vld [vmem:[#allocation14 + $0x178] sm:$0xff]   ;;  %v4246_v4 = vrot.slane %v4244_v32, 5 }
 0x493   : > { %15828 = vmatprep.subr.bf16.mxu1 %v16789_v37 }
 0x495   : > { %15821 = vmatmul.mubr.bf16.vlgmr.msra.gmra.mrb[0].mxu1 %v14337_v57  ;;  %v16801_v57 = vld [vmem:[#allocation14 + $0x198] sm:$0xff]  }
 0x496   : > { %15824 = vmatprep.mubr.bf16.mxu1 %v14338_v33  ;;  %15829 = vmatpush3.bf16.msra.mxu1 %v16789_v37  ;;  %v3890_v37 = vsel %vm19598_vm15, %v14353_v3, %v3889_v39  ;;  %v16804_v33 = vld [vmem:[#allocation14 + $0x1b0] sm:$0xff]   ;;  %v16813_v39 = vld [vmem:[#allocation14 + $0x1e0] sm:$0xff]  }
 0x497   : > { %15830 = vmatprep.subr.bf16.mxu1 %v16790_v21  ;;  %v14358_v47 = vcombine.low %v3886_v53, %v3890_v37  ;;  %v4232_v37 = vld [vmem:[#allocation2 + $0x30] sm:$0xf]  ;;  %v4272_v53 = vshll.u32 %v4228_v45, 16 }
 0x498   : > { %v4297_v61 = vshrl.u32 %v4232_v37, 16  ;;  %v4300_v17 = vshll.u32 %v4232_v37, 16 }
 0x49a   : > { %15831 = vmatpush3.bf16.msra.mxu1 %v16790_v21  ;;  %v16803_v21 = vld [vmem:[#allocation14 + $0x1a8] sm:$0xff]   ;;  %v4299_v13 = vrot.slane %v4297_v61, 4 }
 0x49b   : > { %15832 = vmatprep.subr.bf16.mxu1 %v16791_v36 }
 0x49d   : > { %15825 = vmatmul.mubr.bf16.gmra.mrb[4].mxu1 %v14339_v23  ;;  %v16806_v23 = vld [vmem:[#allocation2 + $0x20] ss:$8 sps:$4 sm:$0xff]  }
 0x49e   : > { %15833 = vmatpush3.bf16.msra.mxu1 %v16791_v36  ;;  %15844 = vmatprep.mubr.bf16.mxu1 %v14356_v25  ;;  %v4257_v36 = vrot.slane %v4255_v34, 4  ;;  %v4264_v25 = vshll.u32 %v19713_v1, 16  ;;  %v4325_v34 = vshrl.u32 %v4236_v38, 16 }
 0x49f   : > { %15834 = vmatprep.subr.bf16.mxu1 %v16792_v9 }
 0x4a0   : > { %v4261_v51 = vor.u32 %v4260_v41, %v4257_v36 }
 0x4a2   : > { %15835 = vmatpush3.bf16.msra.mxu1 %v16792_v9  ;;  %v4247_v9 = vor.u32 %v4246_v4, %v4243_v46  ;;  %v16816_v46 = vld [vmem:[#allocation14 + $0x1f8] sm:$0xff]   ;;  %v4278_v4 = vshll.u32 %v19723_v44, 16 }
 0x4a3   : > { %15836 = vmatprep.subr.bf16.mxu1 %v16793_v63 }
 0x4a4   : > { %v4248_v16 = vrot.slane %v4247_v9, 4  ;;  %v19734_v9 = vld [vmem:[#allocation2 + $0x44] sm:$0x1] }
 0x4a6   : > { %15837 = vmatpush3.bf16.msra.mxu1 %v16793_v63  ;;  %v16808_v63 = vld [vmem:[#allocation2 + $0x30] ss:$8 sps:$4 sm:$0xff]  }
 0x4a7   : > { %15838 = vmatprep.subr.bf16.mxu1 %v16794_v54 }
 0x4aa   : > { %15839 = vmatpush3.bf16.msra.mxu1 %v16794_v54  ;;  %v4250_v54 = vshll.u32 %v19715_v48, 16 }
 0x4ab   : > { %15840 = vmatprep.subr.bf16.mxu1 %v16795_v35 }
 0x4ac   : > { %v4252_v58 = vrot.slane %v4250_v54, 5 }
 0x4ae   : > { %15841 = vmatpush3.bf16.msra.mxu1 %v16795_v35  ;;  %v4262_v35 = vrot.slane %v4261_v51, 4  ;;  %v4253_v3 = vsel %vm19512_vm3, %v4248_v16, %v4252_v58 }
 0x4af   : > { %15842 = vmatprep.subr.bf16.mxu1 %v16796_v2 }
 0x4b2   : > { %15843 = vmatpush3.bf16.msra.mxu1 %v16796_v2  ;;  %v4266_v2 = vrot.slane %v4264_v25, 5  ;;  %v4327_v25 = vrot.slane %v4325_v34, 4 }
 0x4b3   : > { %15852 = vmatprep.subr.bf16.mxu1 %v16797_v8 }
 0x4b4   : > { %v4267_v18 = vsel %vm19512_vm3, %v4262_v35, %v4266_v2  ;;  %v4344_v35 = vrot.slane %v4342_v31, 5  ;;  %v19737_v2 = vld [vmem:[#allocation2 + $0x4c] sm:$0x1] }
 0x4b5   : > { %15845 = vmatmul.mubr.bf16.vlgmr.msra.gmra.mrb[0].mxu1 %v14357_v5  ;;  %v14380_v0 = vcombine.low %v4253_v3, %v4267_v18  ;;  %v4269_v5 = vshrl.u32 %v4228_v45, 16  ;;  %v16817_v3 = vld [vmem:[#allocation14 + $0x200] sm:$0xff]  }
 0x4b6   : > { %15848 = vmatprep.mubr.bf16.mxu1 %v14358_v47  ;;  %15853 = vmatpush3.bf16.msra.mxu1 %v16797_v8  ;;  %v4230_v8 = vld [vmem:[#allocation2 + $0x28] sm:$0xf] }
 0x4b7   : > { %15854 = vmatprep.subr.bf16.mxu1 %v16798_v14  ;;  %v4283_v24 = vshrl.u32 %v4230_v8, 16  ;;  %v4286_v50 = vshll.u32 %v4230_v8, 16  ;;  %v4334_v8 = vshll.u32 %v19734_v9, 16 }
 0x4b9   : > { %v4285_v30 = vrot.slane %v4283_v24, 4  ;;  %v4288_v47 = vrot.slane %v4286_v50, 5  ;;  %v4348_v24 = vshll.u32 %v19737_v2, 16 }
 0x4ba   : > { %15855 = vmatpush3.bf16.msra.mxu1 %v16798_v14  ;;  %v16814_v14 = vld [vmem:[#allocation14 + $0x1e8] sm:$0xff]  }
 0x4bb   : > { %15856 = vmatprep.subr.bf16.mxu1 %v16799_v26 }
 0x4bd   : > { %15849 = vmatmul.mubr.bf16.gmra.mrb[4].mxu1 %v14359_v42  ;;  %v4271_v42 = vrot.slane %v4269_v5, 4 }
 0x4be   : > { %15857 = vmatpush3.bf16.msra.mxu1 %v16799_v26  ;;  %15868 = vmatprep.mubr.bf16.mxu1 %v16800_v40  ;;  %v4316_v26 = vrot.slane %v4314_v7, 5  ;;  %v16815_v40 = vld [vmem:[#allocation14 + $0x1f0] sm:$0xff]   ;;  %v4507_v7 = vld [vmem:[#allocation2 + $0x18] sm:$0xe] }
 0x4bf   : > { %15858 = vmatprep.subr.bf16.mxu1 %v16801_v57  ;;  %v14393_v38 = vrot.slane %v4507_v7, 9  ;;  %v4965_v7 = vsel %vm19080_vm7, 0, %v4964_v19 }
 0x4c0   : > { %v4317_v32 = vor.u32 %v4316_v26, %v4313_v56  ;;  %v4350_v56 = vrot.slane %v4348_v24, 5  ;;  %v4506_v26 = vld [vmem:[#allocation2 + $0x10] sm:$0xe]  ;;  %v4967_v24 = vld [vmem:[#allocation3 + $0x8] sm:$0x1] }
 0x4c1   : > { %4966 = vst [vmem:[#allocation3 + $0x4] sm:$0x1] %v4965_v7 }
 0x4c2   : > { %15859 = vmatpush3.bf16.msra.mxu1 %v16801_v57  ;;  %v4274_v57 = vrot.slane %v4272_v53, 5  ;;  %v4318_v16 = vrot.slane %v4317_v32, 4  ;;  %v4509_v32 = vld [vmem:[#allocation2 + $0x28] sm:$0xe] }
 0x4c3   : > { %15860 = vmatprep.subr.bf16.mxu1 %v16802_v10 }
 0x4c4   : > { %v4275_v36 = vor.u32 %v4274_v57, %v4271_v42  ;;  %v14392_v42 = vrot.slane %v4506_v26, 9  ;;  %v4536_v57 = vrot.slane %v19713_v1, 5  ;;  %v16821_v1 = vld [vmem:[#allocation14 + $0x220] sm:$0xff]   ;;  %v4991_v26 = vld [vmem:[#allocation3 + $0xc] sm:$0x4] }
 0x4c6   : > { %15861 = vmatpush3.bf16.msra.mxu1 %v16802_v10  ;;  %v19725_v10 = vld [vmem:[#allocation2 + $0x2c] sm:$0x1]  ;;  %v4276_v58 = vrot.slane %v4275_v36, 4  ;;  %v4511_v36 = vld [vmem:[#allocation2 + $0x38] sm:$0xe] }
 0x4c7   : > { %15862 = vmatprep.subr.bf16.mxu1 %v16803_v21  ;;  %v4292_v41 = vshll.u32 %v19725_v10, 16 }
 0x4c9   : > { %v4294_v18 = vrot.slane %v4292_v41, 5  ;;  %v16824_v41 = vld [vmem:[#allocation14 + $0x238] sm:$0xff]  }
 0x4ca   : > { %15863 = vmatpush3.bf16.msra.mxu1 %v16803_v21  ;;  %v4289_v21 = vor.u32 %v4288_v47, %v4285_v30  ;;  %v4336_v30 = vrot.slane %v4334_v8, 5 }
 0x4cb   : > { %15864 = vmatprep.subr.bf16.mxu1 %v16804_v33 }
 0x4cc   : > { %v4290_v51 = vrot.slane %v4289_v21, 4 }
 0x4ce   : > { %15865 = vmatpush3.bf16.msra.mxu1 %v16804_v33  ;;  %v4302_v33 = vrot.slane %v4300_v17, 5  ;;  %v4295_v15 = vsel %vm19512_vm3, %v4290_v51, %v4294_v18  ;;  %v4510_v51 = vld [vmem:[#allocation2 + $0x30] sm:$0xe] }
 0x4cf   : > { %15866 = vmatprep.subr.bf16.mxu1 %v16805_v60 }
 0x4d2   : > { %15867 = vmatpush3.bf16.msra.mxu1 %v16805_v60  ;;  %v4339_v60 = vshrl.u32 %v4238_v55, 16  ;;  %v16819_v55 = vld [vmem:[#allocation14 + $0x210] sm:$0xff]  }
 0x4d3   : > { %15876 = vmatprep.subr.bf16.mxu1 %v16807_v12 }
 0x4d4   : > { %v4341_v54 = vrot.slane %v4339_v60, 4  ;;  %v16820_v60 = vld [vmem:[#allocation14 + $0x218] sm:$0xff]  }
 0x4d5   : > { %15869 = vmatmul.mubr.bf16.vlgmr.msra.gmra.mrb[0].mxu1 %v16806_v23  ;;  %v4303_v23 = vor.u32 %v4302_v33, %v4299_v13  ;;  %v4532_v13 = vrot.slane %v19715_v48, 5  ;;  %v4537_v33 = vsel %vm19598_vm15, %v14393_v38, %v4536_v57  ;;  %v16823_v48 = vld [vmem:[#allocation14 + $0x230] sm:$0xff]  }
 0x4d6   : > { %15872 = vmatprep.mubr.bf16.mxu1 %v16808_v63  ;;  %15877 = vmatpush3.bf16.msra.mxu1 %v16807_v12  ;;  %v19730_v12 = vld [vmem:[#allocation2 + $0x34] sm:$0x1]  ;;  %v4330_v63 = vrot.slane %v4328_v43, 5  ;;  %v4345_v45 = vor.u32 %v4344_v35, %v4341_v54  ;;  %v4552_v54 = vrot.slane %v19727_v29, 5  ;;  %v4540_v35 = vrot.slane %v19723_v44, 5  ;;  %v16827_v57 = vld [vmem:[#allocation19 + $0x50] sm:$0xff]  }
 0x4d7   : > { %15878 = vmatprep.subr.bf16.mxu1 %v16809_v6  ;;  %v4533_v43 = vsel %vm19598_vm15, %v14392_v42, %v4532_v13  ;;  %v16826_v42 = vld [vmem:[#allocation19 + $0x48] sm:$0xff]  }
 0x4d8   : > { %v4346_v17 = vrot.slane %v4345_v45, 4  ;;  %v14400_v31 = vcombine.low %v4533_v43, %v4537_v33  ;;  %v16829_v43 = vld [vmem:[#allocation19 + $0x60] sm:$0xff]  }
 0x4da   : > { %15879 = vmatpush3.bf16.msra.mxu1 %v16809_v6  ;;  %v4320_v6 = vshll.u32 %v19727_v29, 16  ;;  %v4351_v21 = vsel %vm19512_vm3, %v4346_v17, %v4350_v56  ;;  %v4970_v56 = vld [vmem:[#allocation3 + $0xc] sm:$0x1] }
 0x4db   : > { %15880 = vmatprep.subr.bf16.mxu1 %v16811_v62  ;;  %v4971_v38 = vsel %vm19080_vm7, 0, %v4970_v56 }
 0x4dc   : > { %4972 = vst [vmem:[#allocation3 + $0xc] sm:$0x1] %v4971_v38 }
 0x4dd   : > { %15873 = vmatmul.mubr.bf16.gmra.mrb[4].mxu1 %v16810_v11  ;;  %v4280_v11 = vrot.slane %v4278_v4, 5  ;;  %v14395_v4 = vrot.slane %v4509_v32, 9  ;;  %v19818_v32 = vld [vmem:[#allocation17] ss:$0 sm:$0xff] }
 0x4de   : > { %15881 = vmatpush3.bf16.msra.mxu1 %v16811_v62  ;;  %15892 = vmatprep.mubr.bf16.mxu1 %v14380_v0  ;;  %v4306_v62 = vshll.u32 %v19730_v12, 16  ;;  %v4322_v0 = vrot.slane %v4320_v6, 5 }
 0x4df   : > { %15882 = vmatprep.subr.bf16.mxu1 %v16812_v20  ;;  %v4281_v28 = vsel %vm19512_vm3, %v4276_v58, %v4280_v11  ;;  %v4548_v58 = vrot.slane %v19730_v12, 5  ;;  %v4513_v11 = vld [vmem:[#allocation2 + $0x48] sm:$0xe] }
 0x4e0   : > { %v4308_v50 = vrot.slane %v4306_v62, 5  ;;  %v4323_v37 = vsel %vm19512_vm3, %v4318_v16, %v4322_v0  ;;  %v14381_v5 = vcombine.low %v4281_v28, %v4295_v15  ;;  %v4512_v16 = vld [vmem:[#allocation2 + $0x40] sm:$0xe]  ;;  %v4556_v0 = vrot.slane %v19734_v9, 5  ;;  %v4985_v28 = vld [vmem:[#allocation3 + $0x4] sm:$0x4] }
 0x4e1   : > { %v14399_v8 = vrot.slane %v4513_v11, 9  ;;  %v4560_v15 = vrot.slane %v19737_v2, 5 }
 0x4e2   : > { %15883 = vmatpush3.bf16.msra.mxu1 %v16812_v20  ;;  %v4304_v20 = vrot.slane %v4303_v23, 4  ;;  %v14397_v23 = vrot.slane %v4511_v36, 9 }
 0x4e3   : > { %15884 = vmatprep.subr.bf16.mxu1 %v16813_v39 }
 0x4e4   : > { %v4309_v53 = vsel %vm19512_vm3, %v4304_v20, %v4308_v50  ;;  %v4553_v18 = vsel %vm19598_vm15, %v14397_v23, %v4552_v54  ;;  %v14398_v20 = vrot.slane %v4512_v16, 9  ;;  %v4988_v50 = vld [vmem:[#allocation3 + $0x8] sm:$0x4]  ;;  %v4997_v16 = vld [vmem:[#allocation3 + $0x14] sm:$0x4] }
 0x4e5   : > { %v14382_v47 = vcombine.low %v4309_v53, %v4323_v37  ;;  %v4968_v37 = vsel %vm19080_vm7, 0, %v4967_v24  ;;  %v4989_v2 = vsel %vm19780_vm1, 0, %v4988_v50  ;;  %v16825_v53 = vld [vmem:[#allocation19 + $0x40] sm:$0xff]  }
 0x4e6   : > { %15885 = vmatpush3.bf16.msra.mxu1 %v16813_v39  ;;  %v4331_v39 = vor.u32 %v4330_v63, %v4327_v25  ;;  %v4544_v25 = vrot.slane %v19725_v10, 5  ;;  %v14396_v63 = vrot.slane %v4510_v51, 9  ;;  %v4557_v12 = vsel %vm19598_vm15, %v14398_v20, %v4556_v0  ;;  %4969 = vst [vmem:[#allocation3 + $0x8] sm:$0x1] %v4968_v37  ;;  %4990 = vst [vmem:[#allocation3 + $0x8] sm:$0x4] %v4989_v2 }
 0x4e7   : > { %15886 = vmatprep.subr.bf16.mxu1 %v16814_v14 }
 0x4e8   : > { %v4332_v61 = vrot.slane %v4331_v39, 4  ;;  %v4545_v62 = vsel %vm19598_vm15, %v14395_v4, %v4544_v25  ;;  %v4549_v29 = vsel %vm19598_vm15, %v14396_v63, %v4548_v58  ;;  %v4561_v39 = vsel %vm19598_vm15, %v14399_v8, %v4560_v15 }
 0x4e9   : > { %v14402_v44 = vcombine.low %v4549_v29, %v4553_v18  ;;  %v14403_v45 = vcombine.low %v4557_v12, %v4561_v39 }
 0x4ea   : > { %15887 = vmatpush3.bf16.msra.mxu1 %v16814_v14  ;;  %v16818_v14 = vld [vmem:[#allocation14 + $0x208] sm:$0xff]  }
 0x4eb   : > { %15888 = vmatprep.subr.bf16.mxu1 %v16815_v40 }
 0x4ee   : > { %15889 = vmatpush3.bf16.msra.mxu1 %v16815_v40  ;;  %v4337_v40 = vsel %vm19512_vm3, %v4332_v61, %v4336_v30  ;;  %v4973_v30 = vld [vmem:[#allocation3 + $0x10] sm:$0x1]  ;;  %vm5101_vm3 = vsmask.f32 2306 }
 0x4ef   : > { %15890 = vmatprep.subr.bf16.mxu1 %v16816_v46  ;;  %v14383_v34 = vcombine.low %v4337_v40, %v4351_v21  ;;  %v4974_v61 = vsel %vm19080_vm7, 0, %v4973_v30  ;;  %v4961_v40 = vld [vmem:[#allocation3] sm:$0x1]  ;;  %v4982_v21 = vld [vmem:[#allocation3] sm:$0x4]  ;;  %vm19870_vm14 = vmand %vm3202_vm12, %vm5101_vm3 }
 0x4f0   : > { %4975 = vst [vmem:[#allocation3 + $0x10] sm:$0x1] %v4974_v61  ;;  %v4962_v13 = vsel %vm19080_vm7, 0, %v4961_v40  ;;  %v4983_v33 = vsel %vm19780_vm1, 0, %v4982_v21  ;;  %vm5175_vm12 = vsmask.f32 1280 }
 0x4f1   : > { %4963 = vst [vmem:[#allocation3] sm:$0x1] %v4962_v13  ;;  %4984 = vst [vmem:[#allocation3] sm:$0x4] %v4983_v33  ;;  %vm5180_vm3 = vsmask.f32 7448 }
 0x4f2   : > { %15891 = vmatpush3.bf16.msra.mxu1 %v16816_v46  ;;  %v4508_v46 = vld [vmem:[#allocation2 + $0x20] sm:$0xe] }
 0x4f3   : > { %15900 = vmatprep.subr.bf16.mxu1 %v16817_v3  ;;  %v14394_v6 = vrot.slane %v4508_v46, 9 }
 0x4f5   : > { %15893 = vmatmul.mubr.bf16.vlgmr.msra.gmra.mrb[0].mxu1 %v14381_v5  ;;  %v4541_v10 = vsel %vm19598_vm15, %v14394_v6, %v4540_v35  ;;  %v4986_v5 = vsel %vm19780_vm1, 0, %v4985_v28  ;;  %vm5176_vm15 = vsmask.f32 3336 }
 0x4f6   : > { %15896 = vmatprep.mubr.bf16.mxu1 %v14382_v47  ;;  %15901 = vmatpush3.bf16.msra.mxu1 %v16817_v3  ;;  %v14401_v3 = vcombine.low %v4541_v10, %v4545_v62  ;;  %4987 = vst [vmem:[#allocation3 + $0x4] sm:$0x4] %v4986_v5  ;;  %v4994_v47 = vld [vmem:[#allocation3 + $0x10] sm:$0x4]  ;;  %v4976_v62 = vld [vmem:[#allocation3 + $0x14] sm:$0x1]  ;;  %vm5177_vm5 = vmor %vm5175_vm12, %vm5176_vm15 }
 0x4f7   : > { %15902 = vmatprep.subr.bf16.mxu1 %v16818_v14  ;;  %v4995_v17 = vsel %vm19780_vm1, 0, %v4994_v47  ;;  %v4977_v11 = vsel %vm19080_vm7, 0, %v4976_v62  ;;  %v4998_v10 = vsel %vm19780_vm1, 0, %v4997_v16  ;;  %vm19918_vm15 = vmor %vm5177_vm5, %vm5178_vm6 }
 0x4f8   : > { %4996 = vst [vmem:[#allocation3 + $0x10] sm:$0x4] %v4995_v17  ;;  %4978 = vst [vmem:[#allocation3 + $0x14] sm:$0x1] %v4977_v11 }
 0x4f9   : > { %4999 = vst [vmem:[#allocation3 + $0x14] sm:$0x4] %v4998_v10  ;;  %vm19938_vm5 = vmor %vm19918_vm15, %vm5180_vm3  ;;  %vm8725_vm15 = vsmask.f32 1284 }
 0x4fa   : > { %15903 = vmatpush3.bf16.msra.mxu1 %v16818_v14  ;;  %v18406_v14 = vmov 0.0  }
 0x4fb   : > { %15904 = vmatprep.subr.bf16.mxu1 %v16819_v55  ;;  %15924 = vmatprep.subr.bf16.mxu0 %v18406_v14 }
 0x4fc   : > { %15925 = vmatpush3.bf16.msra.mxu0 %v16825_v53  ;;  %15940 = vmatprep.mubr.msk.bf16.mxu0 %vm18407_vm2, %v18406_v14 }
 0x4fd   : > { %15897 = vmatmul.mubr.bf16.gmra.mrb[4].mxu1 %v14383_v34  ;;  %15926 = vmatprep.subr.bf16.mxu0 %v18406_v14  ;;  %v16828_v34 = vld [vmem:[#allocation19 + $0x58] sm:$0xff]  }
 0x4fe   : > { %15905 = vmatpush3.bf16.msra.mxu1 %v16819_v55  ;;  %15916 = vmatprep.mubr.bf16.mxu1 %v14400_v31  ;;  %v4992_v55 = vsel %vm19780_vm1, 0, %v4991_v26  ;;  %v16831_v31 = vld [vmem:[#allocation19 + $0x70] sm:$0xff]  }
 0x4ff   : > { %15906 = vmatprep.subr.bf16.mxu1 %v16820_v60  ;;  %4993 = vst [vmem:[#allocation3 + $0xc] sm:$0x4] %v4992_v55 }
 0x500   : > { %15927 = vmatpush3.bf16.msra.mxu0 %v16826_v42 }
 0x501   : > { %15928 = vmatprep.subr.bf16.mxu0 %v18406_v14 }
 0x502   : > { %15907 = vmatpush3.bf16.msra.mxu1 %v16820_v60  ;;  %v16830_v60 = vld [vmem:[#allocation19 + $0x68] sm:$0xff]  }
 0x503   : > { %15908 = vmatprep.subr.bf16.mxu1 %v16821_v1 }
 0x504   : > { %15929 = vmatpush3.bf16.msra.mxu0 %v16827_v57 }
 0x505   : > { %15930 = vmatprep.subr.bf16.mxu0 %v18406_v14 }
 0x506   : > { %15909 = vmatpush3.bf16.msra.mxu1 %v16821_v1  ;;  %v16832_v1 = vld [vmem:[#allocation19 + $0x78] sm:$0xff]  }
 0x507   : > { %15910 = vmatprep.subr.bf16.mxu1 %v16822_v52 }
 0x508   : > { %15931 = vmatpush3.bf16.msra.mxu0 %v16828_v34 }
 0x509   : > { %15932 = vmatprep.subr.bf16.mxu0 %v18406_v14 }
 0x50a   : > { %15911 = vmatpush3.bf16.msra.mxu1 %v16822_v52  ;;  %v19816_v52 = vld [vmem:[#allocation16] ss:$0 sm:$0xff] }
 0x50b   : > { %15912 = vmatprep.subr.bf16.mxu1 %v16823_v48 }
 0x50c   : > { %15933 = vmatpush3.bf16.msra.mxu0 %v16829_v43 }
 0x50d   : > { %15934 = vmatprep.subr.bf16.mxu0 %v18406_v14 }
 0x50e   : > { %15913 = vmatpush3.bf16.msra.mxu1 %v16823_v48 }
 0x50f   : > { %15914 = vmatprep.subr.bf16.mxu1 %v16824_v41 }
 0x510   : > { %15935 = vmatpush3.bf16.msra.mxu0 %v16830_v60 }
 0x511   : > { %15936 = vmatprep.subr.bf16.mxu0 %v18406_v14 }
 0x512   : > { %15915 = vmatpush3.bf16.msra.mxu1 %v16824_v41 }
 0x513   : > { %16104 = vmatprep.subr.bf16.mxu1 %v18406_v14 }
 0x514   : > { %15937 = vmatpush3.bf16.msra.mxu0 %v16831_v31 }
 0x515   : > { %15917 = vmatmul.mubr.bf16.vlgmr.msra.gmra.mrb[0].mxu1 %v14401_v3  ;;  %15938 = vmatprep.subr.bf16.mxu0 %v18406_v14 }
 0x516   : > { %15920 = vmatprep.mubr.bf16.mxu1 %v14402_v44 }
 0x518   : > { %15939 = vmatpush3.bf16.msra.mxu0 %v16832_v1 }
 0x519   : > { %15944 = vmatprep.subr.bf16.mxu0 %v18406_v14 }
 0x51d   : > { %15921 = vmatmul.mubr.bf16.gmra.mrb[4].mxu1 %v14403_v45 }
 0x51e   : > { %16120 = vmatprep.mubr.msk.bf16.mxu1 %vm18407_vm2, %v18406_v14 }
 0x5e8   : > { %v15918_v48 = vpop.f32.mrb[0].mxu1 }
 0x5e9   : > { %v4725_v36 = vmul.f32 %v15918_v48, %v19816_v52  ;;  %v4677_v41 = vpop.f32.mrb[1].mxu1 }
 0x5ea   : > { %v4723_v46 = vmul.f32 %v19816_v52, %v4677_v41  ;;  %v15919_v4 = vpop.f32.mrb[2].mxu1 }
 0x5eb   : > { %v4740_v51 = vadd.f32 %v19818_v32, %v4725_v36  ;;  %v4726_v23 = vmul.f32 %v15919_v4, %v19816_v52  ;;  %v4680_v6 = vpop.f32.mrb[3].mxu1 }
 0x5ec   : > { %v4738_v25 = vadd.f32 %v19818_v32, %v4723_v46  ;;  %v4724_v63 = vmul.f32 %v19816_v52, %v4680_v6 }
 0x5ed   : > { %v4741_v54 = vadd.f32 %v19818_v32, %v4726_v23  ;;  %v4748_v58 = vmax.f32 %v4740_v51, 0.0 }
 0x5ee   : > { %v4739_v35 = vadd.f32 %v19818_v32, %v4724_v63  ;;  %v4746_v3 = vmax.f32 %v4738_v25, 0.0 }
 0x5ef   : > { %v4749_v18 = vmax.f32 %v4741_v54, 0.0 }
 0x5f0   : > { %v4747_v29 = vmax.f32 %v4739_v35, 0.0  ;;  %v15922_v20 = vpop.f32.mrb[4].mxu1 }
 0x5f1   : > { %v4755_v44 = vmax.f32 %v4748_v58, %v4749_v18  ;;  %v4729_v0 = vmul.f32 %v15922_v20, %v19816_v52  ;;  %v4693_v8 = vpop.f32.mrb[5].mxu1 }
 0x5f2   : > { %v4754_v15 = vmax.f32 %v4746_v3, %v4747_v29  ;;  %v4727_v12 = vmul.f32 %v19816_v52, %v4693_v8  ;;  %v15923_v39 = vpop.f32.mrb[6].mxu1 }
 0x5f3   : > { %v4779_v45 = vcombine.high %v4755_v44, %v4755_v44  ;;  %v4786_v24 = vrot.slane %v4755_v44, %v19114_v59  ;;  %v19835_v50 = vpop.f32.mrb[7].mxu1  ;;  %v19839_v19 = vadd.f32 %v19818_v32, %v4729_v0  ;;  %v19842_v28 = vmul.f32 %v15923_v39, %v19816_v52 }
 0x5f4   : > { %v4762_v37 = vcombine.high %v4754_v15, %v4754_v15  ;;  %v4769_v2 = vrot.slane %v4754_v15, %v19114_v59  ;;  %v19847_v30 = vadd.f32 %v19818_v32, %v4727_v12 }
 0x5f5   : > { %v4793_v7 = vrot.slane %v4779_v45, %v19114_v59  ;;  %v4794_v5 = vcombine.high %v4786_v24, %v4786_v24  ;;  %v4874_v53 = vsel %vm20700_vm8, %v4786_v24, -inf }
 0x5f6   : > { %v4875_v47 = vrot.slane %v4874_v53, 4  ;;  %v4776_v61 = vrot.slane %v4762_v37, %v19114_v59  ;;  %v4777_v17 = vcombine.high %v4769_v2, %v4769_v2  ;;  %v4846_v56 = vsel %vm20700_vm8, %v4769_v2, -inf }
 0x5f7   : > { %v4795_v26 = vcombine.high %v4793_v7, %v4793_v7  ;;  %v4881_v38 = vsel %vm20700_vm8, %v4794_v5, -inf  ;;  %v4888_v55 = vsel %vm20700_vm8, %v4793_v7, -inf  ;;  %v4847_v42 = vrot.slane %v4846_v56, 4 }
 0x5f8   : > { %v4876_v57 = vmax.f32 %v4874_v53, %v4875_v47  ;;  %v4882_v40 = vrot.slane %v4881_v38, 4  ;;  %v4889_v21 = vrot.slane %v4888_v55, 4  ;;  %v4778_v13 = vcombine.high %v4776_v61, %v4776_v61 }
 0x5f9   : > { %v4895_v33 = vsel %vm20700_vm8, %v4795_v26, -inf  ;;  %v4848_v34 = vmax.f32 %v4846_v56, %v4847_v42  ;;  %v4853_v43 = vsel %vm20700_vm8, %v4777_v17, -inf  ;;  %v4860_v60 = vsel %vm20700_vm8, %v4776_v61, -inf }
 0x5fa   : > { %v4877_v31 = vrot.slane %v4876_v57, 2  ;;  %v4883_v1 = vmax.f32 %v4881_v38, %v4882_v40  ;;  %v4890_v48 = vmax.f32 %v4888_v55, %v4889_v21  ;;  %v4896_v36 = vrot.slane %v4895_v33, 4 }
 0x5fb   : > { %v4849_v41 = vrot.slane %v4848_v34, 2  ;;  %v4854_v46 = vrot.slane %v4853_v43, 4  ;;  %v4861_v4 = vrot.slane %v4860_v60, 4  ;;  %v4867_v51 = vsel %vm20700_vm8, %v4778_v13, -inf }
 0x5fc   : > { %v4878_v23 = vmax.f32 %v4876_v57, %v4877_v31  ;;  %v4884_v6 = vrot.slane %v4883_v1, 2  ;;  %v4891_v25 = vrot.slane %v4890_v48, 2  ;;  %v4897_v63 = vmax.f32 %v4895_v33, %v4896_v36 }
 0x5fd   : > { %v4850_v54 = vmax.f32 %v4848_v34, %v4849_v41  ;;  %v4855_v35 = vmax.f32 %v4853_v43, %v4854_v46  ;;  %v4862_v62 = vmax.f32 %v4860_v60, %v4861_v4  ;;  %v4868_v16 = vrot.slane %v4867_v51, 4  ;;  %v19864_v4 = vld.sshfl [vmem:[#allocation3] sm:$0x13 pattern:$0x76325410] }
 0x5fe   : > { %v4879_v58 = vrot.slane %v4878_v23, 1  ;;  %v4885_v18 = vmax.f32 %v4883_v1, %v4884_v6  ;;  %v4892_v11 = vmax.f32 %v4890_v48, %v4891_v25  ;;  %v4898_v10 = vrot.slane %v4897_v63, 2 }
 0x5ff   : > { %v4851_v3 = vrot.slane %v4850_v54, 1  ;;  %v4856_v29 = vrot.slane %v4855_v35, 2  ;;  %v4863_v20 = vrot.slane %v4862_v62, 2  ;;  %v4869_v44 = vmax.f32 %v4867_v51, %v4868_v16 }
 0x600   : > { %v4880_v0 = vmax.f32 %v4878_v23, %v4879_v58  ;;  %v4886_v8 = vrot.slane %v4885_v18, 1  ;;  %v4893_v15 = vrot.slane %v4892_v11, 1  ;;  %v4899_v12 = vmax.f32 %v4897_v63, %v4898_v10 }
 0x601   : > { %v4852_v39 = vmax.f32 %v4850_v54, %v4851_v3  ;;  %v4857_v45 = vmax.f32 %v4855_v35, %v4856_v29  ;;  %v4864_v24 = vmax.f32 %v4862_v62, %v4863_v20  ;;  %v4870_v37 = vrot.slane %v4869_v44, 2 }
 0x602   : > { %v4887_v2 = vmax.f32 %v4885_v18, %v4886_v8  ;;  %v4894_v7 = vmax.f32 %v4892_v11, %v4893_v15  ;;  %v4900_v5 = vrot.slane %v4899_v12, 1  ;;  %v15283_v53 = vpack.c.bf16 %v4880_v0, %v4880_v0 }
 0x603   : > { %v4858_v47 = vrot.slane %v4857_v45, 1  ;;  %v4865_v61 = vrot.slane %v4864_v24, 1  ;;  %v4871_v17 = vmax.f32 %v4869_v44, %v4870_v37  ;;  %v4728_v56 = vmul.f32 %v19816_v52, %v19835_v50  ;;  %v5103_v44 = vld [vmem:[#allocation3 + $0x4] sm:$0x7] }
 0x604   : > { %v4901_v26 = vmax.f32 %v4899_v12, %v4900_v5  ;;  %v15284_v38 = vpack.c.bf16 %v4887_v2, %v4887_v2  ;;  %v15285_v55 = vpack.c.bf16 %v4894_v7, %v4894_v7  ;;  %v15279_v42 = vpack.c.bf16 %v4852_v39, %v4852_v39 }
 0x605   : > { %v4859_v57 = vmax.f32 %v4857_v45, %v4858_v47  ;;  %v4866_v40 = vmax.f32 %v4864_v24, %v4865_v61  ;;  %v4872_v21 = vrot.slane %v4871_v17, 1  ;;  %v4752_v13 = vmax.f32 %v19839_v19, 0.0 }
 0x606   : > { %v15286_v33 = vpack.c.bf16 %v4901_v26, %v4901_v26  ;;  %v5068_v34 = vunpack.c.l.b16 %v15283_v53  ;;  %v5069_v43 = vunpack.c.l.b16 %v15284_v38  ;;  %v5070_v60 = vunpack.c.l.b16 %v15285_v55 }
 0x607   : > { %v4873_v31 = vmax.f32 %v4871_v17, %v4872_v21  ;;  %v15280_v1 = vpack.c.bf16 %v4859_v57, %v4859_v57  ;;  %v15281_v48 = vpack.c.bf16 %v4866_v40, %v4866_v40  ;;  %v4745_v36 = vadd.f32 %v19818_v32, %v19842_v28  ;;  %v5106_v28 = vld [vmem:[#allocation3 + $0x8] sm:$0x7] }
 0x608   : > { %v5071_v52 = vunpack.c.l.b16 %v15286_v33  ;;  %v5083_v50 = vsel %vm2611_vm9, %v5069_v43, %v5068_v34  ;;  %v5064_v41 = vunpack.c.l.b16 %v15279_v42  ;;  %v4743_v46 = vadd.f32 %v19818_v32, %v4728_v56 }
 0x609   : > { %v5084_v19 = vsel %vm2613_vm10, %v5070_v60, %v5083_v50  ;;  %v15282_v51 = vpack.c.bf16 %v4873_v31, %v4873_v31  ;;  %v5065_v23 = vunpack.c.l.b16 %v15280_v1  ;;  %v5066_v6 = vunpack.c.l.b16 %v15281_v48 }
 0x60a   : > { %v5085_v25 = vsel %vm2615_vm11, %v5071_v52, %v5084_v19  ;;  %v4750_v54 = vmax.f32 %v19847_v30, 0.0  ;;  %v4753_v35 = vmax.f32 %v4745_v36, 0.0  ;;  %v4751_v32 = vmax.f32 %v4743_v46, 0.0 }
 0x60b   : > { %v5093_v62 = vpack.c.b16 %v5085_v25, %v5085_v25  ;;  %v5067_v16 = vunpack.c.l.b16 %v15282_v51  ;;  %v5080_v58 = vsel %vm2611_vm9, %v5065_v23, %v5064_v41  ;;  %v5183_v18 = vshrl.u32 %v19864_v4, 16 }
 0x60c   : > { %v5081_v11 = vsel %vm2613_vm10, %v5066_v6, %v5080_v58  ;;  %v4757_v10 = vmax.f32 %v4752_v13, %v4753_v35  ;;  %v4756_v3 = vmax.f32 %v4750_v54, %v4751_v32  ;;  %v5150_v39 = vcombine.high %v19864_v4, %v19864_v4 }
 0x60d   : > { %v5107_v29 = vsel %vm19870_vm14, %v5093_v62, %v5106_v28  ;;  %v5082_v20 = vsel %vm2615_vm11, %v5067_v16, %v5081_v11  ;;  %v19885_v45 = vrot.slane %v5183_v18, 6  ;;  %v5186_v24 = vshll.u32 %v19864_v4, 16 }
 0x60e   : > { %5108 = vst [vmem:[#allocation3 + $0x8] sm:$0x7] %v5107_v29  ;;  %v5092_v30 = vpack.c.b16 %v5082_v20, %v5082_v20  ;;  %v4813_v0 = vcombine.high %v4757_v10, %v4757_v10  ;;  %v4820_v8 = vrot.slane %v4757_v10, %v19114_v59  ;;  %v4796_v15 = vcombine.high %v4756_v3, %v4756_v3 }
 0x60f   : > { %v4803_v12 = vrot.slane %v4756_v3, %v19114_v59 }
 0x610   : > { %v5104_v37 = vsel %vm19870_vm14, %v5092_v30, %v5103_v44  ;;  %v4827_v2 = vrot.slane %v4813_v0, %v19114_v59  ;;  %v4828_v7 = vcombine.high %v4820_v8, %v4820_v8  ;;  %v4930_v5 = vsel %vm20700_vm8, %v4820_v8, -inf }
 0x611   : > { %5105 = vst [vmem:[#allocation3 + $0x4] sm:$0x7] %v5104_v37  ;;  %v4931_v53 = vrot.slane %v4930_v5, 4  ;;  %v4810_v47 = vrot.slane %v4796_v15, %v19114_v59  ;;  %v4811_v61 = vcombine.high %v4803_v12, %v4803_v12  ;;  %v4902_v17 = vsel %vm20700_vm8, %v4803_v12, -inf }
 0x612   : > { %v4829_v56 = vcombine.high %v4827_v2, %v4827_v2  ;;  %v4937_v26 = vsel %vm20700_vm8, %v4828_v7, -inf  ;;  %v4944_v38 = vsel %vm20700_vm8, %v4827_v2, -inf  ;;  %v4903_v55 = vrot.slane %v4902_v17, 4 }
 0x613   : > { %v4932_v42 = vmax.f32 %v4930_v5, %v4931_v53  ;;  %v4938_v57 = vrot.slane %v4937_v26, 4  ;;  %v4945_v40 = vrot.slane %v4944_v38, 4  ;;  %v4812_v21 = vcombine.high %v4810_v47, %v4810_v47 }
 0x614   : > { %v4951_v13 = vsel %vm20700_vm8, %v4829_v56, -inf  ;;  %v4904_v33 = vmax.f32 %v4902_v17, %v4903_v55  ;;  %v4909_v34 = vsel %vm20700_vm8, %v4811_v61, -inf  ;;  %v4916_v43 = vsel %vm20700_vm8, %v4810_v47, -inf }
 0x615   : > { %v4933_v60 = vrot.slane %v4932_v42, 2  ;;  %v4939_v31 = vmax.f32 %v4937_v26, %v4938_v57  ;;  %v4946_v1 = vmax.f32 %v4944_v38, %v4945_v40  ;;  %v4952_v48 = vrot.slane %v4951_v13, 4 }
 0x616   : > { %v4905_v36 = vrot.slane %v4904_v33, 2  ;;  %v4910_v52 = vrot.slane %v4909_v34, 4  ;;  %v4917_v50 = vrot.slane %v4916_v43, 4  ;;  %v4923_v41 = vsel %vm20700_vm8, %v4812_v21, -inf  ;;  %vm19910_vm8 = vmor %vm2226_vm4, %vm2611_vm9 }
 0x617   : > { %v4934_v46 = vmax.f32 %v4932_v42, %v4933_v60  ;;  %v4940_v19 = vrot.slane %v4939_v31, 2  ;;  %v4947_v51 = vrot.slane %v4946_v1, 2  ;;  %v4953_v23 = vmax.f32 %v4951_v13, %v4952_v48  ;;  %v14432_v48 = vld.sshfl [vmem:[#allocation3 + $0x8] sm:$0x13 pattern:$0x76325410]  ;;  %vm19925_vm4 = vmor %vm19910_vm8, %vm2615_vm11 }
 0x618   : > { %v4906_v6 = vmax.f32 %v4904_v33, %v4905_v36  ;;  %v4911_v25 = vmax.f32 %v4909_v34, %v4910_v52  ;;  %v4918_v28 = vmax.f32 %v4916_v43, %v4917_v50  ;;  %v4924_v54 = vrot.slane %v4923_v41, 4  ;;  %v14431_v38 = vld.sshfl [vmem:[#allocation3 + $0x4] sm:$0x13 pattern:$0x76325410]  ;;  %vm19947_vm8 = vmor %vm19925_vm4, %vm2619_vm13 }
 0x619   : > { %v4935_v35 = vrot.slane %v4934_v46, 1  ;;  %v4941_v32 = vmax.f32 %v4939_v31, %v4940_v19  ;;  %v4948_v62 = vmax.f32 %v4946_v1, %v4947_v51  ;;  %v4954_v16 = vrot.slane %v4953_v23, 2  ;;  %v5112_v19 = vld [vmem:[#allocation3 + $0x10] sm:$0x7] }
 0x61a   : > { %v4907_v58 = vrot.slane %v4906_v6, 1  ;;  %v4912_v18 = vrot.slane %v4911_v25, 2  ;;  %v4919_v11 = vrot.slane %v4918_v28, 2  ;;  %v4925_v10 = vmax.f32 %v4923_v41, %v4924_v54 }
 0x61b   : > { %v4936_v3 = vmax.f32 %v4934_v46, %v4935_v35  ;;  %v4942_v29 = vrot.slane %v4941_v32, 1  ;;  %v4949_v20 = vrot.slane %v4948_v62, 1  ;;  %v4955_v44 = vmax.f32 %v4953_v23, %v4954_v16 }
 0x61c   : > { %v4908_v30 = vmax.f32 %v4906_v6, %v4907_v58  ;;  %v4913_v0 = vmax.f32 %v4911_v25, %v4912_v18  ;;  %v4920_v8 = vmax.f32 %v4918_v28, %v4919_v11  ;;  %v4926_v15 = vrot.slane %v4925_v10, 2 }
 0x61d   : > { %v4943_v12 = vmax.f32 %v4941_v32, %v4942_v29  ;;  %v4950_v37 = vmax.f32 %v4948_v62, %v4949_v20  ;;  %v4956_v2 = vrot.slane %v4955_v44, 1  ;;  %v15291_v7 = vpack.c.bf16 %v4936_v3, %v4936_v3  ;;  %v14513_v62 = vld.sshfl [vmem:[#allocation3 + $0x14] sm:$0x13 pattern:$0x76325410] }
 0x61e   : > { %v4914_v5 = vrot.slane %v4913_v0, 1  ;;  %v4921_v53 = vrot.slane %v4920_v8, 1  ;;  %v4927_v47 = vmax.f32 %v4925_v10, %v4926_v15  ;;  %v15287_v61 = vpack.c.bf16 %v4908_v30, %v4908_v30  ;;  %v14452_v10 = vld.sshfl [vmem:[#allocation3 + $0x8] sm:$0x12 pattern:$0x76325410] }
 0x61f   : > { %v4957_v17 = vmax.f32 %v4955_v44, %v4956_v2  ;;  %v15292_v56 = vpack.c.bf16 %v4943_v12, %v4943_v12  ;;  %v15293_v26 = vpack.c.bf16 %v4950_v37, %v4950_v37  ;;  %v19902_v55 = vrot.slane %v5186_v24, 7  ;;  %v5109_v37 = vld [vmem:[#allocation3 + $0xc] sm:$0x7] }
 0x620   : > { %v5076_v42 = vunpack.c.l.b16 %v15291_v7  ;;  %v4915_v57 = vmax.f32 %v4913_v0, %v4914_v5  ;;  %v4922_v40 = vmax.f32 %v4920_v8, %v4921_v53  ;;  %v4928_v21 = vrot.slane %v4927_v47, 1  ;;  %v14451_v0 = vld.sshfl [vmem:[#allocation3 + $0x4] sm:$0x12 pattern:$0x76325410] }
 0x621   : > { %v15294_v13 = vpack.c.bf16 %v4957_v17, %v4957_v17  ;;  %v5077_v33 = vunpack.c.l.b16 %v15292_v56  ;;  %v5078_v34 = vunpack.c.l.b16 %v15293_v26  ;;  %v5072_v43 = vunpack.c.l.b16 %v15287_v61 }
 0x622   : > { %v4929_v60 = vmax.f32 %v4927_v47, %v4928_v21  ;;  %v15288_v31 = vpack.c.bf16 %v4915_v57, %v4915_v57  ;;  %v15289_v1 = vpack.c.bf16 %v4922_v40, %v4922_v40  ;;  %v5158_v36 = vcombine.high %v14431_v38, %v14431_v38 }
 0x623   : > { %v5079_v52 = vunpack.c.l.b16 %v15294_v13  ;;  %v5089_v50 = vsel %vm2611_vm9, %v5077_v33, %v5076_v42  ;;  %v5197_v41 = vshrl.u32 %v14431_v38, 16  ;;  %v5200_v46 = vshll.u32 %v14431_v38, 16 }
 0x624   : > { %v5090_v24 = vsel %vm2613_vm10, %v5078_v34, %v5089_v50  ;;  %v15290_v51 = vpack.c.bf16 %v4929_v60, %v4929_v60  ;;  %v5073_v23 = vunpack.c.l.b16 %v15288_v31  ;;  %v5074_v6 = vunpack.c.l.b16 %v15289_v1 }
 0x625   : > { %v5091_v28 = vsel %vm2615_vm11, %v5079_v52, %v5090_v24  ;;  %v5166_v54 = vcombine.high %v14432_v48, %v14432_v48  ;;  %v5199_v35 = vrot.slane %v5197_v41, 6  ;;  %v5202_v32 = vrot.slane %v5200_v46, 7 }
 0x626   : > { %v5095_v16 = vpack.c.b16 %v5091_v28, %v5091_v28  ;;  %v5075_v58 = vunpack.c.l.b16 %v15290_v51  ;;  %v5086_v18 = vsel %vm2611_vm9, %v5073_v23, %v5072_v43  ;;  %v5211_v11 = vshrl.u32 %v14432_v48, 16  ;;  %v14525_v28 = vld.sshfl [vmem:[#allocation3 + $0x14] sm:$0x12 pattern:$0x76325410] }
 0x627   : > { %v5087_v3 = vsel %vm2613_vm10, %v5074_v6, %v5086_v18  ;;  %v5203_v20 = vor.u32 %v5202_v32, %v5199_v35  ;;  %v5206_v44 = vshll.u32 %v5158_v36, 16  ;;  %v5214_v30 = vshll.u32 %v14432_v48, 16 }
 0x628   : > { %v5113_v15 = vsel %vm19870_vm14, %v5095_v16, %v5112_v19  ;;  %v5088_v12 = vsel %vm2615_vm11, %v5075_v58, %v5087_v3  ;;  %v5192_v2 = vshll.u32 %v5150_v39, 16  ;;  %v5213_v7 = vrot.slane %v5211_v11, 6  ;;  %v16930_v39 = vld [vmem:[#allocation23 + $0xc8] sm:$0xff]  }
 0x629   : > { %5114 = vst [vmem:[#allocation3 + $0x10] sm:$0x7] %v5113_v15  ;;  %v5094_v5 = vpack.c.b16 %v5088_v12, %v5088_v12  ;;  %v5204_v53 = vrot.slane %v5203_v20, 2  ;;  %v5216_v47 = vrot.slane %v5214_v30, 7  ;;  %v5220_v61 = vshll.u32 %v5166_v54, 16 }
 0x62a   : > { %v5189_v56 = vor.u32 %v19902_v55, %v19885_v45  ;;  %v5496_v26 = vcombine.high %v14451_v0, %v14451_v0  ;;  %v5504_v38 = vcombine.high %v14452_v10, %v14452_v10  ;;  %v6416_v4 = vshrl.u32 %v14513_v62, 16 }
 0x62b   : > { %v5110_v42 = vsel %vm19870_vm14, %v5094_v5, %v5109_v37  ;;  %v5208_v57 = vrot.slane %v5206_v44, 7  ;;  %v5217_v40 = vor.u32 %v5216_v47, %v5213_v7  ;;  %v6419_v21 = vshll.u32 %v14513_v62, 16 }
 0x62c   : > { %5111 = vst [vmem:[#allocation3 + $0xc] sm:$0x7] %v5110_v42  ;;  %v14455_v13 = vrot.slane %v14451_v0, 9  ;;  %v5524_v33 = vrot.slane %v5496_v26, 7  ;;  %v14456_v45 = vrot.slane %v14452_v10, 9  ;;  %v5528_v55 = vrot.slane %v5504_v38, 7 }
 0x62d   : > { %v19955_v34 = vsel %vm19938_vm5, %v5204_v53, %v5208_v57  ;;  %v5218_v43 = vrot.slane %v5217_v40, 2  ;;  %v5222_v60 = vrot.slane %v5220_v61, 7  ;;  %v6372_v31 = vcombine.high %v14513_v62, %v14513_v62 }
 0x62e   : > { %v19959_v1 = vsel %vm19947_vm8, %v14455_v13, %v5524_v33  ;;  %v5529_v48 = vsel %vm19947_vm8, %v14456_v45, %v5528_v55  ;;  %v6418_v50 = vrot.slane %v6416_v4, 6  ;;  %v6421_v41 = vrot.slane %v6419_v21, 7 }
 0x62f   : > { %v19965_v36 = vsel %vm19938_vm5, %v5218_v43, %v5222_v60  ;;  %v6089_v52 = vcombine.low %v19959_v1, %v5529_v48  ;;  %v5190_v19 = vrot.slane %v5189_v56, 2  ;;  %v5194_v51 = vrot.slane %v5192_v2, 7 }
 0x630   : > { %v14477_v46 = vld.sshfl [vmem:[#allocation3 + $0x10] sm:$0x13 pattern:$0x76325410]  ;;  %v5907_v24 = vcombine.low %v19955_v34, %v19965_v36  ;;  %v6425_v23 = vshll.u32 %v6372_v31, 16  ;;  %v6422_v35 = vor.u32 %v6421_v41, %v6418_v50  ;;  %v6594_v12 = vcombine.high %v14525_v28, %v14525_v28 }
 0x631   : > { %v5877_v6 = vshrl.u32 %v14477_v46, 16  ;;  %v14489_v25 = vld.sshfl [vmem:[#allocation3 + $0x10] sm:$0x12 pattern:$0x76325410]  ;;  %v5880_v58 = vshll.u32 %v14477_v46, 16  ;;  %v5195_v18 = vsel %vm19938_vm5, %v5190_v19, %v5194_v51  ;;  %v5833_v10 = vcombine.high %v14477_v46, %v14477_v46 }
 0x632   : > { %v6427_v3 = vrot.slane %v6425_v23, 7  ;;  %v6055_v30 = vcombine.high %v14489_v25, %v14489_v25  ;;  %v6423_v15 = vrot.slane %v6422_v35, 2  ;;  %v5255_v2 = vcombine.low %v5195_v18, %v19955_v34  ;;  %v16834_v18 = vld [vmem:[#allocation19 + $0x8] sm:$0xff]  }
 0x633   : > { %v14433_v54 = vld.sshfl [vmem:[#allocation3 + $0xc] sm:$0x13 pattern:$0x76325410]  ;;  %v5879_v8 = vrot.slane %v5877_v6, 6  ;;  %v5882_v7 = vrot.slane %v5880_v58, 7 }
 0x634   : > { %v5174_v32 = vcombine.high %v14433_v54, %v14433_v54  ;;  %v5225_v62 = vshrl.u32 %v14433_v54, 16  ;;  %v5228_v16 = vshll.u32 %v14433_v54, 16  ;;  %v14453_v11 = vld.sshfl [vmem:[#allocation3 + $0xc] sm:$0x12 pattern:$0x76325410]  ;;  %v6428_v21 = vsel %vm19938_vm5, %v6423_v15, %v6427_v3 }
 0x635   : > { %v5512_v0 = vcombine.high %v14453_v11, %v14453_v11  ;;  %v14529_v5 = vrot.slane %v14525_v28, 9  ;;  %v14457_v47 = vrot.slane %v14453_v11, 9  ;;  %v5886_v56 = vshll.u32 %v5833_v10, 16  ;;  %v16835_v11 = vld [vmem:[#allocation19 + $0x10] sm:$0xff]   ;;  %v16836_v10 = vld [vmem:[#allocation19 + $0x18] sm:$0xff]   ;;  %v16837_v3 = vld [vmem:[#allocation19 + $0x20] sm:$0xff]  }
 0x636   : > { %v5227_v29 = vrot.slane %v5225_v62, 6  ;;  %v5230_v20 = vrot.slane %v5228_v16, 7  ;;  %v5234_v44 = vshll.u32 %v5174_v32, 16  ;;  %v5883_v38 = vor.u32 %v5882_v7, %v5879_v8  ;;  %v16843_v8 = vld [vmem:[#allocation19 + $0x80] sm:$0xff]  }
 0x637   : > { %v5532_v61 = vrot.slane %v5512_v0, 7  ;;  %v14493_v4 = vrot.slane %v14489_v25, 9  ;;  %v6070_v42 = vrot.slane %v6055_v30, 7  ;;  %v5888_v40 = vrot.slane %v5886_v56, 7  ;;  %v16833_v25 = vld [vmem:[#allocation19] sm:$0xff]   ;;  %v16840_v0 = vld [vmem:[#allocation19 + $0x38] sm:$0xff]  }
 0x638   : > { %v5231_v37 = vor.u32 %v5230_v20, %v5227_v29  ;;  %v5236_v53 = vrot.slane %v5234_v44, 7  ;;  %v6609_v13 = vrot.slane %v6594_v12, 7  ;;  %v5884_v55 = vrot.slane %v5883_v38, 2  ;;  %v16838_v29 = vld [vmem:[#allocation19 + $0x28] sm:$0xff]   ;;  %v16839_v20 = vld [vmem:[#allocation19 + $0x30] sm:$0xff]  }
 0x639   : > { %v5533_v57 = vsel %vm19947_vm8, %v14457_v47, %v5532_v61  ;;  %v6071_v34 = vsel %vm19947_vm8, %v14493_v4, %v6070_v42  ;;  %v5263_v60 = vrot.slane %v5255_v2, %v19114_v59  ;;  %v20000_v28 = vrot.slane %v5907_v24, %v19114_v59  ;;  %v17699_v44 = vld.sshfl [vmem:[#allocation3 + $0x8] sm:$0xf pattern:$0x76325410]  ;;  %v16846_v2 = vld [vmem:[#allocation19 + $0x98] sm:$0xff]  }
 0x63a   : > { %v5232_v26 = vrot.slane %v5231_v37, 2  ;;  %v5552_v45 = vcombine.low %v5529_v48, %v5533_v57  ;;  %v6090_v31 = vcombine.low %v5533_v57, %v6071_v34  ;;  %v6610_v50 = vsel %vm19947_vm8, %v14529_v5, %v6609_v13  ;;  %v17700_v30 = vld.sshfl [vmem:[#allocation3] sm:$0xf pattern:$0x76325410]  ;;  %v16844_v12 = vld [vmem:[#allocation19 + $0x88] sm:$0xff]  }
 0x63b   : > { %v5889_v46 = vsel %vm19938_vm5, %v5884_v55, %v5888_v40  ;;  %v19991_v48 = vrot.slane %v6089_v52, %v19114_v59  ;;  %v6629_v19 = vcombine.low %v6071_v34, %v6610_v50  ;;  %v5382_v15 = vcombine.low %v17700_v30, %v17699_v44  ;;  %v16845_v37 = vld [vmem:[#allocation19 + $0x90] sm:$0xff]   ;;  %v14450_v7 = vld.sshfl [vmem:[#allocation3] sm:$0x12 pattern:$0x76325410]  ;;  %v16848_v47 = vld [vmem:[#allocation19 + $0xa8] sm:$0xff]  }
 0x63c   : > { %v5237_v33 = vsel %vm19938_vm5, %v5232_v26, %v5236_v53  ;;  %v19986_v41 = vrot.slane %v5552_v45, %v19114_v59  ;;  %v19997_v23 = vrot.slane %v6090_v31, %v19114_v59  ;;  %v6447_v6 = vcombine.low %v5889_v46, %v6428_v21  ;;  %v16847_v5 = vld [vmem:[#allocation19 + $0xa0] sm:$0xff]   ;;  %v16849_v26 = vld [vmem:[#allocation19 + $0xb0] sm:$0xff]   ;;  %v16850_v42 = vld [vmem:[#allocation19 + $0xb8] sm:$0xff]  }
 0x63d   : > { %v5256_v43 = vcombine.low %v19965_v36, %v5237_v33  ;;  %v5908_v36 = vcombine.low %v5237_v33, %v5889_v46  ;;  %v20003_v54 = vrot.slane %v6629_v19, %v19114_v59  ;;  %v5488_v53 = vcombine.high %v14450_v7, %v14450_v7  ;;  %v16851_v40 = vld [vmem:[#allocation19 + $0xc0] sm:$0xff]   ;;  %v16852_v13 = vld [vmem:[#allocation19 + $0xc8] sm:$0xff]   ;;  %v16854_v33 = vld [vmem:[#allocation19 + $0xd8] sm:$0xff]  }
 0x63e   : > { %v6105_v32 = vcombine.low %v19991_v48, %v19997_v23  ;;  %v20012_v62 = vrot.slane %v6447_v6, %v19114_v59  ;;  %v14454_v61 = vrot.slane %v14450_v7, 9  ;;  %v16855_v45 = vld [vmem:[#allocation19 + $0xe0] sm:$0xff]   ;;  %v16856_v55 = vld [vmem:[#allocation19 + $0xe8] sm:$0xff]   ;;  %v16857_v34 = vld [vmem:[#allocation19 + $0xf0] sm:$0xff]   ;;  %vm20701_vm11 = vcmask 1041409  }
 0x63f   : > { %v19994_v51 = vrot.slane %v5256_v43, %v19114_v59  ;;  %v20007_v52 = vrot.slane %v5908_v36, %v19114_v59  ;;  %v6644_v16 = vcombine.low %v19986_v41, %v20003_v54  ;;  %v5520_v56 = vrot.slane %v5488_v53, 7  ;;  %v17701_v43 = vld.sshfl [vmem:[#allocation3 + $0xc] sm:$0xf pattern:$0x76325410]  ;;  %v16858_v31 = vld [vmem:[#allocation19 + $0xf8] sm:$0xff]  }
 0x640   : > { %v16861_v50 = vld [vmem:[#allocation19 + $0x100] sm:$0xff]   ;;  %v16862_v19 = vld [vmem:[#allocation19 + $0x108] sm:$0xff]   ;;  %v16863_v36 = vld [vmem:[#allocation19 + $0x110] sm:$0xff]   ;;  %vm8571_vm13 = vsmask.f32 7942 }
 0x641   : > { %v5271_v35 = vcombine.low %v5263_v60, %v19994_v51  ;;  %v5923_v24 = vcombine.low %v20000_v28, %v20007_v52  ;;  %v6462_v58 = vcombine.low %v19994_v51, %v20012_v62  ;;  %v5521_v38 = vsel %vm19947_vm8, %v14454_v61, %v5520_v56  ;;  %v17702_v60 = vld.sshfl [vmem:[#allocation3 + $0x4] sm:$0xf pattern:$0x76325410]  ;;  %v16864_v6 = vld [vmem:[#allocation19 + $0x118] sm:$0xff]   ;;  %v16875_v52 = vld [vmem:[#allocation19 + $0x170] sm:$0xff]  }
 0x642   : > { %v5551_v4 = vcombine.low %v5521_v38, %v19959_v1  ;;  %v16853_v1 = vld [vmem:[#allocation19 + $0xd0] sm:$0xff]   ;;  %v5701_v46 = vcombine.low %v17702_v60, %v17701_v43  ;;  %v16873_v44 = vld [vmem:[#allocation19 + $0x160] sm:$0xff]   ;;  %v16874_v28 = vld [vmem:[#allocation19 + $0x168] sm:$0xff]   ;;  %vm20800_vm4 = vsmask.f32 256 }
 0x643   : > { %15941 = vmatmul.mubr.bf16.vlgmr.msra.gmra.mrb[32].mxu0 %v5271_v35  ;;  %v16866_v35 = vld [vmem:[#allocation19 + $0x128] sm:$0xff]   ;;  %v16877_v30 = vld [vmem:[#allocation19 + $0x180] sm:$0xff]   ;;  %v16883_v23 = vld [vmem:[#allocation19 + $0x1b0] sm:$0xff]  }
 0x644   : > { %15945 = vmatpush3.bf16.msra.mxu0 %v16833_v25  ;;  %15960 = vmatprep.mubr.msk.bf16.mxu0 %vm18407_vm2, %v18406_v14  ;;  %v5559_v57 = vrot.slane %v5551_v4, %v19114_v59  ;;  %v16865_v25 = vld [vmem:[#allocation19 + $0x120] sm:$0xff]   ;;  %v16882_v48 = vld [vmem:[#allocation19 + $0x1a8] sm:$0xff]   ;;  %v16890_v61 = vld [vmem:[#allocation19 + $0x1d8] sm:$0xff]  }
 0x645   : > { %15946 = vmatprep.subr.bf16.mxu0 %v18406_v14  ;;  %v16887_v7 = vld [vmem:[#allocation19 + $0x1c0] sm:$0xff]   ;;  %v16888_v53 = vld [vmem:[#allocation19 + $0x1c8] sm:$0xff]   ;;  %v16893_v38 = vld [vmem:[#allocation19 + $0x1f0] sm:$0xff]  }
 0x646   : > { %v5567_v21 = vcombine.low %v5559_v57, %v19986_v41  ;;  %v16891_v56 = vld [vmem:[#allocation19 + $0x1e0] sm:$0xff]   ;;  %v16894_v4 = vld [vmem:[#allocation19 + $0x1f8] sm:$0xff]   ;;  %v16896_v57 = vld [vmem:[#allocation19 + $0x208] sm:$0xff]  }
 0x647   : > { %v16900_v51 = vld [vmem:[#allocation19 + $0x228] sm:$0xff]   ;;  %v16901_v62 = vld [vmem:[#allocation19 + $0x230] sm:$0xff]   ;;  %v6790_v60 = vld [vmem:[#allocation4 + $0x8] sm:$0x4] }
 0x648   : > { %15947 = vmatpush3.bf16.msra.mxu0 %v16834_v18  ;;  %v16867_v18 = vld [vmem:[#allocation19 + $0x130] sm:$0xff]   ;;  %v6791_v41 = vsel %vm19780_vm1, 0, %v6790_v60  ;;  %v6775_v54 = vld [vmem:[#allocation4 + $0xc] sm:$0x1] }
 0x649   : > { %15948 = vmatprep.subr.bf16.mxu0 %v18406_v14  ;;  %6792 = vst [vmem:[#allocation4 + $0x8] sm:$0x4] %v6791_v41 }
 0x64c   : > { %15949 = vmatpush3.bf16.msra.mxu0 %v16835_v11  ;;  %v16868_v11 = vld [vmem:[#allocation19 + $0x138] sm:$0xff]  }
 0x64d   : > { %15950 = vmatprep.subr.bf16.mxu0 %v18406_v14 }
 0x650   : > { %15951 = vmatpush3.bf16.msra.mxu0 %v16836_v10  ;;  %v16869_v10 = vld [vmem:[#allocation19 + $0x140] sm:$0xff]  }
 0x651   : > { %15952 = vmatprep.subr.bf16.mxu0 %v18406_v14 }
 0x654   : > { %15953 = vmatpush3.bf16.msra.mxu0 %v16837_v3  ;;  %v16870_v3 = vld [vmem:[#allocation19 + $0x148] sm:$0xff]  }
 0x655   : > { %15954 = vmatprep.subr.bf16.mxu0 %v18406_v14 }
 0x658   : > { %15955 = vmatpush3.bf16.msra.mxu0 %v16838_v29  ;;  %v16871_v29 = vld [vmem:[#allocation19 + $0x150] sm:$0xff]  }
 0x659   : > { %15956 = vmatprep.subr.bf16.mxu0 %v18406_v14 }
 0x65c   : > { %15957 = vmatpush3.bf16.msra.mxu0 %v16839_v20  ;;  %v16872_v20 = vld [vmem:[#allocation19 + $0x158] sm:$0xff]  }
 0x65d   : > { %15958 = vmatprep.subr.bf16.mxu0 %v18406_v14 }
 0x660   : > { %15959 = vmatpush3.bf16.msra.mxu0 %v16840_v0  ;;  %v16878_v0 = vld [vmem:[#allocation19 + $0x188] sm:$0xff]  }
 0x661   : > { %15964 = vmatprep.subr.bf16.mxu0 %v18406_v14 }
 0x663   : > { %15961 = vmatmul.mubr.bf16.vlgmr.msra.gmra.mrb[32].mxu0 %v5382_v15  ;;  %v16880_v15 = vld [vmem:[#allocation19 + $0x198] sm:$0xff]  }
 0x664   : > { %15965 = vmatpush3.bf16.msra.mxu0 %v16843_v8  ;;  %15980 = vmatprep.mubr.msk.bf16.mxu0 %vm18407_vm2, %v18406_v14  ;;  %v16879_v8 = vld [vmem:[#allocation19 + $0x190] sm:$0xff]  }
 0x665   : > { %15966 = vmatprep.subr.bf16.mxu0 %v18406_v14 }
 0x668   : > { %15967 = vmatpush3.bf16.msra.mxu0 %v16844_v12  ;;  %v16881_v12 = vld [vmem:[#allocation19 + $0x1a0] sm:$0xff]  }
 0x669   : > { %15968 = vmatprep.subr.bf16.mxu0 %v18406_v14 }
 0x66c   : > { %15969 = vmatpush3.bf16.msra.mxu0 %v16845_v37  ;;  %v17704_v37 = vld.sshfl [vmem:[#allocation3 + $0x10] sm:$0xf pattern:$0x76325410] }
 0x66d   : > { %15970 = vmatprep.subr.bf16.mxu0 %v18406_v14 }
 0x670   : > { %15971 = vmatpush3.bf16.msra.mxu0 %v16846_v2  ;;  %v16884_v2 = vld [vmem:[#allocation19 + $0x1b8] sm:$0xff]  }
 0x671   : > { %15972 = vmatprep.subr.bf16.mxu0 %v18406_v14 }
 0x674   : > { %15973 = vmatpush3.bf16.msra.mxu0 %v16847_v5 }
 0x675   : > { %15974 = vmatprep.subr.bf16.mxu0 %v18406_v14 }
 0x678   : > { %15975 = vmatpush3.bf16.msra.mxu0 %v16848_v47  ;;  %v16889_v47 = vld [vmem:[#allocation19 + $0x1d0] sm:$0xff]  }
 0x679   : > { %15976 = vmatprep.subr.bf16.mxu0 %v18406_v14 }
 0x67c   : > { %15977 = vmatpush3.bf16.msra.mxu0 %v16849_v26  ;;  %v16892_v26 = vld [vmem:[#allocation19 + $0x1e8] sm:$0xff]  }
 0x67d   : > { %15978 = vmatprep.subr.bf16.mxu0 %v18406_v14 }
 0x680   : > { %15979 = vmatpush3.bf16.msra.mxu0 %v16850_v42  ;;  %v16895_v42 = vld [vmem:[#allocation19 + $0x200] sm:$0xff]  }
 0x681   : > { %15984 = vmatprep.subr.bf16.mxu0 %v18406_v14 }
 0x683   : > { %15981 = vmatmul.mubr.bf16.vlgmr.msra.gmra.mrb[32].mxu0 %v5567_v21  ;;  %v16898_v21 = vld [vmem:[#allocation19 + $0x218] sm:$0xff]  }
 0x684   : > { %15985 = vmatpush3.bf16.msra.mxu0 %v16851_v40  ;;  %16000 = vmatprep.mubr.msk.bf16.mxu0 %vm18407_vm2, %v18406_v14  ;;  %v16897_v40 = vld [vmem:[#allocation19 + $0x210] sm:$0xff]  }
 0x685   : > { %15986 = vmatprep.subr.bf16.mxu0 %v18406_v14 }
 0x688   : > { %15987 = vmatpush3.bf16.msra.mxu0 %v16852_v13  ;;  %v16899_v13 = vld [vmem:[#allocation19 + $0x220] sm:$0xff]  }
 0x689   : > { %15988 = vmatprep.subr.bf16.mxu0 %v18406_v14 }
 0x68c   : > { %15989 = vmatpush3.bf16.msra.mxu0 %v16853_v1  ;;  %v6769_v1 = vld [vmem:[#allocation4 + $0x4] sm:$0x1] }
 0x68d   : > { %15990 = vmatprep.subr.bf16.mxu0 %v18406_v14 }
 0x690   : > { %15991 = vmatpush3.bf16.msra.mxu0 %v16854_v33  ;;  %v6772_v33 = vld [vmem:[#allocation4 + $0x8] sm:$0x1] }
 0x691   : > { %15992 = vmatprep.subr.bf16.mxu0 %v18406_v14 }
 0x694   : > { %15993 = vmatpush3.bf16.msra.mxu0 %v16855_v45  ;;  %v6787_v45 = vld [vmem:[#allocation4 + $0x4] sm:$0x4] }
 0x695   : > { %15994 = vmatprep.subr.bf16.mxu0 %v18406_v14  ;;  %v6788_v43 = vsel %vm19780_vm1, 0, %v6787_v45 }
 0x696   : > { %6789 = vst [vmem:[#allocation4 + $0x4] sm:$0x4] %v6788_v43 }
 0x698   : > { %15995 = vmatpush3.bf16.msra.mxu0 %v16856_v55  ;;  %v6770_v55 = vsel %vm19080_vm7, 0, %v6769_v1 }
 0x699   : > { %15996 = vmatprep.subr.bf16.mxu0 %v18406_v14  ;;  %6771 = vst [vmem:[#allocation4 + $0x4] sm:$0x1] %v6770_v55 }
 0x69c   : > { %15997 = vmatpush3.bf16.msra.mxu0 %v16857_v34  ;;  %v6773_v34 = vsel %vm19080_vm7, 0, %v6772_v33 }
 0x69d   : > { %15998 = vmatprep.subr.bf16.mxu0 %v18406_v14  ;;  %6774 = vst [vmem:[#allocation4 + $0x8] sm:$0x1] %v6773_v34 }
 0x6a0   : > { %15999 = vmatpush3.bf16.msra.mxu0 %v16858_v31  ;;  %v6793_v31 = vld [vmem:[#allocation4 + $0xc] sm:$0x4]  ;;  %v6851_v33 = vld [vmem:[#allocation4 + $0x4] sm:$0x7] }
 0x6a1   : > { %16004 = vmatprep.subr.bf16.mxu0 %v18406_v14 }
 0x6a3   : > { %16001 = vmatmul.mubr.bf16.vlgmr.msra.gmra.mrb[32].mxu0 %v5701_v46 }
 0x6a4   : > { %16005 = vmatpush3.bf16.msra.mxu0 %v16861_v50  ;;  %16020 = vmatprep.mubr.msk.bf16.mxu0 %vm18407_vm2, %v18406_v14  ;;  %v6776_v50 = vsel %vm19080_vm7, 0, %v6775_v54  ;;  %v6854_v41 = vld [vmem:[#allocation4 + $0x8] sm:$0x7] }
 0x6a5   : > { %16006 = vmatprep.subr.bf16.mxu0 %v18406_v14  ;;  %6777 = vst [vmem:[#allocation4 + $0xc] sm:$0x1] %v6776_v50 }
 0x6a8   : > { %16007 = vmatpush3.bf16.msra.mxu0 %v16862_v19  ;;  %v6794_v19 = vsel %vm19780_vm1, 0, %v6793_v31 }
 0x6a9   : > { %16008 = vmatprep.subr.bf16.mxu0 %v18406_v14  ;;  %6795 = vst [vmem:[#allocation4 + $0xc] sm:$0x4] %v6794_v19 }
 0x6ac   : > { %16009 = vmatpush3.bf16.msra.mxu0 %v16863_v36  ;;  %v6796_v36 = vld [vmem:[#allocation4 + $0x10] sm:$0x4] }
 0x6ad   : > { %16010 = vmatprep.subr.bf16.mxu0 %v18406_v14 }
 0x6b0   : > { %16011 = vmatpush3.bf16.msra.mxu0 %v16864_v6  ;;  %v6797_v6 = vsel %vm19780_vm1, 0, %v6796_v36  ;;  %v6857_v50 = vld [vmem:[#allocation4 + $0xc] sm:$0x7] }
 0x6b1   : > { %16012 = vmatprep.subr.bf16.mxu0 %v18406_v14  ;;  %6798 = vst [vmem:[#allocation4 + $0x10] sm:$0x4] %v6797_v6 }
 0x6b4   : > { %16013 = vmatpush3.bf16.msra.mxu0 %v16865_v25  ;;  %v16903_v25 = vld [vmem:[#allocation23 + $0x40] sm:$0xff]  }
 0x6b5   : > { %16014 = vmatprep.subr.bf16.mxu0 %v18406_v14  ;;  %16105 = vmatpush3.bf16.msra.mxu1 %v16903_v25 }
 0x6b6   : > { %16106 = vmatprep.subr.bf16.mxu1 %v18406_v14 }
 0x6b8   : > { %16015 = vmatpush3.bf16.msra.mxu0 %v16866_v35  ;;  %v16904_v35 = vld [vmem:[#allocation23 + $0x48] sm:$0xff]  }
 0x6b9   : > { %16016 = vmatprep.subr.bf16.mxu0 %v18406_v14  ;;  %16107 = vmatpush3.bf16.msra.mxu1 %v16904_v35 }
 0x6ba   : > { %16108 = vmatprep.subr.bf16.mxu1 %v18406_v14 }
 0x6bc   : > { %16017 = vmatpush3.bf16.msra.mxu0 %v16867_v18  ;;  %v6766_v18 = vld [vmem:[#allocation4] sm:$0x1] }
 0x6bd   : > { %16018 = vmatprep.subr.bf16.mxu0 %v18406_v14 }
 0x6c0   : > { %16019 = vmatpush3.bf16.msra.mxu0 %v16868_v11  ;;  %v6767_v11 = vsel %vm19080_vm7, 0, %v6766_v18 }
 0x6c1   : > { %16024 = vmatprep.subr.bf16.mxu0 %v18406_v14  ;;  %6768 = vst [vmem:[#allocation4] sm:$0x1] %v6767_v11 }
 0x6c3   : > { %16021 = vmatmul.mubr.bf16.vlgmr.msra.gmra.mrb[32].mxu0 %v5923_v24  ;;  %v16876_v24 = vld [vmem:[#allocation19 + $0x178] sm:$0xff]  }
 0x6c4   : > { %16025 = vmatpush3.bf16.msra.mxu0 %v16869_v10  ;;  %16040 = vmatprep.mubr.msk.bf16.mxu0 %vm18407_vm2, %v18406_v14  ;;  %v6784_v10 = vld [vmem:[#allocation4] sm:$0x4] }
 0x6c5   : > { %16026 = vmatprep.subr.bf16.mxu0 %v18406_v14 }
 0x6c8   : > { %16027 = vmatpush3.bf16.msra.mxu0 %v16870_v3  ;;  %v6785_v3 = vsel %vm19780_vm1, 0, %v6784_v10 }
 0x6c9   : > { %16028 = vmatprep.subr.bf16.mxu0 %v18406_v14  ;;  %6786 = vst [vmem:[#allocation4] sm:$0x4] %v6785_v3 }
 0x6cc   : > { %16029 = vmatpush3.bf16.msra.mxu0 %v16871_v29  ;;  %v16905_v29 = vld [vmem:[#allocation23 + $0x50] sm:$0xff]  }
 0x6cd   : > { %16030 = vmatprep.subr.bf16.mxu0 %v18406_v14  ;;  %16109 = vmatpush3.bf16.msra.mxu1 %v16905_v29 }
 0x6ce   : > { %16110 = vmatprep.subr.bf16.mxu1 %v18406_v14 }
 0x6d0   : > { %16031 = vmatpush3.bf16.msra.mxu0 %v16872_v20  ;;  %v16906_v20 = vld [vmem:[#allocation23 + $0x58] sm:$0xff]  }
 0x6d1   : > { %16032 = vmatprep.subr.bf16.mxu0 %v18406_v14  ;;  %16111 = vmatpush3.bf16.msra.mxu1 %v16906_v20 }
 0x6d2   : > { %16112 = vmatprep.subr.bf16.mxu1 %v18406_v14 }
 0x6d4   : > { %16033 = vmatpush3.bf16.msra.mxu0 %v16873_v44  ;;  %v16907_v44 = vld [vmem:[#allocation23 + $0x60] sm:$0xff]  }
 0x6d5   : > { %16034 = vmatprep.subr.bf16.mxu0 %v18406_v14  ;;  %16113 = vmatpush3.bf16.msra.mxu1 %v16907_v44 }
 0x6d6   : > { %16114 = vmatprep.subr.bf16.mxu1 %v18406_v14 }
 0x6d8   : > { %16035 = vmatpush3.bf16.msra.mxu0 %v16874_v28  ;;  %v16908_v28 = vld [vmem:[#allocation23 + $0x68] sm:$0xff]  }
 0x6d9   : > { %16036 = vmatprep.subr.bf16.mxu0 %v18406_v14  ;;  %16115 = vmatpush3.bf16.msra.mxu1 %v16908_v28 }
 0x6da   : > { %16116 = vmatprep.subr.bf16.mxu1 %v18406_v14 }
 0x6dc   : > { %16037 = vmatpush3.bf16.msra.mxu0 %v16875_v52  ;;  %v16909_v52 = vld [vmem:[#allocation23 + $0x70] sm:$0xff]  }
 0x6dd   : > { %16038 = vmatprep.subr.bf16.mxu0 %v18406_v14  ;;  %16117 = vmatpush3.bf16.msra.mxu1 %v16909_v52 }
 0x6de   : > { %16118 = vmatprep.subr.bf16.mxu1 %v18406_v14 }
 0x6e0   : > { %16039 = vmatpush3.bf16.msra.mxu0 %v16876_v24  ;;  %v16910_v24 = vld [vmem:[#allocation23 + $0x78] sm:$0xff]  }
 0x6e1   : > { %16044 = vmatprep.subr.bf16.mxu0 %v18406_v14  ;;  %16119 = vmatpush3.bf16.msra.mxu1 %v16910_v24 }
 0x6e2   : > { %16124 = vmatprep.subr.bf16.mxu1 %v18406_v14 }
 0x6e3   : > { %16041 = vmatmul.mubr.bf16.vlgmr.msra.gmra.mrb[32].mxu0 %v6105_v32  ;;  %v17703_v32 = vld.sshfl [vmem:[#allocation3 + $0x8] sm:$0xf pattern:$0x76325410] }
 0x6e4   : > { %16045 = vmatpush3.bf16.msra.mxu0 %v16877_v30  ;;  %16060 = vmatprep.mubr.msk.bf16.mxu0 %vm18407_vm2, %v18406_v14  ;;  %v6240_v5 = vcombine.low %v17703_v32, %v17704_v37  ;;  %v6781_v30 = vld [vmem:[#allocation4 + $0x14] sm:$0x1] }
 0x6e5   : > { %16046 = vmatprep.subr.bf16.mxu0 %v18406_v14 }
 0x6e8   : > { %16047 = vmatpush3.bf16.msra.mxu0 %v16878_v0  ;;  %v6799_v0 = vld [vmem:[#allocation4 + $0x14] sm:$0x4] }
 0x6e9   : > { %16048 = vmatprep.subr.bf16.mxu0 %v18406_v14 }
 0x6ec   : > { %16049 = vmatpush3.bf16.msra.mxu0 %v16879_v8  ;;  %v6782_v8 = vsel %vm19080_vm7, 0, %v6781_v30 }
 0x6ed   : > { %16050 = vmatprep.subr.bf16.mxu0 %v18406_v14  ;;  %6783 = vst [vmem:[#allocation4 + $0x14] sm:$0x1] %v6782_v8 }
 0x6f0   : > { %16051 = vmatpush3.bf16.msra.mxu0 %v16880_v15  ;;  %v6800_v15 = vsel %vm19780_vm1, 0, %v6799_v0  ;;  %vm20330_vm1 = vmand %vm20701_vm11, %vm8571_vm13  ;;  %vm20801_vm11 = vcmask 1041408  }
 0x6f1   : > { %16052 = vmatprep.subr.bf16.mxu0 %v18406_v14  ;;  %6801 = vst [vmem:[#allocation4 + $0x14] sm:$0x4] %v6800_v15 }
 0x6f4   : > { %16053 = vmatpush3.bf16.msra.mxu0 %v16881_v12  ;;  %v14538_v12 = vld [vmem:[#allocation20] ss:$0 sm:$0xff] }
 0x6f5   : > { %16054 = vmatprep.subr.bf16.mxu0 %v18406_v14 }
 0x6f8   : > { %16055 = vmatpush3.bf16.msra.mxu0 %v16882_v48  ;;  %v20151_v18 = vld.sshfl [vmem:[#allocation4 + $0x14] sm:$0x13 pattern:$0x76325410] }
 0x6f9   : > { %16056 = vmatprep.subr.bf16.mxu0 %v18406_v14  ;;  %v8152_v52 = vshrl.u32 %v20151_v18, 16  ;;  %v8155_v30 = vshll.u32 %v20151_v18, 16 }
 0x6fb   : > { %v8154_v15 = vrot.slane %v8152_v52, 6 }
 0x6fc   : > { %16057 = vmatpush3.bf16.msra.mxu0 %v16883_v23  ;;  %v14539_v23 = vld [vmem:[#allocation22] ss:$0 sm:$0xff] }
 0x6fd   : > { %16058 = vmatprep.subr.bf16.mxu0 %v18406_v14 }
 0x700   : > { %16059 = vmatpush3.bf16.msra.mxu0 %v16884_v2 }
 0x701   : > { %16064 = vmatprep.subr.bf16.mxu0 %v18406_v14 }
 0x703   : > { %16061 = vmatmul.mubr.bf16.vlgmr.msra.gmra.mrb[32].mxu0 %v6240_v5 }
 0x704   : > { %16065 = vmatpush3.bf16.msra.mxu0 %v16887_v7  ;;  %16080 = vmatprep.mubr.msk.bf16.mxu0 %vm18407_vm2, %v18406_v14 }
 0x705   : > { %16066 = vmatprep.subr.bf16.mxu0 %v18406_v14 }
 0x708   : > { %16067 = vmatpush3.bf16.msra.mxu0 %v16888_v53 }
 0x709   : > { %16068 = vmatprep.subr.bf16.mxu0 %v18406_v14 }
 0x70c   : > { %16069 = vmatpush3.bf16.msra.mxu0 %v16889_v47 }
 0x70d   : > { %16070 = vmatprep.subr.bf16.mxu0 %v18406_v14 }
 0x710   : > { %16071 = vmatpush3.bf16.msra.mxu0 %v16890_v61 }
 0x711   : > { %16072 = vmatprep.subr.bf16.mxu0 %v18406_v14 }
 0x714   : > { %16073 = vmatpush3.bf16.msra.mxu0 %v16891_v56 }
 0x715   : > { %16074 = vmatprep.subr.bf16.mxu0 %v18406_v14 }
 0x718   : > { %16075 = vmatpush3.bf16.msra.mxu0 %v16892_v26 }
 0x719   : > { %16076 = vmatprep.subr.bf16.mxu0 %v18406_v14 }
 0x71c   : > { %16077 = vmatpush3.bf16.msra.mxu0 %v16893_v38 }
 0x71d   : > { %16078 = vmatprep.subr.bf16.mxu0 %v18406_v14 }
 0x720   : > { %16079 = vmatpush3.bf16.msra.mxu0 %v16894_v4  ;;  %v14544_v4 = vld.sshfl [vmem:[#allocation4] sm:$0x13 pattern:$0x76325410] }
 0x721   : > { %16084 = vmatprep.subr.bf16.mxu0 %v18406_v14  ;;  %v6898_v55 = vcombine.high %v14544_v4, %v14544_v4 }
 0x723   : > { %16081 = vmatmul.mubr.bf16.vlgmr.msra.gmra.mrb[32].mxu0 %v6462_v58  ;;  %v16902_v58 = vld [vmem:[#allocation19 + $0x238] sm:$0xff]   ;;  %v6933_v20 = vshll.u32 %v6898_v55, 16 }
 0x724   : > { %16085 = vmatpush3.bf16.msra.mxu0 %v16895_v42  ;;  %16100 = vmatprep.mubr.msk.bf16.mxu0 %vm18407_vm2, %v18406_v14 }
 0x725   : > { %16086 = vmatprep.subr.bf16.mxu0 %v18406_v14  ;;  %v6935_v0 = vrot.slane %v6933_v20, 7 }
 0x728   : > { %16087 = vmatpush3.bf16.msra.mxu0 %v16896_v57 }
 0x729   : > { %16088 = vmatprep.subr.bf16.mxu0 %v18406_v14 }
 0x72c   : > { %16089 = vmatpush3.bf16.msra.mxu0 %v16897_v40 }
 0x72d   : > { %16090 = vmatprep.subr.bf16.mxu0 %v18406_v14 }
 0x730   : > { %16091 = vmatpush3.bf16.msra.mxu0 %v16898_v21  ;;  %v6924_v21 = vshrl.u32 %v14544_v4, 16 }
 0x731   : > { %16092 = vmatprep.subr.bf16.mxu0 %v18406_v14 }
 0x734   : > { %16093 = vmatpush3.bf16.msra.mxu0 %v16899_v13  ;;  %v6927_v13 = vshll.u32 %v14544_v4, 16 }
 0x735   : > { %16094 = vmatprep.subr.bf16.mxu0 %v18406_v14 }
 0x736   : > { %v6929_v19 = vrot.slane %v6927_v13, 7 }
 0x738   : > { %16095 = vmatpush3.bf16.msra.mxu0 %v16900_v51 }
 0x739   : > { %16096 = vmatprep.subr.bf16.mxu0 %v18406_v14 }
 0x73c   : > { %16097 = vmatpush3.bf16.msra.mxu0 %v16901_v62 }
 0x73d   : > { %16098 = vmatprep.subr.bf16.mxu0 %v18406_v14 }
 0x740   : > { %16099 = vmatpush3.bf16.msra.mxu0 %v16902_v58 }
 0x743   : > { %16101 = vmatmul.mubr.bf16.vlgmr.msra.gmra.mrb[32].mxu0 %v6644_v16  ;;  %v6778_v16 = vld [vmem:[#allocation4 + $0x10] sm:$0x1] }
 0x744   : > { %8902 = vmatprep.mubr.bf16.mxu0 %v18405_v27  ;;  %v6779_v46 = vsel %vm19080_vm7, 0, %v6778_v16 }
 0x745   : > { %6780 = vst [vmem:[#allocation4 + $0x10] sm:$0x1] %v6779_v46  ;;  %v6926_v46 = vrot.slane %v6924_v21, 6 }
 0x747   : > { %v6930_v28 = vor.u32 %v6929_v19, %v6926_v46 }
 0x749   : > { %v6931_v8 = vrot.slane %v6930_v28, 2 }
 0x74b   : > { %v6936_v55 = vsel %vm19938_vm5, %v6931_v8, %v6935_v0 }
 0x74c   : > { %v6860_v10 = vld [vmem:[#allocation4 + $0x10] sm:$0x7] }
 0x816   : > { %v6728_v48 = vpop.f32.mrb[32].mxu0 }
 0x817   : > { %v6744_v32 = vmul.f32 %v14538_v12, %v6728_v48  ;;  %v16102_v37 = vpop.f32.mrb[33].mxu0 }
 0x818   : > { %v6731_v2 = vpop.f32.mrb[34].mxu0 }
 0x819   : > { %v6753_v7 = vadd.f32 %v14539_v23, %v6744_v32  ;;  %v6745_v5 = vmul.f32 %v14538_v12, %v6731_v2  ;;  %v16103_v53 = vpop.f32.mrb[35].mxu0  ;;  %v20161_v12 = vld.sshfl [vmem:[#allocation4 + $0x14] sm:$0x12 pattern:$0x76325410]  ;;  %v8157_v2 = vrot.slane %v8155_v30, 7 }
 0x81a   : > { %v8330_v63 = vcombine.high %v20161_v12, %v20161_v12 }
 0x81b   : > { %v6755_v47 = vmax.f32 %v6753_v7, 0.0  ;;  %v6754_v61 = vadd.f32 %v14539_v23, %v6745_v5 }
 0x81c   : > { %v8345_v46 = vrot.slane %v8330_v63, 7 }
 0x81d   : > { %v6759_v56 = vcombine.high %v6755_v47, %v6755_v47  ;;  %v15295_v26 = vpack.c.bf16 %v6755_v47, %v6755_v47  ;;  %v6756_v38 = vmax.f32 %v6754_v61, 0.0 }
 0x81f   : > { %v15296_v42 = vpack.c.bf16 %v6759_v56, %v6759_v56  ;;  %v6819_v9 = vshrl.u32 %v15295_v26, 16  ;;  %v6760_v57 = vcombine.high %v6756_v38, %v6756_v38  ;;  %v15297_v40 = vpack.c.bf16 %v6756_v38, %v6756_v38 }
 0x820   : > { %v6822_v62 = vshll.u32 %v15295_v26, 16 }
 0x821   : > { %v6821_v51 = vrot.slane %v6819_v9, 7  ;;  %v6826_v58 = vshrl.u32 %v15296_v42, 16  ;;  %v15298_v1 = vpack.c.bf16 %v6760_v57, %v6760_v57  ;;  %v6833_v45 = vshrl.u32 %v15297_v40, 16 }
 0x822   : > { %v6829_v60 = vshll.u32 %v15296_v42, 16  ;;  %v6836_v31 = vshll.u32 %v15297_v40, 16  ;;  %v8108_v40 = vcombine.high %v20151_v18, %v20151_v18 }
 0x823   : > { %v6824_v34 = vor.u32 %v6822_v62, %v6821_v51  ;;  %v6828_v43 = vrot.slane %v6826_v58, 7  ;;  %v6840_v54 = vshrl.u32 %v15298_v1, 16  ;;  %v6835_v16 = vrot.slane %v6833_v45, 7 }
 0x824   : > { %v6843_v35 = vshll.u32 %v15298_v1, 16 }
 0x825   : > { %v6831_v36 = vor.u32 %v6829_v60, %v6828_v43  ;;  %v6852_v6 = vsel %vm19870_vm14, %v6824_v34, %v6851_v33  ;;  %v6842_v25 = vrot.slane %v6840_v54, 7  ;;  %v6838_v11 = vor.u32 %v6836_v31, %v6835_v16 }
 0x826   : > { %6853 = vst [vmem:[#allocation4 + $0x4] sm:$0x7] %v6852_v6  ;;  %v8158_v60 = vor.u32 %v8157_v2, %v8154_v15 }
 0x827   : > { %v6855_v3 = vsel %vm19870_vm14, %v6831_v36, %v6854_v41  ;;  %v6845_v29 = vor.u32 %v6843_v35, %v6842_v25  ;;  %v6858_v44 = vsel %vm19870_vm14, %v6838_v11, %v6857_v50  ;;  %v14643_v41 = vrot.slane %v20161_v12, 9 }
 0x828   : > { %6856 = vst [vmem:[#allocation4 + $0x8] sm:$0x7] %v6855_v3  ;;  %6859 = vst [vmem:[#allocation4 + $0xc] sm:$0x7] %v6858_v44  ;;  %v8159_v44 = vrot.slane %v8158_v60, 2 }
 0x829   : > { %v6861_v24 = vsel %vm19870_vm14, %v6845_v29, %v6860_v10  ;;  %v8161_v10 = vshll.u32 %v8108_v40, 16  ;;  %v8346_v40 = vsel %vm19947_vm8, %v14643_v41, %v8345_v46 }
 0x82a   : > { %6862 = vst [vmem:[#allocation4 + $0x10] sm:$0x7] %v6861_v24 }
 0x82d   : > { %v14545_v48 = vld.sshfl [vmem:[#allocation4 + $0x4] sm:$0x13 pattern:$0x76325410] }
 0x82e   : > { %v6906_v23 = vcombine.high %v14545_v48, %v14545_v48  ;;  %v6938_v32 = vshrl.u32 %v14545_v48, 16  ;;  %v6941_v37 = vshll.u32 %v14545_v48, 16  ;;  %v14565_v43 = vld.sshfl [vmem:[#allocation4 + $0x4] sm:$0x12 pattern:$0x76325410] }
 0x82f   : > { %v14546_v7 = vld.sshfl [vmem:[#allocation4 + $0x8] sm:$0x13 pattern:$0x76325410]  ;;  %v7237_v50 = vcombine.high %v14565_v43, %v14565_v43  ;;  %v14569_v15 = vrot.slane %v14565_v43, 9 }
 0x830   : > { %v14547_v5 = vld.sshfl [vmem:[#allocation4 + $0xc] sm:$0x13 pattern:$0x76325410]  ;;  %v6914_v53 = vcombine.high %v14546_v7, %v14546_v7  ;;  %v6940_v47 = vrot.slane %v6938_v32, 6  ;;  %v6943_v61 = vrot.slane %v6941_v37, 7 }
 0x831   : > { %v6922_v56 = vcombine.high %v14547_v5, %v14547_v5  ;;  %v6947_v26 = vshll.u32 %v6906_v23, 16  ;;  %v6952_v38 = vshrl.u32 %v14546_v7, 16  ;;  %v6955_v4 = vshll.u32 %v14546_v7, 16 }
 0x832   : > { %v6944_v42 = vor.u32 %v6943_v61, %v6940_v47  ;;  %v6966_v9 = vshrl.u32 %v14547_v5, 16  ;;  %v6969_v57 = vshll.u32 %v14547_v5, 16  ;;  %v6961_v62 = vshll.u32 %v6914_v53, 16  ;;  %v16911_v47 = vld [vmem:[#allocation23] sm:$0xff]  }
 0x833   : > { %v6949_v21 = vrot.slane %v6947_v26, 7  ;;  %v6954_v13 = vrot.slane %v6952_v38, 6  ;;  %v6957_v51 = vrot.slane %v6955_v4, 7  ;;  %v6975_v45 = vshll.u32 %v6922_v56, 16 }
 0x834   : > { %v6945_v58 = vrot.slane %v6944_v42, 2  ;;  %v6968_v1 = vrot.slane %v6966_v9, 6  ;;  %v6971_v33 = vrot.slane %v6969_v57, 7  ;;  %v6963_v36 = vrot.slane %v6961_v62, 7 }
 0x835   : > { %v6958_v34 = vor.u32 %v6957_v51, %v6954_v13  ;;  %v14566_v31 = vld.sshfl [vmem:[#allocation4 + $0x8] sm:$0x12 pattern:$0x76325410]  ;;  %v6977_v18 = vrot.slane %v6975_v45, 7  ;;  %v7260_v52 = vrot.slane %v7237_v50, 7 }
 0x836   : > { %v20172_v54 = vsel %vm19938_vm5, %v6945_v58, %v6949_v21  ;;  %v6972_v16 = vor.u32 %v6971_v33, %v6968_v1  ;;  %v14567_v6 = vld.sshfl [vmem:[#allocation4 + $0xc] sm:$0x12 pattern:$0x76325410]  ;;  %v7245_v25 = vcombine.high %v14566_v31, %v14566_v31  ;;  %v14570_v12 = vrot.slane %v14566_v31, 9  ;;  %v16912_v58 = vld [vmem:[#allocation23 + $0x8] sm:$0xff]  }
 0x837   : > { %v6959_v19 = vrot.slane %v6958_v34, 2  ;;  %v7253_v11 = vcombine.high %v14567_v6, %v14567_v6  ;;  %v6996_v29 = vcombine.low %v6936_v55, %v20172_v54  ;;  %v14591_v30 = vld.sshfl [vmem:[#allocation4 + $0x10] sm:$0x13 pattern:$0x76325410]  ;;  %v14571_v23 = vrot.slane %v14567_v6, 9 }
 0x838   : > { %v6973_v35 = vrot.slane %v6972_v16, 2  ;;  %v7264_v20 = vrot.slane %v7245_v25, 7  ;;  %v14603_v48 = vld.sshfl [vmem:[#allocation4 + $0x10] sm:$0x12 pattern:$0x76325410]  ;;  %v7569_v32 = vcombine.high %v14591_v30, %v14591_v30  ;;  %v20188_v61 = vsel %vm19947_vm8, %v14569_v15, %v7260_v52 }
 0x839   : > { %v6964_v3 = vsel %vm19938_vm5, %v6959_v19, %v6963_v36  ;;  %v7268_v24 = vrot.slane %v7253_v11, 7  ;;  %v7613_v37 = vshrl.u32 %v14591_v30, 16  ;;  %v7004_v2 = vrot.slane %v6996_v29, %v19114_v59  ;;  %v16913_v16 = vld [vmem:[#allocation23 + $0x10] sm:$0xff]   ;;  %v16916_v29 = vld [vmem:[#allocation23 + $0x28] sm:$0xff]   ;;  %v16918_v52 = vld [vmem:[#allocation23 + $0x38] sm:$0xff]  }
 0x83a   : > { %v6978_v28 = vsel %vm19938_vm5, %v6973_v35, %v6977_v18  ;;  %v7643_v0 = vcombine.low %v20172_v54, %v6964_v3  ;;  %v7265_v5 = vsel %vm19947_vm8, %v14570_v12, %v7264_v20  ;;  %v7616_v53 = vshll.u32 %v14591_v30, 16  ;;  %v16914_v18 = vld [vmem:[#allocation23 + $0x18] sm:$0xff]   ;;  %v16917_v20 = vld [vmem:[#allocation23 + $0x30] sm:$0xff]  }
 0x83b   : > { %v6997_v8 = vcombine.low %v6964_v3, %v6978_v28  ;;  %v7269_v63 = vsel %vm19947_vm8, %v14571_v23, %v7268_v24  ;;  %v7615_v56 = vrot.slane %v7613_v37, 6  ;;  %v8163_v26 = vrot.slane %v8161_v10, 7  ;;  %v16915_v3 = vld [vmem:[#allocation23 + $0x20] sm:$0xff]   ;;  %v16924_v15 = vld [vmem:[#allocation23 + $0x98] sm:$0xff]  }
 0x83c   : > { %v7618_v4 = vrot.slane %v7616_v53, 7  ;;  %v7622_v42 = vshll.u32 %v7569_v32, 16  ;;  %v7791_v9 = vcombine.high %v14603_v48, %v14603_v48  ;;  %v7825_v57 = vcombine.low %v20188_v61, %v7265_v5  ;;  %v16921_v24 = vld [vmem:[#allocation23 + $0x80] sm:$0xff]   ;;  %v16926_v32 = vld [vmem:[#allocation23 + $0xa8] sm:$0xff]  }
 0x83d   : > { %v20182_v7 = vrot.slane %v6997_v8, %v19114_v59  ;;  %v7288_v21 = vcombine.low %v7265_v5, %v7269_v63  ;;  %v14607_v51 = vrot.slane %v14603_v48, 9  ;;  %v8164_v55 = vsel %vm19938_vm5, %v8159_v44, %v8163_v26  ;;  %v17705_v44 = vld.sshfl [vmem:[#allocation4 + $0x8] sm:$0xf pattern:$0x76325410]  ;;  %v16923_v8 = vld [vmem:[#allocation23 + $0x90] sm:$0xff]  }
 0x83e   : > { %v7619_v13 = vor.u32 %v7618_v4, %v7615_v56  ;;  %v7806_v62 = vrot.slane %v7791_v9, 7  ;;  %v7624_v33 = vrot.slane %v7622_v42, 7  ;;  %v20209_v54 = vrot.slane %v7825_v57, %v19114_v59  ;;  %v14564_v12 = vld.sshfl [vmem:[#allocation4] sm:$0x12 pattern:$0x76325410] }
 0x83f   : > { %v7012_v38 = vcombine.low %v7004_v2, %v20182_v7  ;;  %v20204_v60 = vrot.slane %v7288_v21, %v19114_v59  ;;  %v20219_v36 = vrot.slane %v7643_v0, %v19114_v59  ;;  %v16922_v0 = vld [vmem:[#allocation23 + $0x88] sm:$0xff]   ;;  %v16925_v48 = vld [vmem:[#allocation23 + $0xa0] sm:$0xff]   ;;  %v7229_v23 = vcombine.high %v14564_v12, %v14564_v12  ;;  %v16927_v5 = vld [vmem:[#allocation23 + $0xb0] sm:$0xff]  }
 0x840   : > { %v7620_v1 = vrot.slane %v7619_v13, 2  ;;  %v7807_v45 = vsel %vm19947_vm8, %v14607_v51, %v7806_v62  ;;  %v14568_v37 = vrot.slane %v14564_v12, 9  ;;  %v16929_v26 = vld [vmem:[#allocation23 + $0xc0] sm:$0xff]   ;;  %v16932_v4 = vld [vmem:[#allocation23 + $0xd8] sm:$0xff]   ;;  %v16934_v9 = vld [vmem:[#allocation23 + $0xe8] sm:$0xff]  }
 0x841   : > { %16121 = vmatmul.mubr.bf16.vlgmr.msra.gmra.mrb[8].mxu1 %v7012_v38  ;;  %v7826_v34 = vcombine.low %v7269_v63, %v7807_v45  ;;  %v8365_v43 = vcombine.low %v7807_v45, %v8346_v40  ;;  %v7256_v2 = vrot.slane %v7229_v23, 7  ;;  %v16928_v63 = vld [vmem:[#allocation23 + $0xb8] sm:$0xff]   ;;  %v16933_v42 = vld [vmem:[#allocation23 + $0xe0] sm:$0xff]   ;;  %v16935_v57 = vld [vmem:[#allocation23 + $0xf0] sm:$0xff]  }
 0x842   : > { %16125 = vmatpush3.bf16.msra.mxu1 %v16911_v47  ;;  %16140 = vmatprep.mubr.msk.bf16.mxu1 %vm18407_vm2, %v18406_v14  ;;  %v7625_v41 = vsel %vm19938_vm5, %v7620_v1, %v7624_v33  ;;  %v17707_v40 = vld.sshfl [vmem:[#allocation4 + $0xc] sm:$0xf pattern:$0x76325410]  ;;  %v16936_v13 = vld [vmem:[#allocation23 + $0xf8] sm:$0xff]   ;;  %v16941_v1 = vld [vmem:[#allocation23 + $0x110] sm:$0xff]  }
 0x843   : > { %16126 = vmatprep.subr.bf16.mxu1 %v18406_v14  ;;  %v7644_v31 = vcombine.low %v6978_v28, %v7625_v41  ;;  %v20212_v50 = vrot.slane %v7826_v34, %v19114_v59  ;;  %v8183_v46 = vcombine.low %v7625_v41, %v8164_v55  ;;  %v20215_v19 = vrot.slane %v8365_v43, %v19114_v59  ;;  %v17706_v28 = vld.sshfl [vmem:[#allocation4] sm:$0xf pattern:$0x76325410]  ;;  %v16939_v51 = vld [vmem:[#allocation23 + $0x100] sm:$0xff]   ;;  %v16944_v55 = vld [vmem:[#allocation23 + $0x128] sm:$0xff]  }
 0x844   : > { %v7123_v30 = vcombine.low %v17706_v28, %v17705_v44  ;;  %v7257_v53 = vsel %vm19947_vm8, %v14568_v37, %v7256_v2  ;;  %v17708_v21 = vld.sshfl [vmem:[#allocation4 + $0x4] sm:$0xf pattern:$0x76325410]  ;;  %v16943_v45 = vld [vmem:[#allocation23 + $0x120] sm:$0xff]   ;;  %v16945_v34 = vld [vmem:[#allocation23 + $0x130] sm:$0xff]  }
 0x845   : > { %v20222_v17 = vrot.slane %v7644_v31, %v19114_v59  ;;  %v7841_v6 = vcombine.low %v20209_v54, %v20212_v50  ;;  %v20227_v25 = vrot.slane %v8183_v46, %v19114_v59  ;;  %v8380_v35 = vcombine.low %v20204_v60, %v20215_v19  ;;  %v16942_v33 = vld [vmem:[#allocation23 + $0x118] sm:$0xff]   ;;  %v16947_v41 = vld [vmem:[#allocation23 + $0x140] sm:$0xff]   ;;  %v16949_v31 = vld [vmem:[#allocation23 + $0x150] sm:$0xff]  }
 0x846   : > { %16127 = vmatpush3.bf16.msra.mxu1 %v16912_v58  ;;  %v7287_v47 = vcombine.low %v7257_v53, %v20188_v61  ;;  %v16931_v61 = vld [vmem:[#allocation23 + $0xd0] sm:$0xff]   ;;  %v7437_v62 = vcombine.low %v17708_v21, %v17707_v40  ;;  %v16940_v58 = vld [vmem:[#allocation23 + $0x108] sm:$0xff]   ;;  %v16946_v43 = vld [vmem:[#allocation23 + $0x138] sm:$0xff]   ;;  %vm8727_vm8 = vsmask.f32 2312 }
 0x847   : > { %16128 = vmatprep.subr.bf16.mxu1 %v18406_v14  ;;  %v7659_v11 = vcombine.low %v20219_v36, %v20222_v17  ;;  %v8198_v10 = vcombine.low %v20182_v7, %v20227_v25  ;;  %v16950_v46 = vld [vmem:[#allocation23 + $0x158] sm:$0xff]   ;;  %v16952_v36 = vld [vmem:[#allocation23 + $0x168] sm:$0xff]   ;;  %v16953_v17 = vld [vmem:[#allocation23 + $0x170] sm:$0xff]  }
 0x848   : > { %v7295_v56 = vrot.slane %v7287_v47, %v19114_v59  ;;  %v16958_v44 = vld [vmem:[#allocation23 + $0x198] sm:$0xff]   ;;  %v16959_v28 = vld [vmem:[#allocation23 + $0x1a0] sm:$0xff]   ;;  %v16960_v54 = vld [vmem:[#allocation23 + $0x1a8] sm:$0xff]  }
 0x849   : > { %v16961_v50 = vld [vmem:[#allocation23 + $0x1b0] sm:$0xff]   ;;  %v16968_v12 = vld [vmem:[#allocation23 + $0x1d8] sm:$0xff]   ;;  %v16970_v23 = vld [vmem:[#allocation23 + $0x1e8] sm:$0xff]  }
 0x84a   : > { %16129 = vmatpush3.bf16.msra.mxu1 %v16913_v16  ;;  %v7303_v38 = vcombine.low %v7295_v56, %v20204_v60  ;;  %v16948_v16 = vld [vmem:[#allocation23 + $0x148] sm:$0xff]   ;;  %v16972_v37 = vld [vmem:[#allocation23 + $0x1f8] sm:$0xff]   ;;  %v16973_v2 = vld [vmem:[#allocation23 + $0x200] sm:$0xff]  }
 0x84b   : > { %16130 = vmatprep.subr.bf16.mxu1 %v18406_v14  ;;  %v16975_v53 = vld [vmem:[#allocation23 + $0x210] sm:$0xff]   ;;  %v16976_v47 = vld [vmem:[#allocation23 + $0x218] sm:$0xff]   ;;  %v16978_v7 = vld [vmem:[#allocation23 + $0x228] sm:$0xff]  }
 0x84c   : > { %v16979_v25 = vld [vmem:[#allocation23 + $0x230] sm:$0xff]   ;;  %v8561_v56 = vld [vmem:[#allocation5 + $0x2] sm:$0x1]  ;;  %v8558_v21 = vld [vmem:[#allocation5] sm:$0x1] }
 0x84d   : > { %v8579_v60 = vld [vmem:[#allocation5 + $0x4] sm:$0x2]  ;;  %vm8726_vm5 = vmor %vm20800_vm4, %vm8725_vm15 }
 0x84e   : > { %16131 = vmatpush3.bf16.msra.mxu1 %v16914_v18  ;;  %v16951_v18 = vld [vmem:[#allocation23 + $0x160] sm:$0xff]   ;;  %v16989_v40 = vld [vmem:[#allocation28 + $0xa4] ss:$8 sps:$4 sm:$0xff]   ;;  %vm8728_vm13 = vmor %vm8726_vm5, %vm8727_vm8  ;;  %vm8733_vm5 = vsmask.f32 5396 }
 0x84f   : > { %16132 = vmatprep.subr.bf16.mxu1 %v18406_v14  ;;  %vm8735_vm8 = vsmask.f32 6424 }
 0x852   : > { %16133 = vmatpush3.bf16.msra.mxu1 %v16915_v3  ;;  %v16955_v3 = vld [vmem:[#allocation23 + $0x180] sm:$0xff]  }
 0x853   : > { %16134 = vmatprep.subr.bf16.mxu1 %v18406_v14 }
 0x856   : > { %16135 = vmatpush3.bf16.msra.mxu1 %v16916_v29  ;;  %v16956_v29 = vld [vmem:[#allocation23 + $0x188] sm:$0xff]  }
 0x857   : > { %16136 = vmatprep.subr.bf16.mxu1 %v18406_v14 }
 0x85a   : > { %16137 = vmatpush3.bf16.msra.mxu1 %v16917_v20  ;;  %v16957_v20 = vld [vmem:[#allocation23 + $0x190] sm:$0xff]  }
 0x85b   : > { %16138 = vmatprep.subr.bf16.mxu1 %v18406_v14 }
 0x85e   : > { %16139 = vmatpush3.bf16.msra.mxu1 %v16918_v52  ;;  %v17710_v52 = vld.sshfl [vmem:[#allocation4 + $0x8] sm:$0xf pattern:$0x76325410] }
 0x85f   : > { %16144 = vmatprep.subr.bf16.mxu1 %v18406_v14 }
 0x861   : > { %16141 = vmatmul.mubr.bf16.vlgmr.msra.gmra.mrb[8].mxu1 %v7123_v30  ;;  %v16965_v30 = vld [vmem:[#allocation23 + $0x1c0] sm:$0xff]  }
 0x862   : > { %16145 = vmatpush3.bf16.msra.mxu1 %v16921_v24  ;;  %16160 = vmatprep.mubr.msk.bf16.mxu1 %vm18407_vm2, %v18406_v14  ;;  %v16962_v24 = vld [vmem:[#allocation23 + $0x1b8] sm:$0xff]  }
 0x863   : > { %16146 = vmatprep.subr.bf16.mxu1 %v18406_v14 }
 0x866   : > { %16147 = vmatpush3.bf16.msra.mxu1 %v16922_v0 }
 0x867   : > { %16148 = vmatprep.subr.bf16.mxu1 %v18406_v14 }
 0x86a   : > { %16149 = vmatpush3.bf16.msra.mxu1 %v16923_v8  ;;  %v16966_v8 = vld [vmem:[#allocation23 + $0x1c8] sm:$0xff]  }
 0x86b   : > { %16150 = vmatprep.subr.bf16.mxu1 %v18406_v14 }
 0x86e   : > { %16151 = vmatpush3.bf16.msra.mxu1 %v16924_v15  ;;  %v16967_v15 = vld [vmem:[#allocation23 + $0x1d0] sm:$0xff]  }
 0x86f   : > { %16152 = vmatprep.subr.bf16.mxu1 %v18406_v14 }
 0x872   : > { %16153 = vmatpush3.bf16.msra.mxu1 %v16925_v48  ;;  %v16969_v48 = vld [vmem:[#allocation23 + $0x1e0] sm:$0xff]  }
 0x873   : > { %16154 = vmatprep.subr.bf16.mxu1 %v18406_v14 }
 0x876   : > { %16155 = vmatpush3.bf16.msra.mxu1 %v16926_v32  ;;  %v16971_v32 = vld [vmem:[#allocation23 + $0x1f0] sm:$0xff]  }
 0x877   : > { %16156 = vmatprep.subr.bf16.mxu1 %v18406_v14 }
 0x87a   : > { %16157 = vmatpush3.bf16.msra.mxu1 %v16927_v5  ;;  %v16974_v5 = vld [vmem:[#allocation23 + $0x208] sm:$0xff]  }
 0x87b   : > { %16158 = vmatprep.subr.bf16.mxu1 %v18406_v14 }
 0x87e   : > { %16159 = vmatpush3.bf16.msra.mxu1 %v16928_v63  ;;  %v16977_v63 = vld [vmem:[#allocation23 + $0x220] sm:$0xff]  }
 0x87f   : > { %16164 = vmatprep.subr.bf16.mxu1 %v18406_v14 }
 0x881   : > { %16161 = vmatmul.mubr.bf16.vlgmr.msra.gmra.mrb[8].mxu1 %v7303_v38  ;;  %v17233_v38 = vld [vmem:[#allocation32 + $0x360] ss:$8 sps:$4 sm:$0xff]  }
 0x882   : > { %16165 = vmatpush3.bf16.msra.mxu1 %v16929_v26  ;;  %16180 = vmatprep.mubr.msk.bf16.mxu1 %vm18407_vm2, %v18406_v14  ;;  %v8562_v26 = vsel %vm19080_vm7, 0, %v8561_v56 }
 0x883   : > { %16166 = vmatprep.subr.bf16.mxu1 %v18406_v14  ;;  %8563 = vst [vmem:[#allocation5 + $0x2] sm:$0x1] %v8562_v26 }
 0x886   : > { %16167 = vmatpush3.bf16.msra.mxu1 %v16930_v39  ;;  %v8576_v39 = vld [vmem:[#allocation5 + $0x2] sm:$0x2] }
 0x887   : > { %16168 = vmatprep.subr.bf16.mxu1 %v18406_v14 }
 0x88a   : > { %16169 = vmatpush3.bf16.msra.mxu1 %v16931_v61  ;;  %v8564_v61 = vld [vmem:[#allocation5 + $0x4] sm:$0x1] }
 0x88b   : > { %16170 = vmatprep.subr.bf16.mxu1 %v18406_v14  ;;  %v8565_v19 = vsel %vm19080_vm7, 0, %v8564_v61 }
 0x88c   : > { %8566 = vst [vmem:[#allocation5 + $0x4] sm:$0x1] %v8565_v19 }
 0x88e   : > { %16171 = vmatpush3.bf16.msra.mxu1 %v16932_v4  ;;  %v16981_v4 = vld [vmem:[#allocation28 + $0x80] ss:$8 sps:$4 sm:$0xff]  }
 0x88f   : > { %16172 = vmatprep.subr.bf16.mxu1 %v18406_v14 }
 0x892   : > { %16173 = vmatpush3.bf16.msra.mxu1 %v16933_v42  ;;  %v16983_v42 = vld [vmem:[#allocation28 + $0x84] ss:$8 sps:$4 sm:$0xff]  }
 0x893   : > { %16174 = vmatprep.subr.bf16.mxu1 %v18406_v14  ;;  %8870 = vmatprep.subr.bf16.mxu0 %v16983_v42 }
 0x894   : > { %8871 = vmatpush1.bf16.msra.mxu0 %v16981_v4 }
 0x896   : > { %16175 = vmatpush3.bf16.msra.mxu1 %v16934_v9  ;;  %v16986_v9 = vld [vmem:[#allocation28 + $0x94] ss:$8 sps:$4 sm:$0xff]  }
 0x897   : > { %16176 = vmatprep.subr.bf16.mxu1 %v18406_v14  ;;  %8872 = vmatprep.subr.bf16.mxu0 %v16986_v9 }
 0x89a   : > { %16177 = vmatpush3.bf16.msra.mxu1 %v16935_v57  ;;  %v16984_v57 = vld [vmem:[#allocation28 + $0x90] ss:$8 sps:$4 sm:$0xff]  }
 0x89b   : > { %16178 = vmatprep.subr.bf16.mxu1 %v18406_v14  ;;  %8873 = vmatpush1.bf16.msra.mxu0 %v16984_v57 }
 0x89c   : > { %8874 = vmatprep.subr.bf16.mxu0 %v16989_v40 }
 0x89e   : > { %16179 = vmatpush3.bf16.msra.mxu1 %v16936_v13  ;;  %v8573_v13 = vld [vmem:[#allocation5] sm:$0x2] }
 0x89f   : > { %16184 = vmatprep.subr.bf16.mxu1 %v18406_v14 }
 0x8a1   : > { %16181 = vmatmul.mubr.bf16.vlgmr.msra.gmra.mrb[8].mxu1 %v7437_v62  ;;  %v8559_v62 = vsel %vm19080_vm7, 0, %v8558_v21 }
 0x8a2   : > { %16185 = vmatpush3.bf16.msra.mxu1 %v16939_v51  ;;  %16200 = vmatprep.mubr.msk.bf16.mxu1 %vm18407_vm2, %v18406_v14  ;;  %v16987_v51 = vld [vmem:[#allocation28 + $0xa0] ss:$8 sps:$4 sm:$0xff]   ;;  %8560 = vst [vmem:[#allocation5] sm:$0x1] %v8559_v62 }
 0x8a3   : > { %16186 = vmatprep.subr.bf16.mxu1 %v18406_v14  ;;  %8875 = vmatpush1.bf16.msra.mxu0 %v16987_v51 }
 0x8a6   : > { %16187 = vmatpush3.bf16.msra.mxu1 %v16940_v58  ;;  %v8574_v58 = vsel %vm20330_vm1, 0, %v8573_v13 }
 0x8a7   : > { %16188 = vmatprep.subr.bf16.mxu1 %v18406_v14  ;;  %8575 = vst [vmem:[#allocation5] sm:$0x2] %v8574_v58 }
 0x8aa   : > { %16189 = vmatpush3.bf16.msra.mxu1 %v16941_v1  ;;  %v16992_v1 = vld [vmem:[#allocation28 + $0xb4] ss:$8 sps:$4 sm:$0xff]  }
 0x8ab   : > { %16190 = vmatprep.subr.bf16.mxu1 %v18406_v14  ;;  %8876 = vmatprep.subr.bf16.mxu0 %v16992_v1 }
 0x8ae   : > { %16191 = vmatpush3.bf16.msra.mxu1 %v16942_v33  ;;  %v16990_v33 = vld [vmem:[#allocation28 + $0xb0] ss:$8 sps:$4 sm:$0xff]  }
 0x8af   : > { %16192 = vmatprep.subr.bf16.mxu1 %v18406_v14  ;;  %8877 = vmatpush1.bf16.msra.mxu0 %v16990_v33 }
 0x8b2   : > { %16193 = vmatpush3.bf16.msra.mxu1 %v16943_v45  ;;  %v16995_v45 = vld [vmem:[#allocation28 + $0xc4] ss:$8 sps:$4 sm:$0xff]  }
 0x8b3   : > { %16194 = vmatprep.subr.bf16.mxu1 %v18406_v14  ;;  %8878 = vmatprep.subr.bf16.mxu0 %v16995_v45 }
 0x8b6   : > { %16195 = vmatpush3.bf16.msra.mxu1 %v16944_v55  ;;  %v16993_v55 = vld [vmem:[#allocation28 + $0xc0] ss:$8 sps:$4 sm:$0xff]  }
 0x8b7   : > { %16196 = vmatprep.subr.bf16.mxu1 %v18406_v14  ;;  %8879 = vmatpush1.bf16.msra.mxu0 %v16993_v55 }
 0x8ba   : > { %16197 = vmatpush3.bf16.msra.mxu1 %v16945_v34  ;;  %v16998_v34 = vld [vmem:[#allocation28 + $0xd4] ss:$8 sps:$4 sm:$0xff]  }
 0x8bb   : > { %16198 = vmatprep.subr.bf16.mxu1 %v18406_v14  ;;  %8880 = vmatprep.subr.bf16.mxu0 %v16998_v34 }
 0x8be   : > { %16199 = vmatpush3.bf16.msra.mxu1 %v16946_v43  ;;  %v16996_v43 = vld [vmem:[#allocation28 + $0xd0] ss:$8 sps:$4 sm:$0xff]  }
 0x8bf   : > { %16204 = vmatprep.subr.bf16.mxu1 %v18406_v14  ;;  %8881 = vmatpush1.bf16.msra.mxu0 %v16996_v43 }
 0x8c1   : > { %16201 = vmatmul.mubr.bf16.vlgmr.msra.gmra.mrb[8].mxu1 %v7659_v11  ;;  %v16954_v11 = vld [vmem:[#allocation23 + $0x178] sm:$0xff]  }
 0x8c2   : > { %16205 = vmatpush3.bf16.msra.mxu1 %v16947_v41  ;;  %16220 = vmatprep.mubr.msk.bf16.mxu1 %vm18407_vm2, %v18406_v14  ;;  %v17001_v41 = vld [vmem:[#allocation28 + $0xe4] ss:$8 sps:$4 sm:$0xff]  }
 0x8c3   : > { %16206 = vmatprep.subr.bf16.mxu1 %v18406_v14  ;;  %8882 = vmatprep.subr.bf16.mxu0 %v17001_v41 }
 0x8c6   : > { %16207 = vmatpush3.bf16.msra.mxu1 %v16948_v16  ;;  %v16999_v16 = vld [vmem:[#allocation28 + $0xe0] ss:$8 sps:$4 sm:$0xff]  }
 0x8c7   : > { %16208 = vmatprep.subr.bf16.mxu1 %v18406_v14  ;;  %8883 = vmatpush1.bf16.msra.mxu0 %v16999_v16 }
 0x8ca   : > { %16209 = vmatpush3.bf16.msra.mxu1 %v16949_v31  ;;  %v17004_v31 = vld [vmem:[#allocation28 + $0xf4] ss:$8 sps:$4 sm:$0xff]  }
 0x8cb   : > { %16210 = vmatprep.subr.bf16.mxu1 %v18406_v14  ;;  %8884 = vmatprep.subr.bf16.mxu0 %v17004_v31 }
 0x8ce   : > { %16211 = vmatpush3.bf16.msra.mxu1 %v16950_v46  ;;  %v17002_v46 = vld [vmem:[#allocation28 + $0xf0] ss:$8 sps:$4 sm:$0xff]  }
 0x8cf   : > { %16212 = vmatprep.subr.bf16.mxu1 %v18406_v14  ;;  %8885 = vmatpush1.bf16.msra.mxu0 %v17002_v46 }
 0x8d2   : > { %16213 = vmatpush3.bf16.msra.mxu1 %v16951_v18  ;;  %v17007_v18 = vld [vmem:[#allocation28 + $0x4] ss:$8 sps:$4 sm:$0xff]  }
 0x8d3   : > { %16214 = vmatprep.subr.bf16.mxu1 %v18406_v14  ;;  %9009 = vmatprep.subr.bf16.mxu0 %v17007_v18 }
 0x8d6   : > { %16215 = vmatpush3.bf16.msra.mxu1 %v16952_v36  ;;  %v8567_v36 = vld [vmem:[#allocation5 + $0x6] sm:$0x1] }
 0x8d7   : > { %16216 = vmatprep.subr.bf16.mxu1 %v18406_v14 }
 0x8da   : > { %16217 = vmatpush3.bf16.msra.mxu1 %v16953_v17  ;;  %v8582_v17 = vld [vmem:[#allocation5 + $0x6] sm:$0x2] }
 0x8db   : > { %16218 = vmatprep.subr.bf16.mxu1 %v18406_v14 }
 0x8de   : > { %16219 = vmatpush3.bf16.msra.mxu1 %v16954_v11  ;;  %v8568_v11 = vsel %vm19080_vm7, 0, %v8567_v36 }
 0x8df   : > { %16224 = vmatprep.subr.bf16.mxu1 %v18406_v14  ;;  %8569 = vst [vmem:[#allocation5 + $0x6] sm:$0x1] %v8568_v11 }
 0x8e1   : > { %16221 = vmatmul.mubr.bf16.vlgmr.msra.gmra.mrb[8].mxu1 %v7841_v6  ;;  %v17709_v6 = vld.sshfl [vmem:[#allocation4 + $0x10] sm:$0xf pattern:$0x76325410] }
 0x8e2   : > { %16225 = vmatpush3.bf16.msra.mxu1 %v16955_v3  ;;  %16240 = vmatprep.mubr.msk.bf16.mxu1 %vm18407_vm2, %v18406_v14  ;;  %v7976_v0 = vcombine.low %v17710_v52, %v17709_v6  ;;  %v8583_v3 = vsel %vm20330_vm1, 0, %v8582_v17 }
 0x8e3   : > { %16226 = vmatprep.subr.bf16.mxu1 %v18406_v14  ;;  %8584 = vst [vmem:[#allocation5 + $0x6] sm:$0x2] %v8583_v3 }
 0x8e6   : > { %16227 = vmatpush3.bf16.msra.mxu1 %v16956_v29  ;;  %v14652_v29 = vld [vmem:[#allocation25] ss:$0 sm:$0xff] }
 0x8e7   : > { %16228 = vmatprep.subr.bf16.mxu1 %v18406_v14 }
 0x8ea   : > { %16229 = vmatpush3.bf16.msra.mxu1 %v16957_v20 }
 0x8eb   : > { %16230 = vmatprep.subr.bf16.mxu1 %v18406_v14 }
 0x8ee   : > { %16231 = vmatpush3.bf16.msra.mxu1 %v16958_v44  ;;  %v14653_v44 = vld [vmem:[#allocation26] ss:$0 sm:$0xff] }
 0x8ef   : > { %16232 = vmatprep.subr.bf16.mxu1 %v18406_v14 }
 0x8f2   : > { %16233 = vmatpush3.bf16.msra.mxu1 %v16959_v28 }
 0x8f3   : > { %16234 = vmatprep.subr.bf16.mxu1 %v18406_v14 }
 0x8f6   : > { %16235 = vmatpush3.bf16.msra.mxu1 %v16960_v54 }
 0x8f7   : > { %16236 = vmatprep.subr.bf16.mxu1 %v18406_v14 }
 0x8fa   : > { %16237 = vmatpush3.bf16.msra.mxu1 %v16961_v50 }
 0x8fb   : > { %16238 = vmatprep.subr.bf16.mxu1 %v18406_v14 }
 0x8fe   : > { %16239 = vmatpush3.bf16.msra.mxu1 %v16962_v24 }
 0x8ff   : > { %16244 = vmatprep.subr.bf16.mxu1 %v18406_v14 }
 0x901   : > { %16241 = vmatmul.mubr.bf16.vlgmr.msra.gmra.mrb[8].mxu1 %v7976_v0 }
 0x902   : > { %16245 = vmatpush3.bf16.msra.mxu1 %v16965_v30  ;;  %16260 = vmatprep.mubr.msk.bf16.mxu1 %vm18407_vm2, %v18406_v14 }
 0x903   : > { %16246 = vmatprep.subr.bf16.mxu1 %v18406_v14 }
 0x906   : > { %16247 = vmatpush3.bf16.msra.mxu1 %v16966_v8 }
 0x907   : > { %16248 = vmatprep.subr.bf16.mxu1 %v18406_v14 }
 0x90a   : > { %16249 = vmatpush3.bf16.msra.mxu1 %v16967_v15 }
 0x90b   : > { %16250 = vmatprep.subr.bf16.mxu1 %v18406_v14 }
 0x90e   : > { %16251 = vmatpush3.bf16.msra.mxu1 %v16968_v12 }
 0x90f   : > { %16252 = vmatprep.subr.bf16.mxu1 %v18406_v14 }
 0x912   : > { %16253 = vmatpush3.bf16.msra.mxu1 %v16969_v48 }
 0x913   : > { %16254 = vmatprep.subr.bf16.mxu1 %v18406_v14 }
 0x916   : > { %16255 = vmatpush3.bf16.msra.mxu1 %v16970_v23 }
 0x917   : > { %16256 = vmatprep.subr.bf16.mxu1 %v18406_v14 }
 0x91a   : > { %16257 = vmatpush3.bf16.msra.mxu1 %v16971_v32 }
 0x91b   : > { %16258 = vmatprep.subr.bf16.mxu1 %v18406_v14 }
 0x91e   : > { %16259 = vmatpush3.bf16.msra.mxu1 %v16972_v37 }
 0x91f   : > { %16264 = vmatprep.subr.bf16.mxu1 %v18406_v14 }
 0x921   : > { %16261 = vmatmul.mubr.bf16.vlgmr.msra.gmra.mrb[8].mxu1 %v8198_v10  ;;  %v16980_v10 = vld [vmem:[#allocation23 + $0x238] sm:$0xff]  }
 0x922   : > { %16265 = vmatpush3.bf16.msra.mxu1 %v16973_v2  ;;  %16280 = vmatprep.mubr.msk.bf16.mxu1 %vm18407_vm2, %v18406_v14  ;;  %vm20796_vm2 = vcmask 1041408  }
 0x923   : > { %16266 = vmatprep.subr.bf16.mxu1 %v18406_v14  ;;  %vm20797_vm14 = vmmov %vm20796_vm2 }
 0x924   : > { %vm20798_vm6 = vmmov %vm20796_vm2 }
 0x925   : > { %vm20799_vm3 = vmmov %vm20796_vm2 }
 0x926   : > { %16267 = vmatpush3.bf16.msra.mxu1 %v16974_v5 }
 0x927   : > { %16268 = vmatprep.subr.bf16.mxu1 %v18406_v14 }
 0x92a   : > { %16269 = vmatpush3.bf16.msra.mxu1 %v16975_v53 }
 0x92b   : > { %16270 = vmatprep.subr.bf16.mxu1 %v18406_v14 }
 0x92e   : > { %16271 = vmatpush3.bf16.msra.mxu1 %v16976_v47 }
 0x92f   : > { %16272 = vmatprep.subr.bf16.mxu1 %v18406_v14 }
 0x932   : > { %16273 = vmatpush3.bf16.msra.mxu1 %v16977_v63 }
 0x933   : > { %16274 = vmatprep.subr.bf16.mxu1 %v18406_v14 }
 0x936   : > { %16275 = vmatpush3.bf16.msra.mxu1 %v16978_v7 }
 0x937   : > { %16276 = vmatprep.subr.bf16.mxu1 %v18406_v14 }
 0x93a   : > { %16277 = vmatpush3.bf16.msra.mxu1 %v16979_v25 }
 0x93b   : > { %16278 = vmatprep.subr.bf16.mxu1 %v18406_v14  ;;  %v8577_v14 = vsel %vm20330_vm1, 0, %v8576_v39 }
 0x93c   : > { %8578 = vst [vmem:[#allocation5 + $0x2] sm:$0x2] %v8577_v14 }
 0x93e   : > { %16279 = vmatpush3.bf16.msra.mxu1 %v16980_v10 }
 0x941   : > { %16281 = vmatmul.mubr.bf16.vlgmr.msra.gmra.mrb[8].mxu1 %v8380_v35  ;;  %v8580_v35 = vsel %vm20330_vm1, 0, %v8579_v60 }
 0x942   : > { %8581 = vst [vmem:[#allocation5 + $0x4] sm:$0x2] %v8580_v35 }
 0xa14   : > { %v8464_v20 = vpop.f32.mrb[8].mxu1 }
 0xa15   : > { %v8480_v28 = vmul.f32 %v14652_v29, %v8464_v20  ;;  %v16282_v54 = vpop.f32.mrb[9].mxu1 }
 0xa16   : > { %v8467_v50 = vpop.f32.mrb[10].mxu1 }
 0xa17   : > { %v8489_v6 = vadd.f32 %v14653_v44, %v8480_v28  ;;  %v8481_v52 = vmul.f32 %v14652_v29, %v8467_v50  ;;  %v16283_v24 = vpop.f32.mrb[11].mxu1 }
 0xa19   : > { %v8491_v30 = vmax.f32 %v8489_v6, 0.0  ;;  %v8490_v0 = vadd.f32 %v14653_v44, %v8481_v52 }
 0xa1b   : > { %v8495_v8 = vcombine.high %v8491_v30, %v8491_v30  ;;  %v8492_v15 = vmax.f32 %v8490_v0, 0.0  ;;  %v8499_v12 = vsel %vm1126_vm0, %v8491_v30, -inf }
 0xa1d   : > { %v8500_v48 = vsel %vm1126_vm0, %v8495_v8, -inf  ;;  %v8496_v23 = vcombine.high %v8492_v15, %v8492_v15  ;;  %v8502_v37 = vsel %vm1126_vm0, %v8492_v15, -inf }
 0xa1e   : > { %v8501_v32 = vmax.f32 %v8499_v12, %v8500_v48 }
 0xa1f   : > { %v8503_v2 = vsel %vm1126_vm0, %v8496_v23, -inf }
 0xa20   : > { %v8513_v5 = vrot.slane %v8501_v32, %v19114_v59  ;;  %v8504_v53 = vmax.f32 %v8502_v37, %v8503_v2  ;;  %v8681_v32 = vld [vmem:[#allocation5 + $0x2] sm:$0x3] }
 0xa22   : > { %v8514_v47 = vcombine.high %v8513_v5, %v8513_v5  ;;  %v8527_v63 = vsel %vm20796_vm2, %v8513_v5, -inf  ;;  %v8521_v7 = vrot.slane %v8504_v53, %v19114_v59  ;;  %vm8729_vm2 = vsmask.f32 3340  ;;  %v8684_v53 = vld [vmem:[#allocation5 + $0x4] sm:$0x3] }
 0xa23   : > { %v8528_v25 = vrot.slane %v8527_v63, 4 }
 0xa24   : > { %v8534_v10 = vsel %vm20797_vm14, %v8514_v47, -inf  ;;  %v8522_v56 = vcombine.high %v8521_v7, %v8521_v7  ;;  %v8541_v26 = vsel %vm20798_vm6, %v8521_v7, -inf  ;;  %vm8679_vm14 = vsmask.f32 1282  ;;  %vm8730_vm6 = vmor %vm8728_vm13, %vm8729_vm2 }
 0xa25   : > { %v8529_v39 = vmax.f32 %v8527_v63, %v8528_v25  ;;  %v8535_v14 = vrot.slane %v8534_v10, 4  ;;  %v8542_v61 = vrot.slane %v8541_v26, 4  ;;  %vm20369_vm15 = vmand %vm20801_vm11, %vm8679_vm14  ;;  %v14654_v7 = vld.sshfl [vmem:[#allocation5] sm:$0x11 pattern:$0x75316420] }
 0xa26   : > { %v8548_v60 = vsel %vm20799_vm3, %v8522_v56, -inf  ;;  %vm8731_vm3 = vsmask.f32 4368  ;;  %vm8737_vm2 = vsmask.f32 7452 }
 0xa27   : > { %v8530_v19 = vrot.slane %v8529_v39, 2  ;;  %v8536_v35 = vmax.f32 %v8534_v10, %v8535_v14  ;;  %v8543_v4 = vmax.f32 %v8541_v26, %v8542_v61  ;;  %v8549_v42 = vrot.slane %v8548_v60, 4  ;;  %vm8732_vm4 = vmor %vm8730_vm6, %vm8731_vm3 }
 0xa28   : > { %vm8734_vm11 = vmor %vm8732_vm4, %vm8733_vm5  ;;  %v8716_v10 = vcombine.high %v14654_v7, %v14654_v7  ;;  %v18408_v56 = vmov 1966171168   ;;  %vm10331_vm6 = vsmask.f32 2304  ;;  %vm10347_vm4 = vsmask.f32 7950 }
 0xa29   : > { %v8531_v9 = vmax.f32 %v8529_v39, %v8530_v19  ;;  %v8537_v57 = vrot.slane %v8536_v35, 2  ;;  %v8544_v40 = vrot.slane %v8543_v4, 2  ;;  %v8550_v21 = vmax.f32 %v8548_v60, %v8549_v42  ;;  %vm8736_vm13 = vmor %vm8734_vm11, %vm8735_vm8 }
 0xa2a   : > { %v8776_v26 = vunpack.c.l.s4 %v18408_v56  ;;  %v8740_v39 = vshrl.u32 %v14654_v7, 16  ;;  %v8745_v14 = vshll.u32 %v8716_v10, 16  ;;  %vm20380_vm14 = vmor %vm8736_vm13, %vm8737_vm2  ;;  %v17053_v10 = vld [vmem:[#allocation28 + $0x180] ss:$8 sps:$4 sm:$0xff]  }
 0xa2b   : > { %v8532_v13 = vrot.slane %v8531_v9, 1  ;;  %v8538_v51 = vmax.f32 %v8536_v35, %v8537_v57  ;;  %v8545_v62 = vmax.f32 %v8543_v4, %v8544_v40  ;;  %v8551_v58 = vrot.slane %v8550_v21, 2  ;;  %vm10332_vm3 = vmand %vm2611_vm9, %vm10331_vm6 }
 0xa2c   : > { %v8777_v35 = vunpack.c.0.s8 %v8776_v26  ;;  %v8747_v4 = vsel %vm20380_vm14, %v8740_v39, %v8745_v14  ;;  %v17058_v26 = vld [vmem:[#allocation28 + $0x194] ss:$8 sps:$4 sm:$0xff]   ;;  %v17056_v39 = vld [vmem:[#allocation28 + $0x190] ss:$8 sps:$4 sm:$0xff]   ;;  %v17061_v14 = vld [vmem:[#allocation28 + $0x1a4] ss:$8 sps:$4 sm:$0xff]  }
 0xa2d   : > { %v8533_v1 = vmax.f32 %v8531_v9, %v8532_v13  ;;  %v8539_v33 = vrot.slane %v8538_v51, 1  ;;  %v8546_v45 = vrot.slane %v8545_v62, 1  ;;  %v8552_v55 = vmax.f32 %v8550_v21, %v8551_v58  ;;  %v17010_v58 = vld [vmem:[#allocation28 + $0x14] ss:$8 sps:$4 sm:$0xff]   ;;  %vm20440_vm5 = vmor %vm10332_vm3, %vm19080_vm7 }
 0xa2e   : > { %v20392_v21 = vsub.s32 %v8777_v35, %v19106_v49  ;;  %v17062_v35 = vld [vmem:[#allocation28 + $0x1b0] ss:$8 sps:$4 sm:$0xff]   ;;  %vm10348_vm11 = vmand %vm2613_vm10, %vm10347_vm4  ;;  %vm10423_vm10 = vcmask 1043458  }
 0xa2f   : > { %v8540_v34 = vmax.f32 %v8538_v51, %v8539_v33  ;;  %v8585_v43 = vpack.c.bf16 %v8533_v1, %v8533_v1  ;;  %v8547_v41 = vmax.f32 %v8545_v62, %v8546_v45  ;;  %v8553_v16 = vrot.slane %v8552_v55, 1  ;;  %v17005_v51 = vld [vmem:[#allocation28] ss:$8 sps:$4 sm:$0xff]   ;;  %v17008_v1 = vld [vmem:[#allocation28 + $0x10] ss:$8 sps:$4 sm:$0xff]  }
 0xa30   : > { %v17013_v33 = vld [vmem:[#allocation28 + $0x24] ss:$8 sps:$4 sm:$0xff]   ;;  %v17011_v45 = vld [vmem:[#allocation28 + $0x20] ss:$8 sps:$4 sm:$0xff]  }
 0xa31   : > { %v8586_v31 = vpack.c.bf16 %v8540_v34, %v8540_v34  ;;  %v8599_v46 = vrot.slane %v8585_v43, %v19114_v59  ;;  %v8554_v18 = vmax.f32 %v8552_v55, %v8553_v16  ;;  %v8587_v36 = vpack.c.bf16 %v8547_v41, %v8547_v41  ;;  %v17016_v55 = vld [vmem:[#allocation28 + $0x34] ss:$8 sps:$4 sm:$0xff]   ;;  %v17014_v34 = vld [vmem:[#allocation28 + $0x30] ss:$8 sps:$4 sm:$0xff]   ;;  %v17019_v43 = vld [vmem:[#allocation28 + $0x44] ss:$8 sps:$4 sm:$0xff]  }
 0xa32   : > { %v17017_v41 = vld [vmem:[#allocation28 + $0x40] ss:$8 sps:$4 sm:$0xff]   ;;  %v17022_v16 = vld [vmem:[#allocation28 + $0x54] ss:$8 sps:$4 sm:$0xff]  }
 0xa33   : > { %v8606_v17 = vrot.slane %v8586_v31, %v19114_v59  ;;  %v8627_v11 = vrot.slane %v8599_v46, %v19114_v59  ;;  %v8588_v3 = vpack.c.bf16 %v8554_v18, %v8554_v18  ;;  %v8613_v29 = vrot.slane %v8587_v36, %v19114_v59  ;;  %v17020_v31 = vld [vmem:[#allocation28 + $0x50] ss:$8 sps:$4 sm:$0xff]   ;;  %v17025_v46 = vld [vmem:[#allocation28 + $0x64] ss:$8 sps:$4 sm:$0xff]   ;;  %v8687_v18 = vld [vmem:[#allocation5] sm:$0x1] }
 0xa35   : > { %v8634_v20 = vrot.slane %v8606_v17, %v19114_v59  ;;  %v8649_v44 = vunpack.c.l.b16 %v8627_v11  ;;  %v8620_v28 = vrot.slane %v8588_v3, %v19114_v59  ;;  %v8641_v54 = vrot.slane %v8613_v29, %v19114_v59  ;;  %v17023_v17 = vld [vmem:[#allocation28 + $0x60] ss:$8 sps:$4 sm:$0xff]   ;;  %v17028_v11 = vld [vmem:[#allocation28 + $0x74] ss:$8 sps:$4 sm:$0xff]   ;;  %v17026_v29 = vld [vmem:[#allocation28 + $0x70] ss:$8 sps:$4 sm:$0xff]  }
 0xa37   : > { %v8650_v50 = vunpack.c.l.b16 %v8634_v20  ;;  %v8648_v6 = vrot.slane %v8620_v28, %v19114_v59  ;;  %v8651_v52 = vunpack.c.l.b16 %v8641_v54  ;;  %v8653_v24 = vrot.slane %v8649_v44, 7  ;;  %v17031_v44 = vld [vmem:[#allocation28 + $0x104] ss:$8 sps:$4 sm:$0xff]   ;;  %v17029_v28 = vld [vmem:[#allocation28 + $0x100] ss:$8 sps:$4 sm:$0xff]  }
 0xa39   : > { %v8654_v30 = vrot.slane %v8650_v50, 6  ;;  %v8652_v0 = vunpack.c.l.b16 %v8648_v6  ;;  %v8656_v15 = vrot.slane %v8651_v52, 7  ;;  %v17034_v50 = vld [vmem:[#allocation28 + $0x114] ss:$8 sps:$4 sm:$0xff]   ;;  %v17032_v6 = vld [vmem:[#allocation28 + $0x110] ss:$8 sps:$4 sm:$0xff]  }
 0xa3a   : > { %v17037_v52 = vld [vmem:[#allocation28 + $0x124] ss:$8 sps:$4 sm:$0xff]  }
 0xa3b   : > { %v8655_v8 = vsel %vm2611_vm9, %v8654_v30, %v8653_v24  ;;  %v8657_v12 = vrot.slane %v8652_v0, 6  ;;  %v17035_v24 = vld [vmem:[#allocation28 + $0x120] ss:$8 sps:$4 sm:$0xff]   ;;  %v17040_v30 = vld [vmem:[#allocation28 + $0x134] ss:$8 sps:$4 sm:$0xff]  }
 0xa3c   : > { %v8659_v48 = vpack.c.b16 %v8655_v8, %v8655_v8  ;;  %v17038_v0 = vld [vmem:[#allocation28 + $0x130] ss:$8 sps:$4 sm:$0xff]   ;;  %v17043_v8 = vld [vmem:[#allocation28 + $0x144] ss:$8 sps:$4 sm:$0xff]  }
 0xa3d   : > { %v8658_v37 = vsel %vm2611_vm9, %v8657_v12, %v8656_v15  ;;  %v17041_v15 = vld [vmem:[#allocation28 + $0x140] ss:$8 sps:$4 sm:$0xff]   ;;  %v17046_v12 = vld [vmem:[#allocation28 + $0x154] ss:$8 sps:$4 sm:$0xff]   ;;  %vm20451_vm9 = vmor %vm10348_vm11, %vm20330_vm1  ;;  %vm10424_vm1 = vsmask.f32 3338 }
 0xa3e   : > { %v8667_v2 = vrot.slane %v8659_v48, %v19114_v59  ;;  %v8660_v5 = vpack.c.b16 %v8658_v37, %v8658_v37  ;;  %v17044_v48 = vld [vmem:[#allocation28 + $0x150] ss:$8 sps:$4 sm:$0xff]   ;;  %v14690_v37 = vld.sshfl [vmem:[#allocation5] sm:$0x10 pattern:$0x75316420]  ;;  %vm10425_vm8 = vmand %vm10423_vm10, %vm10424_vm1 }
 0xa3f   : > { %vm10426_vm13 = vmor %vm10425_vm8, %vm20369_vm15 }
 0xa40   : > { %v8682_v47 = vsel %vm20369_vm15, %v8667_v2, %v8681_v32  ;;  %v8674_v63 = vrot.slane %v8660_v5, %v19114_v59  ;;  %v17049_v32 = vld [vmem:[#allocation28 + $0x164] ss:$8 sps:$4 sm:$0xff]   ;;  %v17047_v5 = vld [vmem:[#allocation28 + $0x160] ss:$8 sps:$4 sm:$0xff]  }
 0xa41   : > { %8683 = vst [vmem:[#allocation5 + $0x2] sm:$0x3] %v8682_v47 }
 0xa42   : > { %v8685_v25 = vsel %vm20369_vm15, %v8674_v63, %v8684_v53  ;;  %v17052_v53 = vld [vmem:[#allocation28 + $0x174] ss:$8 sps:$4 sm:$0xff]   ;;  %v17050_v63 = vld [vmem:[#allocation28 + $0x170] ss:$8 sps:$4 sm:$0xff]   ;;  %vm20810_vm15 = vcmask 1041409  }
 0xa43   : > { %8686 = vst [vmem:[#allocation5 + $0x4] sm:$0x3] %v8685_v25  ;;  %v17055_v25 = vld [vmem:[#allocation28 + $0x184] ss:$8 sps:$4 sm:$0xff]   ;;  %vm13065_vm2 = vmand %vm20810_vm15, %vm5175_vm12 }
 0xa48   : > { %v14655_v61 = vld.sshfl [vmem:[#allocation5 + $0x2] sm:$0x11 pattern:$0x75316420] }
 0xa49   : > { %v8724_v19 = vcombine.high %v14655_v61, %v14655_v61  ;;  %v8749_v42 = vshrl.u32 %v14655_v61, 16  ;;  %v8688_v36 = vld [vmem:[#allocation5 + $0x2] sm:$0x1] }
 0xa4a   : > { %v8913_v3 = vcombine.low %v8687_v18, %v8688_v36  ;;  %v20400_v2 = vld.sshfl [vmem:[#allocation5 + $0x2] sm:$0x10 pattern:$0x75316420]  ;;  %v17088_v36 = vld [vmem:[#allocation28 + $0x234] ss:$8 sps:$4 sm:$0xff]  }
 0xa4b   : > { %v8754_v9 = vshll.u32 %v8724_v19, 16  ;;  %v14692_v47 = vcombine.high %v14690_v37, %v20400_v2  ;;  %v17059_v61 = vld [vmem:[#allocation28 + $0x1a0] ss:$8 sps:$4 sm:$0xff]   ;;  %v17064_v19 = vld [vmem:[#allocation28 + $0x1b4] ss:$8 sps:$4 sm:$0xff]  }
 0xa4c   : > { %v8920_v20 = vrot.slane %v8913_v3, %v20392_v21  ;;  %v17083_v18 = vld [vmem:[#allocation28 + $0x220] ss:$8 sps:$4 sm:$0xff]   ;;  %v17091_v3 = vld [vmem:[#allocation28 + $0x244] ss:$8 sps:$4 sm:$0xff]   ;;  %v17106_v37 = vld [vmem:[#allocation28 + $0x294] ss:$8 sps:$4 sm:$0xff]  }
 0xa4d   : > { %v20388_v57 = vsel %vm20380_vm14, %v8749_v42, %v8754_v9  ;;  %v9094_v7 = vrot.slane %v14692_v47, %v20392_v21  ;;  %v17065_v42 = vld [vmem:[#allocation28 + $0x1c0] ss:$8 sps:$4 sm:$0xff]   ;;  %v17070_v9 = vld [vmem:[#allocation28 + $0x1d4] ss:$8 sps:$4 sm:$0xff]   ;;  %v17104_v47 = vld [vmem:[#allocation28 + $0x290] ss:$8 sps:$4 sm:$0xff]  }
 0xa4e   : > { %v8774_v40 = vcombine.low %v8747_v4, %v20388_v57  ;;  %v8927_v54 = vrot.slane %v8920_v20, %v20392_v21  ;;  %v17067_v4 = vld [vmem:[#allocation28 + $0x1c4] ss:$8 sps:$4 sm:$0xff]   ;;  %v17089_v20 = vld [vmem:[#allocation28 + $0x240] ss:$8 sps:$4 sm:$0xff]  }
 0xa4f   : > { %v9101_v56 = vrot.slane %v9094_v7, %v20392_v21  ;;  %v17203_v7 = vld [vmem:[#allocation32 + $0x310] ss:$8 sps:$4 sm:$0xff]  }
 0xa50   : > { %v8781_v13 = vrot.slane %v8774_v40, %v20392_v21  ;;  %v17068_v40 = vld [vmem:[#allocation28 + $0x1d0] ss:$8 sps:$4 sm:$0xff]  }
 0xa52   : > { %v8788_v62 = vrot.slane %v8781_v13, %v20392_v21  ;;  %v17073_v13 = vld [vmem:[#allocation28 + $0x1e4] ss:$8 sps:$4 sm:$0xff]  }
 0xa54   : > { %8903 = vmatmul.mubr.bf16.vlgmr.msra.gmra.mrb[36].mxu0 %v8788_v62  ;;  %v17071_v62 = vld [vmem:[#allocation28 + $0x1e0] ss:$8 sps:$4 sm:$0xff]  }
 0xa55   : > { %9010 = vmatpush1.bf16.msra.mxu0 %v17005_v51  ;;  %9041 = vmatprep.mubr.bf16.mxu0 %v18405_v27  ;;  %v9227_v51 = vld [vmem:[#allocation5 + $0x4] sm:$0x1] }
 0xa56   : > { %9011 = vmatprep.subr.bf16.mxu0 %v17010_v58  ;;  %v9226_v58 = vld [vmem:[#allocation5 + $0x2] sm:$0x1] }
 0xa59   : > { %9012 = vmatpush1.bf16.msra.mxu0 %v17008_v1  ;;  %v17076_v1 = vld [vmem:[#allocation28 + $0x1f4] ss:$8 sps:$4 sm:$0xff]  }
 0xa5a   : > { %9013 = vmatprep.subr.bf16.mxu0 %v17013_v33  ;;  %v9247_v33 = vcombine.low %v9226_v58, %v9227_v51  ;;  %v20418_v51 = vld.sshfl [vmem:[#allocation5 + $0x4] sm:$0x10 pattern:$0x75316420]  ;;  %v17124_v58 = vld [vmem:[#allocation28 + $0x2f4] ss:$8 sps:$4 sm:$0xff]  }
 0xa5d   : > { %9014 = vmatpush1.bf16.msra.mxu0 %v17011_v45  ;;  %v17074_v45 = vld [vmem:[#allocation28 + $0x1f0] ss:$8 sps:$4 sm:$0xff]  }
 0xa5e   : > { %9015 = vmatprep.subr.bf16.mxu0 %v17016_v55  ;;  %v9254_v55 = vrot.slane %v9247_v33, %v20392_v21  ;;  %v17122_v33 = vld [vmem:[#allocation28 + $0x2f0] ss:$8 sps:$4 sm:$0xff]  }
 0xa61   : > { %9016 = vmatpush1.bf16.msra.mxu0 %v17014_v34  ;;  %v17079_v34 = vld [vmem:[#allocation28 + $0x204] ss:$8 sps:$4 sm:$0xff]  }
 0xa62   : > { %9017 = vmatprep.subr.bf16.mxu0 %v17019_v43  ;;  %v17077_v43 = vld [vmem:[#allocation28 + $0x200] ss:$8 sps:$4 sm:$0xff]  }
 0xa65   : > { %9018 = vmatpush1.bf16.msra.mxu0 %v17017_v41  ;;  %v9261_v41 = vrot.slane %v9254_v55, %v20392_v21  ;;  %v17127_v55 = vld [vmem:[#allocation28 + $0x304] ss:$8 sps:$4 sm:$0xff]  }
 0xa66   : > { %9019 = vmatprep.subr.bf16.mxu0 %v17022_v16  ;;  %v17082_v16 = vld [vmem:[#allocation28 + $0x214] ss:$8 sps:$4 sm:$0xff]  }
 0xa69   : > { %9020 = vmatpush1.bf16.msra.mxu0 %v17020_v31  ;;  %v17080_v31 = vld [vmem:[#allocation28 + $0x210] ss:$8 sps:$4 sm:$0xff]  }
 0xa6a   : > { %9021 = vmatprep.subr.bf16.mxu0 %v17025_v46  ;;  %v17085_v46 = vld [vmem:[#allocation28 + $0x224] ss:$8 sps:$4 sm:$0xff]  }
 0xa6d   : > { %9022 = vmatpush1.bf16.msra.mxu0 %v17023_v17  ;;  %v14726_v17 = vld.sshfl [vmem:[#allocation5 + $0x4] sm:$0x11 pattern:$0x75316420] }
 0xa6e   : > { %9023 = vmatprep.subr.bf16.mxu0 %v17028_v11  ;;  %v17086_v11 = vld [vmem:[#allocation28 + $0x230] ss:$8 sps:$4 sm:$0xff]  }
 0xa71   : > { %9024 = vmatpush1.bf16.msra.mxu0 %v17026_v29  ;;  %v9405_v29 = vcombine.high %v14726_v17, %v14726_v17 }
 0xa72   : > { %9183 = vmatprep.subr.bf16.mxu0 %v17031_v44  ;;  %v17094_v44 = vld [vmem:[#allocation28 + $0x254] ss:$8 sps:$4 sm:$0xff]  }
 0xa74   : > { %9042 = vmatmul.mubr.bf16.vlgmr.msra.gmra.mrb[36].mxu0 %v8927_v54  ;;  %v17092_v54 = vld [vmem:[#allocation28 + $0x250] ss:$8 sps:$4 sm:$0xff]  }
 0xa75   : > { %9184 = vmatpush1.bf16.msra.mxu0 %v17029_v28  ;;  %9215 = vmatprep.mubr.bf16.mxu0 %v18405_v27  ;;  %v9421_v28 = vshll.u32 %v9405_v29, 16  ;;  %v17145_v29 = vld [vmem:[#allocation28 + $0x364] ss:$8 sps:$4 sm:$0xff]  }
 0xa76   : > { %9185 = vmatprep.subr.bf16.mxu0 %v17034_v50  ;;  %v9416_v50 = vshrl.u32 %v14726_v17, 16  ;;  %v17137_v17 = vld [vmem:[#allocation28 + $0x340] ss:$8 sps:$4 sm:$0xff]  }
 0xa79   : > { %9186 = vmatpush1.bf16.msra.mxu0 %v17032_v6  ;;  %v17097_v6 = vld [vmem:[#allocation28 + $0x264] ss:$8 sps:$4 sm:$0xff]  }
 0xa7a   : > { %9187 = vmatprep.subr.bf16.mxu0 %v17037_v52  ;;  %v20411_v52 = vsel %vm20380_vm14, %v9416_v50, %v9421_v28  ;;  %v17143_v28 = vld [vmem:[#allocation28 + $0x360] ss:$8 sps:$4 sm:$0xff]  }
 0xa7d   : > { %9188 = vmatpush1.bf16.msra.mxu0 %v17035_v24  ;;  %v17095_v24 = vld [vmem:[#allocation28 + $0x260] ss:$8 sps:$4 sm:$0xff]  }
 0xa7e   : > { %9189 = vmatprep.subr.bf16.mxu0 %v17040_v30  ;;  %v17100_v30 = vld [vmem:[#allocation28 + $0x274] ss:$8 sps:$4 sm:$0xff]  }
 0xa81   : > { %9190 = vmatpush1.bf16.msra.mxu0 %v17038_v0  ;;  %v9441_v0 = vcombine.low %v20388_v57, %v20411_v52  ;;  %v17205_v57 = vld [vmem:[#allocation32 + $0x314] ss:$8 sps:$4 sm:$0xff]  }
 0xa82   : > { %9191 = vmatprep.subr.bf16.mxu0 %v17043_v8  ;;  %v17098_v8 = vld [vmem:[#allocation28 + $0x270] ss:$8 sps:$4 sm:$0xff]  }
 0xa85   : > { %9192 = vmatpush1.bf16.msra.mxu0 %v17041_v15  ;;  %v9448_v15 = vrot.slane %v9441_v0, %v20392_v21  ;;  %v17149_v0 = vld [vmem:[#allocation28 + $0x380] ss:$8 sps:$4 sm:$0xff]  }
 0xa86   : > { %9193 = vmatprep.subr.bf16.mxu0 %v17046_v12  ;;  %v17103_v12 = vld [vmem:[#allocation28 + $0x284] ss:$8 sps:$4 sm:$0xff]  }
 0xa89   : > { %9194 = vmatpush1.bf16.msra.mxu0 %v17044_v48  ;;  %v17101_v48 = vld [vmem:[#allocation28 + $0x280] ss:$8 sps:$4 sm:$0xff]  }
 0xa8a   : > { %9195 = vmatprep.subr.bf16.mxu0 %v17049_v32  ;;  %v9455_v32 = vrot.slane %v9448_v15, %v20392_v21  ;;  %v17154_v15 = vld [vmem:[#allocation28 + $0x394] ss:$8 sps:$4 sm:$0xff]  }
 0xa8d   : > { %9196 = vmatpush1.bf16.msra.mxu0 %v17047_v5  ;;  %v17197_v5 = vld [vmem:[#allocation32 + $0x300] ss:$8 sps:$4 sm:$0xff]  }
 0xa8e   : > { %9197 = vmatprep.subr.bf16.mxu0 %v17052_v53  ;;  %v17199_v53 = vld [vmem:[#allocation32 + $0x304] ss:$8 sps:$4 sm:$0xff]  }
 0xa8f   : > { %11523 = vmatprep.subr.bf16.mxu1 %v17199_v53  ;;  %v17158_v53 = vld [vmem:[#allocation28 + $0x3b0] ss:$8 sps:$4 sm:$0xff]  }
 0xa90   : > { %11524 = vmatpush1.bf16.msra.mxu1 %v17197_v5  ;;  %v14781_v5 = vld.sshfl [vmem:[#allocation5 + $0x6] sm:$0x11 pattern:$0x75316420] }
 0xa91   : > { %9198 = vmatpush1.bf16.msra.mxu0 %v17050_v63  ;;  %v17109_v63 = vld [vmem:[#allocation28 + $0x2a4] ss:$8 sps:$4 sm:$0xff]   ;;  %11525 = vmatprep.subr.bf16.mxu1 %v17205_v57  ;;  %v9936_v57 = vcombine.high %v14781_v5, %v14781_v5 }
 0xa92   : > { %9343 = vmatprep.subr.bf16.mxu0 %v17055_v25  ;;  %v17107_v25 = vld [vmem:[#allocation28 + $0x2a0] ss:$8 sps:$4 sm:$0xff]  }
 0xa94   : > { %9216 = vmatmul.mubr.bf16.vlgmr.msra.gmra.mrb[36].mxu0 %v9101_v56  ;;  %v17112_v56 = vld [vmem:[#allocation28 + $0x2b4] ss:$8 sps:$4 sm:$0xff]   ;;  %11526 = vmatpush1.bf16.msra.mxu1 %v17203_v7 }
 0xa95   : > { %9344 = vmatpush1.bf16.msra.mxu0 %v17053_v10  ;;  %9375 = vmatprep.mubr.bf16.mxu0 %v18405_v27  ;;  %v17211_v10 = vld [vmem:[#allocation32 + $0x324] ss:$8 sps:$4 sm:$0xff]   ;;  %v17166_v7 = vld [vmem:[#allocation28 + $0x3d4] ss:$8 sps:$4 sm:$0xff]  }
 0xa96   : > { %9345 = vmatprep.subr.bf16.mxu0 %v17058_v26  ;;  %v17209_v26 = vld [vmem:[#allocation32 + $0x320] ss:$8 sps:$4 sm:$0xff]   ;;  %11527 = vmatprep.subr.bf16.mxu1 %v17211_v10  ;;  %v9952_v10 = vshll.u32 %v9936_v57, 16  ;;  %v17232_v57 = vld [vmem:[#allocation32 + $0x154] ss:$8 sps:$4 sm:$0xff]  }
 0xa98   : > { %11528 = vmatpush1.bf16.msra.mxu1 %v17209_v26  ;;  %v17169_v26 = vld [vmem:[#allocation28 + $0x3e4] ss:$8 sps:$4 sm:$0xff]  }
 0xa99   : > { %9346 = vmatpush1.bf16.msra.mxu0 %v17056_v39  ;;  %v17110_v39 = vld [vmem:[#allocation28 + $0x2b0] ss:$8 sps:$4 sm:$0xff]  }
 0xa9a   : > { %9347 = vmatprep.subr.bf16.mxu0 %v17061_v14  ;;  %v17217_v14 = vld [vmem:[#allocation32 + $0x334] ss:$8 sps:$4 sm:$0xff]  }
 0xa9b   : > { %11529 = vmatprep.subr.bf16.mxu1 %v17217_v14  ;;  %v17167_v14 = vld [vmem:[#allocation28 + $0x3e0] ss:$8 sps:$4 sm:$0xff]  }
 0xa9d   : > { %9348 = vmatpush1.bf16.msra.mxu0 %v17059_v61  ;;  %v17115_v61 = vld [vmem:[#allocation28 + $0x2c4] ss:$8 sps:$4 sm:$0xff]  }
 0xa9e   : > { %9349 = vmatprep.subr.bf16.mxu0 %v17064_v19  ;;  %v17215_v19 = vld [vmem:[#allocation32 + $0x330] ss:$8 sps:$4 sm:$0xff]  }
 0xa9f   : > { %11530 = vmatpush1.bf16.msra.mxu1 %v17215_v19 }
 0xaa1   : > { %9350 = vmatpush1.bf16.msra.mxu0 %v17062_v35  ;;  %v17113_v35 = vld [vmem:[#allocation28 + $0x2c0] ss:$8 sps:$4 sm:$0xff]  }
 0xaa2   : > { %9351 = vmatprep.subr.bf16.mxu0 %v17067_v4  ;;  %v17223_v4 = vld [vmem:[#allocation32 + $0x344] ss:$8 sps:$4 sm:$0xff]  }
 0xaa3   : > { %11531 = vmatprep.subr.bf16.mxu1 %v17223_v4 }
 0xaa5   : > { %9352 = vmatpush1.bf16.msra.mxu0 %v17065_v42  ;;  %v17118_v42 = vld [vmem:[#allocation28 + $0x2d4] ss:$8 sps:$4 sm:$0xff]  }
 0xaa6   : > { %9353 = vmatprep.subr.bf16.mxu0 %v17070_v9  ;;  %v17221_v9 = vld [vmem:[#allocation32 + $0x340] ss:$8 sps:$4 sm:$0xff]  }
 0xaa7   : > { %11532 = vmatpush1.bf16.msra.mxu1 %v17221_v9  ;;  %v17173_v9 = vld [vmem:[#allocation28 + $0x400] ss:$8 sps:$4 sm:$0xff]  }
 0xaa9   : > { %9354 = vmatpush1.bf16.msra.mxu0 %v17068_v40  ;;  %v17116_v40 = vld [vmem:[#allocation28 + $0x2d0] ss:$8 sps:$4 sm:$0xff]  }
 0xaaa   : > { %9355 = vmatprep.subr.bf16.mxu0 %v17073_v13  ;;  %v17121_v13 = vld [vmem:[#allocation28 + $0x2e4] ss:$8 sps:$4 sm:$0xff]  }
 0xaad   : > { %9356 = vmatpush1.bf16.msra.mxu0 %v17071_v62  ;;  %v17119_v62 = vld [vmem:[#allocation28 + $0x2e0] ss:$8 sps:$4 sm:$0xff]  }
 0xaae   : > { %9357 = vmatprep.subr.bf16.mxu0 %v17076_v1  ;;  %v14747_v1 = vcombine.high %v20400_v2, %v20418_v51  ;;  %v17131_v2 = vld [vmem:[#allocation28 + $0x320] ss:$8 sps:$4 sm:$0xff]  }
 0xab1   : > { %9358 = vmatpush1.bf16.msra.mxu0 %v17074_v45  ;;  %v9624_v45 = vrot.slane %v14747_v1, %v20392_v21  ;;  %v17184_v1 = vld [vmem:[#allocation28 + $0x434] ss:$8 sps:$4 sm:$0xff]  }
 0xab2   : > { %9537 = vmatprep.subr.bf16.mxu0 %v17079_v34  ;;  %v17125_v34 = vld [vmem:[#allocation28 + $0x300] ss:$8 sps:$4 sm:$0xff]  }
 0xab4   : > { %9376 = vmatmul.mubr.bf16.vlgmr.msra.gmra.mrb[36].mxu0 %v9261_v41  ;;  %v17130_v41 = vld [vmem:[#allocation28 + $0x314] ss:$8 sps:$4 sm:$0xff]  }
 0xab5   : > { %9538 = vmatpush1.bf16.msra.mxu0 %v17077_v43  ;;  %9569 = vmatprep.mubr.bf16.mxu0 %v18405_v27  ;;  %v9631_v43 = vrot.slane %v9624_v45, %v20392_v21  ;;  %v17187_v45 = vld [vmem:[#allocation28 + $0x444] ss:$8 sps:$4 sm:$0xff]  }
 0xab6   : > { %9539 = vmatprep.subr.bf16.mxu0 %v17082_v16  ;;  %v17128_v16 = vld [vmem:[#allocation28 + $0x310] ss:$8 sps:$4 sm:$0xff]  }
 0xab9   : > { %9540 = vmatpush1.bf16.msra.mxu0 %v17080_v31  ;;  %v17133_v31 = vld [vmem:[#allocation28 + $0x324] ss:$8 sps:$4 sm:$0xff]  }
 0xaba   : > { %9541 = vmatprep.subr.bf16.mxu0 %v17085_v46  ;;  %v17136_v46 = vld [vmem:[#allocation28 + $0x334] ss:$8 sps:$4 sm:$0xff]  }
 0xabd   : > { %9542 = vmatpush1.bf16.msra.mxu0 %v17083_v18  ;;  %v17134_v18 = vld [vmem:[#allocation28 + $0x330] ss:$8 sps:$4 sm:$0xff]  }
 0xabe   : > { %9543 = vmatprep.subr.bf16.mxu0 %v17088_v36  ;;  %v17139_v36 = vld [vmem:[#allocation28 + $0x344] ss:$8 sps:$4 sm:$0xff]  }
 0xac1   : > { %9544 = vmatpush1.bf16.msra.mxu0 %v17086_v11  ;;  %v17142_v11 = vld [vmem:[#allocation28 + $0x354] ss:$8 sps:$4 sm:$0xff]  }
 0xac2   : > { %9545 = vmatprep.subr.bf16.mxu0 %v17091_v3  ;;  %v17140_v3 = vld [vmem:[#allocation28 + $0x350] ss:$8 sps:$4 sm:$0xff]  }
 0xac5   : > { %9546 = vmatpush1.bf16.msra.mxu0 %v17089_v20  ;;  %v9757_v20 = vld [vmem:[#allocation5 + $0x4] sm:$0x1] }
 0xac6   : > { %9547 = vmatprep.subr.bf16.mxu0 %v17094_v44  ;;  %v9758_v44 = vld [vmem:[#allocation5 + $0x6] sm:$0x1] }
 0xac7   : > { %v9778_v50 = vcombine.low %v9757_v20, %v9758_v44  ;;  %v17214_v20 = vld [vmem:[#allocation32 + $0x124] ss:$8 sps:$4 sm:$0xff]   ;;  %v17212_v44 = vld [vmem:[#allocation32 + $0x120] ss:$8 sps:$4 sm:$0xff]  }
 0xac9   : > { %9548 = vmatpush1.bf16.msra.mxu0 %v17092_v54  ;;  %v17148_v54 = vld [vmem:[#allocation28 + $0x374] ss:$8 sps:$4 sm:$0xff]  }
 0xaca   : > { %9549 = vmatprep.subr.bf16.mxu0 %v17097_v6  ;;  %v17146_v6 = vld [vmem:[#allocation28 + $0x370] ss:$8 sps:$4 sm:$0xff]  }
 0xacd   : > { %9550 = vmatpush1.bf16.msra.mxu0 %v17095_v24  ;;  %v9785_v24 = vrot.slane %v9778_v50, %v20392_v21  ;;  %v17226_v50 = vld [vmem:[#allocation32 + $0x144] ss:$8 sps:$4 sm:$0xff]  }
 0xace   : > { %9551 = vmatprep.subr.bf16.mxu0 %v17100_v30  ;;  %v17151_v30 = vld [vmem:[#allocation28 + $0x384] ss:$8 sps:$4 sm:$0xff]  }
 0xad1   : > { %9552 = vmatpush1.bf16.msra.mxu0 %v17098_v8  ;;  %v9792_v8 = vrot.slane %v9785_v24, %v20392_v21  ;;  %v10340_v24 = vld [vmem:[#allocation6 + $0x8] sm:$0x5] }
 0xad2   : > { %9713 = vmatprep.subr.bf16.mxu0 %v17103_v12  ;;  %v17152_v12 = vld [vmem:[#allocation28 + $0x390] ss:$8 sps:$4 sm:$0xff]  }
 0xad4   : > { %9570 = vmatmul.mubr.bf16.vlgmr.msra.gmra.mrb[36].mxu0 %v9455_v32  ;;  %v17155_v32 = vld [vmem:[#allocation28 + $0x3a0] ss:$8 sps:$4 sm:$0xff]  }
 0xad5   : > { %9714 = vmatpush1.bf16.msra.mxu0 %v17101_v48  ;;  %9745 = vmatprep.mubr.bf16.mxu0 %v18405_v27  ;;  %v17157_v48 = vld [vmem:[#allocation28 + $0x3a4] ss:$8 sps:$4 sm:$0xff]  }
 0xad6   : > { %9715 = vmatprep.subr.bf16.mxu0 %v17106_v37  ;;  %v17160_v37 = vld [vmem:[#allocation28 + $0x3b4] ss:$8 sps:$4 sm:$0xff]  }
 0xad9   : > { %9716 = vmatpush1.bf16.msra.mxu0 %v17104_v47  ;;  %v17163_v47 = vld [vmem:[#allocation28 + $0x3c4] ss:$8 sps:$4 sm:$0xff]  }
 0xada   : > { %9717 = vmatprep.subr.bf16.mxu0 %v17109_v63  ;;  %v17161_v63 = vld [vmem:[#allocation28 + $0x3c0] ss:$8 sps:$4 sm:$0xff]  }
 0xadd   : > { %9718 = vmatpush1.bf16.msra.mxu0 %v17107_v25  ;;  %v9947_v25 = vshrl.u32 %v14781_v5, 16  ;;  %v17227_v5 = vld [vmem:[#allocation32 + $0x350] ss:$8 sps:$4 sm:$0xff]  }
 0xade   : > { %9719 = vmatprep.subr.bf16.mxu0 %v17112_v56  ;;  %v17164_v56 = vld [vmem:[#allocation28 + $0x3d0] ss:$8 sps:$4 sm:$0xff]  }
 0xae1   : > { %9720 = vmatpush1.bf16.msra.mxu0 %v17110_v39  ;;  %v9954_v39 = vsel %vm20380_vm14, %v9947_v25, %v9952_v10  ;;  %v17236_v25 = vld [vmem:[#allocation32 + $0x160] ss:$8 sps:$4 sm:$0xff]   ;;  %v17241_v10 = vld [vmem:[#allocation32 + $0x374] ss:$8 sps:$4 sm:$0xff]  }
 0xae2   : > { %9721 = vmatprep.subr.bf16.mxu0 %v17115_v61  ;;  %v17172_v61 = vld [vmem:[#allocation28 + $0x3f4] ss:$8 sps:$4 sm:$0xff]   ;;  %v9972_v19 = vcombine.low %v20411_v52, %v9954_v39  ;;  %v17179_v52 = vld [vmem:[#allocation28 + $0x420] ss:$8 sps:$4 sm:$0xff]  }
 0xae3   : > { %v17242_v39 = vld [vmem:[#allocation32 + $0x170] ss:$8 sps:$4 sm:$0xff]  }
 0xae4   : > { %v9979_v4 = vrot.slane %v9972_v19, %v20392_v21  ;;  %v17245_v19 = vld [vmem:[#allocation32 + $0x380] ss:$8 sps:$4 sm:$0xff]  }
 0xae5   : > { %9722 = vmatpush1.bf16.msra.mxu0 %v17113_v35  ;;  %v17170_v35 = vld [vmem:[#allocation28 + $0x3f0] ss:$8 sps:$4 sm:$0xff]  }
 0xae6   : > { %9723 = vmatprep.subr.bf16.mxu0 %v17118_v42  ;;  %v17175_v42 = vld [vmem:[#allocation28 + $0x404] ss:$8 sps:$4 sm:$0xff]  }
 0xae9   : > { %9724 = vmatpush1.bf16.msra.mxu0 %v17116_v40  ;;  %v9986_v40 = vrot.slane %v9979_v4, %v20392_v21  ;;  %v17253_v4 = vld [vmem:[#allocation32 + $0x394] ss:$8 sps:$4 sm:$0xff]  }
 0xaea   : > { %9725 = vmatprep.subr.bf16.mxu0 %v17121_v13  ;;  %v17178_v13 = vld [vmem:[#allocation28 + $0x414] ss:$8 sps:$4 sm:$0xff]  }
 0xaed   : > { %9726 = vmatpush1.bf16.msra.mxu0 %v17119_v62  ;;  %v17176_v62 = vld [vmem:[#allocation28 + $0x410] ss:$8 sps:$4 sm:$0xff]  }
 0xaee   : > { %9727 = vmatprep.subr.bf16.mxu0 %v17124_v58  ;;  %v17181_v58 = vld [vmem:[#allocation28 + $0x424] ss:$8 sps:$4 sm:$0xff]  }
 0xaf1   : > { %9728 = vmatpush1.bf16.msra.mxu0 %v17122_v33  ;;  %v17182_v33 = vld [vmem:[#allocation28 + $0x430] ss:$8 sps:$4 sm:$0xff]  }
 0xaf2   : > { %9874 = vmatprep.subr.bf16.mxu0 %v17127_v55  ;;  %v17185_v55 = vld [vmem:[#allocation28 + $0x440] ss:$8 sps:$4 sm:$0xff]  }
 0xaf4   : > { %9746 = vmatmul.mubr.bf16.vlgmr.msra.gmra.mrb[36].mxu0 %v9631_v43  ;;  %v17188_v43 = vld [vmem:[#allocation28 + $0x450] ss:$8 sps:$4 sm:$0xff]  }
 0xaf5   : > { %9875 = vmatpush1.bf16.msra.mxu0 %v17125_v34  ;;  %9906 = vmatprep.mubr.bf16.mxu0 %v18405_v27  ;;  %v17190_v34 = vld [vmem:[#allocation28 + $0x454] ss:$8 sps:$4 sm:$0xff]  }
 0xaf6   : > { %9876 = vmatprep.subr.bf16.mxu0 %v17130_v41  ;;  %v17193_v41 = vld [vmem:[#allocation28 + $0x464] ss:$8 sps:$4 sm:$0xff]  }
 0xaf9   : > { %9877 = vmatpush1.bf16.msra.mxu0 %v17128_v16  ;;  %v14801_v16 = vld.sshfl [vmem:[#allocation5 + $0x6] sm:$0x10 pattern:$0x75316420] }
 0xafa   : > { %9878 = vmatprep.subr.bf16.mxu0 %v17133_v31  ;;  %v17196_v31 = vld [vmem:[#allocation28 + $0x474] ss:$8 sps:$4 sm:$0xff]  }
 0xafd   : > { %9879 = vmatpush1.bf16.msra.mxu0 %v17131_v2  ;;  %v14802_v2 = vcombine.high %v20418_v51, %v14801_v16  ;;  %v17220_v51 = vld [vmem:[#allocation32 + $0x134] ss:$8 sps:$4 sm:$0xff]   ;;  %v17266_v16 = vld [vmem:[#allocation32 + $0x1b0] ss:$8 sps:$4 sm:$0xff]  }
 0xafe   : > { %9880 = vmatprep.subr.bf16.mxu0 %v17136_v46  ;;  %v17194_v46 = vld [vmem:[#allocation28 + $0x470] ss:$8 sps:$4 sm:$0xff]  }
 0xb01   : > { %9881 = vmatpush1.bf16.msra.mxu0 %v17134_v18  ;;  %v10155_v18 = vrot.slane %v14802_v2, %v20392_v21  ;;  %v17269_v2 = vld [vmem:[#allocation32 + $0x3c0] ss:$8 sps:$4 sm:$0xff]  }
 0xb02   : > { %9882 = vmatprep.subr.bf16.mxu0 %v17139_v36  ;;  %v17202_v36 = vld [vmem:[#allocation32 + $0x104] ss:$8 sps:$4 sm:$0xff]  }
 0xb05   : > { %9883 = vmatpush1.bf16.msra.mxu0 %v17137_v17  ;;  %v17200_v17 = vld [vmem:[#allocation32 + $0x100] ss:$8 sps:$4 sm:$0xff]  }
 0xb06   : > { %9884 = vmatprep.subr.bf16.mxu0 %v17142_v11  ;;  %v10162_v11 = vrot.slane %v10155_v18, %v20392_v21  ;;  %v17277_v18 = vld [vmem:[#allocation32 + $0x3d4] ss:$8 sps:$4 sm:$0xff]  }
 0xb09   : > { %9885 = vmatpush1.bf16.msra.mxu0 %v17140_v3  ;;  %v17208_v3 = vld [vmem:[#allocation32 + $0x114] ss:$8 sps:$4 sm:$0xff]  }
 0xb0a   : > { %9886 = vmatprep.subr.bf16.mxu0 %v17145_v29  ;;  %v17206_v29 = vld [vmem:[#allocation32 + $0x110] ss:$8 sps:$4 sm:$0xff]  }
 0xb0d   : > { %9887 = vmatpush1.bf16.msra.mxu0 %v17143_v28  ;;  %v17218_v28 = vld [vmem:[#allocation32 + $0x130] ss:$8 sps:$4 sm:$0xff]  }
 0xb0e   : > { %9888 = vmatprep.subr.bf16.mxu0 %v17148_v54  ;;  %v17224_v54 = vld [vmem:[#allocation32 + $0x140] ss:$8 sps:$4 sm:$0xff]  }
 0xb11   : > { %9889 = vmatpush1.bf16.msra.mxu0 %v17146_v6  ;;  %v10337_v6 = vld [vmem:[#allocation6 + $0x4] sm:$0x5] }
 0xb12   : > { %10068 = vmatprep.subr.bf16.mxu0 %v17151_v30 }
 0xb14   : > { %9907 = vmatmul.mubr.bf16.vlgmr.msra.gmra.mrb[36].mxu0 %v9792_v8  ;;  %v10356_v8 = vld [vmem:[#allocation6 + $0x8] sm:$0xa] }
 0xb15   : > { %10069 = vmatpush1.bf16.msra.mxu0 %v17149_v0  ;;  %10100 = vmatprep.mubr.bf16.mxu0 %v18405_v27  ;;  %v10353_v0 = vld [vmem:[#allocation6 + $0x4] sm:$0xa] }
 0xb16   : > { %10070 = vmatprep.subr.bf16.mxu0 %v17154_v15  ;;  %v10338_v15 = vsel %vm20440_vm5, 0, %v10337_v6  ;;  %v17295_v6 = vld [vmem:[#allocation32 + $0x404] ss:$8 sps:$4 sm:$0xff]  }
 0xb17   : > { %10339 = vst [vmem:[#allocation6 + $0x4] sm:$0x5] %v10338_v15  ;;  %v10359_v15 = vld [vmem:[#allocation6 + $0xc] sm:$0xa] }
 0xb19   : > { %10071 = vmatpush1.bf16.msra.mxu0 %v17152_v12  ;;  %v10341_v12 = vsel %vm20440_vm5, 0, %v10340_v24  ;;  %v17298_v24 = vld [vmem:[#allocation32 + $0x4] ss:$8 sps:$4 sm:$0xff]  }
 0xb1a   : > { %10072 = vmatprep.subr.bf16.mxu0 %v17157_v48  ;;  %10342 = vst [vmem:[#allocation6 + $0x8] sm:$0x5] %v10341_v12  ;;  %v10360_v12 = vsel %vm20451_vm9, 0, %v10359_v15 }
 0xb1b   : > { %10361 = vst [vmem:[#allocation6 + $0xc] sm:$0xa] %v10360_v12 }
 0xb1d   : > { %10073 = vmatpush1.bf16.msra.mxu0 %v17155_v32  ;;  %v10354_v32 = vsel %vm20451_vm9, 0, %v10353_v0  ;;  %v10343_v0 = vld [vmem:[#allocation6 + $0xc] sm:$0x5] }
 0xb1e   : > { %10074 = vmatprep.subr.bf16.mxu0 %v17160_v37  ;;  %v10357_v37 = vsel %vm20451_vm9, 0, %v10356_v8  ;;  %10355 = vst [vmem:[#allocation6 + $0x4] sm:$0xa] %v10354_v32  ;;  %v10344_v8 = vsel %vm20440_vm5, 0, %v10343_v0  ;;  %v20468_v32 = vsub.s32 0, %v19106_v49 }
 0xb1f   : > { %10358 = vst [vmem:[#allocation6 + $0x8] sm:$0xa] %v10357_v37  ;;  %10345 = vst [vmem:[#allocation6 + $0xc] sm:$0x5] %v10344_v8  ;;  %v10287_v37 = vld [vmem:[#allocation29] sm:$0x3] }
 0xb21   : > { %10075 = vmatpush1.bf16.msra.mxu0 %v17158_v53  ;;  %v17229_v53 = vld [vmem:[#allocation32 + $0x354] ss:$8 sps:$4 sm:$0xff]  }
 0xb22   : > { %10076 = vmatprep.subr.bf16.mxu0 %v17163_v47  ;;  %v17230_v47 = vld [vmem:[#allocation32 + $0x150] ss:$8 sps:$4 sm:$0xff]   ;;  %11533 = vmatprep.subr.bf16.mxu1 %v17229_v53  ;;  %v10301_v53 = vld [vmem:[#allocation31] sm:$0x3] }
 0xb23   : > { %11534 = vmatpush1.bf16.msra.mxu1 %v17227_v5  ;;  %v20471_v5 = vsub.s32 1, %v19106_v49  ;;  %v10306_v30 = vrot.slane %v10301_v53, %v20468_v32 }
 0xb25   : > { %10077 = vmatpush1.bf16.msra.mxu0 %v17161_v63  ;;  %v17235_v63 = vld [vmem:[#allocation32 + $0x364] ss:$8 sps:$4 sm:$0xff]  }
 0xb26   : > { %10078 = vmatprep.subr.bf16.mxu0 %v17166_v7  ;;  %v17238_v7 = vld [vmem:[#allocation32 + $0x164] ss:$8 sps:$4 sm:$0xff]   ;;  %11535 = vmatprep.subr.bf16.mxu1 %v17235_v63 }
 0xb27   : > { %11536 = vmatpush1.bf16.msra.mxu1 %v17233_v38 }
 0xb28   : > { %11537 = vmatprep.subr.bf16.mxu1 %v17241_v10 }
 0xb29   : > { %10079 = vmatpush1.bf16.msra.mxu0 %v17164_v56  ;;  %v17244_v56 = vld [vmem:[#allocation32 + $0x174] ss:$8 sps:$4 sm:$0xff]  }
 0xb2a   : > { %10080 = vmatprep.subr.bf16.mxu0 %v17169_v26  ;;  %v17239_v26 = vld [vmem:[#allocation32 + $0x370] ss:$8 sps:$4 sm:$0xff]  }
 0xb2b   : > { %11538 = vmatpush1.bf16.msra.mxu1 %v17239_v26 }
 0xb2d   : > { %10081 = vmatpush1.bf16.msra.mxu0 %v17167_v14  ;;  %v17247_v14 = vld [vmem:[#allocation32 + $0x384] ss:$8 sps:$4 sm:$0xff]  }
 0xb2e   : > { %10082 = vmatprep.subr.bf16.mxu0 %v17172_v61  ;;  %v17250_v61 = vld [vmem:[#allocation32 + $0x184] ss:$8 sps:$4 sm:$0xff]   ;;  %11539 = vmatprep.subr.bf16.mxu1 %v17247_v14 }
 0xb2f   : > { %11540 = vmatpush1.bf16.msra.mxu1 %v17245_v19 }
 0xb30   : > { %11541 = vmatprep.subr.bf16.mxu1 %v17253_v4 }
 0xb31   : > { %10083 = vmatpush1.bf16.msra.mxu0 %v17170_v35  ;;  %v17248_v35 = vld [vmem:[#allocation32 + $0x180] ss:$8 sps:$4 sm:$0xff]  }
 0xb32   : > { %10244 = vmatprep.subr.bf16.mxu0 %v17175_v42  ;;  %v17256_v42 = vld [vmem:[#allocation32 + $0x194] ss:$8 sps:$4 sm:$0xff]  }
 0xb34   : > { %10101 = vmatmul.mubr.bf16.vlgmr.msra.gmra.mrb[36].mxu0 %v9986_v40  ;;  %v17254_v40 = vld [vmem:[#allocation32 + $0x190] ss:$8 sps:$4 sm:$0xff]  }
 0xb35   : > { %10245 = vmatpush1.bf16.msra.mxu0 %v17173_v9  ;;  %10276 = vmatprep.mubr.bf16.mxu0 %v18405_v27  ;;  %v17191_v27 = vld [vmem:[#allocation28 + $0x460] ss:$8 sps:$4 sm:$0xff]   ;;  %v17251_v9 = vld [vmem:[#allocation32 + $0x390] ss:$8 sps:$4 sm:$0xff]  }
 0xb36   : > { %10246 = vmatprep.subr.bf16.mxu0 %v17178_v13  ;;  %v17259_v13 = vld [vmem:[#allocation32 + $0x3a4] ss:$8 sps:$4 sm:$0xff]   ;;  %11542 = vmatpush1.bf16.msra.mxu1 %v17251_v9 }
 0xb37   : > { %11543 = vmatprep.subr.bf16.mxu1 %v17259_v13 }
 0xb39   : > { %10247 = vmatpush1.bf16.msra.mxu0 %v17176_v62  ;;  %v17262_v62 = vld [vmem:[#allocation32 + $0x1a4] ss:$8 sps:$4 sm:$0xff]  }
 0xb3a   : > { %10248 = vmatprep.subr.bf16.mxu0 %v17181_v58  ;;  %v10334_v58 = vld [vmem:[#allocation6] sm:$0x5] }
 0xb3d   : > { %10249 = vmatpush1.bf16.msra.mxu0 %v17179_v52  ;;  %v10350_v52 = vld [vmem:[#allocation6] sm:$0xa] }
 0xb3e   : > { %10250 = vmatprep.subr.bf16.mxu0 %v17184_v1  ;;  %v17257_v1 = vld [vmem:[#allocation32 + $0x3a0] ss:$8 sps:$4 sm:$0xff]  }
 0xb3f   : > { %11544 = vmatpush1.bf16.msra.mxu1 %v17257_v1 }
 0xb41   : > { %10251 = vmatpush1.bf16.msra.mxu0 %v17182_v33  ;;  %v10335_v33 = vsel %vm20440_vm5, 0, %v10334_v58 }
 0xb42   : > { %10252 = vmatprep.subr.bf16.mxu0 %v17187_v45  ;;  %v10351_v45 = vsel %vm20451_vm9, 0, %v10350_v52  ;;  %10336 = vst [vmem:[#allocation6] sm:$0x5] %v10335_v33 }
 0xb43   : > { %10352 = vst [vmem:[#allocation6] sm:$0xa] %v10351_v45 }
 0xb45   : > { %10253 = vmatpush1.bf16.msra.mxu0 %v17185_v55  ;;  %v17260_v55 = vld [vmem:[#allocation32 + $0x1a0] ss:$8 sps:$4 sm:$0xff]  }
 0xb46   : > { %10254 = vmatprep.subr.bf16.mxu0 %v17190_v34  ;;  %v17265_v34 = vld [vmem:[#allocation32 + $0x3b4] ss:$8 sps:$4 sm:$0xff]  }
 0xb47   : > { %11545 = vmatprep.subr.bf16.mxu1 %v17265_v34  ;;  %v10427_v34 = vld [vmem:[#allocation6 + $0x4] sm:$0xf] }
 0xb49   : > { %10255 = vmatpush1.bf16.msra.mxu0 %v17188_v43  ;;  %v17268_v43 = vld [vmem:[#allocation32 + $0x1b4] ss:$8 sps:$4 sm:$0xff]  }
 0xb4a   : > { %10256 = vmatprep.subr.bf16.mxu0 %v17193_v41  ;;  %v17263_v41 = vld [vmem:[#allocation32 + $0x3b0] ss:$8 sps:$4 sm:$0xff]  }
 0xb4b   : > { %11546 = vmatpush1.bf16.msra.mxu1 %v17263_v41 }
 0xb4d   : > { %10257 = vmatpush1.bf16.msra.mxu0 %v17191_v27  ;;  %v17271_v27 = vld [vmem:[#allocation32 + $0x3c4] ss:$8 sps:$4 sm:$0xff]  }
 0xb4e   : > { %10258 = vmatprep.subr.bf16.mxu0 %v17196_v31  ;;  %v17274_v31 = vld [vmem:[#allocation32 + $0x1c4] ss:$8 sps:$4 sm:$0xff]   ;;  %11547 = vmatprep.subr.bf16.mxu1 %v17271_v27  ;;  %v10430_v27 = vld [vmem:[#allocation6 + $0x8] sm:$0xf] }
 0xb4f   : > { %11548 = vmatpush1.bf16.msra.mxu1 %v17269_v2 }
 0xb50   : > { %11549 = vmatprep.subr.bf16.mxu1 %v17277_v18 }
 0xb51   : > { %10259 = vmatpush1.bf16.msra.mxu0 %v17194_v46  ;;  %v17272_v46 = vld [vmem:[#allocation32 + $0x1c0] ss:$8 sps:$4 sm:$0xff]  }
 0xb52   : > { %10739 = vmatprep.subr.bf16.mxu0 %v17202_v36  ;;  %v17280_v36 = vld [vmem:[#allocation32 + $0x1d4] ss:$8 sps:$4 sm:$0xff]  }
 0xb54   : > { %10277 = vmatmul.mubr.bf16.vlgmr.msra.gmra.mrb[36].mxu0 %v10162_v11  ;;  %v17278_v11 = vld [vmem:[#allocation32 + $0x1d0] ss:$8 sps:$4 sm:$0xff]  }
 0xb55   : > { %10740 = vmatpush1.bf16.msra.mxu0 %v17200_v17  ;;  %v17275_v17 = vld [vmem:[#allocation32 + $0x3d0] ss:$8 sps:$4 sm:$0xff]  }
 0xb56   : > { %10741 = vmatprep.subr.bf16.mxu0 %v17208_v3  ;;  %v17283_v3 = vld [vmem:[#allocation32 + $0x3e4] ss:$8 sps:$4 sm:$0xff]   ;;  %11550 = vmatpush1.bf16.msra.mxu1 %v17275_v17 }
 0xb57   : > { %11551 = vmatprep.subr.bf16.mxu1 %v17283_v3 }
 0xb59   : > { %10742 = vmatpush1.bf16.msra.mxu0 %v17206_v29  ;;  %v17286_v29 = vld [vmem:[#allocation32 + $0x1e4] ss:$8 sps:$4 sm:$0xff]  }
 0xb5a   : > { %10743 = vmatprep.subr.bf16.mxu0 %v17214_v20  ;;  %v17281_v20 = vld [vmem:[#allocation32 + $0x3e0] ss:$8 sps:$4 sm:$0xff]  }
 0xb5b   : > { %11552 = vmatpush1.bf16.msra.mxu1 %v17281_v20 }
 0xb5d   : > { %10744 = vmatpush1.bf16.msra.mxu0 %v17212_v44  ;;  %v17284_v44 = vld [vmem:[#allocation32 + $0x1e0] ss:$8 sps:$4 sm:$0xff]  }
 0xb5e   : > { %10745 = vmatprep.subr.bf16.mxu0 %v17220_v51  ;;  %v17289_v51 = vld [vmem:[#allocation32 + $0x3f4] ss:$8 sps:$4 sm:$0xff]  }
 0xb5f   : > { %11553 = vmatprep.subr.bf16.mxu1 %v17289_v51 }
 0xb61   : > { %10746 = vmatpush1.bf16.msra.mxu0 %v17218_v28  ;;  %v17292_v28 = vld [vmem:[#allocation32 + $0x1f4] ss:$8 sps:$4 sm:$0xff]  }
 0xb62   : > { %10747 = vmatprep.subr.bf16.mxu0 %v17226_v50  ;;  %v17290_v50 = vld [vmem:[#allocation32 + $0x1f0] ss:$8 sps:$4 sm:$0xff]  }
 0xb65   : > { %10748 = vmatpush1.bf16.msra.mxu0 %v17224_v54  ;;  %v17287_v54 = vld [vmem:[#allocation32 + $0x3f0] ss:$8 sps:$4 sm:$0xff]  }
 0xb66   : > { %10749 = vmatprep.subr.bf16.mxu0 %v17232_v57  ;;  %11554 = vmatpush1.bf16.msra.mxu1 %v17287_v54  ;;  %v10296_v57 = vrot.slane %v10287_v37, %v20471_v5 }
 0xb67   : > { %11822 = vmatprep.subr.bf16.mxu1 %v17295_v6 }
 0xb69   : > { %10750 = vmatpush1.bf16.msra.mxu0 %v17230_v47  ;;  %v10292_v47 = vrot.slane %v10287_v37, %v20468_v32 }
 0xb6a   : > { %10751 = vmatprep.subr.bf16.mxu0 %v17238_v7  ;;  %v10310_v7 = vrot.slane %v10301_v53, %v20471_v5 }
 0xb6d   : > { %10752 = vmatpush1.bf16.msra.mxu0 %v17236_v25 }
 0xb6e   : > { %10753 = vmatprep.subr.bf16.mxu0 %v17244_v56 }
 0xb71   : > { %10754 = vmatpush1.bf16.msra.mxu0 %v17242_v39 }
 0xb72   : > { %10755 = vmatprep.subr.bf16.mxu0 %v17250_v61 }
 0xb75   : > { %10756 = vmatpush1.bf16.msra.mxu0 %v17248_v35 }
 0xb76   : > { %10757 = vmatprep.subr.bf16.mxu0 %v17256_v42 }
 0xb79   : > { %10758 = vmatpush1.bf16.msra.mxu0 %v17254_v40 }
 0xb7a   : > { %10759 = vmatprep.subr.bf16.mxu0 %v17262_v62 }
 0xb7d   : > { %10760 = vmatpush1.bf16.msra.mxu0 %v17260_v55 }
 0xb7e   : > { %10761 = vmatprep.subr.bf16.mxu0 %v17268_v43 }
 0xb81   : > { %10762 = vmatpush1.bf16.msra.mxu0 %v17266_v16 }
 0xb82   : > { %10763 = vmatprep.subr.bf16.mxu0 %v17274_v31 }
 0xb85   : > { %10764 = vmatpush1.bf16.msra.mxu0 %v17272_v46  ;;  %v14823_v46 = vld.sshfl [vmem:[#allocation6] sm:$0x33 pattern:$0x75316420] }
 0xb86   : > { %10765 = vmatprep.subr.bf16.mxu0 %v17280_v36  ;;  %v14821_v36 = vld.sshfl [vmem:[#allocation6] sm:$0x3 pattern:$0x75316420] }
 0xb89   : > { %10766 = vmatpush1.bf16.msra.mxu0 %v17278_v11  ;;  %v10504_v11 = vshrl.u32 %v14823_v46, 16 }
 0xb8a   : > { %10767 = vmatprep.subr.bf16.mxu0 %v17286_v29 }
 0xb8d   : > { %10768 = vmatpush1.bf16.msra.mxu0 %v17284_v44 }
 0xb8e   : > { %10769 = vmatprep.subr.bf16.mxu0 %v17292_v28 }
 0xb91   : > { %10770 = vmatpush1.bf16.msra.mxu0 %v17290_v50 }
 0xb92   : > { %10965 = vmatprep.subr.bf16.mxu0 %v17298_v24 }
 0xc27   : > { %v10278_v63 = vpop.f32.mrb[36].mxu0 }
 0xc28   : > { %v10299_v48 = vmul.f32 %v10292_v47, %v10278_v63  ;;  %v10280_v38 = vpop.f32.mrb[37].mxu0  ;;  %v17293_v63 = vld [vmem:[#allocation32 + $0x400] ss:$8 sps:$4 sm:$0xff]  }
 0xc29   : > { %v10300_v25 = vmul.f32 %v10296_v57, %v10280_v38  ;;  %v10282_v10 = vpop.f32.mrb[38].mxu0 }
 0xc2a   : > { %v10313_v56 = vadd.f32 %v10306_v30, %v10299_v48  ;;  %v10283_v26 = vpop.f32.mrb[39].mxu0 }
 0xc2b   : > { %v10314_v39 = vadd.f32 %v10310_v7, %v10300_v25  ;;  %v17301_v25 = vld [vmem:[#allocation32 + $0x414] ss:$8 sps:$4 sm:$0xff]  }
 0xc2c   : > { %v10315_v14 = vmax.f32 %v10313_v56, 0.0 }
 0xc2d   : > { %v10316_v49 = vmax.f32 %v10314_v39, 0.0 }
 0xc2f   : > { %v10319_v61 = vcombine.low %v10315_v14, %v10316_v49  ;;  %v17296_v14 = vld [vmem:[#allocation32] ss:$8 sps:$4 sm:$0xff]  }
 0xc31   : > { %v10326_v19 = vrot.slane %v10319_v61, %v19114_v59 }
 0xc33   : > { %v10327_v35 = vcombine.high %v10326_v19, %v10326_v19  ;;  %v10368_v4 = vrot.slane %v10326_v19, %v19114_v59  ;;  %v17299_v19 = vld [vmem:[#allocation32 + $0x410] ss:$8 sps:$4 sm:$0xff]  }
 0xc35   : > { %v10369_v42 = vcombine.high %v10368_v4, %v10368_v4  ;;  %v10376_v9 = vrot.slane %v10327_v35, %v19114_v59 }
 0xc37   : > { %v10377_v40 = vcombine.high %v10376_v9, %v10376_v9  ;;  %v14819_v13 = vpack.c.bf16 %v10369_v42, %v10368_v4  ;;  %v17304_v42 = vld [vmem:[#allocation32 + $0x14] ss:$8 sps:$4 sm:$0xff]  }
 0xc39   : > { %v10397_v62 = vrot.slane %v14819_v13, %v19114_v59  ;;  %v14820_v58 = vpack.c.bf16 %v10377_v40, %v10376_v9  ;;  %v17307_v9 = vld [vmem:[#allocation32 + $0x424] ss:$8 sps:$4 sm:$0xff]   ;;  %v17302_v40 = vld [vmem:[#allocation32 + $0x10] ss:$8 sps:$4 sm:$0xff]   ;;  %v17305_v13 = vld [vmem:[#allocation32 + $0x420] ss:$8 sps:$4 sm:$0xff]  }
 0xc3b   : > { %v10405_v52 = vrot.slane %v14820_v58, %v19114_v59  ;;  %v10407_v1 = vshrl.u32 %v10397_v62, 16  ;;  %v10410_v45 = vshll.u32 %v10397_v62, 16  ;;  %v10494_v59 = vcombine.high %v14823_v46, %v14823_v46  ;;  %v17310_v62 = vld [vmem:[#allocation32 + $0x24] ss:$8 sps:$4 sm:$0xff]   ;;  %v17313_v58 = vld [vmem:[#allocation32 + $0x434] ss:$8 sps:$4 sm:$0xff]  }
 0xc3c   : > { %v17326_v46 = vld [vmem:[#allocation32 + $0x50] ss:$8 sps:$4 sm:$0xff]  }
 0xc3d   : > { %v10409_v33 = vrot.slane %v10407_v1, 7  ;;  %v10414_v55 = vshrl.u32 %v10405_v52, 16  ;;  %v10417_v16 = vshll.u32 %v10405_v52, 16  ;;  %v10509_v3 = vshll.u32 %v10494_v59, 16  ;;  %v17308_v52 = vld [vmem:[#allocation32 + $0x20] ss:$8 sps:$4 sm:$0xff]  }
 0xc3e   : > { %v17311_v1 = vld [vmem:[#allocation32 + $0x430] ss:$8 sps:$4 sm:$0xff]   ;;  %v17334_v59 = vld [vmem:[#allocation32 + $0x64] ss:$8 sps:$4 sm:$0xff]  }
 0xc3f   : > { %v10412_v43 = vor.u32 %v10410_v45, %v10409_v33  ;;  %v10416_v41 = vrot.slane %v10414_v55, 7  ;;  %v10511_v54 = vsel %vm20380_vm14, %v10504_v11, %v10509_v3  ;;  %v17316_v33 = vld [vmem:[#allocation32 + $0x34] ss:$8 sps:$4 sm:$0xff]   ;;  %v17319_v45 = vld [vmem:[#allocation32 + $0x444] ss:$8 sps:$4 sm:$0xff]  }
 0xc40   : > { %v17314_v55 = vld [vmem:[#allocation32 + $0x30] ss:$8 sps:$4 sm:$0xff]   ;;  %v17340_v3 = vld [vmem:[#allocation32 + $0x74] ss:$8 sps:$4 sm:$0xff]  }
 0xc41   : > { %v10419_v31 = vor.u32 %v10417_v16, %v10416_v41  ;;  %v10428_v2 = vsel %vm10426_vm13, %v10412_v43, %v10427_v34  ;;  %v17317_v34 = vld [vmem:[#allocation32 + $0x440] ss:$8 sps:$4 sm:$0xff]   ;;  %v17322_v43 = vld [vmem:[#allocation32 + $0x44] ss:$8 sps:$4 sm:$0xff]   ;;  %v17325_v41 = vld [vmem:[#allocation32 + $0x454] ss:$8 sps:$4 sm:$0xff]  }
 0xc42   : > { %10429 = vst [vmem:[#allocation6 + $0x4] sm:$0xf] %v10428_v2  ;;  %v17320_v16 = vld [vmem:[#allocation32 + $0x40] ss:$8 sps:$4 sm:$0xff]   ;;  %v17331_v2 = vld [vmem:[#allocation32 + $0x464] ss:$8 sps:$4 sm:$0xff]  }
 0xc43   : > { %v10431_v18 = vsel %vm10426_vm13, %v10419_v31, %v10430_v27  ;;  %v17323_v27 = vld [vmem:[#allocation32 + $0x450] ss:$8 sps:$4 sm:$0xff]   ;;  %v17328_v31 = vld [vmem:[#allocation32 + $0x54] ss:$8 sps:$4 sm:$0xff]  }
 0xc44   : > { %10432 = vst [vmem:[#allocation6 + $0x8] sm:$0xf] %v10431_v18  ;;  %v17329_v18 = vld [vmem:[#allocation32 + $0x460] ss:$8 sps:$4 sm:$0xff]   ;;  %v17335_v11 = vld [vmem:[#allocation32 + $0x470] ss:$8 sps:$4 sm:$0xff]  }
 0xc49   : > { %v14926_v17 = vld.sshfl [vmem:[#allocation6 + $0x4] sm:$0x3 pattern:$0x75316420] }
 0xc4a   : > { %v14824_v29 = vld.sshfl [vmem:[#allocation6 + $0x4] sm:$0x33 pattern:$0x75316420]  ;;  %v10780_v51 = vcombine.low %v14821_v36, %v14926_v17  ;;  %v17337_v36 = vld [vmem:[#allocation32 + $0x474] ss:$8 sps:$4 sm:$0xff]  }
 0xc4b   : > { %v20484_v20 = vld.sshfl [vmem:[#allocation6 + $0x8] sm:$0x3 pattern:$0x75316420]  ;;  %v10502_v23 = vcombine.high %v14824_v29, %v14824_v29  ;;  %v10513_v50 = vshrl.u32 %v14824_v29, 16 }
 0xc4c   : > { %v11338_v44 = vcombine.low %v14926_v17, %v20484_v20  ;;  %v14961_v28 = vld.sshfl [vmem:[#allocation6 + $0x8] sm:$0x33 pattern:$0x75316420]  ;;  %v20493_v47 = vrot.slane %v10780_v51, %v20392_v21  ;;  %v17332_v17 = vld [vmem:[#allocation32 + $0x60] ss:$8 sps:$4 sm:$0xff]  }
 0xc4d   : > { %v10518_v6 = vshll.u32 %v10502_v23, 16  ;;  %v11585_v24 = vcombine.high %v14961_v28, %v14961_v28  ;;  %v11596_v15 = vshrl.u32 %v14961_v28, 16  ;;  %v17343_v29 = vld [vmem:[#allocation32 + $0x484] ss:$8 sps:$4 sm:$0xff]   ;;  %v17338_v23 = vld [vmem:[#allocation32 + $0x70] ss:$8 sps:$4 sm:$0xff]  }
 0xc4e   : > { %v11345_v0 = vrot.slane %v11338_v44, %v20392_v21  ;;  %v10788_v56 = vcombine.high %v20493_v47, %v20493_v47  ;;  %v17341_v44 = vld [vmem:[#allocation32 + $0x480] ss:$8 sps:$4 sm:$0xff]   ;;  %v17346_v51 = vld [vmem:[#allocation32 + $0x84] ss:$8 sps:$4 sm:$0xff]   ;;  %v17349_v28 = vld [vmem:[#allocation32 + $0x494] ss:$8 sps:$4 sm:$0xff]  }
 0xc4f   : > { %v10520_v8 = vsel %vm20380_vm14, %v10513_v50, %v10518_v6  ;;  %v11601_v12 = vshll.u32 %v11585_v24, 16  ;;  %v17347_v50 = vld [vmem:[#allocation32 + $0x490] ss:$8 sps:$4 sm:$0xff]   ;;  %v17352_v6 = vld [vmem:[#allocation32 + $0x94] ss:$8 sps:$4 sm:$0xff]  }
 0xc50   : > { %v11346_v37 = vcombine.high %v11345_v0, %v11345_v0  ;;  %v10554_v53 = vcombine.low %v10511_v54, %v10520_v8  ;;  %v11353_v38 = vrot.slane %v11345_v0, %v20392_v21  ;;  %v10802_v35 = vrot.slane %v10788_v56, %v20392_v21  ;;  %v17344_v54 = vld [vmem:[#allocation32 + $0x80] ss:$8 sps:$4 sm:$0xff]   ;;  %v17355_v24 = vld [vmem:[#allocation32 + $0x4a4] ss:$8 sps:$4 sm:$0xff]   ;;  %v17350_v0 = vld [vmem:[#allocation32 + $0x90] ss:$8 sps:$4 sm:$0xff]  }
 0xc51   : > { %v11603_v57 = vsel %vm20380_vm14, %v11596_v15, %v11601_v12  ;;  %v17358_v15 = vld [vmem:[#allocation32 + $0xa4] ss:$8 sps:$4 sm:$0xff]   ;;  %v17361_v12 = vld [vmem:[#allocation32 + $0x4b4] ss:$8 sps:$4 sm:$0xff]   ;;  %v17371_v56 = vld [vmem:[#allocation32 + $0x4d0] ss:$8 sps:$4 sm:$0xff]  }
 0xc52   : > { %v11360_v30 = vrot.slane %v11346_v37, %v20392_v21  ;;  %v10561_v7 = vrot.slane %v10554_v53, %v20392_v21  ;;  %v11637_v48 = vcombine.low %v10520_v8, %v11603_v57  ;;  %v17353_v8 = vld [vmem:[#allocation32 + $0x4a0] ss:$8 sps:$4 sm:$0xff]   ;;  %v17359_v53 = vld [vmem:[#allocation32 + $0x4b0] ss:$8 sps:$4 sm:$0xff]   ;;  %v17364_v57 = vld [vmem:[#allocation32 + $0xb4] ss:$8 sps:$4 sm:$0xff]  }
 0xc53   : > { %v17356_v37 = vld [vmem:[#allocation32 + $0xa0] ss:$8 sps:$4 sm:$0xff]  }
 0xc54   : > { %11555 = vmatprep.mubr.bf16.mxu1 %v11360_v30  ;;  %v10562_v10 = vcombine.high %v10561_v7, %v10561_v7  ;;  %v20503_v26 = vrot.slane %v11637_v48, %v20392_v21  ;;  %v10569_v61 = vrot.slane %v10561_v7, %v20392_v21  ;;  %v17367_v30 = vld [vmem:[#allocation32 + $0x4c4] ss:$8 sps:$4 sm:$0xff]   ;;  %v17365_v7 = vld [vmem:[#allocation32 + $0x4c0] ss:$8 sps:$4 sm:$0xff]  }
 0xc55   : > { %11556 = vmatmul.mubr.bf16.vlgmr.msra.gmra.mrb[12].mxu1 %v11353_v38  ;;  %v17370_v48 = vld [vmem:[#allocation32 + $0xc4] ss:$8 sps:$4 sm:$0xff]   ;;  %v17373_v38 = vld [vmem:[#allocation32 + $0x4d4] ss:$8 sps:$4 sm:$0xff]  }
 0xc56   : > { %11823 = vmatpush1.bf16.msra.mxu1 %v17293_v63  ;;  %v10576_v39 = vrot.slane %v10562_v10, %v20392_v21  ;;  %v11645_v49 = vcombine.high %v20503_v26, %v20503_v26  ;;  %v17362_v63 = vld [vmem:[#allocation32 + $0xb0] ss:$8 sps:$4 sm:$0xff]   ;;  %v20511_v10 = vld.sshfl [vmem:[#allocation6 + $0x8] sm:$0x30 pattern:$0x75316420] }
 0xc57   : > { %11824 = vmatprep.subr.bf16.mxu1 %v17301_v25  ;;  %v17368_v25 = vld [vmem:[#allocation32 + $0xc0] ss:$8 sps:$4 sm:$0xff]  }
 0xc58   : > { %10771 = vmatprep.mubr.bf16.mxu0 %v10576_v39  ;;  %v11659_v4 = vrot.slane %v11645_v49, %v20392_v21  ;;  %v17376_v39 = vld [vmem:[#allocation32 + $0xd4] ss:$8 sps:$4 sm:$0xff]   ;;  %v14996_v49 = vld.sshfl [vmem:[#allocation6 + $0x4] sm:$0x30 pattern:$0x75316420] }
 0xc59   : > { %10772 = vmatmul.mubr.bf16.vlgmr.msra.gmra.mrb[40].mxu0 %v10569_v61  ;;  %v14998_v61 = vcombine.high %v14996_v49, %v20511_v10 }
 0xc5a   : > { %10966 = vmatpush1.bf16.msra.mxu0 %v17296_v14  ;;  %10997 = vmatprep.mubr.bf16.mxu0 %v10802_v35  ;;  %v17379_v14 = vld [vmem:[#allocation32 + $0x4e4] ss:$8 sps:$4 sm:$0xff]   ;;  %v17374_v35 = vld [vmem:[#allocation32 + $0xd0] ss:$8 sps:$4 sm:$0xff]  }
 0xc5b   : > { %11825 = vmatpush1.bf16.msra.mxu1 %v17299_v19  ;;  %11854 = vmatprep.mubr.bf16.mxu1 %v11659_v4  ;;  %v14891_v19 = vld.sshfl [vmem:[#allocation6] sm:$0x30 pattern:$0x75316420]  ;;  %v17377_v4 = vld [vmem:[#allocation32 + $0x4e0] ss:$8 sps:$4 sm:$0xff]  }
 0xc5c   : > { %10967 = vmatprep.subr.bf16.mxu0 %v17304_v42  ;;  %11826 = vmatprep.subr.bf16.mxu1 %v17307_v9  ;;  %v17382_v42 = vld [vmem:[#allocation32 + $0xe4] ss:$8 sps:$4 sm:$0xff]   ;;  %v17385_v9 = vld [vmem:[#allocation32 + $0x4f4] ss:$8 sps:$4 sm:$0xff]  }
 0xc5e   : > { %10968 = vmatpush1.bf16.msra.mxu0 %v17302_v40  ;;  %v14893_v40 = vcombine.high %v14891_v19, %v14996_v49  ;;  %v17443_v49 = vld [vmem:[#allocation32 + $0x590] ss:$8 sps:$4 sm:$0xff]   ;;  %v17451_v19 = vld [vmem:[#allocation32 + $0x5a4] ss:$8 sps:$4 sm:$0xff]  }
 0xc5f   : > { %11827 = vmatpush1.bf16.msra.mxu1 %v17305_v13  ;;  %10969 = vmatprep.subr.bf16.mxu0 %v17310_v62  ;;  %v20515_v13 = vrot.slane %v14998_v61, %v20392_v21  ;;  %v17380_v62 = vld [vmem:[#allocation32 + $0xe0] ss:$8 sps:$4 sm:$0xff]   ;;  %v17448_v61 = vld [vmem:[#allocation32 + $0x294] ss:$8 sps:$4 sm:$0xff]  }
 0xc60   : > { %11828 = vmatprep.subr.bf16.mxu1 %v17313_v58  ;;  %v17383_v58 = vld [vmem:[#allocation32 + $0x4f0] ss:$8 sps:$4 sm:$0xff]  }
 0xc62   : > { %10970 = vmatpush1.bf16.msra.mxu0 %v17308_v52  ;;  %v17388_v52 = vld [vmem:[#allocation32 + $0xf4] ss:$8 sps:$4 sm:$0xff]  }
 0xc63   : > { %11829 = vmatpush1.bf16.msra.mxu1 %v17311_v1  ;;  %10971 = vmatprep.subr.bf16.mxu0 %v17316_v33  ;;  %v17391_v1 = vld [vmem:[#allocation32 + $0x504] ss:$8 sps:$4 sm:$0xff]   ;;  %v20518_v33 = vrot.slane %v14893_v40, %v20392_v21  ;;  %v17452_v40 = vld [vmem:[#allocation32 + $0x2a0] ss:$8 sps:$4 sm:$0xff]  }
 0xc64   : > { %11830 = vmatprep.subr.bf16.mxu1 %v17319_v45  ;;  %v11926_v45 = vcombine.high %v20515_v13, %v20515_v13 }
 0xc66   : > { %10972 = vmatpush1.bf16.msra.mxu0 %v17314_v55  ;;  %v17386_v55 = vld [vmem:[#allocation32 + $0xf0] ss:$8 sps:$4 sm:$0xff]  }
 0xc67   : > { %11831 = vmatpush1.bf16.msra.mxu1 %v17317_v34  ;;  %10973 = vmatprep.subr.bf16.mxu0 %v17322_v43  ;;  %v17389_v34 = vld [vmem:[#allocation32 + $0x500] ss:$8 sps:$4 sm:$0xff]   ;;  %v11652_v43 = vrot.slane %v20503_v26, %v20392_v21 }
 0xc68   : > { %11832 = vmatprep.subr.bf16.mxu1 %v17325_v41  ;;  %v17394_v41 = vld [vmem:[#allocation32 + $0x204] ss:$8 sps:$4 sm:$0xff]  }
 0xc6a   : > { %10974 = vmatpush1.bf16.msra.mxu0 %v17320_v16  ;;  %v11067_v16 = vcombine.high %v20518_v33, %v20518_v33 }
 0xc6b   : > { %11833 = vmatpush1.bf16.msra.mxu1 %v17323_v27  ;;  %10975 = vmatprep.subr.bf16.mxu0 %v17328_v31  ;;  %v17397_v27 = vld [vmem:[#allocation32 + $0x514] ss:$8 sps:$4 sm:$0xff]   ;;  %v11940_v31 = vrot.slane %v11926_v45, %v20392_v21  ;;  %v17461_v45 = vld [vmem:[#allocation32 + $0x5c0] ss:$8 sps:$4 sm:$0xff]  }
 0xc6c   : > { %11834 = vmatprep.subr.bf16.mxu1 %v17331_v2  ;;  %v17392_v2 = vld [vmem:[#allocation32 + $0x200] ss:$8 sps:$4 sm:$0xff]   ;;  %v11081_v26 = vrot.slane %v11067_v16, %v20392_v21  ;;  %v17467_v16 = vld [vmem:[#allocation32 + $0x5d0] ss:$8 sps:$4 sm:$0xff]  }
 0xc6e   : > { %10976 = vmatpush1.bf16.msra.mxu0 %v17326_v46  ;;  %v10795_v46 = vrot.slane %v20493_v47, %v20392_v21  ;;  %v17407_v47 = vld [vmem:[#allocation32 + $0x530] ss:$8 sps:$4 sm:$0xff]  }
 0xc6f   : > { %11835 = vmatpush1.bf16.msra.mxu1 %v17329_v18  ;;  %10977 = vmatprep.subr.bf16.mxu0 %v17334_v59  ;;  %v17395_v18 = vld [vmem:[#allocation32 + $0x510] ss:$8 sps:$4 sm:$0xff]   ;;  %v17400_v59 = vld [vmem:[#allocation32 + $0x214] ss:$8 sps:$4 sm:$0xff]  }
 0xc70   : > { %11836 = vmatprep.subr.bf16.mxu1 %v17337_v36  ;;  %v17403_v36 = vld [vmem:[#allocation32 + $0x524] ss:$8 sps:$4 sm:$0xff]  }
 0xc72   : > { %10978 = vmatpush1.bf16.msra.mxu0 %v17332_v17  ;;  %v17398_v17 = vld [vmem:[#allocation32 + $0x210] ss:$8 sps:$4 sm:$0xff]  }
 0xc73   : > { %11837 = vmatpush1.bf16.msra.mxu1 %v17335_v11  ;;  %10979 = vmatprep.subr.bf16.mxu0 %v17340_v3  ;;  %v17401_v11 = vld [vmem:[#allocation32 + $0x520] ss:$8 sps:$4 sm:$0xff]   ;;  %v17406_v3 = vld [vmem:[#allocation32 + $0x224] ss:$8 sps:$4 sm:$0xff]  }
 0xc74   : > { %11838 = vmatprep.subr.bf16.mxu1 %v17343_v29  ;;  %v17409_v29 = vld [vmem:[#allocation32 + $0x534] ss:$8 sps:$4 sm:$0xff]  }
 0xc76   : > { %10980 = vmatpush1.bf16.msra.mxu0 %v17338_v23  ;;  %v17404_v23 = vld [vmem:[#allocation32 + $0x220] ss:$8 sps:$4 sm:$0xff]  }
 0xc77   : > { %11839 = vmatpush1.bf16.msra.mxu1 %v17341_v44  ;;  %10981 = vmatprep.subr.bf16.mxu0 %v17346_v51  ;;  %v17412_v44 = vld [vmem:[#allocation32 + $0x234] ss:$8 sps:$4 sm:$0xff]   ;;  %v17415_v51 = vld [vmem:[#allocation32 + $0x544] ss:$8 sps:$4 sm:$0xff]  }
 0xc78   : > { %11840 = vmatprep.subr.bf16.mxu1 %v17349_v28  ;;  %v17410_v28 = vld [vmem:[#allocation32 + $0x230] ss:$8 sps:$4 sm:$0xff]  }
 0xc7a   : > { %10982 = vmatpush1.bf16.msra.mxu0 %v17344_v54  ;;  %v17413_v54 = vld [vmem:[#allocation32 + $0x540] ss:$8 sps:$4 sm:$0xff]  }
 0xc7b   : > { %11841 = vmatpush1.bf16.msra.mxu1 %v17347_v50  ;;  %10983 = vmatprep.subr.bf16.mxu0 %v17352_v6  ;;  %v17418_v50 = vld [vmem:[#allocation32 + $0x244] ss:$8 sps:$4 sm:$0xff]   ;;  %v17421_v6 = vld [vmem:[#allocation32 + $0x554] ss:$8 sps:$4 sm:$0xff]  }
 0xc7c   : > { %11842 = vmatprep.subr.bf16.mxu1 %v17355_v24  ;;  %v17416_v24 = vld [vmem:[#allocation32 + $0x240] ss:$8 sps:$4 sm:$0xff]  }
 0xc7e   : > { %10984 = vmatpush1.bf16.msra.mxu0 %v17350_v0  ;;  %v17419_v0 = vld [vmem:[#allocation32 + $0x550] ss:$8 sps:$4 sm:$0xff]  }
 0xc7f   : > { %11843 = vmatpush1.bf16.msra.mxu1 %v17353_v8  ;;  %10985 = vmatprep.subr.bf16.mxu0 %v17358_v15  ;;  %v17424_v8 = vld [vmem:[#allocation32 + $0x254] ss:$8 sps:$4 sm:$0xff]   ;;  %v17427_v15 = vld [vmem:[#allocation32 + $0x564] ss:$8 sps:$4 sm:$0xff]  }
 0xc80   : > { %11844 = vmatprep.subr.bf16.mxu1 %v17361_v12  ;;  %v17422_v12 = vld [vmem:[#allocation32 + $0x250] ss:$8 sps:$4 sm:$0xff]  }
 0xc82   : > { %10986 = vmatpush1.bf16.msra.mxu0 %v17356_v37  ;;  %v17425_v37 = vld [vmem:[#allocation32 + $0x560] ss:$8 sps:$4 sm:$0xff]  }
 0xc83   : > { %11845 = vmatpush1.bf16.msra.mxu1 %v17359_v53  ;;  %10987 = vmatprep.subr.bf16.mxu0 %v17364_v57  ;;  %v17430_v53 = vld [vmem:[#allocation32 + $0x264] ss:$8 sps:$4 sm:$0xff]   ;;  %v17433_v57 = vld [vmem:[#allocation32 + $0x574] ss:$8 sps:$4 sm:$0xff]  }
 0xc84   : > { %11846 = vmatprep.subr.bf16.mxu1 %v17367_v30  ;;  %v17428_v30 = vld [vmem:[#allocation32 + $0x260] ss:$8 sps:$4 sm:$0xff]  }
 0xc86   : > { %10988 = vmatpush1.bf16.msra.mxu0 %v17362_v63  ;;  %v17431_v63 = vld [vmem:[#allocation32 + $0x570] ss:$8 sps:$4 sm:$0xff]  }
 0xc87   : > { %11847 = vmatpush1.bf16.msra.mxu1 %v17365_v7  ;;  %10989 = vmatprep.subr.bf16.mxu0 %v17370_v48  ;;  %v17436_v7 = vld [vmem:[#allocation32 + $0x274] ss:$8 sps:$4 sm:$0xff]   ;;  %v17439_v48 = vld [vmem:[#allocation32 + $0x584] ss:$8 sps:$4 sm:$0xff]  }
 0xc88   : > { %11848 = vmatprep.subr.bf16.mxu1 %v17373_v38  ;;  %v17434_v38 = vld [vmem:[#allocation32 + $0x270] ss:$8 sps:$4 sm:$0xff]  }
 0xc8a   : > { %10990 = vmatpush1.bf16.msra.mxu0 %v17368_v25  ;;  %v17437_v25 = vld [vmem:[#allocation32 + $0x580] ss:$8 sps:$4 sm:$0xff]  }
 0xc8b   : > { %11849 = vmatpush1.bf16.msra.mxu1 %v17371_v56  ;;  %10991 = vmatprep.subr.bf16.mxu0 %v17376_v39  ;;  %v17442_v56 = vld [vmem:[#allocation32 + $0x284] ss:$8 sps:$4 sm:$0xff]   ;;  %v17445_v39 = vld [vmem:[#allocation32 + $0x594] ss:$8 sps:$4 sm:$0xff]  }
 0xc8c   : > { %11850 = vmatprep.subr.bf16.mxu1 %v17379_v14  ;;  %v17440_v14 = vld [vmem:[#allocation32 + $0x280] ss:$8 sps:$4 sm:$0xff]  }
 0xc8e   : > { %10992 = vmatpush1.bf16.msra.mxu0 %v17374_v35  ;;  %v17446_v35 = vld [vmem:[#allocation32 + $0x290] ss:$8 sps:$4 sm:$0xff]  }
 0xc8f   : > { %11851 = vmatpush1.bf16.msra.mxu1 %v17377_v4  ;;  %10993 = vmatprep.subr.bf16.mxu0 %v17382_v42  ;;  %v17449_v4 = vld [vmem:[#allocation32 + $0x5a0] ss:$8 sps:$4 sm:$0xff]   ;;  %v17454_v42 = vld [vmem:[#allocation32 + $0x2a4] ss:$8 sps:$4 sm:$0xff]  }
 0xc90   : > { %11852 = vmatprep.subr.bf16.mxu1 %v17385_v9  ;;  %v17457_v9 = vld [vmem:[#allocation32 + $0x5b4] ss:$8 sps:$4 sm:$0xff]  }
 0xc92   : > { %10994 = vmatpush1.bf16.msra.mxu0 %v17380_v62  ;;  %v17455_v62 = vld [vmem:[#allocation32 + $0x5b0] ss:$8 sps:$4 sm:$0xff]  }
 0xc93   : > { %11853 = vmatpush1.bf16.msra.mxu1 %v17383_v58  ;;  %10995 = vmatprep.subr.bf16.mxu0 %v17388_v52  ;;  %v17460_v58 = vld [vmem:[#allocation32 + $0x2b4] ss:$8 sps:$4 sm:$0xff]   ;;  %v17463_v52 = vld [vmem:[#allocation32 + $0x5c4] ss:$8 sps:$4 sm:$0xff]  }
 0xc94   : > { %12103 = vmatprep.subr.bf16.mxu1 %v17391_v1  ;;  %v17458_v1 = vld [vmem:[#allocation32 + $0x2b0] ss:$8 sps:$4 sm:$0xff]  }
 0xc96   : > { %10996 = vmatpush1.bf16.msra.mxu0 %v17386_v55  ;;  %11855 = vmatmul.mubr.bf16.vlgmr.msra.gmra.mrb[12].mxu1 %v11652_v43  ;;  %v17466_v55 = vld [vmem:[#allocation32 + $0x2c4] ss:$8 sps:$4 sm:$0xff]   ;;  %v17464_v43 = vld [vmem:[#allocation32 + $0x2c0] ss:$8 sps:$4 sm:$0xff]  }
 0xc97   : > { %12104 = vmatpush1.bf16.msra.mxu1 %v17389_v34  ;;  %12135 = vmatprep.mubr.bf16.mxu1 %v11940_v31  ;;  %v17469_v34 = vld [vmem:[#allocation32 + $0x5d4] ss:$8 sps:$4 sm:$0xff]   ;;  %v17475_v31 = vld [vmem:[#allocation32 + $0x5e4] ss:$8 sps:$4 sm:$0xff]  }
 0xc98   : > { %11244 = vmatprep.subr.bf16.mxu0 %v17394_v41  ;;  %12105 = vmatprep.subr.bf16.mxu1 %v17397_v27  ;;  %v15032_v41 = vld.sshfl [vmem:[#allocation6 + $0xc] sm:$0x3 pattern:$0x75316420]  ;;  %v17472_v27 = vld [vmem:[#allocation32 + $0x2d4] ss:$8 sps:$4 sm:$0xff]  }
 0xc99   : > { %10998 = vmatmul.mubr.bf16.vlgmr.msra.gmra.mrb[40].mxu0 %v10795_v46  ;;  %v17470_v46 = vld [vmem:[#allocation32 + $0x2d0] ss:$8 sps:$4 sm:$0xff]  }
 0xc9a   : > { %11245 = vmatpush1.bf16.msra.mxu0 %v17392_v2  ;;  %11276 = vmatprep.mubr.bf16.mxu0 %v11081_v26  ;;  %v12198_v2 = vcombine.low %v20484_v20, %v15032_v41  ;;  %v17481_v26 = vld [vmem:[#allocation32 + $0x5f4] ss:$8 sps:$4 sm:$0xff]   ;;  %v17527_v41 = vld [vmem:[#allocation32 + $0x6e0] ss:$8 sps:$4 sm:$0xff]  }
 0xc9b   : > { %12106 = vmatpush1.bf16.msra.mxu1 %v17395_v18  ;;  %11246 = vmatprep.subr.bf16.mxu0 %v17400_v59  ;;  %v17473_v18 = vld [vmem:[#allocation32 + $0x5e0] ss:$8 sps:$4 sm:$0xff]   ;;  %v17478_v59 = vld [vmem:[#allocation32 + $0x2e4] ss:$8 sps:$4 sm:$0xff]  }
 0xc9c   : > { %12107 = vmatprep.subr.bf16.mxu1 %v17403_v36  ;;  %v20532_v36 = vrot.slane %v12198_v2, %v20392_v21  ;;  %v17535_v2 = vld [vmem:[#allocation32 + $0x704] ss:$8 sps:$4 sm:$0xff]  }
 0xc9e   : > { %11247 = vmatpush1.bf16.msra.mxu0 %v17398_v17  ;;  %v17476_v17 = vld [vmem:[#allocation32 + $0x2e0] ss:$8 sps:$4 sm:$0xff]   ;;  %v12206_v20 = vcombine.high %v20532_v36, %v20532_v36 }
 0xc9f   : > { %12108 = vmatpush1.bf16.msra.mxu1 %v17401_v11  ;;  %11248 = vmatprep.subr.bf16.mxu0 %v17406_v3  ;;  %v17479_v11 = vld [vmem:[#allocation32 + $0x5f0] ss:$8 sps:$4 sm:$0xff]   ;;  %v17484_v3 = vld [vmem:[#allocation32 + $0x2f4] ss:$8 sps:$4 sm:$0xff]  }
 0xca0   : > { %12109 = vmatprep.subr.bf16.mxu1 %v17409_v29  ;;  %v17487_v29 = vld [vmem:[#allocation32 + $0x604] ss:$8 sps:$4 sm:$0xff]  }
 0xca2   : > { %11249 = vmatpush1.bf16.msra.mxu0 %v17404_v23  ;;  %v17482_v23 = vld [vmem:[#allocation32 + $0x2f0] ss:$8 sps:$4 sm:$0xff]  }
 0xca3   : > { %12110 = vmatpush1.bf16.msra.mxu1 %v17407_v47  ;;  %11250 = vmatprep.subr.bf16.mxu0 %v17412_v44  ;;  %v17485_v47 = vld [vmem:[#allocation32 + $0x600] ss:$8 sps:$4 sm:$0xff]   ;;  %v11933_v44 = vrot.slane %v20515_v13, %v20392_v21  ;;  %v17494_v13 = vld [vmem:[#allocation32 + $0x630] ss:$8 sps:$4 sm:$0xff]  }
 0xca4   : > { %12111 = vmatprep.subr.bf16.mxu1 %v17415_v51  ;;  %v17490_v51 = vld [vmem:[#allocation32 + $0x614] ss:$8 sps:$4 sm:$0xff]  }
 0xca6   : > { %11251 = vmatpush1.bf16.msra.mxu0 %v17410_v28  ;;  %v12220_v28 = vrot.slane %v12206_v20, %v20392_v21  ;;  %v17542_v20 = vld [vmem:[#allocation32 + $0x730] ss:$8 sps:$4 sm:$0xff]  }
 0xca7   : > { %12112 = vmatpush1.bf16.msra.mxu1 %v17413_v54  ;;  %11252 = vmatprep.subr.bf16.mxu0 %v17418_v50  ;;  %v11074_v54 = vrot.slane %v20518_v33, %v20392_v21  ;;  %v17488_v50 = vld [vmem:[#allocation32 + $0x610] ss:$8 sps:$4 sm:$0xff]   ;;  %v17505_v33 = vld [vmem:[#allocation32 + $0x664] ss:$8 sps:$4 sm:$0xff]  }
 0xca8   : > { %12113 = vmatprep.subr.bf16.mxu1 %v17421_v6  ;;  %v17493_v6 = vld [vmem:[#allocation32 + $0x624] ss:$8 sps:$4 sm:$0xff]  }
 0xcaa   : > { %11253 = vmatpush1.bf16.msra.mxu0 %v17416_v24  ;;  %v17491_v24 = vld [vmem:[#allocation32 + $0x620] ss:$8 sps:$4 sm:$0xff]  }
 0xcab   : > { %12114 = vmatpush1.bf16.msra.mxu1 %v17419_v0  ;;  %11254 = vmatprep.subr.bf16.mxu0 %v17424_v8  ;;  %v17496_v0 = vld [vmem:[#allocation32 + $0x634] ss:$8 sps:$4 sm:$0xff]   ;;  %v17499_v8 = vld [vmem:[#allocation32 + $0x644] ss:$8 sps:$4 sm:$0xff]  }
 0xcac   : > { %12115 = vmatprep.subr.bf16.mxu1 %v17427_v15  ;;  %v17497_v15 = vld [vmem:[#allocation32 + $0x640] ss:$8 sps:$4 sm:$0xff]  }
 0xcae   : > { %11255 = vmatpush1.bf16.msra.mxu0 %v17422_v12  ;;  %v17502_v12 = vld [vmem:[#allocation32 + $0x654] ss:$8 sps:$4 sm:$0xff]  }
 0xcaf   : > { %12116 = vmatpush1.bf16.msra.mxu1 %v17425_v37  ;;  %11256 = vmatprep.subr.bf16.mxu0 %v17430_v53  ;;  %v17500_v37 = vld [vmem:[#allocation32 + $0x650] ss:$8 sps:$4 sm:$0xff]   ;;  %v17503_v53 = vld [vmem:[#allocation32 + $0x660] ss:$8 sps:$4 sm:$0xff]  }
 0xcb0   : > { %12117 = vmatprep.subr.bf16.mxu1 %v17433_v57  ;;  %v17508_v57 = vld [vmem:[#allocation32 + $0x674] ss:$8 sps:$4 sm:$0xff]  }
 0xcb2   : > { %11257 = vmatpush1.bf16.msra.mxu0 %v17428_v30  ;;  %v17506_v30 = vld [vmem:[#allocation32 + $0x670] ss:$8 sps:$4 sm:$0xff]  }
 0xcb3   : > { %12118 = vmatpush1.bf16.msra.mxu1 %v17431_v63  ;;  %11258 = vmatprep.subr.bf16.mxu0 %v17436_v7  ;;  %v17511_v63 = vld [vmem:[#allocation32 + $0x684] ss:$8 sps:$4 sm:$0xff]   ;;  %v17509_v7 = vld [vmem:[#allocation32 + $0x680] ss:$8 sps:$4 sm:$0xff]  }
 0xcb4   : > { %12119 = vmatprep.subr.bf16.mxu1 %v17439_v48  ;;  %v17514_v48 = vld [vmem:[#allocation32 + $0x694] ss:$8 sps:$4 sm:$0xff]  }
 0xcb6   : > { %11259 = vmatpush1.bf16.msra.mxu0 %v17434_v38  ;;  %v17512_v38 = vld [vmem:[#allocation32 + $0x690] ss:$8 sps:$4 sm:$0xff]  }
 0xcb7   : > { %12120 = vmatpush1.bf16.msra.mxu1 %v17437_v25  ;;  %11260 = vmatprep.subr.bf16.mxu0 %v17442_v56  ;;  %v17517_v25 = vld [vmem:[#allocation32 + $0x6a4] ss:$8 sps:$4 sm:$0xff]   ;;  %v15066_v56 = vld.sshfl [vmem:[#allocation6 + $0xc] sm:$0x33 pattern:$0x75316420] }
 0xcb8   : > { %12121 = vmatprep.subr.bf16.mxu1 %v17445_v39  ;;  %v17515_v39 = vld [vmem:[#allocation32 + $0x6a0] ss:$8 sps:$4 sm:$0xff]  }
 0xcba   : > { %11261 = vmatpush1.bf16.msra.mxu0 %v17440_v14  ;;  %v15065_v14 = vld.sshfl [vmem:[#allocation6 + $0x8] sm:$0x33 pattern:$0x75316420] }
 0xcbb   : > { %12122 = vmatpush1.bf16.msra.mxu1 %v17443_v49  ;;  %11262 = vmatprep.subr.bf16.mxu0 %v17448_v61  ;;  %v17520_v49 = vld [vmem:[#allocation32 + $0x6b4] ss:$8 sps:$4 sm:$0xff]   ;;  %v12437_v61 = vcombine.high %v15065_v14, %v15065_v14 }
 0xcbc   : > { %12123 = vmatprep.subr.bf16.mxu1 %v17451_v19  ;;  %v12445_v19 = vcombine.high %v15066_v56, %v15066_v56 }
 0xcbe   : > { %11263 = vmatpush1.bf16.msra.mxu0 %v17446_v35  ;;  %v17518_v35 = vld [vmem:[#allocation32 + $0x6b0] ss:$8 sps:$4 sm:$0xff]  }
 0xcbf   : > { %12124 = vmatpush1.bf16.msra.mxu1 %v17449_v4  ;;  %11264 = vmatprep.subr.bf16.mxu0 %v17454_v42  ;;  %v17523_v4 = vld [vmem:[#allocation32 + $0x6c4] ss:$8 sps:$4 sm:$0xff]   ;;  %v12452_v42 = vshll.u32 %v12437_v61, 16  ;;  %v17581_v61 = vld [vmem:[#allocation32 + $0x800] ss:$8 sps:$4 sm:$0xff]  }
 0xcc0   : > { %12125 = vmatprep.subr.bf16.mxu1 %v17457_v9  ;;  %v12456_v9 = vshrl.u32 %v15066_v56, 16 }
 0xcc2   : > { %11265 = vmatpush1.bf16.msra.mxu0 %v17452_v40  ;;  %v12461_v40 = vshll.u32 %v12445_v19, 16 }
 0xcc3   : > { %12126 = vmatpush1.bf16.msra.mxu1 %v17455_v62  ;;  %11266 = vmatprep.subr.bf16.mxu0 %v17460_v58  ;;  %v17521_v62 = vld [vmem:[#allocation32 + $0x6c0] ss:$8 sps:$4 sm:$0xff]   ;;  %v17526_v58 = vld [vmem:[#allocation32 + $0x6d4] ss:$8 sps:$4 sm:$0xff]  }
 0xcc4   : > { %12127 = vmatprep.subr.bf16.mxu1 %v17463_v52  ;;  %v12447_v52 = vshrl.u32 %v15065_v14, 16  ;;  %v17583_v14 = vld [vmem:[#allocation32 + $0x804] ss:$8 sps:$4 sm:$0xff]  }
 0xcc6   : > { %11267 = vmatpush1.bf16.msra.mxu0 %v17458_v1  ;;  %v12454_v1 = vsel %vm20380_vm14, %v12447_v52, %v12452_v42  ;;  %v17589_v42 = vld [vmem:[#allocation32 + $0x824] ss:$8 sps:$4 sm:$0xff]   ;;  %v17593_v52 = vld [vmem:[#allocation32 + $0x840] ss:$8 sps:$4 sm:$0xff]  }
 0xcc7   : > { %12128 = vmatpush1.bf16.msra.mxu1 %v17461_v45  ;;  %11268 = vmatprep.subr.bf16.mxu0 %v17466_v55  ;;  %v12463_v45 = vsel %vm20380_vm14, %v12456_v9, %v12461_v40  ;;  %v17524_v55 = vld [vmem:[#allocation32 + $0x6d0] ss:$8 sps:$4 sm:$0xff]   ;;  %v17587_v9 = vld [vmem:[#allocation32 + $0x820] ss:$8 sps:$4 sm:$0xff]   ;;  %v17592_v40 = vld [vmem:[#allocation32 + $0x834] ss:$8 sps:$4 sm:$0xff]  }
 0xcc8   : > { %12129 = vmatprep.subr.bf16.mxu1 %v17469_v34  ;;  %v17529_v34 = vld [vmem:[#allocation32 + $0x6e4] ss:$8 sps:$4 sm:$0xff]   ;;  %vm20575_vm14 = vmor %vm13065_vm2, %vm19080_vm7 }
 0xcca   : > { %11269 = vmatpush1.bf16.msra.mxu0 %v17464_v43  ;;  %v12497_v43 = vcombine.low %v12454_v1, %v12463_v45  ;;  %v17598_v1 = vld [vmem:[#allocation32 + $0x854] ss:$8 sps:$4 sm:$0xff]   ;;  %v17596_v45 = vld [vmem:[#allocation32 + $0x850] ss:$8 sps:$4 sm:$0xff]  }
 0xccb   : > { %12130 = vmatpush1.bf16.msra.mxu1 %v17467_v16  ;;  %11270 = vmatprep.subr.bf16.mxu0 %v17472_v27  ;;  %v17532_v16 = vld [vmem:[#allocation32 + $0x6f4] ss:$8 sps:$4 sm:$0xff]  }
 0xccc   : > { %12131 = vmatprep.subr.bf16.mxu1 %v17475_v31  ;;  %v20546_v27 = vrot.slane %v12497_v43, %v20392_v21  ;;  %v17530_v31 = vld [vmem:[#allocation32 + $0x6f0] ss:$8 sps:$4 sm:$0xff]   ;;  %v17604_v43 = vld [vmem:[#allocation32 + $0x874] ss:$8 sps:$4 sm:$0xff]  }
 0xcce   : > { %11271 = vmatpush1.bf16.msra.mxu0 %v17470_v46  ;;  %v12505_v60 = vcombine.high %v20546_v27, %v20546_v27  ;;  %v17533_v46 = vld [vmem:[#allocation32 + $0x700] ss:$8 sps:$4 sm:$0xff]   ;;  %v12512_v19 = vrot.slane %v20546_v27, %v20392_v21 }
 0xccf   : > { %12132 = vmatpush1.bf16.msra.mxu1 %v17473_v18  ;;  %11272 = vmatprep.subr.bf16.mxu0 %v17478_v59  ;;  %v12213_v18 = vrot.slane %v20532_v36, %v20392_v21  ;;  %v17538_v59 = vld [vmem:[#allocation32 + $0x714] ss:$8 sps:$4 sm:$0xff]   ;;  %v17545_v36 = vld [vmem:[#allocation32 + $0x740] ss:$8 sps:$4 sm:$0xff]  }
 0xcd0   : > { %12133 = vmatprep.subr.bf16.mxu1 %v17481_v26  ;;  %v12519_v26 = vrot.slane %v12505_v60, %v20392_v21  ;;  %v17605_v27 = vld [vmem:[#allocation32 + $0x880] ss:$8 sps:$4 sm:$0xff]   ;;  %v17613_v60 = vld [vmem:[#allocation32 + $0x8a4] ss:$8 sps:$4 sm:$0xff]  }
 0xcd2   : > { %11273 = vmatpush1.bf16.msra.mxu0 %v17476_v17  ;;  %v17536_v17 = vld [vmem:[#allocation32 + $0x710] ss:$8 sps:$4 sm:$0xff]  }
 0xcd3   : > { %12134 = vmatpush1.bf16.msra.mxu1 %v17479_v11  ;;  %11274 = vmatprep.subr.bf16.mxu0 %v17484_v3  ;;  %v17541_v11 = vld [vmem:[#allocation32 + $0x724] ss:$8 sps:$4 sm:$0xff]   ;;  %v17539_v3 = vld [vmem:[#allocation32 + $0x720] ss:$8 sps:$4 sm:$0xff]  }
 0xcd4   : > { %12383 = vmatprep.subr.bf16.mxu1 %v17487_v29  ;;  %v17544_v29 = vld [vmem:[#allocation32 + $0x734] ss:$8 sps:$4 sm:$0xff]  }
 0xcd6   : > { %11275 = vmatpush1.bf16.msra.mxu0 %v17482_v23  ;;  %12136 = vmatmul.mubr.bf16.vlgmr.msra.gmra.mrb[12].mxu1 %v11933_v44  ;;  %v17547_v23 = vld [vmem:[#allocation32 + $0x744] ss:$8 sps:$4 sm:$0xff]   ;;  %v17548_v44 = vld [vmem:[#allocation32 + $0x750] ss:$8 sps:$4 sm:$0xff]  }
 0xcd7   : > { %12384 = vmatpush1.bf16.msra.mxu1 %v17485_v47  ;;  %12415 = vmatprep.mubr.bf16.mxu1 %v12220_v28  ;;  %v17550_v47 = vld [vmem:[#allocation32 + $0x754] ss:$8 sps:$4 sm:$0xff]   ;;  %v17551_v28 = vld [vmem:[#allocation32 + $0x760] ss:$8 sps:$4 sm:$0xff]  }
 0xcd8   : > { %12385 = vmatprep.subr.bf16.mxu1 %v17490_v51  ;;  %v17553_v51 = vld [vmem:[#allocation32 + $0x764] ss:$8 sps:$4 sm:$0xff]  }
 0xcd9   : > { %11277 = vmatmul.mubr.bf16.vlgmr.msra.gmra.mrb[40].mxu0 %v11074_v54  ;;  %v17556_v54 = vld [vmem:[#allocation32 + $0x774] ss:$8 sps:$4 sm:$0xff]  }
 0xcdb   : > { %12386 = vmatpush1.bf16.msra.mxu1 %v17488_v50  ;;  %v17554_v50 = vld [vmem:[#allocation32 + $0x770] ss:$8 sps:$4 sm:$0xff]  }
 0xcdc   : > { %12387 = vmatprep.subr.bf16.mxu1 %v17493_v6  ;;  %v17559_v6 = vld [vmem:[#allocation32 + $0x784] ss:$8 sps:$4 sm:$0xff]  }
 0xcdf   : > { %12388 = vmatpush1.bf16.msra.mxu1 %v17491_v24  ;;  %v17557_v24 = vld [vmem:[#allocation32 + $0x780] ss:$8 sps:$4 sm:$0xff]  }
 0xce0   : > { %12389 = vmatprep.subr.bf16.mxu1 %v17496_v0  ;;  %v17562_v0 = vld [vmem:[#allocation32 + $0x794] ss:$8 sps:$4 sm:$0xff]  }
 0xce3   : > { %12390 = vmatpush1.bf16.msra.mxu1 %v17494_v13  ;;  %v17560_v13 = vld [vmem:[#allocation32 + $0x790] ss:$8 sps:$4 sm:$0xff]  }
 0xce4   : > { %12391 = vmatprep.subr.bf16.mxu1 %v17499_v8  ;;  %v17565_v8 = vld [vmem:[#allocation32 + $0x7a4] ss:$8 sps:$4 sm:$0xff]  }
 0xce7   : > { %12392 = vmatpush1.bf16.msra.mxu1 %v17497_v15  ;;  %v17563_v15 = vld [vmem:[#allocation32 + $0x7a0] ss:$8 sps:$4 sm:$0xff]  }
 0xce8   : > { %12393 = vmatprep.subr.bf16.mxu1 %v17502_v12  ;;  %v17568_v12 = vld [vmem:[#allocation32 + $0x7b4] ss:$8 sps:$4 sm:$0xff]  }
 0xceb   : > { %12394 = vmatpush1.bf16.msra.mxu1 %v17500_v37  ;;  %v17566_v37 = vld [vmem:[#allocation32 + $0x7b0] ss:$8 sps:$4 sm:$0xff]  }
 0xcec   : > { %12395 = vmatprep.subr.bf16.mxu1 %v17505_v33  ;;  %v17571_v33 = vld [vmem:[#allocation32 + $0x7c4] ss:$8 sps:$4 sm:$0xff]  }
 0xcef   : > { %12396 = vmatpush1.bf16.msra.mxu1 %v17503_v53  ;;  %v17569_v53 = vld [vmem:[#allocation32 + $0x7c0] ss:$8 sps:$4 sm:$0xff]  }
 0xcf0   : > { %12397 = vmatprep.subr.bf16.mxu1 %v17508_v57  ;;  %v17574_v57 = vld [vmem:[#allocation32 + $0x7d4] ss:$8 sps:$4 sm:$0xff]  }
 0xcf3   : > { %12398 = vmatpush1.bf16.msra.mxu1 %v17506_v30  ;;  %v15102_v30 = vld.sshfl [vmem:[#allocation6 + $0xc] sm:$0x30 pattern:$0x75316420] }
 0xcf4   : > { %12399 = vmatprep.subr.bf16.mxu1 %v17511_v63  ;;  %v17572_v63 = vld [vmem:[#allocation32 + $0x7d0] ss:$8 sps:$4 sm:$0xff]  }
 0xcf7   : > { %12400 = vmatpush1.bf16.msra.mxu1 %v17509_v7  ;;  %v17577_v7 = vld [vmem:[#allocation32 + $0x7e4] ss:$8 sps:$4 sm:$0xff]  }
 0xcf8   : > { %12401 = vmatprep.subr.bf16.mxu1 %v17514_v48  ;;  %v15103_v48 = vcombine.high %v20511_v10, %v15102_v30  ;;  %v17586_v10 = vld [vmem:[#allocation32 + $0x814] ss:$8 sps:$4 sm:$0xff]  }
 0xcf9   : > { %v17641_v30 = vld [vmem:[#allocation37 + $0x70] sm:$0xff]  }
 0xcfa   : > { %v20555_v56 = vrot.slane %v15103_v48, %v20392_v21  ;;  %v17644_v48 = vld [vmem:[#allocation37 + $0x38] sm:$0xff]  }
 0xcfb   : > { %12402 = vmatpush1.bf16.msra.mxu1 %v17512_v38  ;;  %v17575_v38 = vld [vmem:[#allocation32 + $0x7e0] ss:$8 sps:$4 sm:$0xff]  }
 0xcfc   : > { %12403 = vmatprep.subr.bf16.mxu1 %v17517_v25  ;;  %v17580_v25 = vld [vmem:[#allocation32 + $0x7f4] ss:$8 sps:$4 sm:$0xff]  }
 0xcff   : > { %12404 = vmatpush1.bf16.msra.mxu1 %v17515_v39  ;;  %v17578_v39 = vld [vmem:[#allocation32 + $0x7f0] ss:$8 sps:$4 sm:$0xff]  }
 0xd00   : > { %12405 = vmatprep.subr.bf16.mxu1 %v17520_v49  ;;  %v12786_v49 = vcombine.high %v20555_v56, %v20555_v56 }
 0xd03   : > { %12406 = vmatpush1.bf16.msra.mxu1 %v17518_v35  ;;  %v12800_v35 = vrot.slane %v12786_v49, %v20392_v21 }
 0xd04   : > { %12407 = vmatprep.subr.bf16.mxu1 %v17523_v4  ;;  %v17584_v4 = vld [vmem:[#allocation32 + $0x810] ss:$8 sps:$4 sm:$0xff]  }
 0xd07   : > { %12408 = vmatpush1.bf16.msra.mxu1 %v17521_v62  ;;  %v17590_v62 = vld [vmem:[#allocation32 + $0x830] ss:$8 sps:$4 sm:$0xff]  }
 0xd08   : > { %12409 = vmatprep.subr.bf16.mxu1 %v17526_v58  ;;  %v17595_v58 = vld [vmem:[#allocation32 + $0x844] ss:$8 sps:$4 sm:$0xff]  }
 0xd0b   : > { %12410 = vmatpush1.bf16.msra.mxu1 %v17524_v55  ;;  %v17601_v55 = vld [vmem:[#allocation32 + $0x864] ss:$8 sps:$4 sm:$0xff]  }
 0xd0c   : > { %12411 = vmatprep.subr.bf16.mxu1 %v17529_v34  ;;  %v17599_v34 = vld [vmem:[#allocation32 + $0x860] ss:$8 sps:$4 sm:$0xff]  }
 0xd0f   : > { %12412 = vmatpush1.bf16.msra.mxu1 %v17527_v41  ;;  %v17602_v41 = vld [vmem:[#allocation32 + $0x870] ss:$8 sps:$4 sm:$0xff]  }
 0xd10   : > { %12413 = vmatprep.subr.bf16.mxu1 %v17532_v16  ;;  %v17607_v16 = vld [vmem:[#allocation32 + $0x884] ss:$8 sps:$4 sm:$0xff]  }
 0xd13   : > { %12414 = vmatpush1.bf16.msra.mxu1 %v17530_v31  ;;  %v17610_v31 = vld [vmem:[#allocation32 + $0x894] ss:$8 sps:$4 sm:$0xff]  }
 0xd14   : > { %12682 = vmatprep.subr.bf16.mxu1 %v17535_v2  ;;  %v17608_v2 = vld [vmem:[#allocation32 + $0x890] ss:$8 sps:$4 sm:$0xff]  }
 0xd16   : > { %12416 = vmatmul.mubr.bf16.vlgmr.msra.gmra.mrb[12].mxu1 %v12213_v18  ;;  %v17616_v18 = vld [vmem:[#allocation32 + $0x8b4] ss:$8 sps:$4 sm:$0xff]  }
 0xd17   : > { %12683 = vmatpush1.bf16.msra.mxu1 %v17533_v46  ;;  %12714 = vmatprep.mubr.bf16.mxu1 %v12519_v26  ;;  %v17611_v46 = vld [vmem:[#allocation32 + $0x8a0] ss:$8 sps:$4 sm:$0xff]   ;;  %v17619_v26 = vld [vmem:[#allocation32 + $0x8c4] ss:$8 sps:$4 sm:$0xff]  }
 0xd18   : > { %12684 = vmatprep.subr.bf16.mxu1 %v17538_v59  ;;  %v17614_v59 = vld [vmem:[#allocation32 + $0x8b0] ss:$8 sps:$4 sm:$0xff]  }
 0xd1b   : > { %12685 = vmatpush1.bf16.msra.mxu1 %v17536_v17  ;;  %v17617_v17 = vld [vmem:[#allocation32 + $0x8c0] ss:$8 sps:$4 sm:$0xff]  }
 0xd1c   : > { %12686 = vmatprep.subr.bf16.mxu1 %v17541_v11  ;;  %v17622_v11 = vld [vmem:[#allocation32 + $0x8d4] ss:$8 sps:$4 sm:$0xff]  }
 0xd1f   : > { %12687 = vmatpush1.bf16.msra.mxu1 %v17539_v3  ;;  %v17620_v3 = vld [vmem:[#allocation32 + $0x8d0] ss:$8 sps:$4 sm:$0xff]  }
 0xd20   : > { %12688 = vmatprep.subr.bf16.mxu1 %v17544_v29  ;;  %v17625_v29 = vld [vmem:[#allocation32 + $0x8e4] ss:$8 sps:$4 sm:$0xff]  }
 0xd23   : > { %12689 = vmatpush1.bf16.msra.mxu1 %v17542_v20  ;;  %v17623_v20 = vld [vmem:[#allocation32 + $0x8e0] ss:$8 sps:$4 sm:$0xff]  }
 0xd24   : > { %12690 = vmatprep.subr.bf16.mxu1 %v17547_v23  ;;  %v17628_v23 = vld [vmem:[#allocation32 + $0x8f4] ss:$8 sps:$4 sm:$0xff]  }
 0xd27   : > { %12691 = vmatpush1.bf16.msra.mxu1 %v17545_v36  ;;  %v17626_v36 = vld [vmem:[#allocation32 + $0x8f0] ss:$8 sps:$4 sm:$0xff]  }
 0xd28   : > { %12692 = vmatprep.subr.bf16.mxu1 %v17550_v47  ;;  %v12793_v47 = vrot.slane %v20555_v56, %v20392_v21  ;;  %v13020_v56 = vld [vmem:[#allocation35] sm:$0x3] }
 0xd2b   : > { %12693 = vmatpush1.bf16.msra.mxu1 %v17548_v44 }
 0xd2c   : > { %12694 = vmatprep.subr.bf16.mxu1 %v17553_v51 }
 0xd2f   : > { %12695 = vmatpush1.bf16.msra.mxu1 %v17551_v28 }
 0xd30   : > { %12696 = vmatprep.subr.bf16.mxu1 %v17556_v54 }
 0xd33   : > { %12697 = vmatpush1.bf16.msra.mxu1 %v17554_v50  ;;  %v17629_v50 = vld [vmem:[#allocation37 + $0x40] sm:$0xff]  }
 0xd34   : > { %12698 = vmatprep.subr.bf16.mxu1 %v17559_v6  ;;  %v17630_v6 = vld [vmem:[#allocation37] sm:$0xff]   ;;  %15586 = vmatprep.subr.bf16.mxu0 %v17629_v50  ;;  %v17649_v50 = vld [vmem:[#allocation37 + $0xd0] sm:$0xff]  }
 0xd35   : > { %15587 = vmatpush3.bf16.msra.mxu0 %v17630_v6  ;;  %v17650_v6 = vld [vmem:[#allocation37 + $0x90] sm:$0xff]  }
 0xd37   : > { %12699 = vmatpush1.bf16.msra.mxu1 %v17557_v24  ;;  %v17631_v24 = vld [vmem:[#allocation37 + $0x48] sm:$0xff]  }
 0xd38   : > { %12700 = vmatprep.subr.bf16.mxu1 %v17562_v0  ;;  %v17632_v0 = vld [vmem:[#allocation37 + $0x8] sm:$0xff]   ;;  %15588 = vmatprep.subr.bf16.mxu0 %v17631_v24  ;;  %v17651_v24 = vld [vmem:[#allocation37 + $0xd8] sm:$0xff]  }
 0xd39   : > { %15589 = vmatpush3.bf16.msra.mxu0 %v17632_v0  ;;  %v17652_v0 = vld [vmem:[#allocation37 + $0x98] sm:$0xff]  }
 0xd3b   : > { %12701 = vmatpush1.bf16.msra.mxu1 %v17560_v13  ;;  %v17633_v13 = vld [vmem:[#allocation37 + $0x50] sm:$0xff]  }
 0xd3c   : > { %12702 = vmatprep.subr.bf16.mxu1 %v17565_v8  ;;  %v17634_v8 = vld [vmem:[#allocation37 + $0x10] sm:$0xff]   ;;  %15590 = vmatprep.subr.bf16.mxu0 %v17633_v13  ;;  %v17653_v13 = vld [vmem:[#allocation37 + $0xe0] sm:$0xff]  }
 0xd3d   : > { %15591 = vmatpush3.bf16.msra.mxu0 %v17634_v8  ;;  %v17654_v8 = vld [vmem:[#allocation37 + $0xa0] sm:$0xff]  }
 0xd3f   : > { %12703 = vmatpush1.bf16.msra.mxu1 %v17563_v15  ;;  %v17635_v15 = vld [vmem:[#allocation37 + $0x58] sm:$0xff]  }
 0xd40   : > { %12704 = vmatprep.subr.bf16.mxu1 %v17568_v12  ;;  %v17636_v12 = vld [vmem:[#allocation37 + $0x18] sm:$0xff]   ;;  %15592 = vmatprep.subr.bf16.mxu0 %v17635_v15  ;;  %v17655_v15 = vld [vmem:[#allocation37 + $0xe8] sm:$0xff]  }
 0xd41   : > { %15593 = vmatpush3.bf16.msra.mxu0 %v17636_v12  ;;  %v17656_v12 = vld [vmem:[#allocation37 + $0xa8] sm:$0xff]  }
 0xd43   : > { %12705 = vmatpush1.bf16.msra.mxu1 %v17566_v37  ;;  %v17637_v37 = vld [vmem:[#allocation37 + $0x60] sm:$0xff]  }
 0xd44   : > { %12706 = vmatprep.subr.bf16.mxu1 %v17571_v33  ;;  %v17638_v33 = vld [vmem:[#allocation37 + $0x20] sm:$0xff]   ;;  %15594 = vmatprep.subr.bf16.mxu0 %v17637_v37  ;;  %v17657_v37 = vld [vmem:[#allocation37 + $0xf0] sm:$0xff]  }
 0xd45   : > { %15595 = vmatpush3.bf16.msra.mxu0 %v17638_v33 }
 0xd47   : > { %12707 = vmatpush1.bf16.msra.mxu1 %v17569_v53  ;;  %v17639_v53 = vld [vmem:[#allocation37 + $0x68] sm:$0xff]  }
 0xd48   : > { %12708 = vmatprep.subr.bf16.mxu1 %v17574_v57  ;;  %v17640_v57 = vld [vmem:[#allocation37 + $0x28] sm:$0xff]   ;;  %15596 = vmatprep.subr.bf16.mxu0 %v17639_v53  ;;  %v17658_v53 = vld [vmem:[#allocation37 + $0xb0] sm:$0xff]  }
 0xd49   : > { %15597 = vmatpush3.bf16.msra.mxu0 %v17640_v57  ;;  %v17659_v57 = vld [vmem:[#allocation37 + $0xf8] sm:$0xff]  }
 0xd4a   : > { %15598 = vmatprep.subr.bf16.mxu0 %v17641_v30 }
 0xd4b   : > { %12709 = vmatpush1.bf16.msra.mxu1 %v17572_v63  ;;  %v17642_v63 = vld [vmem:[#allocation37 + $0x30] sm:$0xff]  }
 0xd4c   : > { %12710 = vmatprep.subr.bf16.mxu1 %v17577_v7  ;;  %v17643_v7 = vld [vmem:[#allocation37 + $0x78] sm:$0xff]  }
 0xd4d   : > { %15599 = vmatpush3.bf16.msra.mxu0 %v17642_v63  ;;  %v17660_v63 = vld [vmem:[#allocation37 + $0xb8] sm:$0xff]  }
 0xd4e   : > { %15600 = vmatprep.subr.bf16.mxu0 %v17643_v7  ;;  %v17661_v7 = vld [vmem:[#allocation37 + $0x140] sm:$0xff]  }
 0xd4f   : > { %12711 = vmatpush1.bf16.msra.mxu1 %v17575_v38  ;;  %v17645_v38 = vld [vmem:[#allocation37 + $0xc0] sm:$0xff]  }
 0xd50   : > { %12712 = vmatprep.subr.bf16.mxu1 %v17580_v25  ;;  %v13006_v25 = vld [vmem:[#allocation34] sm:$0x3] }
 0xd51   : > { %15601 = vmatpush3.bf16.msra.mxu0 %v17644_v48  ;;  %v13015_v49 = vrot.slane %v13006_v25, %v20471_v5 }
 0xd52   : > { %15608 = vmatprep.subr.bf16.mxu0 %v17645_v38  ;;  %v17662_v38 = vld [vmem:[#allocation37 + $0x100] sm:$0xff]  }
 0xd53   : > { %12713 = vmatpush1.bf16.msra.mxu1 %v17578_v39  ;;  %v13011_v39 = vrot.slane %v13006_v25, %v20468_v32 }
 0xd54   : > { %12963 = vmatprep.subr.bf16.mxu1 %v17583_v14 }
 0xd56   : > { %12715 = vmatmul.mubr.bf16.vlgmr.msra.gmra.mrb[12].mxu1 %v12512_v19 }
 0xd57   : > { %12964 = vmatpush1.bf16.msra.mxu1 %v17581_v61  ;;  %12995 = vmatprep.mubr.bf16.mxu1 %v12800_v35 }
 0xd58   : > { %12965 = vmatprep.subr.bf16.mxu1 %v17586_v10  ;;  %v13025_v10 = vrot.slane %v13020_v56, %v20468_v32 }
 0xd5b   : > { %12966 = vmatpush1.bf16.msra.mxu1 %v17584_v4 }
 0xd5c   : > { %12967 = vmatprep.subr.bf16.mxu1 %v17589_v42  ;;  %v13029_v42 = vrot.slane %v13020_v56, %v20471_v5  ;;  %v17664_v56 = vld [vmem:[#allocation37 + $0x148] sm:$0xff]   ;;  %v17683_v5 = vld [vmem:[#allocation37 + $0x190] sm:$0xff]  }
 0xd5f   : > { %12968 = vmatpush1.bf16.msra.mxu1 %v17587_v9 }
 0xd60   : > { %12969 = vmatprep.subr.bf16.mxu1 %v17592_v40 }
 0xd63   : > { %12970 = vmatpush1.bf16.msra.mxu1 %v17590_v62 }
 0xd64   : > { %12971 = vmatprep.subr.bf16.mxu1 %v17595_v58 }
 0xd67   : > { %12972 = vmatpush1.bf16.msra.mxu1 %v17593_v52 }
 0xd68   : > { %12973 = vmatprep.subr.bf16.mxu1 %v17598_v1 }
 0xd6b   : > { %12974 = vmatpush1.bf16.msra.mxu1 %v17596_v45 }
 0xd6c   : > { %12975 = vmatprep.subr.bf16.mxu1 %v17601_v55 }
 0xd6f   : > { %12976 = vmatpush1.bf16.msra.mxu1 %v17599_v34 }
 0xd70   : > { %12977 = vmatprep.subr.bf16.mxu1 %v17604_v43 }
 0xd73   : > { %12978 = vmatpush1.bf16.msra.mxu1 %v17602_v41 }
 0xd74   : > { %12979 = vmatprep.subr.bf16.mxu1 %v17607_v16  ;;  %v13067_v16 = vld [vmem:[#allocation7] sm:$0x3] }
 0xd77   : > { %12980 = vmatpush1.bf16.msra.mxu1 %v17605_v27 }
 0xd78   : > { %12981 = vmatprep.subr.bf16.mxu1 %v17610_v31 }
 0xd7b   : > { %12982 = vmatpush1.bf16.msra.mxu1 %v17608_v2  ;;  %v13076_v2 = vld [vmem:[#allocation7 + $0x2] sm:$0x3] }
 0xd7c   : > { %12983 = vmatprep.subr.bf16.mxu1 %v17613_v60  ;;  %v13088_v60 = vld [vmem:[#allocation7 + $0x4] sm:$0x3] }
 0xd7f   : > { %12984 = vmatpush1.bf16.msra.mxu1 %v17611_v46 }
 0xd80   : > { %12985 = vmatprep.subr.bf16.mxu1 %v17616_v18 }
 0xd83   : > { %12986 = vmatpush1.bf16.msra.mxu1 %v17614_v59 }
 0xd84   : > { %12987 = vmatprep.subr.bf16.mxu1 %v17619_v26  ;;  %v13097_v26 = vld [vmem:[#allocation7 + $0x6] sm:$0x3] }
 0xd87   : > { %12988 = vmatpush1.bf16.msra.mxu1 %v17617_v17 }
 0xd88   : > { %12989 = vmatprep.subr.bf16.mxu1 %v17622_v11 }
 0xd8b   : > { %12990 = vmatpush1.bf16.msra.mxu1 %v17620_v3 }
 0xd8c   : > { %12991 = vmatprep.subr.bf16.mxu1 %v17625_v29 }
 0xd8f   : > { %12992 = vmatpush1.bf16.msra.mxu1 %v17623_v20 }
 0xd90   : > { %12993 = vmatprep.subr.bf16.mxu1 %v17628_v23 }
 0xd93   : > { %12994 = vmatpush1.bf16.msra.mxu1 %v17626_v36 }
 0xd96   : > { %12996 = vmatmul.mubr.bf16.vlgmr.msra.gmra.mrb[12].mxu1 %v12793_v47  ;;  %v17646_v47 = vld [vmem:[#allocation37 + $0x80] sm:$0xff]  }
 0xdac   : > { %v11278_v44 = vpop.f32.mrb[40].mxu0 }
 0xdad   : > { %v11280_v51 = vpop.f32.mrb[41].mxu0 }
 0xdae   : > { %v11282_v28 = vpop.f32.mrb[42].mxu0 }
 0xdaf   : > { %v11283_v54 = vpop.f32.mrb[43].mxu0 }
 0xdb0   : > { %v17648_v54 = vld [vmem:[#allocation37 + $0x88] sm:$0xff]  }
 0xe69   : > { %v12997_v14 = vpop.f32.mrb[12].mxu1 }
 0xe6a   : > { %v16284_v61 = vadd.f32 %v12997_v14, %v11278_v44  ;;  %v12999_v19 = vpop.f32.mrb[13].mxu1  ;;  %v17665_v14 = vld [vmem:[#allocation37 + $0x108] sm:$0xff]  }
 0xe6b   : > { %v16285_v35 = vadd.f32 %v12999_v19, %v11280_v51  ;;  %v13001_v4 = vpop.f32.mrb[14].mxu1  ;;  %v17647_v51 = vld [vmem:[#allocation37 + $0xc8] sm:$0xff]   ;;  %v17668_v19 = vld [vmem:[#allocation37 + $0x158] sm:$0xff]  }
 0xe6c   : > { %v13018_v9 = vmul.f32 %v16284_v61, %v13011_v39  ;;  %v13002_v40 = vpop.f32.mrb[15].mxu1  ;;  %v17667_v61 = vld [vmem:[#allocation37 + $0x110] sm:$0xff]   ;;  %v17671_v4 = vld [vmem:[#allocation37 + $0x120] sm:$0xff]  }
 0xe6d   : > { %v13019_v62 = vmul.f32 %v16285_v35, %v13015_v49  ;;  %v17666_v49 = vld [vmem:[#allocation37 + $0x150] sm:$0xff]   ;;  %v17670_v35 = vld [vmem:[#allocation37 + $0x160] sm:$0xff]  }
 0xe6e   : > { %v13032_v58 = vadd.f32 %v13025_v10, %v13018_v9  ;;  %v17669_v10 = vld [vmem:[#allocation37 + $0x118] sm:$0xff]   ;;  %v17673_v9 = vld [vmem:[#allocation37 + $0x128] sm:$0xff]   ;;  %v17674_v40 = vld [vmem:[#allocation37 + $0x170] sm:$0xff]  }
 0xe6f   : > { %v13033_v52 = vadd.f32 %v13029_v42, %v13019_v62  ;;  %v17672_v42 = vld [vmem:[#allocation37 + $0x168] sm:$0xff]   ;;  %v17675_v62 = vld [vmem:[#allocation37 + $0x130] sm:$0xff]  }
 0xe70   : > { %v13034_v1 = vmax.f32 %v13032_v58, 0.0  ;;  %v17676_v58 = vld [vmem:[#allocation37 + $0x178] sm:$0xff]  }
 0xe71   : > { %v13035_v45 = vmax.f32 %v13033_v52, 0.0  ;;  %v17677_v52 = vld [vmem:[#allocation37 + $0x138] sm:$0xff]  }
 0xe72   : > { %v13036_v55 = vsel %vm1126_vm0, %v13034_v1, 0.0 }
 0xe73   : > { %v13037_v34 = vsel %vm1126_vm0, %v13035_v45, 0.0  ;;  %v15136_v43 = vpack.c.bf16 %v13035_v45, %v13034_v1  ;;  %v17678_v1 = vld [vmem:[#allocation37 + $0x1c0] sm:$0xff]   ;;  %vm13043_vm0 = vcmask 3072  }
 0xe74   : > { %v13038_v32 = vadd.f32 %v13037_v34, %v13036_v55  ;;  %v17679_v45 = vld [vmem:[#allocation37 + $0x180] sm:$0xff]   ;;  %v17680_v34 = vld [vmem:[#allocation37 + $0x1c8] sm:$0xff]  }
 0xe75   : > { %v13056_v41 = vrot.slane %v15136_v43, %v20392_v21 }
 0xe76   : > { %13039 = vadd.xlane.f32.xlu0 %v13038_v32  ;;  %v17681_v32 = vld [vmem:[#allocation37 + $0x188] sm:$0xff]  }
 0xe77   : > { %v13063_v27 = vrot.slane %v13056_v41, %v20392_v21  ;;  %v13079_v31 = vcombine.high %v13056_v41, %v13056_v41  ;;  %v17682_v41 = vld [vmem:[#allocation37 + $0x1d0] sm:$0xff]  }
 0xe79   : > { %v13068_v46 = vsel %vm20575_vm14, %v13063_v27, %v13067_v16  ;;  %v13071_v18 = vshrl.u32 %v13063_v27, 16  ;;  %v13086_v59 = vrot.slane %v13079_v31, %v20392_v21  ;;  %v17684_v16 = vld [vmem:[#allocation37 + $0x1d8] sm:$0xff]   ;;  %v17686_v31 = vld [vmem:[#allocation37 + $0x1e0] sm:$0xff]  }
 0xe7a   : > { %13069 = vst [vmem:[#allocation7] sm:$0x3] %v13068_v46  ;;  %v17685_v27 = vld [vmem:[#allocation37 + $0x198] sm:$0xff]   ;;  %v17690_v46 = vld [vmem:[#allocation37 + $0x1f0] sm:$0xff]  }
 0xe7b   : > { %v13077_v22 = vsel %vm20575_vm14, %v13071_v18, %v13076_v2  ;;  %v13089_v17 = vsel %vm20575_vm14, %v13086_v59, %v13088_v60  ;;  %v13092_v11 = vshrl.u32 %v13086_v59, 16  ;;  %v17687_v2 = vld [vmem:[#allocation37 + $0x1a0] sm:$0xff]   ;;  %v17689_v60 = vld [vmem:[#allocation37 + $0x1a8] sm:$0xff]   ;;  %v17691_v18 = vld [vmem:[#allocation37 + $0x1b0] sm:$0xff]  }
 0xe7c   : > { %13078 = vst [vmem:[#allocation7 + $0x2] sm:$0x3] %v13077_v22  ;;  %13090 = vst [vmem:[#allocation7 + $0x4] sm:$0x3] %v13089_v17  ;;  %v17692_v59 = vld [vmem:[#allocation37 + $0x1f8] sm:$0xff]  }
 0xe7d   : > { %v13098_v3 = vsel %vm20575_vm14, %v13092_v11, %v13097_v26  ;;  %v17693_v26 = vld [vmem:[#allocation37 + $0x1b8] sm:$0xff]  }
 0xe7e   : > { %13099 = vst [vmem:[#allocation7 + $0x6] sm:$0x3] %v13098_v3 }
 0xe85   : > { %v13100_v29 = vld [vmem:[#allocation7] sm:$0xff] }
 0xe86   : > { %v13238_v20 = vrot.slane %v13100_v29, %v20392_v21  ;;  %v13231_v33 = vcombine.high %v13100_v29, %v13100_v29 }
 0xe88   : > { %v13246_v23 = vcombine.high %v13238_v20, %v13238_v20  ;;  %v13254_v44 = vrot.slane %v13238_v20, %v20392_v21  ;;  %v13245_v30 = vrot.slane %v13231_v33, %v20392_v21 }
 0xe8a   : > { %v13268_v36 = vrot.slane %v13246_v23, %v20392_v21  ;;  %v13247_v48 = vcombine.high %v13245_v30, %v13245_v30  ;;  %v13276_v25 = vcombine.high %v13254_v44, %v13254_v44  ;;  %v13261_v55 = vrot.slane %v13245_v30, %v20392_v21 }
 0xe8c   : > { %13704 = vmatprep.mubr.bf16.mxu0 %v13268_v36  ;;  %v13278_v28 = vcombine.high %v13268_v36, %v13268_v36  ;;  %v13275_v39 = vrot.slane %v13247_v48, %v20392_v21  ;;  %v17688_v21 = vld [vmem:[#allocation37 + $0x1e8] sm:$0xff]   ;;  %v13277_v22 = vcombine.high %v13261_v55, %v13261_v55 }
 0xe8d   : > { %13705 = vmatmul.mubr.bf16.vlgmr.msra.gmra.mrb[44].mxu0 %v13254_v44 }
 0xe8e   : > { %15609 = vmatpush3.bf16.msra.mxu0 %v17646_v47  ;;  %13744 = vmatprep.mubr.bf16.mxu0 %v13278_v28  ;;  %v13279_v43 = vcombine.high %v13275_v39, %v13275_v39  ;;  %v13229_v47 = vld [vmem:[#allocation38] sm:$0x1] }
 0xe8f   : > { %15610 = vmatprep.subr.bf16.mxu0 %v17647_v51 }
 0xe92   : > { %15611 = vmatpush3.bf16.msra.mxu0 %v17648_v54 }
 0xe93   : > { %15612 = vmatprep.subr.bf16.mxu0 %v17649_v50 }
 0xe96   : > { %15613 = vmatpush3.bf16.msra.mxu0 %v17650_v6 }
 0xe97   : > { %15614 = vmatprep.subr.bf16.mxu0 %v17651_v24 }
 0xe9a   : > { %15615 = vmatpush3.bf16.msra.mxu0 %v17652_v0 }
 0xe9b   : > { %15616 = vmatprep.subr.bf16.mxu0 %v17653_v13 }
 0xe9e   : > { %15617 = vmatpush3.bf16.msra.mxu0 %v17654_v8 }
 0xe9f   : > { %15618 = vmatprep.subr.bf16.mxu0 %v17655_v15 }
 0xea2   : > { %15619 = vmatpush3.bf16.msra.mxu0 %v17656_v12 }
 0xea3   : > { %15620 = vmatprep.subr.bf16.mxu0 %v17657_v37 }
 0xea6   : > { %15621 = vmatpush3.bf16.msra.mxu0 %v17658_v53 }
 0xea7   : > { %15622 = vmatprep.subr.bf16.mxu0 %v17659_v57 }
 0xeaa   : > { %15623 = vmatpush3.bf16.msra.mxu0 %v17660_v63 }
 0xeab   : > { %15630 = vmatprep.subr.bf16.mxu0 %v17661_v7 }
 0xead   : > { %13745 = vmatmul.mubr.bf16.vlgmr.msra.gmra.mrb[48].mxu0 %v13276_v25 }
 0xeae   : > { %15631 = vmatpush3.bf16.msra.mxu0 %v17662_v38  ;;  %13784 = vmatprep.mubr.bf16.mxu0 %v13275_v39 }
 0xeaf   : > { %15632 = vmatprep.subr.bf16.mxu0 %v17664_v56 }
 0xeb2   : > { %15633 = vmatpush3.bf16.msra.mxu0 %v17665_v14 }
 0xeb3   : > { %15634 = vmatprep.subr.bf16.mxu0 %v17666_v49 }
 0xeb6   : > { %15635 = vmatpush3.bf16.msra.mxu0 %v17667_v61 }
 0xeb7   : > { %15636 = vmatprep.subr.bf16.mxu0 %v17668_v19 }
 0xeba   : > { %15637 = vmatpush3.bf16.msra.mxu0 %v17669_v10 }
 0xebb   : > { %15638 = vmatprep.subr.bf16.mxu0 %v17670_v35 }
 0xebe   : > { %15639 = vmatpush3.bf16.msra.mxu0 %v17671_v4 }
 0xebf   : > { %15640 = vmatprep.subr.bf16.mxu0 %v17672_v42 }
 0xec2   : > { %15641 = vmatpush3.bf16.msra.mxu0 %v17673_v9 }
 0xec3   : > { %15642 = vmatprep.subr.bf16.mxu0 %v17674_v40 }
 0xec6   : > { %15643 = vmatpush3.bf16.msra.mxu0 %v17675_v62 }
 0xec7   : > { %15644 = vmatprep.subr.bf16.mxu0 %v17676_v58 }
 0xeca   : > { %15645 = vmatpush3.bf16.msra.mxu0 %v17677_v52 }
 0xecb   : > { %15652 = vmatprep.subr.bf16.mxu0 %v17678_v1 }
 0xecd   : > { %13785 = vmatmul.mubr.bf16.vlgmr.msra.gmra.mrb[52].mxu0 %v13261_v55 }
 0xece   : > { %15653 = vmatpush3.bf16.msra.mxu0 %v17679_v45  ;;  %13824 = vmatprep.mubr.bf16.mxu0 %v13279_v43 }
 0xecf   : > { %15654 = vmatprep.subr.bf16.mxu0 %v17680_v34 }
 0xed2   : > { %15655 = vmatpush3.bf16.msra.mxu0 %v17681_v32 }
 0xed3   : > { %15656 = vmatprep.subr.bf16.mxu0 %v17682_v41 }
 0xed6   : > { %15657 = vmatpush3.bf16.msra.mxu0 %v17683_v5 }
 0xed7   : > { %15658 = vmatprep.subr.bf16.mxu0 %v17684_v16 }
 0xeda   : > { %15659 = vmatpush3.bf16.msra.mxu0 %v17685_v27 }
 0xedb   : > { %15660 = vmatprep.subr.bf16.mxu0 %v17686_v31 }
 0xede   : > { %15661 = vmatpush3.bf16.msra.mxu0 %v17687_v2 }
 0xedf   : > { %15662 = vmatprep.subr.bf16.mxu0 %v17688_v21 }
 0xee2   : > { %15663 = vmatpush3.bf16.msra.mxu0 %v17689_v60 }
 0xee3   : > { %15664 = vmatprep.subr.bf16.mxu0 %v17690_v46 }
 0xee6   : > { %15665 = vmatpush3.bf16.msra.mxu0 %v17691_v18 }
 0xee7   : > { %15666 = vmatprep.subr.bf16.mxu0 %v17692_v59 }
 0xeea   : > { %15667 = vmatpush3.bf16.msra.mxu0 %v17693_v26 }
 0xeed   : > { %13825 = vmatmul.mubr.bf16.vlgmr.msra.gmra.mrb[56].mxu0 %v13277_v22 }
 0xf03   : > { %v13040_v17 = vpop.xlane.xlu0 %13039 }
 0xf04   : > { %v13042_v11 = vmul.f32 0.00390625, %v13040_v17 }
 0xf06   : > { %13044 = vst.msk [vmem:[%s956_s8] sm:$0xf] %vm13043_vm0, %v13042_v11 }
 0xf60   : > { %v15602_v3 = vpop.f32.mrb[44].mxu0 }
 0xf61   : > { %v15603_v29 = vpop.f32.mrb[45].mxu0 }
 0xf62   : > { %v15604_v20 = vadd.f32 %v15603_v29, %v15602_v3  ;;  %v15605_v23 = vpop.f32.mrb[46].mxu0 }
 0xf63   : > { %v15606_v36 = vpop.f32.mrb[47].mxu0 }
 0xf64   : > { %v13707_v28 = vadd.f32 %v15604_v20, %v13229_v47 }
 0xf80   : > { %v15624_v44 = vpop.f32.mrb[48].mxu0 }
 0xf81   : > { %v15625_v51 = vpop.f32.mrb[49].mxu0 }
 0xf82   : > { %v15626_v54 = vadd.f32 %v15625_v51, %v15624_v44  ;;  %v15627_v50 = vpop.f32.mrb[50].mxu0 }
 0xf83   : > { %v15628_v6 = vpop.f32.mrb[51].mxu0 }
 0xf84   : > { %v13747_v24 = vadd.f32 %v15626_v54, %v13707_v28 }
 0xfa0   : > { %v15646_v0 = vpop.f32.mrb[52].mxu0 }
 0xfa1   : > { %v15647_v13 = vpop.f32.mrb[53].mxu0 }
 0xfa2   : > { %v15648_v8 = vadd.f32 %v15647_v13, %v15646_v0  ;;  %v15649_v15 = vpop.f32.mrb[54].mxu0 }
 0xfa3   : > { %v15650_v12 = vpop.f32.mrb[55].mxu0 }
 0xfa4   : > { %v13787_v37 = vadd.f32 %v15648_v8, %v13747_v24 }
 0xfc0   : > { %v15668_v33 = vpop.f32.mrb[56].mxu0 }
 0xfc1   : > { %v15669_v53 = vpop.f32.mrb[57].mxu0 }
 0xfc2   : > { %v15670_v57 = vadd.f32 %v15669_v53, %v15668_v33  ;;  %v15671_v30 = vpop.f32.mrb[58].mxu0 }
 0xfc3   : > { %v15672_v63 = vpop.f32.mrb[59].mxu0 }
 0xfc4   : > { %v13827_v7 = vadd.f32 %v15670_v57, %v13787_v37 }
 0xfc6   : > { %v13832_v48 = vmax.f32 %v13827_v7, 0.0 }
 0xfc8   : > { %13833 = vst [vmem:[%s947_s6] sm:$0x1] %v13832_v48 }
 0xfc9   : > { %18284 = shalt.err (!%p18281_p6)
}
 0xfca   : > { %s18285_s14 = scalar_lea.hbm %s20604_s10, 16  ;;  %s18289_s25 = scalar_lea.hbm %s20816_s12, 32 }
 0xfcb   : > { %p18286_p5 = scmp.ne.s32.totalorder %s20604_s10, %s18285_s14  ;;  %p18290_p10 = scmp.lt.u32.totalorder %s20604_s10, %s20816_s12 }
 0xfcc   : > { %p18291_p2 = scmp.lt.u32.totalorder %s18289_s25, %s18285_s14  ;;  %p18293_p4 = scmp.lt.u32.totalorder %s18285_s14, %s20604_s10 }
 0xfcd   : > { %p18287_p9 = pnand %p18286_p5, %p20817_p7 }
 0xfce   : > { %p18292_p3 = por %p18291_p2, %p18290_p10 }
 0xfcf   : > { %p18288_p12 = pneg %p18287_p9 }
 0xfd0   : > { %p18294_p8 = por %p18293_p4, %p18292_p3 }
 0xfd2   : > { %p18295_p11 = pnand %p18294_p8, %p18288_p12 }
 0xfd4   : > { %18298 = shalt.err (!%p18295_p11)
}
 0xfd5   : > { %16554 = dma.vmem_to_hbm [thread:$0]  (%p20817_p7), %s20606_s28, 16, %s20604_s10, %s13839_s23  }
 0xfd6 PF: > { %s20818_s0 = sld [smem:[#allocation56_spill]]  ;;  %s20819_s1 = sld [smem:[#allocation53_spill]] }
 0xfd7   : > { %s20820_s3 = sld [smem:[#allocation61_spill]] }
 0xfdc   : > { %p16661_p13 = scmp.ge.s32.totalorder %s20818_s0, 2  ;;  %s13873_s30 = sand.u32 1, %s20819_s1  }
 0xfdd   : > { %p20821_p1 = scmp.ne.s32.totalorder %s20820_s3, 0  ;;  %s13874_s29 = scalar_lea.sflag [#allocation10], %s13873_s30 }
 0xfdf   : > { %p16618_p0 = pnand %p16661_p13, %p20821_p1 }
 0xfe1   : > { %18360 = dma.done.wait (!%p16618_p0), %s13874_s29, 16  }
 0xfe2   : > { %18362 = vsyncadd (!%p16618_p0), %s13874_s29, 4294967280  ;;  %s20822_s30 = sld [smem:[#allocation58_spill]]  ;;  %s20823_s3 = sld [smem:[#allocation54_spill]] }
 0xfe3   : > { %s20824_s28 = sld [smem:[#allocation55_spill]]  ;;  %s20825_s29 = sld [smem:[#allocation59_spill]] }
 0xfe8   : > { %p44_p6 = scmp.ge.s32.totalorder %s20822_s30, 4  }
 0xfea   :  { %46 = sbr.rel (!%p44_p6) target bundleno = 28 (0x1c), region = 287 }
 0xff1   :  { %13878 = vsyncpa [#allocation9], 1 }
 0xff2   :  { %13880 = vsyncpa [#allocation9 + $0x1], 1 }
 0xff3   :  { %13881 = vsyncpa [#allocation12], 1 }
 0xff4   :  { %13882 = vsyncpa [#allocation15], 1 }
 0xff5   :  { %13883 = vsyncpa [#allocation18], 1 }
 0xff6   :  { %13884 = vsyncpa [#allocation21], 1 }
 0xff7   :  { %13885 = vsyncpa [#allocation24], 1 }
 0xff8   :  { %13886 = vsyncpa [#allocation27], 1 }
 0xff9   :  { %13887 = vsyncpa [#allocation30], 1 }
 0xffa   :  { %13888 = vsyncpa [#allocation33], 1 }
 0xffb   :  { %13889 = vsyncpa [#allocation36], 1 }
 0xffc   :  { %13890 = vsyncpa [#allocation39], 1 }
 0xffd   :  { %13891 = vsyncpa [#allocation10], 1 }
 0xffe   :  { %13893 = vsyncpa [#allocation10 + $0x1], 1 }

</bundles_post_ra>
